<compile_context>
chip_gen: v5e
topology: v5e:2x2
jax: 0.10.0
libtpu: 0.0.40
codegen_flags: <defaults>
</compile_context>

<pallas_src>
import functools

import jax
import jax.numpy as jnp
from jax import lax
from jax.experimental import pallas as pl
from jax.experimental.pallas import tpu as pltpu

VMEM_LIMIT_BYTES = 32 * 1024 * 1024   # safe on v7x (64 MiB/TC); > v5e's 16 MiB scoped default
TARGET_BLOCK_BYTES = 1 << 20          # ~1 MiB streaming blocks (size blocks by bytes, not lanes)


def _round_up(x, m):
    return (x + m - 1) // m * m


def _fold_bn(gamma, beta, mean, var, eps=1e-5):
    gamma = gamma.astype(jnp.float32)
    beta = beta.astype(jnp.float32)
    mean = mean.astype(jnp.float32)
    var = var.astype(jnp.float32)
    scale = gamma * lax.rsqrt(var + eps)
    shift = beta - mean * scale
    return scale, shift


def _hard_swish(v):
    return v * (jnp.clip(v + 3.0, 0.0, 6.0) * (1.0 / 6.0))


def _hard_sigmoid(v):
    # PP-OCR / PytorchOCR variant: relu6(1.2*x + 3) / 6
    return jnp.clip(1.2 * v + 3.0, 0.0, 6.0) * (1.0 / 6.0)


def _pick_channel_block(c, hp, wp, itemsize):
    """Channel block Cb for the depthwise grid (N, C//Cb); targets ~1 MiB input blocks."""
    if c <= 8:
        return c
    cb = (TARGET_BLOCK_BYTES // max(1, hp * wp * itemsize)) // 8 * 8
    cb = int(min(c, max(8, cb)))
    while cb > 8 and c % cb != 0:
        cb -= 8
    return cb if c % cb == 0 else c


def _pick_lane_tile(hw, c, itemsize):
    """HW lane tile for the pointwise pass: multiple of 128, >=512 lanes, ~1 MiB per block."""
    hw128 = _round_up(hw, 128)
    max_lanes = max(512, (TARGET_BLOCK_BYTES // max(1, c * itemsize)) // 128 * 128)
    return int(min(hw128, max_lanes))


# --------------------------------------------------------------------------------------
# 1) Depthwise KxK conv + folded BN + hard_swish  (+ fused SE global-pool partial sums)
# --------------------------------------------------------------------------------------
def _dw_conv_kernel(x_ref, w_ref, shift_ref, *out_refs,
                    kh, kw, ho, wo, stride, hw_pad, with_psum):
    """One (image, channel-block) step.

    x_ref:     (1, Cb, Hp, Wp)  spatially pre-padded input window
    w_ref:     (Cb, KH*KW)      f32 depthwise weights with BN scale folded in (VMEM)
    shift_ref: (Cb, 1)          f32 folded BN shift
    out[0]:    (1, Cb, HWp)     activation, flattened HW on lanes, zero-padded to HWp
    out[1]:    (1, Cb, 1)       f32 sum of the activation over the true HW (SE pool, optional)
    """
    if with_psum:
        y_ref, psum_ref = out_refs
    else:
        (y_ref,) = out_refs

    wv = w_ref[...]                                    # (Cb, KH*KW) f32
    shiftv = shift_ref[...]                            # (Cb, 1) f32
    cb = wv.shape[0]
    psum = jnp.zeros((cb, 1), jnp.float32)

    for h in range(ho):                                # static loops: KH*KW taps per output row
        acc = jnp.zeros((cb, wo), jnp.float32)
        for dh in range(kh):
            row = h * stride + dh
            if stride == 1:
                xrow = x_ref[0, :, row, :].astype(jnp.float32)        # (Cb, Wp)
            for dwi in range(kw):
                k = dh * kw + dwi
                if stride == 1:
                    tap = xrow[:, dwi:dwi + wo]
                else:
                    # TODO(synk): strided lane loads (pl.ds stride>1); if a Mosaic version rejects
                    # this, fall back to stride-1 compute + host-side subsample.
                    tap = x_ref[0, :, row, pl.ds(dwi, wo, stride=stride)].astype(jnp.float32)
                acc = acc + tap * wv[:, k:k + 1]       # (Cb, Wo) * (Cb, 1) lane broadcast
        yrow = _hard_swish(acc + shiftv).astype(y_ref.dtype)          # (Cb, Wo)
        y_ref[0, :, h * wo:(h + 1) * wo] = yrow        # lane-dense flattened writeback block
        if with_psum:
            psum = psum + jnp.sum(yrow.astype(jnp.float32), axis=-1, keepdims=True)

    if hw_pad > 0:                                     # zero the lane-padding tail once
        y_ref[0, :, ho * wo:] = jnp.zeros((cb, hw_pad), y_ref.dtype)
    if with_psum:
        psum_ref[0] = psum


# --------------------------------------------------------------------------------------
# 2) SE excitation: s = hard_sigmoid(relu(mean @ W1^T + b1) @ W2^T + b2), batched over images
# --------------------------------------------------------------------------------------
def _se_excite_kernel(p_ref, w1t_ref, b1_ref, w2t_ref, b2_ref, s_ref, *, inv_hw):
    pooled = p_ref[...] * inv_hw                                      # (Np, C) f32 means
    h = jnp.dot(pooled, w1t_ref[...], preferred_element_type=jnp.float32,
                precision=lax.Precision.HIGHEST) + b1_ref[...]       # (Np, Crp)
    h = jnp.maximum(h, 0.0)
    s = jnp.dot(h, w2t_ref[...], preferred_element_type=jnp.float32,
                precision=lax.Precision.HIGHEST) + b2_ref[...]       # (Np, C)
    s_ref[...] = _hard_sigmoid(s)


# --------------------------------------------------------------------------------------
# 3) Pointwise 1x1 conv + folded BN + hard_swish, SE channel scale fused in front of the dot
# --------------------------------------------------------------------------------------
def _pw_conv_kernel(*refs, use_se, mm_dtype, precision):
    if use_se:
        x_ref, s_ref, w_ref, shift_ref, o_ref = refs
    else:
        x_ref, w_ref, shift_ref, o_ref = refs
    if use_se:
        x = (x_ref[0].astype(jnp.float32) * s_ref[0]).astype(mm_dtype)   # (C1, T) * (C1, 1)
    else:
        x = x_ref[0].astype(mm_dtype)
    y = jnp.dot(w_ref[...], x, preferred_element_type=jnp.float32,
                precision=precision)                                     # (C2, T) f32 acc
    y = y + shift_ref[...]                                               # (C2, 1) lane broadcast
    o_ref[0] = _hard_swish(y).astype(o_ref.dtype)


# --------------------------------------------------------------------------------------
# Full DepthwiseSeparable forward
# --------------------------------------------------------------------------------------
def depthwise_separable_forward(x, params, *, stride=1, padding=1, use_se=True):
    N, C_in, H, W = x.shape
    dw_w = params["dw_w"]                          # (C1, KH, KW) depthwise weights
    C1, KH, KW = dw_w.shape
    assert C1 == C_in, "only pure depthwise conv (groups == in_channels == out_channels) supported"
    pw_w = params["pw_w"]                          # (C2, C1)
    C2 = pw_w.shape[0]

    dw_scale, dw_shift = _fold_bn(*params["dw_bn"])
    pw_scale, pw_shift = _fold_bn(*params["pw_bn"])

    Hp, Wp = H + 2 * padding, W + 2 * padding
    Ho = (Hp - KH) // stride + 1
    Wo = (Wp - KW) // stride + 1
    HW = Ho * Wo
    itemsize = jnp.dtype(x.dtype).itemsize

    tile = _pick_lane_tile(HW, C1, itemsize)       # lane tile for the streaming pointwise pass
    HWp = _round_up(HW, tile)
    hw_pad = HWp - HW
    cb = _pick_channel_block(C1, Hp, Wp, itemsize)
    n_cb = C1 // cb
    n_t = HWp // tile

    xp = jnp.pad(x, ((0, 0), (0, 0), (padding, padding), (padding, padding)))
    dw_wfold = (dw_w.astype(jnp.float32) * dw_scale[:, None, None]).reshape(C1, KH * KW)
    dw_shift2 = dw_shift.reshape(C1, 1)

    # ---- 1) depthwise conv + BN + hard_swish (SE pool sums fused as a second output) ----
    dw_out_shapes = [jax.ShapeDtypeStruct((N, C1, HWp), x.dtype)]
    dw_out_specs = [pl.BlockSpec((1, cb, HWp), lambda n, c: (n, c, 0))]
    if use_se:
        dw_out_shapes.append(jax.ShapeDtypeStruct((N, C1, 1), jnp.float32))
        dw_out_specs.append(pl.BlockSpec((1, cb, 1), lambda n, c: (n, c, 0)))

    dw_res = pl.pallas_call(
        functools.partial(_dw_conv_kernel, kh=KH, kw=KW, ho=Ho, wo=Wo, stride=stride,
                          hw_pad=hw_pad, with_psum=use_se),
        out_shape=tuple(dw_out_shapes),
        grid_spec=pltpu.PrefetchScalarGridSpec(
            num_scalar_prefetch=0,
            grid=(N, n_cb),
            in_specs=[
                pl.BlockSpec((1, cb, Hp, Wp), lambda n, c: (n, c, 0, 0)),
                pl.BlockSpec((cb, KH * KW), lambda n, c: (c, 0)),
                pl.BlockSpec((cb, 1), lambda n, c: (c, 0)),
            ],
            out_specs=dw_out_specs),
        compiler_params=pltpu.CompilerParams(
            dimension_semantics=("parallel", "parallel"),
            vmem_limit_bytes=VMEM_LIMIT_BYTES),
        cost_estimate=pl.CostEstimate(
            flops=2 * N * C1 * HW * KH * KW,
            transcendentals=0,
            bytes_accessed=N * C1 * (Hp * Wp + HWp) * itemsize),
    )(xp, dw_wfold, dw_shift2)
    if use_se:
        y_flat, psum = dw_res
    else:
        (y_flat,) = dw_res

    # ---- 2) tiny batched SE excitation (one small matmul pair) ----
    s3 = None
    if use_se:
        w1, b1 = params["se_w1"], params["se_b1"]          # (Cr, C1), (Cr,)
        w2, b2 = params["se_w2"], params["se_b2"]          # (C1, Cr), (C1,)
        Cr = w1.shape[0]
        Crp = max(8, _round_up(Cr, 8))                     # exact: relu(0)=0 hits zero rows of w2t
        w1t = jnp.pad(w1.astype(jnp.float32).T, ((0, 0), (0, Crp - Cr)))   # (C1, Crp)
        b1r = jnp.pad(b1.astype(jnp.float32).reshape(1, Cr), ((0, 0), (0, Crp - Cr)))
        w2t = jnp.pad(w2.astype(jnp.float32).T, ((0, Crp - Cr), (0, 0)))   # (Crp, C1)
        b2r = b2.astype(jnp.float32).reshape(1, C1)

        Np = max(8, _round_up(N, 8))                       # pad batch (sublane) dim for the dots
        pooled = psum.reshape(N, C1)
        if Np != N:
            pooled = jnp.pad(pooled, ((0, Np - N), (0, 0)))

        s = pl.pallas_call(
            functools.partial(_se_excite_kernel, inv_hw=1.0 / float(HW)),
            out_shape=jax.ShapeDtypeStruct((Np, C1), jnp.float32),
            grid_spec=pltpu.PrefetchScalarGridSpec(
                num_scalar_prefetch=0,
                grid=(1,),
                in_specs=[
                    pl.BlockSpec((Np, C1), lambda i: (0, 0)),
                    pl.BlockSpec((C1, Crp), lambda i: (0, 0)),
                    pl.BlockSpec((1, Crp), lambda i: (0, 0)),
                    pl.BlockSpec((Crp, C1), lambda i: (0, 0)),
                    pl.BlockSpec((1, C1), lambda i: (0, 0)),
                ],
                out_specs=pl.BlockSpec((Np, C1), lambda i: (0, 0))),
            compiler_params=pltpu.CompilerParams(
                dimension_semantics=("arbitrary",),
                vmem_limit_bytes=VMEM_LIMIT_BYTES),
            cost_estimate=pl.CostEstimate(
                flops=4 * Np * C1 * Crp,
                transcendentals=0,
                bytes_accessed=4 * (2 * Np * C1 + 2 * C1 * Crp)),
        )(pooled, w1t, b1r, w2t, b2r)
        s3 = s[:N].reshape(N, C1, 1)

    # ---- 3) pointwise 1x1 conv + folded BN + hard_swish, SE scale fused ----
    stream_bf16 = (x.dtype == jnp.bfloat16)
    mm_dtype = jnp.bfloat16 if stream_bf16 else jnp.float32
    precision = None if stream_bf16 else lax.Precision.HIGHEST
    pw_wfold = (pw_w.astype(jnp.float32) * pw_scale[:, None]).astype(mm_dtype)    # (C2, C1)
    pw_shift2 = pw_shift.reshape(C2, 1)

    pw_inputs = [y_flat]
    pw_in_specs = [pl.BlockSpec((1, C1, tile), lambda n, t: (n, 0, t))]
    if use_se:
        pw_inputs.append(s3)
        pw_in_specs.append(pl.BlockSpec((1, C1, 1), lambda n, t: (n, 0, 0)))
    pw_inputs += [pw_wfold, pw_shift2]
    pw_in_specs += [pl.BlockSpec((C2, C1), lambda n, t: (0, 0)),
                    pl.BlockSpec((C2, 1), lambda n, t: (0, 0))]

    z = pl.pallas_call(
        functools.partial(_pw_conv_kernel, use_se=use_se, mm_dtype=mm_dtype,
                          precision=precision),
        out_shape=jax.ShapeDtypeStruct((N, C2, HWp), x.dtype),
        grid_spec=pltpu.PrefetchScalarGridSpec(
            num_scalar_prefetch=0,
            grid=(N, n_t),
            in_specs=pw_in_specs,
            out_specs=pl.BlockSpec((1, C2, tile), lambda n, t: (n, 0, t))),
        compiler_params=pltpu.CompilerParams(
            dimension_semantics=("parallel", "parallel"),
            vmem_limit_bytes=VMEM_LIMIT_BYTES),
        cost_estimate=pl.CostEstimate(
            flops=2 * N * C2 * C1 * HWp,
            transcendentals=0,
            bytes_accessed=(N * (C1 + C2) * HWp + C2 * C1) * itemsize),
    )(*pw_inputs)

    return z[:, :, :HW].reshape(N, C2, Ho, Wo)


# --------------------------------------------------------------------------------------
# Pure-JAX reference mirroring the PyTorch forward (BatchNorm in inference mode)
# --------------------------------------------------------------------------------------
def depthwise_separable_ref(x, params, *, stride=1, padding=1, use_se=True):
    stream_dtype = x.dtype
    f32 = jnp.float32
    C = x.shape[1]

    dw_scale, dw_shift = _fold_bn(*params["dw_bn"])
    y = lax.conv_general_dilated(
        x.astype(f32), params["dw_w"].astype(f32)[:, None, :, :],
        (stride, stride), [(padding, padding), (padding, padding)],
        dimension_numbers=("NCHW", "OIHW", "NCHW"),
        feature_group_count=C, precision=lax.Precision.HIGHEST)
    y = y * dw_scale[None, :, None, None] + dw_shift[None, :, None, None]
    y = _hard_swish(y).astype(stream_dtype)

    if use_se:
        w1 = params["se_w1"].astype(f32); b1 = params["se_b1"].astype(f32)
        w2 = params["se_w2"].astype(f32); b2 = params["se_b2"].astype(f32)
        p = jnp.mean(y.astype(f32), axis=(2, 3), keepdims=True)
        h = jnp.einsum("oc,nchw->nohw", w1, p, precision="highest") + b1[None, :, None, None]
        h = jnp.maximum(h, 0.0)
        s = jnp.einsum("co,nohw->nchw", w2, h, precision="highest") + b2[None, :, None, None]
        s = _hard_sigmoid(s)
        y = (y.astype(f32) * s).astype(stream_dtype)

    pw_scale, pw_shift = _fold_bn(*params["pw_bn"])
    z = jnp.einsum("oc,nchw->nohw", params["pw_w"].astype(f32), y.astype(f32),
                   precision="highest")
    z = z * pw_scale[None, :, None, None] + pw_shift[None, :, None, None]
    return _hard_swish(z).astype(stream_dtype)


if __name__ == "__main__":
    key = jax.random.PRNGKey(0)
    # DepthwiseSeparable(in_channels=4, num_filters1=4, num_filters2=8, groups=4,
    #                    stride=1, scale=1, dw_size=3, padding=1, use_se=True)
    N, C_in, H, W = 2, 4, 16, 16
    num_filters1, num_filters2 = 4, 8
    stride, dw_size, padding, reduction = 1, 3, 1, 4
    C1, C2 = num_filters1, num_filters2
    Cr = max(1, C1 // reduction)

    ks = jax.random.split(key, 16)
    x = jax.random.normal(ks[0], (N, C_in, H, W), jnp.float32)
    params = {
        "dw_w": jax.random.normal(ks[1], (C1, dw_size, dw_size), jnp.float32) * 0.3,
        "dw_bn": (jax.random.uniform(ks[2], (C1,), jnp.float32, 0.5, 1.5),
                  jax.random.normal(ks[3], (C1,), jnp.float32) * 0.1,
                  jax.random.normal(ks[4], (C1,), jnp.float32) * 0.1,
                  jax.random.uniform(ks[5], (C1,), jnp.float32, 0.5, 1.5)),
        "se_w1": jax.random.normal(ks[6], (Cr, C1), jnp.float32) * 0.5,
        "se_b1": jax.random.normal(ks[7], (Cr,), jnp.float32) * 0.1,
        "se_w2": jax.random.normal(ks[8], (C1, Cr), jnp.float32) * 0.5,
        "se_b2": jax.random.normal(ks[9], (C1,), jnp.float32) * 0.1,
        "pw_w": jax.random.normal(ks[10], (C2, C1), jnp.float32) * 0.3,
        "pw_bn": (jax.random.uniform(ks[11], (C2,), jnp.float32, 0.5, 1.5),
                  jax.random.normal(ks[12], (C2,), jnp.float32) * 0.1,
                  jax.random.normal(ks[13], (C2,), jnp.float32) * 0.1,
                  jax.random.uniform(ks[14], (C2,), jnp.float32, 0.5, 1.5)),
    }

    fwd = jax.jit(depthwise_separable_forward,
                  static_argnames=("stride", "padding", "use_se"))

    # float32, with SE (tight check against the pure-JAX reference)
    out = jax.block_until_ready(fwd(x, params, stride=stride, padding=padding, use_se=True))
    ref = depthwise_separable_ref(x, params, stride=stride, padding=padding, use_se=True)
    assert out.shape == (N, C2, H, W) and out.dtype == jnp.float32
    assert jnp.allclose(out, ref, atol=2e-4, rtol=2e-4), float(jnp.max(jnp.abs(out - ref)))

    # float32, without SE
    out_ns = jax.block_until_ready(fwd(x, params, stride=stride, padding=padding, use_se=False))
    ref_ns = depthwise_separable_ref(x, params, stride=stride, padding=padding, use_se=False)
    assert out_ns.shape == (N, C2, H, W)
    assert jnp.allclose(out_ns, ref_ns, atol=2e-4, rtol=2e-4)

    # bfloat16, with SE: activations streamed in native bf16, bf16 MXU dot, f32 math elsewhere
    xb = x.astype(jnp.bfloat16)
    outb = jax.block_until_ready(fwd(xb, params, stride=stride, padding=padding, use_se=True))
    refb = depthwise_separable_ref(xb, params, stride=stride, padding=padding, use_se=True)
    assert outb.shape == (N, C2, H, W) and outb.dtype == jnp.bfloat16
    assert jnp.allclose(outb.astype(jnp.float32), refb.astype(jnp.float32),
                        atol=5e-2, rtol=5e-2)

    print("KERNEL_OK")
</pallas_src>

<mosaic_0001>
module attributes {stable_mosaic.version = 11 : i64} {
  func.func @_se_excite_kernel(%arg0: i32, %arg1: memref<8x4xf32, #tpu.memory_space<vmem>>, %arg2: memref<4x8xf32, #tpu.memory_space<vmem>>, %arg3: memref<1x8xf32, #tpu.memory_space<vmem>>, %arg4: memref<8x4xf32, #tpu.memory_space<vmem>>, %arg5: memref<1x4xf32, #tpu.memory_space<vmem>>, %arg6: memref<8x4xf32, #tpu.memory_space<vmem>>) attributes {dimension_semantics = [#tpu.dimension_semantics<arbitrary>], iteration_bounds = array<i64: 1>, scalar_prefetch = 0 : i64, scratch_operands = 0 : i64, tpu.core_type = #tpu.core_type<tc>, window_params = [{pipeline_mode = #tpu.pipeline_mode<synchronous>, transform_indices = @transform_0, window_bounds = array<i64: 8, 4>}, {pipeline_mode = #tpu.pipeline_mode<synchronous>, transform_indices = @transform_1, window_bounds = array<i64: 4, 8>}, {pipeline_mode = #tpu.pipeline_mode<synchronous>, transform_indices = @transform_2, window_bounds = array<i64: 1, 8>}, {pipeline_mode = #tpu.pipeline_mode<synchronous>, transform_indices = @transform_3, window_bounds = array<i64: 8, 4>}, {pipeline_mode = #tpu.pipeline_mode<synchronous>, transform_indices = @transform_4, window_bounds = array<i64: 1, 4>}, {pipeline_mode = #tpu.pipeline_mode<synchronous>, transform_indices = @transform_5, window_bounds = array<i64: 8, 4>}]} {
    %c0 = arith.constant 0 : index
    %c0_0 = arith.constant 0 : index
    %0 = vector.load %arg1[%c0, %c0_0] : memref<8x4xf32, #tpu.memory_space<vmem>>, vector<8x4xf32>
    %cst = arith.constant 3.906250e-03 : f32
    %1 = vector.broadcast %cst : f32 to vector<8x4xf32>
    %2 = arith.mulf %0, %1 : vector<8x4xf32>
    %c0_1 = arith.constant 0 : index
    %c0_2 = arith.constant 0 : index
    %3 = vector.load %arg2[%c0_1, %c0_2] : memref<4x8xf32, #tpu.memory_space<vmem>>, vector<4x8xf32>
    %cst_3 = arith.constant dense<0.000000e+00> : vector<8x8xf32>
    %4 = tpu.matmul %2, %3, %cst_3 {dimension_numbers = #tpu.dot_dimension_numbers<[1], [0], [0], [1], [0, 0, 1, 1], [], []>, precision = #tpu.contract_precision<fp32>} : vector<8x4xf32>, vector<4x8xf32>, vector<8x8xf32> -> vector<8x8xf32>
    %c0_4 = arith.constant 0 : index
    %c0_5 = arith.constant 0 : index
    %5 = vector.load %arg3[%c0_4, %c0_5] : memref<1x8xf32, #tpu.memory_space<vmem>>, vector<1x8xf32>
    %6 = vector.broadcast %5 : vector<1x8xf32> to vector<8x8xf32>
    %7 = arith.addf %4, %6 : vector<8x8xf32>
    %cst_6 = arith.constant 0.000000e+00 : f32
    %8 = vector.broadcast %cst_6 : f32 to vector<8x8xf32>
    %9 = arith.maximumf %7, %8 : vector<8x8xf32>
    %c0_7 = arith.constant 0 : index
    %c0_8 = arith.constant 0 : index
    %10 = vector.load %arg4[%c0_7, %c0_8] : memref<8x4xf32, #tpu.memory_space<vmem>>, vector<8x4xf32>
    %cst_9 = arith.constant dense<0.000000e+00> : vector<8x4xf32>
    %11 = tpu.matmul %9, %10, %cst_9 {dimension_numbers = #tpu.dot_dimension_numbers<[1], [0], [0], [1], [0, 0, 1, 1], [], []>, precision = #tpu.contract_precision<fp32>} : vector<8x8xf32>, vector<8x4xf32>, vector<8x4xf32> -> vector<8x4xf32>
    %c0_10 = arith.constant 0 : index
    %c0_11 = arith.constant 0 : index
    %12 = vector.load %arg5[%c0_10, %c0_11] : memref<1x4xf32, #tpu.memory_space<vmem>>, vector<1x4xf32>
    %13 = vector.broadcast %12 : vector<1x4xf32> to vector<8x4xf32>
    %14 = arith.addf %11, %13 : vector<8x4xf32>
    %cst_12 = arith.constant 1.200000e+00 : f32
    %15 = vector.broadcast %cst_12 : f32 to vector<8x4xf32>
    %16 = arith.mulf %15, %14 : vector<8x4xf32>
    %cst_13 = arith.constant 3.000000e+00 : f32
    %17 = vector.broadcast %cst_13 : f32 to vector<8x4xf32>
    %18 = arith.addf %16, %17 : vector<8x4xf32>
    %cst_14 = arith.constant 0.000000e+00 : f32
    %cst_15 = arith.constant 6.000000e+00 : f32
    %19 = vector.broadcast %cst_14 : f32 to vector<8x4xf32>
    %20 = arith.maximumf %19, %18 : vector<8x4xf32>
    %21 = vector.broadcast %cst_15 : f32 to vector<8x4xf32>
    %22 = arith.minimumf %21, %20 : vector<8x4xf32>
    %cst_16 = arith.constant 0.166666672 : f32
    %23 = vector.broadcast %cst_16 : f32 to vector<8x4xf32>
    %24 = arith.mulf %22, %23 : vector<8x4xf32>
    %c0_17 = arith.constant 0 : index
    %c0_18 = arith.constant 0 : index
    %25 = vector.load %arg6[%c0_17, %c0_18] : memref<8x4xf32, #tpu.memory_space<vmem>>, vector<8x4xf32>
    tpu.vector_store %arg6[%c0_17, %c0_18], %24 {strides = array<i32>} : memref<8x4xf32, #tpu.memory_space<vmem>>, vector<8x4xf32>,
    return
  }
  func.func @transform_0(%arg0: i32) -> (i32, i32) {
    %c0_i32 = arith.constant 0 : i32
    %c0_i32_0 = arith.constant 0 : i32
    %c0_i32_1 = arith.constant 0 : i32
    return %c0_i32, %c0_i32_0 : i32, i32
  }
  func.func @transform_1(%arg0: i32) -> (i32, i32) {
    %c0_i32 = arith.constant 0 : i32
    %c0_i32_0 = arith.constant 0 : i32
    %c0_i32_1 = arith.constant 0 : i32
    return %c0_i32, %c0_i32_0 : i32, i32
  }
  func.func @transform_2(%arg0: i32) -> (i32, i32) {
    %c0_i32 = arith.constant 0 : i32
    %c0_i32_0 = arith.constant 0 : i32
    %c0_i32_1 = arith.constant 0 : i32
    return %c0_i32, %c0_i32_0 : i32, i32
  }
  func.func @transform_3(%arg0: i32) -> (i32, i32) {
    %c0_i32 = arith.constant 0 : i32
    %c0_i32_0 = arith.constant 0 : i32
    %c0_i32_1 = arith.constant 0 : i32
    return %c0_i32, %c0_i32_0 : i32, i32
  }
  func.func @transform_4(%arg0: i32) -> (i32, i32) {
    %c0_i32 = arith.constant 0 : i32
    %c0_i32_0 = arith.constant 0 : i32
    %c0_i32_1 = arith.constant 0 : i32
    return %c0_i32, %c0_i32_0 : i32, i32
  }
  func.func @transform_5(%arg0: i32) -> (i32, i32) {
    %c0_i32 = arith.constant 0 : i32
    %c0_i32_0 = arith.constant 0 : i32
    %c0_i32_1 = arith.constant 0 : i32
    return %c0_i32, %c0_i32_0 : i32, i32
  }
}

module attributes {stable_mosaic.version = 11 : i64} {
  func.func @_dw_conv_kernel(%arg0: i32, %arg1: i32, %arg2: memref<1x4x18x18xf32, #tpu.memory_space<vmem>>, %arg3: memref<4x9xf32, #tpu.memory_space<vmem>>, %arg4: memref<4x1xf32, #tpu.memory_space<vmem>>, %arg5: memref<1x4x256xf32, #tpu.memory_space<vmem>>, %arg6: memref<1x4x1xf32, #tpu.memory_space<vmem>>) attributes {dimension_semantics = [#tpu.dimension_semantics<parallel>, #tpu.dimension_semantics<parallel>], iteration_bounds = array<i64: 2, 1>, scalar_prefetch = 0 : i64, scratch_operands = 0 : i64, tpu.core_type = #tpu.core_type<tc>, window_params = [{transform_indices = @transform_0, window_bounds = array<i64: 1, 4, 18, 18>}, {transform_indices = @transform_1, window_bounds = array<i64: 4, 9>}, {transform_indices = @transform_2, window_bounds = array<i64: 4, 1>}, {transform_indices = @transform_3, window_bounds = array<i64: 1, 4, 256>}, {transform_indices = @transform_4, window_bounds = array<i64: 1, 4, 1>}]} {
    %c0 = arith.constant 0 : index
    %c0_0 = arith.constant 0 : index
    %0 = vector.load %arg3[%c0, %c0_0] : memref<4x9xf32, #tpu.memory_space<vmem>>, vector<4x9xf32>
    %c0_1 = arith.constant 0 : index
    %c0_2 = arith.constant 0 : index
    %1 = vector.load %arg4[%c0_1, %c0_2] : memref<4x1xf32, #tpu.memory_space<vmem>>, vector<4x1xf32>
    %cst = arith.constant 0.000000e+00 : f32
    %2 = vector.broadcast %cst : f32 to vector<4x1xf32>
    %cst_3 = arith.constant 0.000000e+00 : f32
    %3 = vector.broadcast %cst_3 : f32 to vector<4x16xf32>
    %c0_4 = arith.constant 0 : index
    %c0_5 = arith.constant 0 : index
    %c0_6 = arith.constant 0 : index
    %c0_7 = arith.constant 0 : index
    %4 = vector.load %arg2[%c0_4, %c0_5, %c0_6, %c0_7] : memref<1x4x18x18xf32, #tpu.memory_space<vmem>>, vector<1x4x1x18xf32>
    %5 = vector.shape_cast %4 : vector<1x4x1x18xf32> to vector<4x18xf32>
    %6 = vector.extract_strided_slice %5 {offsets = [0, 0], sizes = [4, 16], strides = [1, 1]} : vector<4x18xf32> to vector<4x16xf32>
    %7 = vector.extract_strided_slice %0 {offsets = [0, 0], sizes = [4, 1], strides = [1, 1]} : vector<4x9xf32> to vector<4x1xf32>
    %8 = vector.broadcast %7 : vector<4x1xf32> to vector<4x16xf32>
    %9 = arith.mulf %6, %8 : vector<4x16xf32>
    %10 = arith.addf %3, %9 : vector<4x16xf32>
    %11 = vector.extract_strided_slice %5 {offsets = [0, 1], sizes = [4, 16], strides = [1, 1]} : vector<4x18xf32> to vector<4x16xf32>
    %12 = vector.extract_strided_slice %0 {offsets = [0, 1], sizes = [4, 1], strides = [1, 1]} : vector<4x9xf32> to vector<4x1xf32>
    %13 = vector.broadcast %12 : vector<4x1xf32> to vector<4x16xf32>
    %14 = arith.mulf %11, %13 : vector<4x16xf32>
    %15 = arith.addf %10, %14 : vector<4x16xf32>
    %16 = vector.extract_strided_slice %5 {offsets = [0, 2], sizes = [4, 16], strides = [1, 1]} : vector<4x18xf32> to vector<4x16xf32>
    %17 = vector.extract_strided_slice %0 {offsets = [0, 2], sizes = [4, 1], strides = [1, 1]} : vector<4x9xf32> to vector<4x1xf32>
    %18 = vector.broadcast %17 : vector<4x1xf32> to vector<4x16xf32>
    %19 = arith.mulf %16, %18 : vector<4x16xf32>
    %20 = arith.addf %15, %19 : vector<4x16xf32>
    %c0_8 = arith.constant 0 : index
    %c0_9 = arith.constant 0 : index
    %c1 = arith.constant 1 : index
    %c0_10 = arith.constant 0 : index
    %21 = vector.load %arg2[%c0_8, %c0_9, %c1, %c0_10] : memref<1x4x18x18xf32, #tpu.memory_space<vmem>>, vector<1x4x1x18xf32>
    %22 = vector.shape_cast %21 : vector<1x4x1x18xf32> to vector<4x18xf32>
    %23 = vector.extract_strided_slice %22 {offsets = [0, 0], sizes = [4, 16], strides = [1, 1]} : vector<4x18xf32> to vector<4x16xf32>
    %24 = vector.extract_strided_slice %0 {offsets = [0, 3], sizes = [4, 1], strides = [1, 1]} : vector<4x9xf32> to vector<4x1xf32>
    %25 = vector.broadcast %24 : vector<4x1xf32> to vector<4x16xf32>
    %26 = arith.mulf %23, %25 : vector<4x16xf32>
    %27 = arith.addf %20, %26 : vector<4x16xf32>
    %28 = vector.extract_strided_slice %22 {offsets = [0, 1], sizes = [4, 16], strides = [1, 1]} : vector<4x18xf32> to vector<4x16xf32>
    %29 = vector.extract_strided_slice %0 {offsets = [0, 4], sizes = [4, 1], strides = [1, 1]} : vector<4x9xf32> to vector<4x1xf32>
    %30 = vector.broadcast %29 : vector<4x1xf32> to vector<4x16xf32>
    %31 = arith.mulf %28, %30 : vector<4x16xf32>
    %32 = arith.addf %27, %31 : vector<4x16xf32>
    %33 = vector.extract_strided_slice %22 {offsets = [0, 2], sizes = [4, 16], strides = [1, 1]} : vector<4x18xf32> to vector<4x16xf32>
    %34 = vector.extract_strided_slice %0 {offsets = [0, 5], sizes = [4, 1], strides = [1, 1]} : vector<4x9xf32> to vector<4x1xf32>
    %35 = vector.broadcast %34 : vector<4x1xf32> to vector<4x16xf32>
    %36 = arith.mulf %33, %35 : vector<4x16xf32>
    %37 = arith.addf %32, %36 : vector<4x16xf32>
    %c0_11 = arith.constant 0 : index
    %c0_12 = arith.constant 0 : index
    %c2 = arith.constant 2 : index
    %c0_13 = arith.constant 0 : index
    %38 = vector.load %arg2[%c0_11, %c0_12, %c2, %c0_13] : memref<1x4x18x18xf32, #tpu.memory_space<vmem>>, vector<1x4x1x18xf32>
    %39 = vector.shape_cast %38 : vector<1x4x1x18xf32> to vector<4x18xf32>
    %40 = vector.extract_strided_slice %39 {offsets = [0, 0], sizes = [4, 16], strides = [1, 1]} : vector<4x18xf32> to vector<4x16xf32>
    %41 = vector.extract_strided_slice %0 {offsets = [0, 6], sizes = [4, 1], strides = [1, 1]} : vector<4x9xf32> to vector<4x1xf32>
    %42 = vector.broadcast %41 : vector<4x1xf32> to vector<4x16xf32>
    %43 = arith.mulf %40, %42 : vector<4x16xf32>
    %44 = arith.addf %37, %43 : vector<4x16xf32>
    %45 = vector.extract_strided_slice %39 {offsets = [0, 1], sizes = [4, 16], strides = [1, 1]} : vector<4x18xf32> to vector<4x16xf32>
    %46 = vector.extract_strided_slice %0 {offsets = [0, 7], sizes = [4, 1], strides = [1, 1]} : vector<4x9xf32> to vector<4x1xf32>
    %47 = vector.broadcast %46 : vector<4x1xf32> to vector<4x16xf32>
    %48 = arith.mulf %45, %47 : vector<4x16xf32>
    %49 = arith.addf %44, %48 : vector<4x16xf32>
    %50 = vector.extract_strided_slice %39 {offsets = [0, 2], sizes = [4, 16], strides = [1, 1]} : vector<4x18xf32> to vector<4x16xf32>
    %51 = vector.extract_strided_slice %0 {offsets = [0, 8], sizes = [4, 1], strides = [1, 1]} : vector<4x9xf32> to vector<4x1xf32>
    %52 = vector.broadcast %51 : vector<4x1xf32> to vector<4x16xf32>
    %53 = arith.mulf %50, %52 : vector<4x16xf32>
    %54 = arith.addf %49, %53 : vector<4x16xf32>
    %55 = vector.broadcast %1 : vector<4x1xf32> to vector<4x16xf32>
    %56 = arith.addf %54, %55 : vector<4x16xf32>
    %cst_14 = arith.constant 3.000000e+00 : f32
    %57 = vector.broadcast %cst_14 : f32 to vector<4x16xf32>
    %58 = arith.addf %56, %57 : vector<4x16xf32>
    %cst_15 = arith.constant 0.000000e+00 : f32
    %cst_16 = arith.constant 6.000000e+00 : f32
    %59 = vector.broadcast %cst_15 : f32 to vector<4x16xf32>
    %60 = arith.maximumf %59, %58 : vector<4x16xf32>
    %61 = vector.broadcast %cst_16 : f32 to vector<4x16xf32>
    %62 = arith.minimumf %61, %60 : vector<4x16xf32>
    %cst_17 = arith.constant 0.166666672 : f32
    %63 = vector.broadcast %cst_17 : f32 to vector<4x16xf32>
    %64 = arith.mulf %62, %63 : vector<4x16xf32>
    %65 = arith.mulf %56, %64 : vector<4x16xf32>
    %c0_18 = arith.constant 0 : index
    %c0_19 = arith.constant 0 : index
    %c0_20 = arith.constant 0 : index
    %66 = vector.load %arg5[%c0_18, %c0_19, %c0_20] : memref<1x4x256xf32, #tpu.memory_space<vmem>>, vector<1x4x16xf32>
    %67 = vector.shape_cast %66 : vector<1x4x16xf32> to vector<4x16xf32>
    %68 = vector.shape_cast %65 : vector<4x16xf32> to vector<1x4x16xf32>
    tpu.vector_store %arg5[%c0_18, %c0_19, %c0_20], %68 {strides = array<i32>} : memref<1x4x256xf32, #tpu.memory_space<vmem>>, vector<1x4x16xf32>,
    %cst_21 = arith.constant dense<0.000000e+00> : vector<4xf32>
    %69 = vector.multi_reduction <add>, %65, %cst_21 [1] : vector<4x16xf32> to vector<4xf32>
    %70 = vector.shape_cast %69 : vector<4xf32> to vector<4x1xf32>
    %71 = arith.addf %2, %70 : vector<4x1xf32>
    %cst_22 = arith.constant 0.000000e+00 : f32
    %72 = vector.broadcast %cst_22 : f32 to vector<4x16xf32>
    %c0_23 = arith.constant 0 : index
    %c0_24 = arith.constant 0 : index
    %c1_25 = arith.constant 1 : index
    %c0_26 = arith.constant 0 : index
    %73 = vector.load %arg2[%c0_23, %c0_24, %c1_25, %c0_26] : memref<1x4x18x18xf32, #tpu.memory_space<vmem>>, vector<1x4x1x18xf32>
    %74 = vector.shape_cast %73 : vector<1x4x1x18xf32> to vector<4x18xf32>
    %75 = vector.extract_strided_slice %74 {offsets = [0, 0], sizes = [4, 16], strides = [1, 1]} : vector<4x18xf32> to vector<4x16xf32>
    %76 = vector.extract_strided_slice %0 {offsets = [0, 0], sizes = [4, 1], strides = [1, 1]} : vector<4x9xf32> to vector<4x1xf32>
    %77 = vector.broadcast %76 : vector<4x1xf32> to vector<4x16xf32>
    %78 = arith.mulf %75, %77 : vector<4x16xf32>
    %79 = arith.addf %72, %78 : vector<4x16xf32>
    %80 = vector.extract_strided_slice %74 {offsets = [0, 1], sizes = [4, 16], strides = [1, 1]} : vector<4x18xf32> to vector<4x16xf32>
    %81 = vector.extract_strided_slice %0 {offsets = [0, 1], sizes = [4, 1], strides = [1, 1]} : vector<4x9xf32> to vector<4x1xf32>
    %82 = vector.broadcast %81 : vector<4x1xf32> to vector<4x16xf32>
    %83 = arith.mulf %80, %82 : vector<4x16xf32>
    %84 = arith.addf %79, %83 : vector<4x16xf32>
    %85 = vector.extract_strided_slice %74 {offsets = [0, 2], sizes = [4, 16], strides = [1, 1]} : vector<4x18xf32> to vector<4x16xf32>
    %86 = vector.extract_strided_slice %0 {offsets = [0, 2], sizes = [4, 1], strides = [1, 1]} : vector<4x9xf32> to vector<4x1xf32>
    %87 = vector.broadcast %86 : vector<4x1xf32> to vector<4x16xf32>
    %88 = arith.mulf %85, %87 : vector<4x16xf32>
    %89 = arith.addf %84, %88 : vector<4x16xf32>
    %c0_27 = arith.constant 0 : index
    %c0_28 = arith.constant 0 : index
    %c2_29 = arith.constant 2 : index
    %c0_30 = arith.constant 0 : index
    %90 = vector.load %arg2[%c0_27, %c0_28, %c2_29, %c0_30] : memref<1x4x18x18xf32, #tpu.memory_space<vmem>>, vector<1x4x1x18xf32>
    %91 = vector.shape_cast %90 : vector<1x4x1x18xf32> to vector<4x18xf32>
    %92 = vector.extract_strided_slice %91 {offsets = [0, 0], sizes = [4, 16], strides = [1, 1]} : vector<4x18xf32> to vector<4x16xf32>
    %93 = vector.extract_strided_slice %0 {offsets = [0, 3], sizes = [4, 1], strides = [1, 1]} : vector<4x9xf32> to vector<4x1xf32>
    %94 = vector.broadcast %93 : vector<4x1xf32> to vector<4x16xf32>
    %95 = arith.mulf %92, %94 : vector<4x16xf32>
    %96 = arith.addf %89, %95 : vector<4x16xf32>
    %97 = vector.extract_strided_slice %91 {offsets = [0, 1], sizes = [4, 16], strides = [1, 1]} : vector<4x18xf32> to vector<4x16xf32>
    %98 = vector.extract_strided_slice %0 {offsets = [0, 4], sizes = [4, 1], strides = [1, 1]} : vector<4x9xf32> to vector<4x1xf32>
    %99 = vector.broadcast %98 : vector<4x1xf32> to vector<4x16xf32>
    %100 = arith.mulf %97, %99 : vector<4x16xf32>
    %101 = arith.addf %96, %100 : vector<4x16xf32>
    %102 = vector.extract_strided_slice %91 {offsets = [0, 2], sizes = [4, 16], strides = [1, 1]} : vector<4x18xf32> to vector<4x16xf32>
    %103 = vector.extract_strided_slice %0 {offsets = [0, 5], sizes = [4, 1], strides = [1, 1]} : vector<4x9xf32> to vector<4x1xf32>
    %104 = vector.broadcast %103 : vector<4x1xf32> to vector<4x16xf32>
    %105 = arith.mulf %102, %104 : vector<4x16xf32>
    %106 = arith.addf %101, %105 : vector<4x16xf32>
    %c0_31 = arith.constant 0 : index
    %c0_32 = arith.constant 0 : index
    %c3 = arith.constant 3 : index
    %c0_33 = arith.constant 0 : index
    %107 = vector.load %arg2[%c0_31, %c0_32, %c3, %c0_33] : memref<1x4x18x18xf32, #tpu.memory_space<vmem>>, vector<1x4x1x18xf32>
    %108 = vector.shape_cast %107 : vector<1x4x1x18xf32> to vector<4x18xf32>
    %109 = vector.extract_strided_slice %108 {offsets = [0, 0], sizes = [4, 16], strides = [1, 1]} : vector<4x18xf32> to vector<4x16xf32>
    %110 = vector.extract_strided_slice %0 {offsets = [0, 6], sizes = [4, 1], strides = [1, 1]} : vector<4x9xf32> to vector<4x1xf32>
    %111 = vector.broadcast %110 : vector<4x1xf32> to vector<4x16xf32>
    %112 = arith.mulf %109, %111 : vector<4x16xf32>
    %113 = arith.addf %106, %112 : vector<4x16xf32>
    %114 = vector.extract_strided_slice %108 {offsets = [0, 1], sizes = [4, 16], strides = [1, 1]} : vector<4x18xf32> to vector<4x16xf32>
    %115 = vector.extract_strided_slice %0 {offsets = [0, 7], sizes = [4, 1], strides = [1, 1]} : vector<4x9xf32> to vector<4x1xf32>
    %116 = vector.broadcast %115 : vector<4x1xf32> to vector<4x16xf32>
    %117 = arith.mulf %114, %116 : vector<4x16xf32>
    %118 = arith.addf %113, %117 : vector<4x16xf32>
    %119 = vector.extract_strided_slice %108 {offsets = [0, 2], sizes = [4, 16], strides = [1, 1]} : vector<4x18xf32> to vector<4x16xf32>
    %120 = vector.extract_strided_slice %0 {offsets = [0, 8], sizes = [4, 1], strides = [1, 1]} : vector<4x9xf32> to vector<4x1xf32>
    %121 = vector.broadcast %120 : vector<4x1xf32> to vector<4x16xf32>
    %122 = arith.mulf %119, %121 : vector<4x16xf32>
    %123 = arith.addf %118, %122 : vector<4x16xf32>
    %124 = vector.broadcast %1 : vector<4x1xf32> to vector<4x16xf32>
    %125 = arith.addf %123, %124 : vector<4x16xf32>
    %cst_34 = arith.constant 3.000000e+00 : f32
    %126 = vector.broadcast %cst_34 : f32 to vector<4x16xf32>
    %127 = arith.addf %125, %126 : vector<4x16xf32>
    %cst_35 = arith.constant 0.000000e+00 : f32
    %cst_36 = arith.constant 6.000000e+00 : f32
    %128 = vector.broadcast %cst_35 : f32 to vector<4x16xf32>
    %129 = arith.maximumf %128, %127 : vector<4x16xf32>
    %130 = vector.broadcast %cst_36 : f32 to vector<4x16xf32>
    %131 = arith.minimumf %130, %129 : vector<4x16xf32>
    %cst_37 = arith.constant 0.166666672 : f32
    %132 = vector.broadcast %cst_37 : f32 to vector<4x16xf32>
    %133 = arith.mulf %131, %132 : vector<4x16xf32>
    %134 = arith.mulf %125, %133 : vector<4x16xf32>
    %c0_38 = arith.constant 0 : index
    %c0_39 = arith.constant 0 : index
    %c16 = arith.constant 16 : index
    %135 = vector.load %arg5[%c0_38, %c0_39, %c16] : memref<1x4x256xf32, #tpu.memory_space<vmem>>, vector<1x4x16xf32>
    %136 = vector.shape_cast %135 : vector<1x4x16xf32> to vector<4x16xf32>
    %137 = vector.shape_cast %134 : vector<4x16xf32> to vector<1x4x16xf32>
    tpu.vector_store %arg5[%c0_38, %c0_39, %c16], %137 {strides = array<i32>} : memref<1x4x256xf32, #tpu.memory_space<vmem>>, vector<1x4x16xf32>,
    %cst_40 = arith.constant dense<0.000000e+00> : vector<4xf32>
    %138 = vector.multi_reduction <add>, %134, %cst_40 [1] : vector<4x16xf32> to vector<4xf32>
    %139 = vector.shape_cast %138 : vector<4xf32> to vector<4x1xf32>
    %140 = arith.addf %71, %139 : vector<4x1xf32>
    %cst_41 = arith.constant 0.000000e+00 : f32
    %141 = vector.broadcast %cst_41 : f32 to vector<4x16xf32>
    %c0_42 = arith.constant 0 : index
    %c0_43 = arith.constant 0 : index
    %c2_44 = arith.constant 2 : index
    %c0_45 = arith.constant 0 : index
    %142 = vector.load %arg2[%c0_42, %c0_43, %c2_44, %c0_45] : memref<1x4x18x18xf32, #tpu.memory_space<vmem>>, vector<1x4x1x18xf32>
    %143 = vector.shape_cast %142 : vector<1x4x1x18xf32> to vector<4x18xf32>
    %144 = vector.extract_strided_slice %143 {offsets = [0, 0], sizes = [4, 16], strides = [1, 1]} : vector<4x18xf32> to vector<4x16xf32>
    %145 = vector.extract_strided_slice %0 {offsets = [0, 0], sizes = [4, 1], strides = [1, 1]} : vector<4x9xf32> to vector<4x1xf32>
    %146 = vector.broadcast %145 : vector<4x1xf32> to vector<4x16xf32>
    %147 = arith.mulf %144, %146 : vector<4x16xf32>
    %148 = arith.addf %141, %147 : vector<4x16xf32>
    %149 = vector.extract_strided_slice %143 {offsets = [0, 1], sizes = [4, 16], strides = [1, 1]} : vector<4x18xf32> to vector<4x16xf32>
    %150 = vector.extract_strided_slice %0 {offsets = [0, 1], sizes = [4, 1], strides = [1, 1]} : vector<4x9xf32> to vector<4x1xf32>
    %151 = vector.broadcast %150 : vector<4x1xf32> to vector<4x16xf32>
    %152 = arith.mulf %149, %151 : vector<4x16xf32>
    %153 = arith.addf %148, %152 : vector<4x16xf32>
    %154 = vector.extract_strided_slice %143 {offsets = [0, 2], sizes = [4, 16], strides = [1, 1]} : vector<4x18xf32> to vector<4x16xf32>
    %155 = vector.extract_strided_slice %0 {offsets = [0, 2], sizes = [4, 1], strides = [1, 1]} : vector<4x9xf32> to vector<4x1xf32>
    %156 = vector.broadcast %155 : vector<4x1xf32> to vector<4x16xf32>
    %157 = arith.mulf %154, %156 : vector<4x16xf32>
    %158 = arith.addf %153, %157 : vector<4x16xf32>
    %c0_46 = arith.constant 0 : index
    %c0_47 = arith.constant 0 : index
    %c3_48 = arith.constant 3 : index
    %c0_49 = arith.constant 0 : index
    %159 = vector.load %arg2[%c0_46, %c0_47, %c3_48, %c0_49] : memref<1x4x18x18xf32, #tpu.memory_space<vmem>>, vector<1x4x1x18xf32>
    %160 = vector.shape_cast %159 : vector<1x4x1x18xf32> to vector<4x18xf32>
    %161 = vector.extract_strided_slice %160 {offsets = [0, 0], sizes = [4, 16], strides = [1, 1]} : vector<4x18xf32> to vector<4x16xf32>
    %162 = vector.extract_strided_slice %0 {offsets = [0, 3], sizes = [4, 1], strides = [1, 1]} : vector<4x9xf32> to vector<4x1xf32>
    %163 = vector.broadcast %162 : vector<4x1xf32> to vector<4x16xf32>
    %164 = arith.mulf %161, %163 : vector<4x16xf32>
    %165 = arith.addf %158, %164 : vector<4x16xf32>
    %166 = vector.extract_strided_slice %160 {offsets = [0, 1], sizes = [4, 16], strides = [1, 1]} : vector<4x18xf32> to vector<4x16xf32>
    %167 = vector.extract_strided_slice %0 {offsets = [0, 4], sizes = [4, 1], strides = [1, 1]} : vector<4x9xf32> to vector<4x1xf32>
    %168 = vector.broadcast %167 : vector<4x1xf32> to vector<4x16xf32>
    %169 = arith.mulf %166, %168 : vector<4x16xf32>
    %170 = arith.addf %165, %169 : vector<4x16xf32>
    %171 = vector.extract_strided_slice %160 {offsets = [0, 2], sizes = [4, 16], strides = [1, 1]} : vector<4x18xf32> to vector<4x16xf32>
    %172 = vector.extract_strided_slice %0 {offsets = [0, 5], sizes = [4, 1], strides = [1, 1]} : vector<4x9xf32> to vector<4x1xf32>
    %173 = vector.broadcast %172 : vector<4x1xf32> to vector<4x16xf32>
    %174 = arith.mulf %171, %173 : vector<4x16xf32>
    %175 = arith.addf %170, %174 : vector<4x16xf32>
    %c0_50 = arith.constant 0 : index
    %c0_51 = arith.constant 0 : index
    %c4 = arith.constant 4 : index
    %c0_52 = arith.constant 0 : index
    %176 = vector.load %arg2[%c0_50, %c0_51, %c4, %c0_52] : memref<1x4x18x18xf32, #tpu.memory_space<vmem>>, vector<1x4x1x18xf32>
    %177 = vector.shape_cast %176 : vector<1x4x1x18xf32> to vector<4x18xf32>
    %178 = vector.extract_strided_slice %177 {offsets = [0, 0], sizes = [4, 16], strides = [1, 1]} : vector<4x18xf32> to vector<4x16xf32>
    %179 = vector.extract_strided_slice %0 {offsets = [0, 6], sizes = [4, 1], strides = [1, 1]} : vector<4x9xf32> to vector<4x1xf32>
    %180 = vector.broadcast %179 : vector<4x1xf32> to vector<4x16xf32>
    %181 = arith.mulf %178, %180 : vector<4x16xf32>
    %182 = arith.addf %175, %181 : vector<4x16xf32>
    %183 = vector.extract_strided_slice %177 {offsets = [0, 1], sizes = [4, 16], strides = [1, 1]} : vector<4x18xf32> to vector<4x16xf32>
    %184 = vector.extract_strided_slice %0 {offsets = [0, 7], sizes = [4, 1], strides = [1, 1]} : vector<4x9xf32> to vector<4x1xf32>
    %185 = vector.broadcast %184 : vector<4x1xf32> to vector<4x16xf32>
    %186 = arith.mulf %183, %185 : vector<4x16xf32>
    %187 = arith.addf %182, %186 : vector<4x16xf32>
    %188 = vector.extract_strided_slice %177 {offsets = [0, 2], sizes = [4, 16], strides = [1, 1]} : vector<4x18xf32> to vector<4x16xf32>
    %189 = vector.extract_strided_slice %0 {offsets = [0, 8], sizes = [4, 1], strides = [1, 1]} : vector<4x9xf32> to vector<4x1xf32>
    %190 = vector.broadcast %189 : vector<4x1xf32> to vector<4x16xf32>
    %191 = arith.mulf %188, %190 : vector<4x16xf32>
    %192 = arith.addf %187, %191 : vector<4x16xf32>
    %193 = vector.broadcast %1 : vector<4x1xf32> to vector<4x16xf32>
    %194 = arith.addf %192, %193 : vector<4x16xf32>
    %cst_53 = arith.constant 3.000000e+00 : f32
    %195 = vector.broadcast %cst_53 : f32 to vector<4x16xf32>
    %196 = arith.addf %194, %195 : vector<4x16xf32>
    %cst_54 = arith.constant 0.000000e+00 : f32
    %cst_55 = arith.constant 6.000000e+00 : f32
    %197 = vector.broadcast %cst_54 : f32 to vector<4x16xf32>
    %198 = arith.maximumf %197, %196 : vector<4x16xf32>
    %199 = vector.broadcast %cst_55 : f32 to vector<4x16xf32>
    %200 = arith.minimumf %199, %198 : vector<4x16xf32>
    %cst_56 = arith.constant 0.166666672 : f32
    %201 = vector.broadcast %cst_56 : f32 to vector<4x16xf32>
    %202 = arith.mulf %200, %201 : vector<4x16xf32>
    %203 = arith.mulf %194, %202 : vector<4x16xf32>
    %c0_57 = arith.constant 0 : index
    %c0_58 = arith.constant 0 : index
    %c32 = arith.constant 32 : index
    %204 = vector.load %arg5[%c0_57, %c0_58, %c32] : memref<1x4x256xf32, #tpu.memory_space<vmem>>, vector<1x4x16xf32>
    %205 = vector.shape_cast %204 : vector<1x4x16xf32> to vector<4x16xf32>
    %206 = vector.shape_cast %203 : vector<4x16xf32> to vector<1x4x16xf32>
    tpu.vector_store %arg5[%c0_57, %c0_58, %c32], %206 {strides = array<i32>} : memref<1x4x256xf32, #tpu.memory_space<vmem>>, vector<1x4x16xf32>,
    %cst_59 = arith.constant dense<0.000000e+00> : vector<4xf32>
    %207 = vector.multi_reduction <add>, %203, %cst_59 [1] : vector<4x16xf32> to vector<4xf32>
    %208 = vector.shape_cast %207 : vector<4xf32> to vector<4x1xf32>
    %209 = arith.addf %140, %208 : vector<4x1xf32>
    %cst_60 = arith.constant 0.000000e+00 : f32
    %210 = vector.broadcast %cst_60 : f32 to vector<4x16xf32>
    %c0_61 = arith.constant 0 : index
    %c0_62 = arith.constant 0 : index
    %c3_63 = arith.constant 3 : index
    %c0_64 = arith.constant 0 : index
    %211 = vector.load %arg2[%c0_61, %c0_62, %c3_63, %c0_64] : memref<1x4x18x18xf32, #tpu.memory_space<vmem>>, vector<1x4x1x18xf32>
    %212 = vector.shape_cast %211 : vector<1x4x1x18xf32> to vector<4x18xf32>
    %213 = vector.extract_strided_slice %212 {offsets = [0, 0], sizes = [4, 16], strides = [1, 1]} : vector<4x18xf32> to vector<4x16xf32>
    %214 = vector.extract_strided_slice %0 {offsets = [0, 0], sizes = [4, 1], strides = [1, 1]} : vector<4x9xf32> to vector<4x1xf32>
    %215 = vector.broadcast %214 : vector<4x1xf32> to vector<4x16xf32>
    %216 = arith.mulf %213, %215 : vector<4x16xf32>
    %217 = arith.addf %210, %216 : vector<4x16xf32>
    %218 = vector.extract_strided_slice %212 {offsets = [0, 1], sizes = [4, 16], strides = [1, 1]} : vector<4x18xf32> to vector<4x16xf32>
    %219 = vector.extract_strided_slice %0 {offsets = [0, 1], sizes = [4, 1], strides = [1, 1]} : vector<4x9xf32> to vector<4x1xf32>
    %220 = vector.broadcast %219 : vector<4x1xf32> to vector<4x16xf32>
    %221 = arith.mulf %218, %220 : vector<4x16xf32>
    %222 = arith.addf %217, %221 : vector<4x16xf32>
    %223 = vector.extract_strided_slice %212 {offsets = [0, 2], sizes = [4, 16], strides = [1, 1]} : vector<4x18xf32> to vector<4x16xf32>
    %224 = vector.extract_strided_slice %0 {offsets = [0, 2], sizes = [4, 1], strides = [1, 1]} : vector<4x9xf32> to vector<4x1xf32>
    %225 = vector.broadcast %224 : vector<4x1xf32> to vector<4x16xf32>
    %226 = arith.mulf %223, %225 : vector<4x16xf32>
    %227 = arith.addf %222, %226 : vector<4x16xf32>
    %c0_65 = arith.constant 0 : index
    %c0_66 = arith.constant 0 : index
    %c4_67 = arith.constant 4 : index
    %c0_68 = arith.constant 0 : index
    %228 = vector.load %arg2[%c0_65, %c0_66, %c4_67, %c0_68] : memref<1x4x18x18xf32, #tpu.memory_space<vmem>>, vector<1x4x1x18xf32>
    %229 = vector.shape_cast %228 : vector<1x4x1x18xf32> to vector<4x18xf32>
    %230 = vector.extract_strided_slice %229 {offsets = [0, 0], sizes = [4, 16], strides = [1, 1]} : vector<4x18xf32> to vector<4x16xf32>
    %231 = vector.extract_strided_slice %0 {offsets = [0, 3], sizes = [4, 1], strides = [1, 1]} : vector<4x9xf32> to vector<4x1xf32>
    %232 = vector.broadcast %231 : vector<4x1xf32> to vector<4x16xf32>
    %233 = arith.mulf %230, %232 : vector<4x16xf32>
    %234 = arith.addf %227, %233 : vector<4x16xf32>
    %235 = vector.extract_strided_slice %229 {offsets = [0, 1], sizes = [4, 16], strides = [1, 1]} : vector<4x18xf32> to vector<4x16xf32>
    %236 = vector.extract_strided_slice %0 {offsets = [0, 4], sizes = [4, 1], strides = [1, 1]} : vector<4x9xf32> to vector<4x1xf32>
    %237 = vector.broadcast %236 : vector<4x1xf32> to vector<4x16xf32>
    %238 = arith.mulf %235, %237 : vector<4x16xf32>
    %239 = arith.addf %234, %238 : vector<4x16xf32>
    %240 = vector.extract_strided_slice %229 {offsets = [0, 2], sizes = [4, 16], strides = [1, 1]} : vector<4x18xf32> to vector<4x16xf32>
    %241 = vector.extract_strided_slice %0 {offsets = [0, 5], sizes = [4, 1], strides = [1, 1]} : vector<4x9xf32> to vector<4x1xf32>
    %242 = vector.broadcast %241 : vector<4x1xf32> to vector<4x16xf32>
    %243 = arith.mulf %240, %242 : vector<4x16xf32>
    %244 = arith.addf %239, %243 : vector<4x16xf32>
    %c0_69 = arith.constant 0 : index
    %c0_70 = arith.constant 0 : index
    %c5 = arith.constant 5 : index
    %c0_71 = arith.constant 0 : index
    %245 = vector.load %arg2[%c0_69, %c0_70, %c5, %c0_71] : memref<1x4x18x18xf32, #tpu.memory_space<vmem>>, vector<1x4x1x18xf32>
    %246 = vector.shape_cast %245 : vector<1x4x1x18xf32> to vector<4x18xf32>
    %247 = vector.extract_strided_slice %246 {offsets = [0, 0], sizes = [4, 16], strides = [1, 1]} : vector<4x18xf32> to vector<4x16xf32>
    %248 = vector.extract_strided_slice %0 {offsets = [0, 6], sizes = [4, 1], strides = [1, 1]} : vector<4x9xf32> to vector<4x1xf32>
    %249 = vector.broadcast %248 : vector<4x1xf32> to vector<4x16xf32>
    %250 = arith.mulf %247, %249 : vector<4x16xf32>
    %251 = arith.addf %244, %250 : vector<4x16xf32>
    %252 = vector.extract_strided_slice %246 {offsets = [0, 1], sizes = [4, 16], strides = [1, 1]} : vector<4x18xf32> to vector<4x16xf32>
    %253 = vector.extract_strided_slice %0 {offsets = [0, 7], sizes = [4, 1], strides = [1, 1]} : vector<4x9xf32> to vector<4x1xf32>
    %254 = vector.broadcast %253 : vector<4x1xf32> to vector<4x16xf32>
    %255 = arith.mulf %252, %254 : vector<4x16xf32>
    %256 = arith.addf %251, %255 : vector<4x16xf32>
    %257 = vector.extract_strided_slice %246 {offsets = [0, 2], sizes = [4, 16], strides = [1, 1]} : vector<4x18xf32> to vector<4x16xf32>
    %258 = vector.extract_strided_slice %0 {offsets = [0, 8], sizes = [4, 1], strides = [1, 1]} : vector<4x9xf32> to vector<4x1xf32>
    %259 = vector.broadcast %258 : vector<4x1xf32> to vector<4x16xf32>
    %260 = arith.mulf %257, %259 : vector<4x16xf32>
    %261 = arith.addf %256, %260 : vector<4x16xf32>
    %262 = vector.broadcast %1 : vector<4x1xf32> to vector<4x16xf32>
    %263 = arith.addf %261, %262 : vector<4x16xf32>
    %cst_72 = arith.constant 3.000000e+00 : f32
    %264 = vector.broadcast %cst_72 : f32 to vector<4x16xf32>
    %265 = arith.addf %263, %264 : vector<4x16xf32>
    %cst_73 = arith.constant 0.000000e+00 : f32
    %cst_74 = arith.constant 6.000000e+00 : f32
    %266 = vector.broadcast %cst_73 : f32 to vector<4x16xf32>
    %267 = arith.maximumf %266, %265 : vector<4x16xf32>
    %268 = vector.broadcast %cst_74 : f32 to vector<4x16xf32>
    %269 = arith.minimumf %268, %267 : vector<4x16xf32>
    %cst_75 = arith.constant 0.166666672 : f32
    %270 = vector.broadcast %cst_75 : f32 to vector<4x16xf32>
    %271 = arith.mulf %269, %270 : vector<4x16xf32>
    %272 = arith.mulf %263, %271 : vector<4x16xf32>
    %c0_76 = arith.constant 0 : index
    %c0_77 = arith.constant 0 : index
    %c48 = arith.constant 48 : index
    %273 = vector.load %arg5[%c0_76, %c0_77, %c48] : memref<1x4x256xf32, #tpu.memory_space<vmem>>, vector<1x4x16xf32>
    %274 = vector.shape_cast %273 : vector<1x4x16xf32> to vector<4x16xf32>
    %275 = vector.shape_cast %272 : vector<4x16xf32> to vector<1x4x16xf32>
    tpu.vector_store %arg5[%c0_76, %c0_77, %c48], %275 {strides = array<i32>} : memref<1x4x256xf32, #tpu.memory_space<vmem>>, vector<1x4x16xf32>,
    %cst_78 = arith.constant dense<0.000000e+00> : vector<4xf32>
    %276 = vector.multi_reduction <add>, %272, %cst_78 [1] : vector<4x16xf32> to vector<4xf32>
    %277 = vector.shape_cast %276 : vector<4xf32> to vector<4x1xf32>
    %278 = arith.addf %209, %277 : vector<4x1xf32>
    %cst_79 = arith.constant 0.000000e+00 : f32
    %279 = vector.broadcast %cst_79 : f32 to vector<4x16xf32>
    %c0_80 = arith.constant 0 : index
    %c0_81 = arith.constant 0 : index
    %c4_82 = arith.constant 4 : index
    %c0_83 = arith.constant 0 : index
    %280 = vector.load %arg2[%c0_80, %c0_81, %c4_82, %c0_83] : memref<1x4x18x18xf32, #tpu.memory_space<vmem>>, vector<1x4x1x18xf32>
    %281 = vector.shape_cast %280 : vector<1x4x1x18xf32> to vector<4x18xf32>
    %282 = vector.extract_strided_slice %281 {offsets = [0, 0], sizes = [4, 16], strides = [1, 1]} : vector<4x18xf32> to vector<4x16xf32>
    %283 = vector.extract_strided_slice %0 {offsets = [0, 0], sizes = [4, 1], strides = [1, 1]} : vector<4x9xf32> to vector<4x1xf32>
    %284 = vector.broadcast %283 : vector<4x1xf32> to vector<4x16xf32>
    %285 = arith.mulf %282, %284 : vector<4x16xf32>
    %286 = arith.addf %279, %285 : vector<4x16xf32>
    %287 = vector.extract_strided_slice %281 {offsets = [0, 1], sizes = [4, 16], strides = [1, 1]} : vector<4x18xf32> to vector<4x16xf32>
    %288 = vector.extract_strided_slice %0 {offsets = [0, 1], sizes = [4, 1], strides = [1, 1]} : vector<4x9xf32> to vector<4x1xf32>
    %289 = vector.broadcast %288 : vector<4x1xf32> to vector<4x16xf32>
    %290 = arith.mulf %287, %289 : vector<4x16xf32>
    %291 = arith.addf %286, %290 : vector<4x16xf32>
    %292 = vector.extract_strided_slice %281 {offsets = [0, 2], sizes = [4, 16], strides = [1, 1]} : vector<4x18xf32> to vector<4x16xf32>
    %293 = vector.extract_strided_slice %0 {offsets = [0, 2], sizes = [4, 1], strides = [1, 1]} : vector<4x9xf32> to vector<4x1xf32>
    %294 = vector.broadcast %293 : vector<4x1xf32> to vector<4x16xf32>
    %295 = arith.mulf %292, %294 : vector<4x16xf32>
    %296 = arith.addf %291, %295 : vector<4x16xf32>
    %c0_84 = arith.constant 0 : index
    %c0_85 = arith.constant 0 : index
    %c5_86 = arith.constant 5 : index
    %c0_87 = arith.constant 0 : index
    %297 = vector.load %arg2[%c0_84, %c0_85, %c5_86, %c0_87] : memref<1x4x18x18xf32, #tpu.memory_space<vmem>>, vector<1x4x1x18xf32>
    %298 = vector.shape_cast %297 : vector<1x4x1x18xf32> to vector<4x18xf32>
    %299 = vector.extract_strided_slice %298 {offsets = [0, 0], sizes = [4, 16], strides = [1, 1]} : vector<4x18xf32> to vector<4x16xf32>
    %300 = vector.extract_strided_slice %0 {offsets = [0, 3], sizes = [4, 1], strides = [1, 1]} : vector<4x9xf32> to vector<4x1xf32>
    %301 = vector.broadcast %300 : vector<4x1xf32> to vector<4x16xf32>
    %302 = arith.mulf %299, %301 : vector<4x16xf32>
    %303 = arith.addf %296, %302 : vector<4x16xf32>
    %304 = vector.extract_strided_slice %298 {offsets = [0, 1], sizes = [4, 16], strides = [1, 1]} : vector<4x18xf32> to vector<4x16xf32>
    %305 = vector.extract_strided_slice %0 {offsets = [0, 4], sizes = [4, 1], strides = [1, 1]} : vector<4x9xf32> to vector<4x1xf32>
    %306 = vector.broadcast %305 : vector<4x1xf32> to vector<4x16xf32>
    %307 = arith.mulf %304, %306 : vector<4x16xf32>
    %308 = arith.addf %303, %307 : vector<4x16xf32>
    %309 = vector.extract_strided_slice %298 {offsets = [0, 2], sizes = [4, 16], strides = [1, 1]} : vector<4x18xf32> to vector<4x16xf32>
    %310 = vector.extract_strided_slice %0 {offsets = [0, 5], sizes = [4, 1], strides = [1, 1]} : vector<4x9xf32> to vector<4x1xf32>
    %311 = vector.broadcast %310 : vector<4x1xf32> to vector<4x16xf32>
    %312 = arith.mulf %309, %311 : vector<4x16xf32>
    %313 = arith.addf %308, %312 : vector<4x16xf32>
    %c0_88 = arith.constant 0 : index
    %c0_89 = arith.constant 0 : index
    %c6 = arith.constant 6 : index
    %c0_90 = arith.constant 0 : index
    %314 = vector.load %arg2[%c0_88, %c0_89, %c6, %c0_90] : memref<1x4x18x18xf32, #tpu.memory_space<vmem>>, vector<1x4x1x18xf32>
    %315 = vector.shape_cast %314 : vector<1x4x1x18xf32> to vector<4x18xf32>
    %316 = vector.extract_strided_slice %315 {offsets = [0, 0], sizes = [4, 16], strides = [1, 1]} : vector<4x18xf32> to vector<4x16xf32>
    %317 = vector.extract_strided_slice %0 {offsets = [0, 6], sizes = [4, 1], strides = [1, 1]} : vector<4x9xf32> to vector<4x1xf32>
    %318 = vector.broadcast %317 : vector<4x1xf32> to vector<4x16xf32>
    %319 = arith.mulf %316, %318 : vector<4x16xf32>
    %320 = arith.addf %313, %319 : vector<4x16xf32>
    %321 = vector.extract_strided_slice %315 {offsets = [0, 1], sizes = [4, 16], strides = [1, 1]} : vector<4x18xf32> to vector<4x16xf32>
    %322 = vector.extract_strided_slice %0 {offsets = [0, 7], sizes = [4, 1], strides = [1, 1]} : vector<4x9xf32> to vector<4x1xf32>
    %323 = vector.broadcast %322 : vector<4x1xf32> to vector<4x16xf32>
    %324 = arith.mulf %321, %323 : vector<4x16xf32>
    %325 = arith.addf %320, %324 : vector<4x16xf32>
    %326 = vector.extract_strided_slice %315 {offsets = [0, 2], sizes = [4, 16], strides = [1, 1]} : vector<4x18xf32> to vector<4x16xf32>
    %327 = vector.extract_strided_slice %0 {offsets = [0, 8], sizes = [4, 1], strides = [1, 1]} : vector<4x9xf32> to vector<4x1xf32>
    %328 = vector.broadcast %327 : vector<4x1xf32> to vector<4x16xf32>
    %329 = arith.mulf %326, %328 : vector<4x16xf32>
    %330 = arith.addf %325, %329 : vector<4x16xf32>
    %331 = vector.broadcast %1 : vector<4x1xf32> to vector<4x16xf32>
    %332 = arith.addf %330, %331 : vector<4x16xf32>
    %cst_91 = arith.constant 3.000000e+00 : f32
    %333 = vector.broadcast %cst_91 : f32 to vector<4x16xf32>
    %334 = arith.addf %332, %333 : vector<4x16xf32>
    %cst_92 = arith.constant 0.000000e+00 : f32
    %cst_93 = arith.constant 6.000000e+00 : f32
    %335 = vector.broadcast %cst_92 : f32 to vector<4x16xf32>
    %336 = arith.maximumf %335, %334 : vector<4x16xf32>
    %337 = vector.broadcast %cst_93 : f32 to vector<4x16xf32>
    %338 = arith.minimumf %337, %336 : vector<4x16xf32>
    %cst_94 = arith.constant 0.166666672 : f32
    %339 = vector.broadcast %cst_94 : f32 to vector<4x16xf32>
    %340 = arith.mulf %338, %339 : vector<4x16xf32>
    %341 = arith.mulf %332, %340 : vector<4x16xf32>
    %c0_95 = arith.constant 0 : index
    %c0_96 = arith.constant 0 : index
    %c64 = arith.constant 64 : index
    %342 = vector.load %arg5[%c0_95, %c0_96, %c64] : memref<1x4x256xf32, #tpu.memory_space<vmem>>, vector<1x4x16xf32>
    %343 = vector.shape_cast %342 : vector<1x4x16xf32> to vector<4x16xf32>
    %344 = vector.shape_cast %341 : vector<4x16xf32> to vector<1x4x16xf32>
    tpu.vector_store %arg5[%c0_95, %c0_96, %c64], %344 {strides = array<i32>} : memref<1x4x256xf32, #tpu.memory_space<vmem>>, vector<1x4x16xf32>,
    %cst_97 = arith.constant dense<0.000000e+00> : vector<4xf32>
    %345 = vector.multi_reduction <add>, %341, %cst_97 [1] : vector<4x16xf32> to vector<4xf32>
    %346 = vector.shape_cast %345 : vector<4xf32> to vector<4x1xf32>
    %347 = arith.addf %278, %346 : vector<4x1xf32>
    %cst_98 = arith.constant 0.000000e+00 : f32
    %348 = vector.broadcast %cst_98 : f32 to vector<4x16xf32>
    %c0_99 = arith.constant 0 : index
    %c0_100 = arith.constant 0 : index
    %c5_101 = arith.constant 5 : index
    %c0_102 = arith.constant 0 : index
    %349 = vector.load %arg2[%c0_99, %c0_100, %c5_101, %c0_102] : memref<1x4x18x18xf32, #tpu.memory_space<vmem>>, vector<1x4x1x18xf32>
    %350 = vector.shape_cast %349 : vector<1x4x1x18xf32> to vector<4x18xf32>
    %351 = vector.extract_strided_slice %350 {offsets = [0, 0], sizes = [4, 16], strides = [1, 1]} : vector<4x18xf32> to vector<4x16xf32>
    %352 = vector.extract_strided_slice %0 {offsets = [0, 0], sizes = [4, 1], strides = [1, 1]} : vector<4x9xf32> to vector<4x1xf32>
    %353 = vector.broadcast %352 : vector<4x1xf32> to vector<4x16xf32>
    %354 = arith.mulf %351, %353 : vector<4x16xf32>
    %355 = arith.addf %348, %354 : vector<4x16xf32>
    %356 = vector.extract_strided_slice %350 {offsets = [0, 1], sizes = [4, 16], strides = [1, 1]} : vector<4x18xf32> to vector<4x16xf32>
    %357 = vector.extract_strided_slice %0 {offsets = [0, 1], sizes = [4, 1], strides = [1, 1]} : vector<4x9xf32> to vector<4x1xf32>
    %358 = vector.broadcast %357 : vector<4x1xf32> to vector<4x16xf32>
    %359 = arith.mulf %356, %358 : vector<4x16xf32>
    %360 = arith.addf %355, %359 : vector<4x16xf32>
    %361 = vector.extract_strided_slice %350 {offsets = [0, 2], sizes = [4, 16], strides = [1, 1]} : vector<4x18xf32> to vector<4x16xf32>
    %362 = vector.extract_strided_slice %0 {offsets = [0, 2], sizes = [4, 1], strides = [1, 1]} : vector<4x9xf32> to vector<4x1xf32>
    %363 = vector.broadcast %362 : vector<4x1xf32> to vector<4x16xf32>
    %364 = arith.mulf %361, %363 : vector<4x16xf32>
    %365 = arith.addf %360, %364 : vector<4x16xf32>
    %c0_103 = arith.constant 0 : index
    %c0_104 = arith.constant 0 : index
    %c6_105 = arith.constant 6 : index
    %c0_106 = arith.constant 0 : index
    %366 = vector.load %arg2[%c0_103, %c0_104, %c6_105, %c0_106] : memref<1x4x18x18xf32, #tpu.memory_space<vmem>>, vector<1x4x1x18xf32>
    %367 = vector.shape_cast %366 : vector<1x4x1x18xf32> to vector<4x18xf32>
    %368 = vector.extract_strided_slice %367 {offsets = [0, 0], sizes = [4, 16], strides = [1, 1]} : vector<4x18xf32> to vector<4x16xf32>
    %369 = vector.extract_strided_slice %0 {offsets = [0, 3], sizes = [4, 1], strides = [1, 1]} : vector<4x9xf32> to vector<4x1xf32>
    %370 = vector.broadcast %369 : vector<4x1xf32> to vector<4x16xf32>
    %371 = arith.mulf %368, %370 : vector<4x16xf32>
    %372 = arith.addf %365, %371 : vector<4x16xf32>
    %373 = vector.extract_strided_slice %367 {offsets = [0, 1], sizes = [4, 16], strides = [1, 1]} : vector<4x18xf32> to vector<4x16xf32>
    %374 = vector.extract_strided_slice %0 {offsets = [0, 4], sizes = [4, 1], strides = [1, 1]} : vector<4x9xf32> to vector<4x1xf32>
    %375 = vector.broadcast %374 : vector<4x1xf32> to vector<4x16xf32>
    %376 = arith.mulf %373, %375 : vector<4x16xf32>
    %377 = arith.addf %372, %376 : vector<4x16xf32>
    %378 = vector.extract_strided_slice %367 {offsets = [0, 2], sizes = [4, 16], strides = [1, 1]} : vector<4x18xf32> to vector<4x16xf32>
    %379 = vector.extract_strided_slice %0 {offsets = [0, 5], sizes = [4, 1], strides = [1, 1]} : vector<4x9xf32> to vector<4x1xf32>
    %380 = vector.broadcast %379 : vector<4x1xf32> to vector<4x16xf32>
    %381 = arith.mulf %378, %380 : vector<4x16xf32>
    %382 = arith.addf %377, %381 : vector<4x16xf32>
    %c0_107 = arith.constant 0 : index
    %c0_108 = arith.constant 0 : index
    %c7 = arith.constant 7 : index
    %c0_109 = arith.constant 0 : index
    %383 = vector.load %arg2[%c0_107, %c0_108, %c7, %c0_109] : memref<1x4x18x18xf32, #tpu.memory_space<vmem>>, vector<1x4x1x18xf32>
    %384 = vector.shape_cast %383 : vector<1x4x1x18xf32> to vector<4x18xf32>
    %385 = vector.extract_strided_slice %384 {offsets = [0, 0], sizes = [4, 16], strides = [1, 1]} : vector<4x18xf32> to vector<4x16xf32>
    %386 = vector.extract_strided_slice %0 {offsets = [0, 6], sizes = [4, 1], strides = [1, 1]} : vector<4x9xf32> to vector<4x1xf32>
    %387 = vector.broadcast %386 : vector<4x1xf32> to vector<4x16xf32>
    %388 = arith.mulf %385, %387 : vector<4x16xf32>
    %389 = arith.addf %382, %388 : vector<4x16xf32>
    %390 = vector.extract_strided_slice %384 {offsets = [0, 1], sizes = [4, 16], strides = [1, 1]} : vector<4x18xf32> to vector<4x16xf32>
    %391 = vector.extract_strided_slice %0 {offsets = [0, 7], sizes = [4, 1], strides = [1, 1]} : vector<4x9xf32> to vector<4x1xf32>
    %392 = vector.broadcast %391 : vector<4x1xf32> to vector<4x16xf32>
    %393 = arith.mulf %390, %392 : vector<4x16xf32>
    %394 = arith.addf %389, %393 : vector<4x16xf32>
    %395 = vector.extract_strided_slice %384 {offsets = [0, 2], sizes = [4, 16], strides = [1, 1]} : vector<4x18xf32> to vector<4x16xf32>
    %396 = vector.extract_strided_slice %0 {offsets = [0, 8], sizes = [4, 1], strides = [1, 1]} : vector<4x9xf32> to vector<4x1xf32>
    %397 = vector.broadcast %396 : vector<4x1xf32> to vector<4x16xf32>
    %398 = arith.mulf %395, %397 : vector<4x16xf32>
    %399 = arith.addf %394, %398 : vector<4x16xf32>
    %400 = vector.broadcast %1 : vector<4x1xf32> to vector<4x16xf32>
    %401 = arith.addf %399, %400 : vector<4x16xf32>
    %cst_110 = arith.constant 3.000000e+00 : f32
    %402 = vector.broadcast %cst_110 : f32 to vector<4x16xf32>
    %403 = arith.addf %401, %402 : vector<4x16xf32>
    %cst_111 = arith.constant 0.000000e+00 : f32
    %cst_112 = arith.constant 6.000000e+00 : f32
    %404 = vector.broadcast %cst_111 : f32 to vector<4x16xf32>
    %405 = arith.maximumf %404, %403 : vector<4x16xf32>
    %406 = vector.broadcast %cst_112 : f32 to vector<4x16xf32>
    %407 = arith.minimumf %406, %405 : vector<4x16xf32>
    %cst_113 = arith.constant 0.166666672 : f32
    %408 = vector.broadcast %cst_113 : f32 to vector<4x16xf32>
    %409 = arith.mulf %407, %408 : vector<4x16xf32>
    %410 = arith.mulf %401, %409 : vector<4x16xf32>
    %c0_114 = arith.constant 0 : index
    %c0_115 = arith.constant 0 : index
    %c80 = arith.constant 80 : index
    %411 = vector.load %arg5[%c0_114, %c0_115, %c80] : memref<1x4x256xf32, #tpu.memory_space<vmem>>, vector<1x4x16xf32>
    %412 = vector.shape_cast %411 : vector<1x4x16xf32> to vector<4x16xf32>
    %413 = vector.shape_cast %410 : vector<4x16xf32> to vector<1x4x16xf32>
    tpu.vector_store %arg5[%c0_114, %c0_115, %c80], %413 {strides = array<i32>} : memref<1x4x256xf32, #tpu.memory_space<vmem>>, vector<1x4x16xf32>,
    %cst_116 = arith.constant dense<0.000000e+00> : vector<4xf32>
    %414 = vector.multi_reduction <add>, %410, %cst_116 [1] : vector<4x16xf32> to vector<4xf32>
    %415 = vector.shape_cast %414 : vector<4xf32> to vector<4x1xf32>
    %416 = arith.addf %347, %415 : vector<4x1xf32>
    %cst_117 = arith.constant 0.000000e+00 : f32
    %417 = vector.broadcast %cst_117 : f32 to vector<4x16xf32>
    %c0_118 = arith.constant 0 : index
    %c0_119 = arith.constant 0 : index
    %c6_120 = arith.constant 6 : index
    %c0_121 = arith.constant 0 : index
    %418 = vector.load %arg2[%c0_118, %c0_119, %c6_120, %c0_121] : memref<1x4x18x18xf32, #tpu.memory_space<vmem>>, vector<1x4x1x18xf32>
    %419 = vector.shape_cast %418 : vector<1x4x1x18xf32> to vector<4x18xf32>
    %420 = vector.extract_strided_slice %419 {offsets = [0, 0], sizes = [4, 16], strides = [1, 1]} : vector<4x18xf32> to vector<4x16xf32>
    %421 = vector.extract_strided_slice %0 {offsets = [0, 0], sizes = [4, 1], strides = [1, 1]} : vector<4x9xf32> to vector<4x1xf32>
    %422 = vector.broadcast %421 : vector<4x1xf32> to vector<4x16xf32>
    %423 = arith.mulf %420, %422 : vector<4x16xf32>
    %424 = arith.addf %417, %423 : vector<4x16xf32>
    %425 = vector.extract_strided_slice %419 {offsets = [0, 1], sizes = [4, 16], strides = [1, 1]} : vector<4x18xf32> to vector<4x16xf32>
    %426 = vector.extract_strided_slice %0 {offsets = [0, 1], sizes = [4, 1], strides = [1, 1]} : vector<4x9xf32> to vector<4x1xf32>
    %427 = vector.broadcast %426 : vector<4x1xf32> to vector<4x16xf32>
    %428 = arith.mulf %425, %427 : vector<4x16xf32>
    %429 = arith.addf %424, %428 : vector<4x16xf32>
    %430 = vector.extract_strided_slice %419 {offsets = [0, 2], sizes = [4, 16], strides = [1, 1]} : vector<4x18xf32> to vector<4x16xf32>
    %431 = vector.extract_strided_slice %0 {offsets = [0, 2], sizes = [4, 1], strides = [1, 1]} : vector<4x9xf32> to vector<4x1xf32>
    %432 = vector.broadcast %431 : vector<4x1xf32> to vector<4x16xf32>
    %433 = arith.mulf %430, %432 : vector<4x16xf32>
    %434 = arith.addf %429, %433 : vector<4x16xf32>
    %c0_122 = arith.constant 0 : index
    %c0_123 = arith.constant 0 : index
    %c7_124 = arith.constant 7 : index
    %c0_125 = arith.constant 0 : index
    %435 = vector.load %arg2[%c0_122, %c0_123, %c7_124, %c0_125] : memref<1x4x18x18xf32, #tpu.memory_space<vmem>>, vector<1x4x1x18xf32>
    %436 = vector.shape_cast %435 : vector<1x4x1x18xf32> to vector<4x18xf32>
    %437 = vector.extract_strided_slice %436 {offsets = [0, 0], sizes = [4, 16], strides = [1, 1]} : vector<4x18xf32> to vector<4x16xf32>
    %438 = vector.extract_strided_slice %0 {offsets = [0, 3], sizes = [4, 1], strides = [1, 1]} : vector<4x9xf32> to vector<4x1xf32>
    %439 = vector.broadcast %438 : vector<4x1xf32> to vector<4x16xf32>
    %440 = arith.mulf %437, %439 : vector<4x16xf32>
    %441 = arith.addf %434, %440 : vector<4x16xf32>
    %442 = vector.extract_strided_slice %436 {offsets = [0, 1], sizes = [4, 16], strides = [1, 1]} : vector<4x18xf32> to vector<4x16xf32>
    %443 = vector.extract_strided_slice %0 {offsets = [0, 4], sizes = [4, 1], strides = [1, 1]} : vector<4x9xf32> to vector<4x1xf32>
    %444 = vector.broadcast %443 : vector<4x1xf32> to vector<4x16xf32>
    %445 = arith.mulf %442, %444 : vector<4x16xf32>
    %446 = arith.addf %441, %445 : vector<4x16xf32>
    %447 = vector.extract_strided_slice %436 {offsets = [0, 2], sizes = [4, 16], strides = [1, 1]} : vector<4x18xf32> to vector<4x16xf32>
    %448 = vector.extract_strided_slice %0 {offsets = [0, 5], sizes = [4, 1], strides = [1, 1]} : vector<4x9xf32> to vector<4x1xf32>
    %449 = vector.broadcast %448 : vector<4x1xf32> to vector<4x16xf32>
    %450 = arith.mulf %447, %449 : vector<4x16xf32>
    %451 = arith.addf %446, %450 : vector<4x16xf32>
    %c0_126 = arith.constant 0 : index
    %c0_127 = arith.constant 0 : index
    %c8 = arith.constant 8 : index
    %c0_128 = arith.constant 0 : index
    %452 = vector.load %arg2[%c0_126, %c0_127, %c8, %c0_128] : memref<1x4x18x18xf32, #tpu.memory_space<vmem>>, vector<1x4x1x18xf32>
    %453 = vector.shape_cast %452 : vector<1x4x1x18xf32> to vector<4x18xf32>
    %454 = vector.extract_strided_slice %453 {offsets = [0, 0], sizes = [4, 16], strides = [1, 1]} : vector<4x18xf32> to vector<4x16xf32>
    %455 = vector.extract_strided_slice %0 {offsets = [0, 6], sizes = [4, 1], strides = [1, 1]} : vector<4x9xf32> to vector<4x1xf32>
    %456 = vector.broadcast %455 : vector<4x1xf32> to vector<4x16xf32>
    %457 = arith.mulf %454, %456 : vector<4x16xf32>
    %458 = arith.addf %451, %457 : vector<4x16xf32>
    %459 = vector.extract_strided_slice %453 {offsets = [0, 1], sizes = [4, 16], strides = [1, 1]} : vector<4x18xf32> to vector<4x16xf32>
    %460 = vector.extract_strided_slice %0 {offsets = [0, 7], sizes = [4, 1], strides = [1, 1]} : vector<4x9xf32> to vector<4x1xf32>
    %461 = vector.broadcast %460 : vector<4x1xf32> to vector<4x16xf32>
    %462 = arith.mulf %459, %461 : vector<4x16xf32>
    %463 = arith.addf %458, %462 : vector<4x16xf32>
    %464 = vector.extract_strided_slice %453 {offsets = [0, 2], sizes = [4, 16], strides = [1, 1]} : vector<4x18xf32> to vector<4x16xf32>
    %465 = vector.extract_strided_slice %0 {offsets = [0, 8], sizes = [4, 1], strides = [1, 1]} : vector<4x9xf32> to vector<4x1xf32>
    %466 = vector.broadcast %465 : vector<4x1xf32> to vector<4x16xf32>
    %467 = arith.mulf %464, %466 : vector<4x16xf32>
    %468 = arith.addf %463, %467 : vector<4x16xf32>
    %469 = vector.broadcast %1 : vector<4x1xf32> to vector<4x16xf32>
    %470 = arith.addf %468, %469 : vector<4x16xf32>
    %cst_129 = arith.constant 3.000000e+00 : f32
    %471 = vector.broadcast %cst_129 : f32 to vector<4x16xf32>
    %472 = arith.addf %470, %471 : vector<4x16xf32>
    %cst_130 = arith.constant 0.000000e+00 : f32
    %cst_131 = arith.constant 6.000000e+00 : f32
    %473 = vector.broadcast %cst_130 : f32 to vector<4x16xf32>
    %474 = arith.maximumf %473, %472 : vector<4x16xf32>
    %475 = vector.broadcast %cst_131 : f32 to vector<4x16xf32>
    %476 = arith.minimumf %475, %474 : vector<4x16xf32>
    %cst_132 = arith.constant 0.166666672 : f32
    %477 = vector.broadcast %cst_132 : f32 to vector<4x16xf32>
    %478 = arith.mulf %476, %477 : vector<4x16xf32>
    %479 = arith.mulf %470, %478 : vector<4x16xf32>
    %c0_133 = arith.constant 0 : index
    %c0_134 = arith.constant 0 : index
    %c96 = arith.constant 96 : index
    %480 = vector.load %arg5[%c0_133, %c0_134, %c96] : memref<1x4x256xf32, #tpu.memory_space<vmem>>, vector<1x4x16xf32>
    %481 = vector.shape_cast %480 : vector<1x4x16xf32> to vector<4x16xf32>
    %482 = vector.shape_cast %479 : vector<4x16xf32> to vector<1x4x16xf32>
    tpu.vector_store %arg5[%c0_133, %c0_134, %c96], %482 {strides = array<i32>} : memref<1x4x256xf32, #tpu.memory_space<vmem>>, vector<1x4x16xf32>,
    %cst_135 = arith.constant dense<0.000000e+00> : vector<4xf32>
    %483 = vector.multi_reduction <add>, %479, %cst_135 [1] : vector<4x16xf32> to vector<4xf32>
    %484 = vector.shape_cast %483 : vector<4xf32> to vector<4x1xf32>
    %485 = arith.addf %416, %484 : vector<4x1xf32>
    %cst_136 = arith.constant 0.000000e+00 : f32
    %486 = vector.broadcast %cst_136 : f32 to vector<4x16xf32>
    %c0_137 = arith.constant 0 : index
    %c0_138 = arith.constant 0 : index
    %c7_139 = arith.constant 7 : index
    %c0_140 = arith.constant 0 : index
    %487 = vector.load %arg2[%c0_137, %c0_138, %c7_139, %c0_140] : memref<1x4x18x18xf32, #tpu.memory_space<vmem>>, vector<1x4x1x18xf32>
    %488 = vector.shape_cast %487 : vector<1x4x1x18xf32> to vector<4x18xf32>
    %489 = vector.extract_strided_slice %488 {offsets = [0, 0], sizes = [4, 16], strides = [1, 1]} : vector<4x18xf32> to vector<4x16xf32>
    %490 = vector.extract_strided_slice %0 {offsets = [0, 0], sizes = [4, 1], strides = [1, 1]} : vector<4x9xf32> to vector<4x1xf32>
    %491 = vector.broadcast %490 : vector<4x1xf32> to vector<4x16xf32>
    %492 = arith.mulf %489, %491 : vector<4x16xf32>
    %493 = arith.addf %486, %492 : vector<4x16xf32>
    %494 = vector.extract_strided_slice %488 {offsets = [0, 1], sizes = [4, 16], strides = [1, 1]} : vector<4x18xf32> to vector<4x16xf32>
    %495 = vector.extract_strided_slice %0 {offsets = [0, 1], sizes = [4, 1], strides = [1, 1]} : vector<4x9xf32> to vector<4x1xf32>
    %496 = vector.broadcast %495 : vector<4x1xf32> to vector<4x16xf32>
    %497 = arith.mulf %494, %496 : vector<4x16xf32>
    %498 = arith.addf %493, %497 : vector<4x16xf32>
    %499 = vector.extract_strided_slice %488 {offsets = [0, 2], sizes = [4, 16], strides = [1, 1]} : vector<4x18xf32> to vector<4x16xf32>
    %500 = vector.extract_strided_slice %0 {offsets = [0, 2], sizes = [4, 1], strides = [1, 1]} : vector<4x9xf32> to vector<4x1xf32>
    %501 = vector.broadcast %500 : vector<4x1xf32> to vector<4x16xf32>
    %502 = arith.mulf %499, %501 : vector<4x16xf32>
    %503 = arith.addf %498, %502 : vector<4x16xf32>
    %c0_141 = arith.constant 0 : index
    %c0_142 = arith.constant 0 : index
    %c8_143 = arith.constant 8 : index
    %c0_144 = arith.constant 0 : index
    %504 = vector.load %arg2[%c0_141, %c0_142, %c8_143, %c0_144] : memref<1x4x18x18xf32, #tpu.memory_space<vmem>>, vector<1x4x1x18xf32>
    %505 = vector.shape_cast %504 : vector<1x4x1x18xf32> to vector<4x18xf32>
    %506 = vector.extract_strided_slice %505 {offsets = [0, 0], sizes = [4, 16], strides = [1, 1]} : vector<4x18xf32> to vector<4x16xf32>
    %507 = vector.extract_strided_slice %0 {offsets = [0, 3], sizes = [4, 1], strides = [1, 1]} : vector<4x9xf32> to vector<4x1xf32>
    %508 = vector.broadcast %507 : vector<4x1xf32> to vector<4x16xf32>
    %509 = arith.mulf %506, %508 : vector<4x16xf32>
    %510 = arith.addf %503, %509 : vector<4x16xf32>
    %511 = vector.extract_strided_slice %505 {offsets = [0, 1], sizes = [4, 16], strides = [1, 1]} : vector<4x18xf32> to vector<4x16xf32>
    %512 = vector.extract_strided_slice %0 {offsets = [0, 4], sizes = [4, 1], strides = [1, 1]} : vector<4x9xf32> to vector<4x1xf32>
    %513 = vector.broadcast %512 : vector<4x1xf32> to vector<4x16xf32>
    %514 = arith.mulf %511, %513 : vector<4x16xf32>
    %515 = arith.addf %510, %514 : vector<4x16xf32>
    %516 = vector.extract_strided_slice %505 {offsets = [0, 2], sizes = [4, 16], strides = [1, 1]} : vector<4x18xf32> to vector<4x16xf32>
    %517 = vector.extract_strided_slice %0 {offsets = [0, 5], sizes = [4, 1], strides = [1, 1]} : vector<4x9xf32> to vector<4x1xf32>
    %518 = vector.broadcast %517 : vector<4x1xf32> to vector<4x16xf32>
    %519 = arith.mulf %516, %518 : vector<4x16xf32>
    %520 = arith.addf %515, %519 : vector<4x16xf32>
    %c0_145 = arith.constant 0 : index
    %c0_146 = arith.constant 0 : index
    %c9 = arith.constant 9 : index
    %c0_147 = arith.constant 0 : index
    %521 = vector.load %arg2[%c0_145, %c0_146, %c9, %c0_147] : memref<1x4x18x18xf32, #tpu.memory_space<vmem>>, vector<1x4x1x18xf32>
    %522 = vector.shape_cast %521 : vector<1x4x1x18xf32> to vector<4x18xf32>
    %523 = vector.extract_strided_slice %522 {offsets = [0, 0], sizes = [4, 16], strides = [1, 1]} : vector<4x18xf32> to vector<4x16xf32>
    %524 = vector.extract_strided_slice %0 {offsets = [0, 6], sizes = [4, 1], strides = [1, 1]} : vector<4x9xf32> to vector<4x1xf32>
    %525 = vector.broadcast %524 : vector<4x1xf32> to vector<4x16xf32>
    %526 = arith.mulf %523, %525 : vector<4x16xf32>
    %527 = arith.addf %520, %526 : vector<4x16xf32>
    %528 = vector.extract_strided_slice %522 {offsets = [0, 1], sizes = [4, 16], strides = [1, 1]} : vector<4x18xf32> to vector<4x16xf32>
    %529 = vector.extract_strided_slice %0 {offsets = [0, 7], sizes = [4, 1], strides = [1, 1]} : vector<4x9xf32> to vector<4x1xf32>
    %530 = vector.broadcast %529 : vector<4x1xf32> to vector<4x16xf32>
    %531 = arith.mulf %528, %530 : vector<4x16xf32>
    %532 = arith.addf %527, %531 : vector<4x16xf32>
    %533 = vector.extract_strided_slice %522 {offsets = [0, 2], sizes = [4, 16], strides = [1, 1]} : vector<4x18xf32> to vector<4x16xf32>
    %534 = vector.extract_strided_slice %0 {offsets = [0, 8], sizes = [4, 1], strides = [1, 1]} : vector<4x9xf32> to vector<4x1xf32>
    %535 = vector.broadcast %534 : vector<4x1xf32> to vector<4x16xf32>
    %536 = arith.mulf %533, %535 : vector<4x16xf32>
    %537 = arith.addf %532, %536 : vector<4x16xf32>
    %538 = vector.broadcast %1 : vector<4x1xf32> to vector<4x16xf32>
    %539 = arith.addf %537, %538 : vector<4x16xf32>
    %cst_148 = arith.constant 3.000000e+00 : f32
    %540 = vector.broadcast %cst_148 : f32 to vector<4x16xf32>
    %541 = arith.addf %539, %540 : vector<4x16xf32>
    %cst_149 = arith.constant 0.000000e+00 : f32
    %cst_150 = arith.constant 6.000000e+00 : f32
    %542 = vector.broadcast %cst_149 : f32 to vector<4x16xf32>
    %543 = arith.maximumf %542, %541 : vector<4x16xf32>
    %544 = vector.broadcast %cst_150 : f32 to vector<4x16xf32>
    %545 = arith.minimumf %544, %543 : vector<4x16xf32>
    %cst_151 = arith.constant 0.166666672 : f32
    %546 = vector.broadcast %cst_151 : f32 to vector<4x16xf32>
    %547 = arith.mulf %545, %546 : vector<4x16xf32>
    %548 = arith.mulf %539, %547 : vector<4x16xf32>
    %c0_152 = arith.constant 0 : index
    %c0_153 = arith.constant 0 : index
    %c112 = arith.constant 112 : index
    %549 = vector.load %arg5[%c0_152, %c0_153, %c112] : memref<1x4x256xf32, #tpu.memory_space<vmem>>, vector<1x4x16xf32>
    %550 = vector.shape_cast %549 : vector<1x4x16xf32> to vector<4x16xf32>
    %551 = vector.shape_cast %548 : vector<4x16xf32> to vector<1x4x16xf32>
    tpu.vector_store %arg5[%c0_152, %c0_153, %c112], %551 {strides = array<i32>} : memref<1x4x256xf32, #tpu.memory_space<vmem>>, vector<1x4x16xf32>,
    %cst_154 = arith.constant dense<0.000000e+00> : vector<4xf32>
    %552 = vector.multi_reduction <add>, %548, %cst_154 [1] : vector<4x16xf32> to vector<4xf32>
    %553 = vector.shape_cast %552 : vector<4xf32> to vector<4x1xf32>
    %554 = arith.addf %485, %553 : vector<4x1xf32>
    %cst_155 = arith.constant 0.000000e+00 : f32
    %555 = vector.broadcast %cst_155 : f32 to vector<4x16xf32>
    %c0_156 = arith.constant 0 : index
    %c0_157 = arith.constant 0 : index
    %c8_158 = arith.constant 8 : index
    %c0_159 = arith.constant 0 : index
    %556 = vector.load %arg2[%c0_156, %c0_157, %c8_158, %c0_159] : memref<1x4x18x18xf32, #tpu.memory_space<vmem>>, vector<1x4x1x18xf32>
    %557 = vector.shape_cast %556 : vector<1x4x1x18xf32> to vector<4x18xf32>
    %558 = vector.extract_strided_slice %557 {offsets = [0, 0], sizes = [4, 16], strides = [1, 1]} : vector<4x18xf32> to vector<4x16xf32>
    %559 = vector.extract_strided_slice %0 {offsets = [0, 0], sizes = [4, 1], strides = [1, 1]} : vector<4x9xf32> to vector<4x1xf32>
    %560 = vector.broadcast %559 : vector<4x1xf32> to vector<4x16xf32>
    %561 = arith.mulf %558, %560 : vector<4x16xf32>
    %562 = arith.addf %555, %561 : vector<4x16xf32>
    %563 = vector.extract_strided_slice %557 {offsets = [0, 1], sizes = [4, 16], strides = [1, 1]} : vector<4x18xf32> to vector<4x16xf32>
    %564 = vector.extract_strided_slice %0 {offsets = [0, 1], sizes = [4, 1], strides = [1, 1]} : vector<4x9xf32> to vector<4x1xf32>
    %565 = vector.broadcast %564 : vector<4x1xf32> to vector<4x16xf32>
    %566 = arith.mulf %563, %565 : vector<4x16xf32>
    %567 = arith.addf %562, %566 : vector<4x16xf32>
    %568 = vector.extract_strided_slice %557 {offsets = [0, 2], sizes = [4, 16], strides = [1, 1]} : vector<4x18xf32> to vector<4x16xf32>
    %569 = vector.extract_strided_slice %0 {offsets = [0, 2], sizes = [4, 1], strides = [1, 1]} : vector<4x9xf32> to vector<4x1xf32>
    %570 = vector.broadcast %569 : vector<4x1xf32> to vector<4x16xf32>
    %571 = arith.mulf %568, %570 : vector<4x16xf32>
    %572 = arith.addf %567, %571 : vector<4x16xf32>
    %c0_160 = arith.constant 0 : index
    %c0_161 = arith.constant 0 : index
    %c9_162 = arith.constant 9 : index
    %c0_163 = arith.constant 0 : index
    %573 = vector.load %arg2[%c0_160, %c0_161, %c9_162, %c0_163] : memref<1x4x18x18xf32, #tpu.memory_space<vmem>>, vector<1x4x1x18xf32>
    %574 = vector.shape_cast %573 : vector<1x4x1x18xf32> to vector<4x18xf32>
    %575 = vector.extract_strided_slice %574 {offsets = [0, 0], sizes = [4, 16], strides = [1, 1]} : vector<4x18xf32> to vector<4x16xf32>
    %576 = vector.extract_strided_slice %0 {offsets = [0, 3], sizes = [4, 1], strides = [1, 1]} : vector<4x9xf32> to vector<4x1xf32>
    %577 = vector.broadcast %576 : vector<4x1xf32> to vector<4x16xf32>
    %578 = arith.mulf %575, %577 : vector<4x16xf32>
    %579 = arith.addf %572, %578 : vector<4x16xf32>
    %580 = vector.extract_strided_slice %574 {offsets = [0, 1], sizes = [4, 16], strides = [1, 1]} : vector<4x18xf32> to vector<4x16xf32>
    %581 = vector.extract_strided_slice %0 {offsets = [0, 4], sizes = [4, 1], strides = [1, 1]} : vector<4x9xf32> to vector<4x1xf32>
    %582 = vector.broadcast %581 : vector<4x1xf32> to vector<4x16xf32>
    %583 = arith.mulf %580, %582 : vector<4x16xf32>
    %584 = arith.addf %579, %583 : vector<4x16xf32>
    %585 = vector.extract_strided_slice %574 {offsets = [0, 2], sizes = [4, 16], strides = [1, 1]} : vector<4x18xf32> to vector<4x16xf32>
    %586 = vector.extract_strided_slice %0 {offsets = [0, 5], sizes = [4, 1], strides = [1, 1]} : vector<4x9xf32> to vector<4x1xf32>
    %587 = vector.broadcast %586 : vector<4x1xf32> to vector<4x16xf32>
    %588 = arith.mulf %585, %587 : vector<4x16xf32>
    %589 = arith.addf %584, %588 : vector<4x16xf32>
    %c0_164 = arith.constant 0 : index
    %c0_165 = arith.constant 0 : index
    %c10 = arith.constant 10 : index
    %c0_166 = arith.constant 0 : index
    %590 = vector.load %arg2[%c0_164, %c0_165, %c10, %c0_166] : memref<1x4x18x18xf32, #tpu.memory_space<vmem>>, vector<1x4x1x18xf32>
    %591 = vector.shape_cast %590 : vector<1x4x1x18xf32> to vector<4x18xf32>
    %592 = vector.extract_strided_slice %591 {offsets = [0, 0], sizes = [4, 16], strides = [1, 1]} : vector<4x18xf32> to vector<4x16xf32>
    %593 = vector.extract_strided_slice %0 {offsets = [0, 6], sizes = [4, 1], strides = [1, 1]} : vector<4x9xf32> to vector<4x1xf32>
    %594 = vector.broadcast %593 : vector<4x1xf32> to vector<4x16xf32>
    %595 = arith.mulf %592, %594 : vector<4x16xf32>
    %596 = arith.addf %589, %595 : vector<4x16xf32>
    %597 = vector.extract_strided_slice %591 {offsets = [0, 1], sizes = [4, 16], strides = [1, 1]} : vector<4x18xf32> to vector<4x16xf32>
    %598 = vector.extract_strided_slice %0 {offsets = [0, 7], sizes = [4, 1], strides = [1, 1]} : vector<4x9xf32> to vector<4x1xf32>
    %599 = vector.broadcast %598 : vector<4x1xf32> to vector<4x16xf32>
    %600 = arith.mulf %597, %599 : vector<4x16xf32>
    %601 = arith.addf %596, %600 : vector<4x16xf32>
    %602 = vector.extract_strided_slice %591 {offsets = [0, 2], sizes = [4, 16], strides = [1, 1]} : vector<4x18xf32> to vector<4x16xf32>
    %603 = vector.extract_strided_slice %0 {offsets = [0, 8], sizes = [4, 1], strides = [1, 1]} : vector<4x9xf32> to vector<4x1xf32>
    %604 = vector.broadcast %603 : vector<4x1xf32> to vector<4x16xf32>
    %605 = arith.mulf %602, %604 : vector<4x16xf32>
    %606 = arith.addf %601, %605 : vector<4x16xf32>
    %607 = vector.broadcast %1 : vector<4x1xf32> to vector<4x16xf32>
    %608 = arith.addf %606, %607 : vector<4x16xf32>
    %cst_167 = arith.constant 3.000000e+00 : f32
    %609 = vector.broadcast %cst_167 : f32 to vector<4x16xf32>
    %610 = arith.addf %608, %609 : vector<4x16xf32>
    %cst_168 = arith.constant 0.000000e+00 : f32
    %cst_169 = arith.constant 6.000000e+00 : f32
    %611 = vector.broadcast %cst_168 : f32 to vector<4x16xf32>
    %612 = arith.maximumf %611, %610 : vector<4x16xf32>
    %613 = vector.broadcast %cst_169 : f32 to vector<4x16xf32>
    %614 = arith.minimumf %613, %612 : vector<4x16xf32>
    %cst_170 = arith.constant 0.166666672 : f32
    %615 = vector.broadcast %cst_170 : f32 to vector<4x16xf32>
    %616 = arith.mulf %614, %615 : vector<4x16xf32>
    %617 = arith.mulf %608, %616 : vector<4x16xf32>
    %c0_171 = arith.constant 0 : index
    %c0_172 = arith.constant 0 : index
    %c128 = arith.constant 128 : index
    %618 = vector.load %arg5[%c0_171, %c0_172, %c128] : memref<1x4x256xf32, #tpu.memory_space<vmem>>, vector<1x4x16xf32>
    %619 = vector.shape_cast %618 : vector<1x4x16xf32> to vector<4x16xf32>
    %620 = vector.shape_cast %617 : vector<4x16xf32> to vector<1x4x16xf32>
    tpu.vector_store %arg5[%c0_171, %c0_172, %c128], %620 {strides = array<i32>} : memref<1x4x256xf32, #tpu.memory_space<vmem>>, vector<1x4x16xf32>,
    %cst_173 = arith.constant dense<0.000000e+00> : vector<4xf32>
    %621 = vector.multi_reduction <add>, %617, %cst_173 [1] : vector<4x16xf32> to vector<4xf32>
    %622 = vector.shape_cast %621 : vector<4xf32> to vector<4x1xf32>
    %623 = arith.addf %554, %622 : vector<4x1xf32>
    %cst_174 = arith.constant 0.000000e+00 : f32
    %624 = vector.broadcast %cst_174 : f32 to vector<4x16xf32>
    %c0_175 = arith.constant 0 : index
    %c0_176 = arith.constant 0 : index
    %c9_177 = arith.constant 9 : index
    %c0_178 = arith.constant 0 : index
    %625 = vector.load %arg2[%c0_175, %c0_176, %c9_177, %c0_178] : memref<1x4x18x18xf32, #tpu.memory_space<vmem>>, vector<1x4x1x18xf32>
    %626 = vector.shape_cast %625 : vector<1x4x1x18xf32> to vector<4x18xf32>
    %627 = vector.extract_strided_slice %626 {offsets = [0, 0], sizes = [4, 16], strides = [1, 1]} : vector<4x18xf32> to vector<4x16xf32>
    %628 = vector.extract_strided_slice %0 {offsets = [0, 0], sizes = [4, 1], strides = [1, 1]} : vector<4x9xf32> to vector<4x1xf32>
    %629 = vector.broadcast %628 : vector<4x1xf32> to vector<4x16xf32>
    %630 = arith.mulf %627, %629 : vector<4x16xf32>
    %631 = arith.addf %624, %630 : vector<4x16xf32>
    %632 = vector.extract_strided_slice %626 {offsets = [0, 1], sizes = [4, 16], strides = [1, 1]} : vector<4x18xf32> to vector<4x16xf32>
    %633 = vector.extract_strided_slice %0 {offsets = [0, 1], sizes = [4, 1], strides = [1, 1]} : vector<4x9xf32> to vector<4x1xf32>
    %634 = vector.broadcast %633 : vector<4x1xf32> to vector<4x16xf32>
    %635 = arith.mulf %632, %634 : vector<4x16xf32>
    %636 = arith.addf %631, %635 : vector<4x16xf32>
    %637 = vector.extract_strided_slice %626 {offsets = [0, 2], sizes = [4, 16], strides = [1, 1]} : vector<4x18xf32> to vector<4x16xf32>
    %638 = vector.extract_strided_slice %0 {offsets = [0, 2], sizes = [4, 1], strides = [1, 1]} : vector<4x9xf32> to vector<4x1xf32>
    %639 = vector.broadcast %638 : vector<4x1xf32> to vector<4x16xf32>
    %640 = arith.mulf %637, %639 : vector<4x16xf32>
    %641 = arith.addf %636, %640 : vector<4x16xf32>
    %c0_179 = arith.constant 0 : index
    %c0_180 = arith.constant 0 : index
    %c10_181 = arith.constant 10 : index
    %c0_182 = arith.constant 0 : index
    %642 = vector.load %arg2[%c0_179, %c0_180, %c10_181, %c0_182] : memref<1x4x18x18xf32, #tpu.memory_space<vmem>>, vector<1x4x1x18xf32>
    %643 = vector.shape_cast %642 : vector<1x4x1x18xf32> to vector<4x18xf32>
    %644 = vector.extract_strided_slice %643 {offsets = [0, 0], sizes = [4, 16], strides = [1, 1]} : vector<4x18xf32> to vector<4x16xf32>
    %645 = vector.extract_strided_slice %0 {offsets = [0, 3], sizes = [4, 1], strides = [1, 1]} : vector<4x9xf32> to vector<4x1xf32>
    %646 = vector.broadcast %645 : vector<4x1xf32> to vector<4x16xf32>
    %647 = arith.mulf %644, %646 : vector<4x16xf32>
    %648 = arith.addf %641, %647 : vector<4x16xf32>
    %649 = vector.extract_strided_slice %643 {offsets = [0, 1], sizes = [4, 16], strides = [1, 1]} : vector<4x18xf32> to vector<4x16xf32>
    %650 = vector.extract_strided_slice %0 {offsets = [0, 4], sizes = [4, 1], strides = [1, 1]} : vector<4x9xf32> to vector<4x1xf32>
    %651 = vector.broadcast %650 : vector<4x1xf32> to vector<4x16xf32>
    %652 = arith.mulf %649, %651 : vector<4x16xf32>
    %653 = arith.addf %648, %652 : vector<4x16xf32>
    %654 = vector.extract_strided_slice %643 {offsets = [0, 2], sizes = [4, 16], strides = [1, 1]} : vector<4x18xf32> to vector<4x16xf32>
    %655 = vector.extract_strided_slice %0 {offsets = [0, 5], sizes = [4, 1], strides = [1, 1]} : vector<4x9xf32> to vector<4x1xf32>
    %656 = vector.broadcast %655 : vector<4x1xf32> to vector<4x16xf32>
    %657 = arith.mulf %654, %656 : vector<4x16xf32>
    %658 = arith.addf %653, %657 : vector<4x16xf32>
    %c0_183 = arith.constant 0 : index
    %c0_184 = arith.constant 0 : index
    %c11 = arith.constant 11 : index
    %c0_185 = arith.constant 0 : index
    %659 = vector.load %arg2[%c0_183, %c0_184, %c11, %c0_185] : memref<1x4x18x18xf32, #tpu.memory_space<vmem>>, vector<1x4x1x18xf32>
    %660 = vector.shape_cast %659 : vector<1x4x1x18xf32> to vector<4x18xf32>
    %661 = vector.extract_strided_slice %660 {offsets = [0, 0], sizes = [4, 16], strides = [1, 1]} : vector<4x18xf32> to vector<4x16xf32>
    %662 = vector.extract_strided_slice %0 {offsets = [0, 6], sizes = [4, 1], strides = [1, 1]} : vector<4x9xf32> to vector<4x1xf32>
    %663 = vector.broadcast %662 : vector<4x1xf32> to vector<4x16xf32>
    %664 = arith.mulf %661, %663 : vector<4x16xf32>
    %665 = arith.addf %658, %664 : vector<4x16xf32>
    %666 = vector.extract_strided_slice %660 {offsets = [0, 1], sizes = [4, 16], strides = [1, 1]} : vector<4x18xf32> to vector<4x16xf32>
    %667 = vector.extract_strided_slice %0 {offsets = [0, 7], sizes = [4, 1], strides = [1, 1]} : vector<4x9xf32> to vector<4x1xf32>
    %668 = vector.broadcast %667 : vector<4x1xf32> to vector<4x16xf32>
    %669 = arith.mulf %666, %668 : vector<4x16xf32>
    %670 = arith.addf %665, %669 : vector<4x16xf32>
    %671 = vector.extract_strided_slice %660 {offsets = [0, 2], sizes = [4, 16], strides = [1, 1]} : vector<4x18xf32> to vector<4x16xf32>
    %672 = vector.extract_strided_slice %0 {offsets = [0, 8], sizes = [4, 1], strides = [1, 1]} : vector<4x9xf32> to vector<4x1xf32>
    %673 = vector.broadcast %672 : vector<4x1xf32> to vector<4x16xf32>
    %674 = arith.mulf %671, %673 : vector<4x16xf32>
    %675 = arith.addf %670, %674 : vector<4x16xf32>
    %676 = vector.broadcast %1 : vector<4x1xf32> to vector<4x16xf32>
    %677 = arith.addf %675, %676 : vector<4x16xf32>
    %cst_186 = arith.constant 3.000000e+00 : f32
    %678 = vector.broadcast %cst_186 : f32 to vector<4x16xf32>
    %679 = arith.addf %677, %678 : vector<4x16xf32>
    %cst_187 = arith.constant 0.000000e+00 : f32
    %cst_188 = arith.constant 6.000000e+00 : f32
    %680 = vector.broadcast %cst_187 : f32 to vector<4x16xf32>
    %681 = arith.maximumf %680, %679 : vector<4x16xf32>
    %682 = vector.broadcast %cst_188 : f32 to vector<4x16xf32>
    %683 = arith.minimumf %682, %681 : vector<4x16xf32>
    %cst_189 = arith.constant 0.166666672 : f32
    %684 = vector.broadcast %cst_189 : f32 to vector<4x16xf32>
    %685 = arith.mulf %683, %684 : vector<4x16xf32>
    %686 = arith.mulf %677, %685 : vector<4x16xf32>
    %c0_190 = arith.constant 0 : index
    %c0_191 = arith.constant 0 : index
    %c144 = arith.constant 144 : index
    %687 = vector.load %arg5[%c0_190, %c0_191, %c144] : memref<1x4x256xf32, #tpu.memory_space<vmem>>, vector<1x4x16xf32>
    %688 = vector.shape_cast %687 : vector<1x4x16xf32> to vector<4x16xf32>
    %689 = vector.shape_cast %686 : vector<4x16xf32> to vector<1x4x16xf32>
    tpu.vector_store %arg5[%c0_190, %c0_191, %c144], %689 {strides = array<i32>} : memref<1x4x256xf32, #tpu.memory_space<vmem>>, vector<1x4x16xf32>,
    %cst_192 = arith.constant dense<0.000000e+00> : vector<4xf32>
    %690 = vector.multi_reduction <add>, %686, %cst_192 [1] : vector<4x16xf32> to vector<4xf32>
    %691 = vector.shape_cast %690 : vector<4xf32> to vector<4x1xf32>
    %692 = arith.addf %623, %691 : vector<4x1xf32>
    %cst_193 = arith.constant 0.000000e+00 : f32
    %693 = vector.broadcast %cst_193 : f32 to vector<4x16xf32>
    %c0_194 = arith.constant 0 : index
    %c0_195 = arith.constant 0 : index
    %c10_196 = arith.constant 10 : index
    %c0_197 = arith.constant 0 : index
    %694 = vector.load %arg2[%c0_194, %c0_195, %c10_196, %c0_197] : memref<1x4x18x18xf32, #tpu.memory_space<vmem>>, vector<1x4x1x18xf32>
    %695 = vector.shape_cast %694 : vector<1x4x1x18xf32> to vector<4x18xf32>
    %696 = vector.extract_strided_slice %695 {offsets = [0, 0], sizes = [4, 16], strides = [1, 1]} : vector<4x18xf32> to vector<4x16xf32>
    %697 = vector.extract_strided_slice %0 {offsets = [0, 0], sizes = [4, 1], strides = [1, 1]} : vector<4x9xf32> to vector<4x1xf32>
    %698 = vector.broadcast %697 : vector<4x1xf32> to vector<4x16xf32>
    %699 = arith.mulf %696, %698 : vector<4x16xf32>
    %700 = arith.addf %693, %699 : vector<4x16xf32>
    %701 = vector.extract_strided_slice %695 {offsets = [0, 1], sizes = [4, 16], strides = [1, 1]} : vector<4x18xf32> to vector<4x16xf32>
    %702 = vector.extract_strided_slice %0 {offsets = [0, 1], sizes = [4, 1], strides = [1, 1]} : vector<4x9xf32> to vector<4x1xf32>
    %703 = vector.broadcast %702 : vector<4x1xf32> to vector<4x16xf32>
    %704 = arith.mulf %701, %703 : vector<4x16xf32>
    %705 = arith.addf %700, %704 : vector<4x16xf32>
    %706 = vector.extract_strided_slice %695 {offsets = [0, 2], sizes = [4, 16], strides = [1, 1]} : vector<4x18xf32> to vector<4x16xf32>
    %707 = vector.extract_strided_slice %0 {offsets = [0, 2], sizes = [4, 1], strides = [1, 1]} : vector<4x9xf32> to vector<4x1xf32>
    %708 = vector.broadcast %707 : vector<4x1xf32> to vector<4x16xf32>
    %709 = arith.mulf %706, %708 : vector<4x16xf32>
    %710 = arith.addf %705, %709 : vector<4x16xf32>
    %c0_198 = arith.constant 0 : index
    %c0_199 = arith.constant 0 : index
    %c11_200 = arith.constant 11 : index
    %c0_201 = arith.constant 0 : index
    %711 = vector.load %arg2[%c0_198, %c0_199, %c11_200, %c0_201] : memref<1x4x18x18xf32, #tpu.memory_space<vmem>>, vector<1x4x1x18xf32>
    %712 = vector.shape_cast %711 : vector<1x4x1x18xf32> to vector<4x18xf32>
    %713 = vector.extract_strided_slice %712 {offsets = [0, 0], sizes = [4, 16], strides = [1, 1]} : vector<4x18xf32> to vector<4x16xf32>
    %714 = vector.extract_strided_slice %0 {offsets = [0, 3], sizes = [4, 1], strides = [1, 1]} : vector<4x9xf32> to vector<4x1xf32>
    %715 = vector.broadcast %714 : vector<4x1xf32> to vector<4x16xf32>
    %716 = arith.mulf %713, %715 : vector<4x16xf32>
    %717 = arith.addf %710, %716 : vector<4x16xf32>
    %718 = vector.extract_strided_slice %712 {offsets = [0, 1], sizes = [4, 16], strides = [1, 1]} : vector<4x18xf32> to vector<4x16xf32>
    %719 = vector.extract_strided_slice %0 {offsets = [0, 4], sizes = [4, 1], strides = [1, 1]} : vector<4x9xf32> to vector<4x1xf32>
    %720 = vector.broadcast %719 : vector<4x1xf32> to vector<4x16xf32>
    %721 = arith.mulf %718, %720 : vector<4x16xf32>
    %722 = arith.addf %717, %721 : vector<4x16xf32>
    %723 = vector.extract_strided_slice %712 {offsets = [0, 2], sizes = [4, 16], strides = [1, 1]} : vector<4x18xf32> to vector<4x16xf32>
    %724 = vector.extract_strided_slice %0 {offsets = [0, 5], sizes = [4, 1], strides = [1, 1]} : vector<4x9xf32> to vector<4x1xf32>
    %725 = vector.broadcast %724 : vector<4x1xf32> to vector<4x16xf32>
    %726 = arith.mulf %723, %725 : vector<4x16xf32>
    %727 = arith.addf %722, %726 : vector<4x16xf32>
    %c0_202 = arith.constant 0 : index
    %c0_203 = arith.constant 0 : index
    %c12 = arith.constant 12 : index
    %c0_204 = arith.constant 0 : index
    %728 = vector.load %arg2[%c0_202, %c0_203, %c12, %c0_204] : memref<1x4x18x18xf32, #tpu.memory_space<vmem>>, vector<1x4x1x18xf32>
    %729 = vector.shape_cast %728 : vector<1x4x1x18xf32> to vector<4x18xf32>
    %730 = vector.extract_strided_slice %729 {offsets = [0, 0], sizes = [4, 16], strides = [1, 1]} : vector<4x18xf32> to vector<4x16xf32>
    %731 = vector.extract_strided_slice %0 {offsets = [0, 6], sizes = [4, 1], strides = [1, 1]} : vector<4x9xf32> to vector<4x1xf32>
    %732 = vector.broadcast %731 : vector<4x1xf32> to vector<4x16xf32>
    %733 = arith.mulf %730, %732 : vector<4x16xf32>
    %734 = arith.addf %727, %733 : vector<4x16xf32>
    %735 = vector.extract_strided_slice %729 {offsets = [0, 1], sizes = [4, 16], strides = [1, 1]} : vector<4x18xf32> to vector<4x16xf32>
    %736 = vector.extract_strided_slice %0 {offsets = [0, 7], sizes = [4, 1], strides = [1, 1]} : vector<4x9xf32> to vector<4x1xf32>
    %737 = vector.broadcast %736 : vector<4x1xf32> to vector<4x16xf32>
    %738 = arith.mulf %735, %737 : vector<4x16xf32>
    %739 = arith.addf %734, %738 : vector<4x16xf32>
    %740 = vector.extract_strided_slice %729 {offsets = [0, 2], sizes = [4, 16], strides = [1, 1]} : vector<4x18xf32> to vector<4x16xf32>
    %741 = vector.extract_strided_slice %0 {offsets = [0, 8], sizes = [4, 1], strides = [1, 1]} : vector<4x9xf32> to vector<4x1xf32>
    %742 = vector.broadcast %741 : vector<4x1xf32> to vector<4x16xf32>
    %743 = arith.mulf %740, %742 : vector<4x16xf32>
    %744 = arith.addf %739, %743 : vector<4x16xf32>
    %745 = vector.broadcast %1 : vector<4x1xf32> to vector<4x16xf32>
    %746 = arith.addf %744, %745 : vector<4x16xf32>
    %cst_205 = arith.constant 3.000000e+00 : f32
    %747 = vector.broadcast %cst_205 : f32 to vector<4x16xf32>
    %748 = arith.addf %746, %747 : vector<4x16xf32>
    %cst_206 = arith.constant 0.000000e+00 : f32
    %cst_207 = arith.constant 6.000000e+00 : f32
    %749 = vector.broadcast %cst_206 : f32 to vector<4x16xf32>
    %750 = arith.maximumf %749, %748 : vector<4x16xf32>
    %751 = vector.broadcast %cst_207 : f32 to vector<4x16xf32>
    %752 = arith.minimumf %751, %750 : vector<4x16xf32>
    %cst_208 = arith.constant 0.166666672 : f32
    %753 = vector.broadcast %cst_208 : f32 to vector<4x16xf32>
    %754 = arith.mulf %752, %753 : vector<4x16xf32>
    %755 = arith.mulf %746, %754 : vector<4x16xf32>
    %c0_209 = arith.constant 0 : index
    %c0_210 = arith.constant 0 : index
    %c160 = arith.constant 160 : index
    %756 = vector.load %arg5[%c0_209, %c0_210, %c160] : memref<1x4x256xf32, #tpu.memory_space<vmem>>, vector<1x4x16xf32>
    %757 = vector.shape_cast %756 : vector<1x4x16xf32> to vector<4x16xf32>
    %758 = vector.shape_cast %755 : vector<4x16xf32> to vector<1x4x16xf32>
    tpu.vector_store %arg5[%c0_209, %c0_210, %c160], %758 {strides = array<i32>} : memref<1x4x256xf32, #tpu.memory_space<vmem>>, vector<1x4x16xf32>,
    %cst_211 = arith.constant dense<0.000000e+00> : vector<4xf32>
    %759 = vector.multi_reduction <add>, %755, %cst_211 [1] : vector<4x16xf32> to vector<4xf32>
    %760 = vector.shape_cast %759 : vector<4xf32> to vector<4x1xf32>
    %761 = arith.addf %692, %760 : vector<4x1xf32>
    %cst_212 = arith.constant 0.000000e+00 : f32
    %762 = vector.broadcast %cst_212 : f32 to vector<4x16xf32>
    %c0_213 = arith.constant 0 : index
    %c0_214 = arith.constant 0 : index
    %c11_215 = arith.constant 11 : index
    %c0_216 = arith.constant 0 : index
    %763 = vector.load %arg2[%c0_213, %c0_214, %c11_215, %c0_216] : memref<1x4x18x18xf32, #tpu.memory_space<vmem>>, vector<1x4x1x18xf32>
    %764 = vector.shape_cast %763 : vector<1x4x1x18xf32> to vector<4x18xf32>
    %765 = vector.extract_strided_slice %764 {offsets = [0, 0], sizes = [4, 16], strides = [1, 1]} : vector<4x18xf32> to vector<4x16xf32>
    %766 = vector.extract_strided_slice %0 {offsets = [0, 0], sizes = [4, 1], strides = [1, 1]} : vector<4x9xf32> to vector<4x1xf32>
    %767 = vector.broadcast %766 : vector<4x1xf32> to vector<4x16xf32>
    %768 = arith.mulf %765, %767 : vector<4x16xf32>
    %769 = arith.addf %762, %768 : vector<4x16xf32>
    %770 = vector.extract_strided_slice %764 {offsets = [0, 1], sizes = [4, 16], strides = [1, 1]} : vector<4x18xf32> to vector<4x16xf32>
    %771 = vector.extract_strided_slice %0 {offsets = [0, 1], sizes = [4, 1], strides = [1, 1]} : vector<4x9xf32> to vector<4x1xf32>
    %772 = vector.broadcast %771 : vector<4x1xf32> to vector<4x16xf32>
    %773 = arith.mulf %770, %772 : vector<4x16xf32>
    %774 = arith.addf %769, %773 : vector<4x16xf32>
    %775 = vector.extract_strided_slice %764 {offsets = [0, 2], sizes = [4, 16], strides = [1, 1]} : vector<4x18xf32> to vector<4x16xf32>
    %776 = vector.extract_strided_slice %0 {offsets = [0, 2], sizes = [4, 1], strides = [1, 1]} : vector<4x9xf32> to vector<4x1xf32>
    %777 = vector.broadcast %776 : vector<4x1xf32> to vector<4x16xf32>
    %778 = arith.mulf %775, %777 : vector<4x16xf32>
    %779 = arith.addf %774, %778 : vector<4x16xf32>
    %c0_217 = arith.constant 0 : index
    %c0_218 = arith.constant 0 : index
    %c12_219 = arith.constant 12 : index
    %c0_220 = arith.constant 0 : index
    %780 = vector.load %arg2[%c0_217, %c0_218, %c12_219, %c0_220] : memref<1x4x18x18xf32, #tpu.memory_space<vmem>>, vector<1x4x1x18xf32>
    %781 = vector.shape_cast %780 : vector<1x4x1x18xf32> to vector<4x18xf32>
    %782 = vector.extract_strided_slice %781 {offsets = [0, 0], sizes = [4, 16], strides = [1, 1]} : vector<4x18xf32> to vector<4x16xf32>
    %783 = vector.extract_strided_slice %0 {offsets = [0, 3], sizes = [4, 1], strides = [1, 1]} : vector<4x9xf32> to vector<4x1xf32>
    %784 = vector.broadcast %783 : vector<4x1xf32> to vector<4x16xf32>
    %785 = arith.mulf %782, %784 : vector<4x16xf32>
    %786 = arith.addf %779, %785 : vector<4x16xf32>
    %787 = vector.extract_strided_slice %781 {offsets = [0, 1], sizes = [4, 16], strides = [1, 1]} : vector<4x18xf32> to vector<4x16xf32>
    %788 = vector.extract_strided_slice %0 {offsets = [0, 4], sizes = [4, 1], strides = [1, 1]} : vector<4x9xf32> to vector<4x1xf32>
    %789 = vector.broadcast %788 : vector<4x1xf32> to vector<4x16xf32>
    %790 = arith.mulf %787, %789 : vector<4x16xf32>
    %791 = arith.addf %786, %790 : vector<4x16xf32>
    %792 = vector.extract_strided_slice %781 {offsets = [0, 2], sizes = [4, 16], strides = [1, 1]} : vector<4x18xf32> to vector<4x16xf32>
    %793 = vector.extract_strided_slice %0 {offsets = [0, 5], sizes = [4, 1], strides = [1, 1]} : vector<4x9xf32> to vector<4x1xf32>
    %794 = vector.broadcast %793 : vector<4x1xf32> to vector<4x16xf32>
    %795 = arith.mulf %792, %794 : vector<4x16xf32>
    %796 = arith.addf %791, %795 : vector<4x16xf32>
    %c0_221 = arith.constant 0 : index
    %c0_222 = arith.constant 0 : index
    %c13 = arith.constant 13 : index
    %c0_223 = arith.constant 0 : index
    %797 = vector.load %arg2[%c0_221, %c0_222, %c13, %c0_223] : memref<1x4x18x18xf32, #tpu.memory_space<vmem>>, vector<1x4x1x18xf32>
    %798 = vector.shape_cast %797 : vector<1x4x1x18xf32> to vector<4x18xf32>
    %799 = vector.extract_strided_slice %798 {offsets = [0, 0], sizes = [4, 16], strides = [1, 1]} : vector<4x18xf32> to vector<4x16xf32>
    %800 = vector.extract_strided_slice %0 {offsets = [0, 6], sizes = [4, 1], strides = [1, 1]} : vector<4x9xf32> to vector<4x1xf32>
    %801 = vector.broadcast %800 : vector<4x1xf32> to vector<4x16xf32>
    %802 = arith.mulf %799, %801 : vector<4x16xf32>
    %803 = arith.addf %796, %802 : vector<4x16xf32>
    %804 = vector.extract_strided_slice %798 {offsets = [0, 1], sizes = [4, 16], strides = [1, 1]} : vector<4x18xf32> to vector<4x16xf32>
    %805 = vector.extract_strided_slice %0 {offsets = [0, 7], sizes = [4, 1], strides = [1, 1]} : vector<4x9xf32> to vector<4x1xf32>
    %806 = vector.broadcast %805 : vector<4x1xf32> to vector<4x16xf32>
    %807 = arith.mulf %804, %806 : vector<4x16xf32>
    %808 = arith.addf %803, %807 : vector<4x16xf32>
    %809 = vector.extract_strided_slice %798 {offsets = [0, 2], sizes = [4, 16], strides = [1, 1]} : vector<4x18xf32> to vector<4x16xf32>
    %810 = vector.extract_strided_slice %0 {offsets = [0, 8], sizes = [4, 1], strides = [1, 1]} : vector<4x9xf32> to vector<4x1xf32>
    %811 = vector.broadcast %810 : vector<4x1xf32> to vector<4x16xf32>
    %812 = arith.mulf %809, %811 : vector<4x16xf32>
    %813 = arith.addf %808, %812 : vector<4x16xf32>
    %814 = vector.broadcast %1 : vector<4x1xf32> to vector<4x16xf32>
    %815 = arith.addf %813, %814 : vector<4x16xf32>
    %cst_224 = arith.constant 3.000000e+00 : f32
    %816 = vector.broadcast %cst_224 : f32 to vector<4x16xf32>
    %817 = arith.addf %815, %816 : vector<4x16xf32>
    %cst_225 = arith.constant 0.000000e+00 : f32
    %cst_226 = arith.constant 6.000000e+00 : f32
    %818 = vector.broadcast %cst_225 : f32 to vector<4x16xf32>
    %819 = arith.maximumf %818, %817 : vector<4x16xf32>
    %820 = vector.broadcast %cst_226 : f32 to vector<4x16xf32>
    %821 = arith.minimumf %820, %819 : vector<4x16xf32>
    %cst_227 = arith.constant 0.166666672 : f32
    %822 = vector.broadcast %cst_227 : f32 to vector<4x16xf32>
    %823 = arith.mulf %821, %822 : vector<4x16xf32>
    %824 = arith.mulf %815, %823 : vector<4x16xf32>
    %c0_228 = arith.constant 0 : index
    %c0_229 = arith.constant 0 : index
    %c176 = arith.constant 176 : index
    %825 = vector.load %arg5[%c0_228, %c0_229, %c176] : memref<1x4x256xf32, #tpu.memory_space<vmem>>, vector<1x4x16xf32>
    %826 = vector.shape_cast %825 : vector<1x4x16xf32> to vector<4x16xf32>
    %827 = vector.shape_cast %824 : vector<4x16xf32> to vector<1x4x16xf32>
    tpu.vector_store %arg5[%c0_228, %c0_229, %c176], %827 {strides = array<i32>} : memref<1x4x256xf32, #tpu.memory_space<vmem>>, vector<1x4x16xf32>,
    %cst_230 = arith.constant dense<0.000000e+00> : vector<4xf32>
    %828 = vector.multi_reduction <add>, %824, %cst_230 [1] : vector<4x16xf32> to vector<4xf32>
    %829 = vector.shape_cast %828 : vector<4xf32> to vector<4x1xf32>
    %830 = arith.addf %761, %829 : vector<4x1xf32>
    %cst_231 = arith.constant 0.000000e+00 : f32
    %831 = vector.broadcast %cst_231 : f32 to vector<4x16xf32>
    %c0_232 = arith.constant 0 : index
    %c0_233 = arith.constant 0 : index
    %c12_234 = arith.constant 12 : index
    %c0_235 = arith.constant 0 : index
    %832 = vector.load %arg2[%c0_232, %c0_233, %c12_234, %c0_235] : memref<1x4x18x18xf32, #tpu.memory_space<vmem>>, vector<1x4x1x18xf32>
    %833 = vector.shape_cast %832 : vector<1x4x1x18xf32> to vector<4x18xf32>
    %834 = vector.extract_strided_slice %833 {offsets = [0, 0], sizes = [4, 16], strides = [1, 1]} : vector<4x18xf32> to vector<4x16xf32>
    %835 = vector.extract_strided_slice %0 {offsets = [0, 0], sizes = [4, 1], strides = [1, 1]} : vector<4x9xf32> to vector<4x1xf32>
    %836 = vector.broadcast %835 : vector<4x1xf32> to vector<4x16xf32>
    %837 = arith.mulf %834, %836 : vector<4x16xf32>
    %838 = arith.addf %831, %837 : vector<4x16xf32>
    %839 = vector.extract_strided_slice %833 {offsets = [0, 1], sizes = [4, 16], strides = [1, 1]} : vector<4x18xf32> to vector<4x16xf32>
    %840 = vector.extract_strided_slice %0 {offsets = [0, 1], sizes = [4, 1], strides = [1, 1]} : vector<4x9xf32> to vector<4x1xf32>
    %841 = vector.broadcast %840 : vector<4x1xf32> to vector<4x16xf32>
    %842 = arith.mulf %839, %841 : vector<4x16xf32>
    %843 = arith.addf %838, %842 : vector<4x16xf32>
    %844 = vector.extract_strided_slice %833 {offsets = [0, 2], sizes = [4, 16], strides = [1, 1]} : vector<4x18xf32> to vector<4x16xf32>
    %845 = vector.extract_strided_slice %0 {offsets = [0, 2], sizes = [4, 1], strides = [1, 1]} : vector<4x9xf32> to vector<4x1xf32>
    %846 = vector.broadcast %845 : vector<4x1xf32> to vector<4x16xf32>
    %847 = arith.mulf %844, %846 : vector<4x16xf32>
    %848 = arith.addf %843, %847 : vector<4x16xf32>
    %c0_236 = arith.constant 0 : index
    %c0_237 = arith.constant 0 : index
    %c13_238 = arith.constant 13 : index
    %c0_239 = arith.constant 0 : index
    %849 = vector.load %arg2[%c0_236, %c0_237, %c13_238, %c0_239] : memref<1x4x18x18xf32, #tpu.memory_space<vmem>>, vector<1x4x1x18xf32>
    %850 = vector.shape_cast %849 : vector<1x4x1x18xf32> to vector<4x18xf32>
    %851 = vector.extract_strided_slice %850 {offsets = [0, 0], sizes = [4, 16], strides = [1, 1]} : vector<4x18xf32> to vector<4x16xf32>
    %852 = vector.extract_strided_slice %0 {offsets = [0, 3], sizes = [4, 1], strides = [1, 1]} : vector<4x9xf32> to vector<4x1xf32>
    %853 = vector.broadcast %852 : vector<4x1xf32> to vector<4x16xf32>
    %854 = arith.mulf %851, %853 : vector<4x16xf32>
    %855 = arith.addf %848, %854 : vector<4x16xf32>
    %856 = vector.extract_strided_slice %850 {offsets = [0, 1], sizes = [4, 16], strides = [1, 1]} : vector<4x18xf32> to vector<4x16xf32>
    %857 = vector.extract_strided_slice %0 {offsets = [0, 4], sizes = [4, 1], strides = [1, 1]} : vector<4x9xf32> to vector<4x1xf32>
    %858 = vector.broadcast %857 : vector<4x1xf32> to vector<4x16xf32>
    %859 = arith.mulf %856, %858 : vector<4x16xf32>
    %860 = arith.addf %855, %859 : vector<4x16xf32>
    %861 = vector.extract_strided_slice %850 {offsets = [0, 2], sizes = [4, 16], strides = [1, 1]} : vector<4x18xf32> to vector<4x16xf32>
    %862 = vector.extract_strided_slice %0 {offsets = [0, 5], sizes = [4, 1], strides = [1, 1]} : vector<4x9xf32> to vector<4x1xf32>
    %863 = vector.broadcast %862 : vector<4x1xf32> to vector<4x16xf32>
    %864 = arith.mulf %861, %863 : vector<4x16xf32>
    %865 = arith.addf %860, %864 : vector<4x16xf32>
    %c0_240 = arith.constant 0 : index
    %c0_241 = arith.constant 0 : index
    %c14 = arith.constant 14 : index
    %c0_242 = arith.constant 0 : index
    %866 = vector.load %arg2[%c0_240, %c0_241, %c14, %c0_242] : memref<1x4x18x18xf32, #tpu.memory_space<vmem>>, vector<1x4x1x18xf32>
    %867 = vector.shape_cast %866 : vector<1x4x1x18xf32> to vector<4x18xf32>
    %868 = vector.extract_strided_slice %867 {offsets = [0, 0], sizes = [4, 16], strides = [1, 1]} : vector<4x18xf32> to vector<4x16xf32>
    %869 = vector.extract_strided_slice %0 {offsets = [0, 6], sizes = [4, 1], strides = [1, 1]} : vector<4x9xf32> to vector<4x1xf32>
    %870 = vector.broadcast %869 : vector<4x1xf32> to vector<4x16xf32>
    %871 = arith.mulf %868, %870 : vector<4x16xf32>
    %872 = arith.addf %865, %871 : vector<4x16xf32>
    %873 = vector.extract_strided_slice %867 {offsets = [0, 1], sizes = [4, 16], strides = [1, 1]} : vector<4x18xf32> to vector<4x16xf32>
    %874 = vector.extract_strided_slice %0 {offsets = [0, 7], sizes = [4, 1], strides = [1, 1]} : vector<4x9xf32> to vector<4x1xf32>
    %875 = vector.broadcast %874 : vector<4x1xf32> to vector<4x16xf32>
    %876 = arith.mulf %873, %875 : vector<4x16xf32>
    %877 = arith.addf %872, %876 : vector<4x16xf32>
    %878 = vector.extract_strided_slice %867 {offsets = [0, 2], sizes = [4, 16], strides = [1, 1]} : vector<4x18xf32> to vector<4x16xf32>
    %879 = vector.extract_strided_slice %0 {offsets = [0, 8], sizes = [4, 1], strides = [1, 1]} : vector<4x9xf32> to vector<4x1xf32>
    %880 = vector.broadcast %879 : vector<4x1xf32> to vector<4x16xf32>
    %881 = arith.mulf %878, %880 : vector<4x16xf32>
    %882 = arith.addf %877, %881 : vector<4x16xf32>
    %883 = vector.broadcast %1 : vector<4x1xf32> to vector<4x16xf32>
    %884 = arith.addf %882, %883 : vector<4x16xf32>
    %cst_243 = arith.constant 3.000000e+00 : f32
    %885 = vector.broadcast %cst_243 : f32 to vector<4x16xf32>
    %886 = arith.addf %884, %885 : vector<4x16xf32>
    %cst_244 = arith.constant 0.000000e+00 : f32
    %cst_245 = arith.constant 6.000000e+00 : f32
    %887 = vector.broadcast %cst_244 : f32 to vector<4x16xf32>
    %888 = arith.maximumf %887, %886 : vector<4x16xf32>
    %889 = vector.broadcast %cst_245 : f32 to vector<4x16xf32>
    %890 = arith.minimumf %889, %888 : vector<4x16xf32>
    %cst_246 = arith.constant 0.166666672 : f32
    %891 = vector.broadcast %cst_246 : f32 to vector<4x16xf32>
    %892 = arith.mulf %890, %891 : vector<4x16xf32>
    %893 = arith.mulf %884, %892 : vector<4x16xf32>
    %c0_247 = arith.constant 0 : index
    %c0_248 = arith.constant 0 : index
    %c192 = arith.constant 192 : index
    %894 = vector.load %arg5[%c0_247, %c0_248, %c192] : memref<1x4x256xf32, #tpu.memory_space<vmem>>, vector<1x4x16xf32>
    %895 = vector.shape_cast %894 : vector<1x4x16xf32> to vector<4x16xf32>
    %896 = vector.shape_cast %893 : vector<4x16xf32> to vector<1x4x16xf32>
    tpu.vector_store %arg5[%c0_247, %c0_248, %c192], %896 {strides = array<i32>} : memref<1x4x256xf32, #tpu.memory_space<vmem>>, vector<1x4x16xf32>,
    %cst_249 = arith.constant dense<0.000000e+00> : vector<4xf32>
    %897 = vector.multi_reduction <add>, %893, %cst_249 [1] : vector<4x16xf32> to vector<4xf32>
    %898 = vector.shape_cast %897 : vector<4xf32> to vector<4x1xf32>
    %899 = arith.addf %830, %898 : vector<4x1xf32>
    %cst_250 = arith.constant 0.000000e+00 : f32
    %900 = vector.broadcast %cst_250 : f32 to vector<4x16xf32>
    %c0_251 = arith.constant 0 : index
    %c0_252 = arith.constant 0 : index
    %c13_253 = arith.constant 13 : index
    %c0_254 = arith.constant 0 : index
    %901 = vector.load %arg2[%c0_251, %c0_252, %c13_253, %c0_254] : memref<1x4x18x18xf32, #tpu.memory_space<vmem>>, vector<1x4x1x18xf32>
    %902 = vector.shape_cast %901 : vector<1x4x1x18xf32> to vector<4x18xf32>
    %903 = vector.extract_strided_slice %902 {offsets = [0, 0], sizes = [4, 16], strides = [1, 1]} : vector<4x18xf32> to vector<4x16xf32>
    %904 = vector.extract_strided_slice %0 {offsets = [0, 0], sizes = [4, 1], strides = [1, 1]} : vector<4x9xf32> to vector<4x1xf32>
    %905 = vector.broadcast %904 : vector<4x1xf32> to vector<4x16xf32>
    %906 = arith.mulf %903, %905 : vector<4x16xf32>
    %907 = arith.addf %900, %906 : vector<4x16xf32>
    %908 = vector.extract_strided_slice %902 {offsets = [0, 1], sizes = [4, 16], strides = [1, 1]} : vector<4x18xf32> to vector<4x16xf32>
    %909 = vector.extract_strided_slice %0 {offsets = [0, 1], sizes = [4, 1], strides = [1, 1]} : vector<4x9xf32> to vector<4x1xf32>
    %910 = vector.broadcast %909 : vector<4x1xf32> to vector<4x16xf32>
    %911 = arith.mulf %908, %910 : vector<4x16xf32>
    %912 = arith.addf %907, %911 : vector<4x16xf32>
    %913 = vector.extract_strided_slice %902 {offsets = [0, 2], sizes = [4, 16], strides = [1, 1]} : vector<4x18xf32> to vector<4x16xf32>
    %914 = vector.extract_strided_slice %0 {offsets = [0, 2], sizes = [4, 1], strides = [1, 1]} : vector<4x9xf32> to vector<4x1xf32>
    %915 = vector.broadcast %914 : vector<4x1xf32> to vector<4x16xf32>
    %916 = arith.mulf %913, %915 : vector<4x16xf32>
    %917 = arith.addf %912, %916 : vector<4x16xf32>
    %c0_255 = arith.constant 0 : index
    %c0_256 = arith.constant 0 : index
    %c14_257 = arith.constant 14 : index
    %c0_258 = arith.constant 0 : index
    %918 = vector.load %arg2[%c0_255, %c0_256, %c14_257, %c0_258] : memref<1x4x18x18xf32, #tpu.memory_space<vmem>>, vector<1x4x1x18xf32>
    %919 = vector.shape_cast %918 : vector<1x4x1x18xf32> to vector<4x18xf32>
    %920 = vector.extract_strided_slice %919 {offsets = [0, 0], sizes = [4, 16], strides = [1, 1]} : vector<4x18xf32> to vector<4x16xf32>
    %921 = vector.extract_strided_slice %0 {offsets = [0, 3], sizes = [4, 1], strides = [1, 1]} : vector<4x9xf32> to vector<4x1xf32>
    %922 = vector.broadcast %921 : vector<4x1xf32> to vector<4x16xf32>
    %923 = arith.mulf %920, %922 : vector<4x16xf32>
    %924 = arith.addf %917, %923 : vector<4x16xf32>
    %925 = vector.extract_strided_slice %919 {offsets = [0, 1], sizes = [4, 16], strides = [1, 1]} : vector<4x18xf32> to vector<4x16xf32>
    %926 = vector.extract_strided_slice %0 {offsets = [0, 4], sizes = [4, 1], strides = [1, 1]} : vector<4x9xf32> to vector<4x1xf32>
    %927 = vector.broadcast %926 : vector<4x1xf32> to vector<4x16xf32>
    %928 = arith.mulf %925, %927 : vector<4x16xf32>
    %929 = arith.addf %924, %928 : vector<4x16xf32>
    %930 = vector.extract_strided_slice %919 {offsets = [0, 2], sizes = [4, 16], strides = [1, 1]} : vector<4x18xf32> to vector<4x16xf32>
    %931 = vector.extract_strided_slice %0 {offsets = [0, 5], sizes = [4, 1], strides = [1, 1]} : vector<4x9xf32> to vector<4x1xf32>
    %932 = vector.broadcast %931 : vector<4x1xf32> to vector<4x16xf32>
    %933 = arith.mulf %930, %932 : vector<4x16xf32>
    %934 = arith.addf %929, %933 : vector<4x16xf32>
    %c0_259 = arith.constant 0 : index
    %c0_260 = arith.constant 0 : index
    %c15 = arith.constant 15 : index
    %c0_261 = arith.constant 0 : index
    %935 = vector.load %arg2[%c0_259, %c0_260, %c15, %c0_261] : memref<1x4x18x18xf32, #tpu.memory_space<vmem>>, vector<1x4x1x18xf32>
    %936 = vector.shape_cast %935 : vector<1x4x1x18xf32> to vector<4x18xf32>
    %937 = vector.extract_strided_slice %936 {offsets = [0, 0], sizes = [4, 16], strides = [1, 1]} : vector<4x18xf32> to vector<4x16xf32>
    %938 = vector.extract_strided_slice %0 {offsets = [0, 6], sizes = [4, 1], strides = [1, 1]} : vector<4x9xf32> to vector<4x1xf32>
    %939 = vector.broadcast %938 : vector<4x1xf32> to vector<4x16xf32>
    %940 = arith.mulf %937, %939 : vector<4x16xf32>
    %941 = arith.addf %934, %940 : vector<4x16xf32>
    %942 = vector.extract_strided_slice %936 {offsets = [0, 1], sizes = [4, 16], strides = [1, 1]} : vector<4x18xf32> to vector<4x16xf32>
    %943 = vector.extract_strided_slice %0 {offsets = [0, 7], sizes = [4, 1], strides = [1, 1]} : vector<4x9xf32> to vector<4x1xf32>
    %944 = vector.broadcast %943 : vector<4x1xf32> to vector<4x16xf32>
    %945 = arith.mulf %942, %944 : vector<4x16xf32>
    %946 = arith.addf %941, %945 : vector<4x16xf32>
    %947 = vector.extract_strided_slice %936 {offsets = [0, 2], sizes = [4, 16], strides = [1, 1]} : vector<4x18xf32> to vector<4x16xf32>
    %948 = vector.extract_strided_slice %0 {offsets = [0, 8], sizes = [4, 1], strides = [1, 1]} : vector<4x9xf32> to vector<4x1xf32>
    %949 = vector.broadcast %948 : vector<4x1xf32> to vector<4x16xf32>
    %950 = arith.mulf %947, %949 : vector<4x16xf32>
    %951 = arith.addf %946, %950 : vector<4x16xf32>
    %952 = vector.broadcast %1 : vector<4x1xf32> to vector<4x16xf32>
    %953 = arith.addf %951, %952 : vector<4x16xf32>
    %cst_262 = arith.constant 3.000000e+00 : f32
    %954 = vector.broadcast %cst_262 : f32 to vector<4x16xf32>
    %955 = arith.addf %953, %954 : vector<4x16xf32>
    %cst_263 = arith.constant 0.000000e+00 : f32
    %cst_264 = arith.constant 6.000000e+00 : f32
    %956 = vector.broadcast %cst_263 : f32 to vector<4x16xf32>
    %957 = arith.maximumf %956, %955 : vector<4x16xf32>
    %958 = vector.broadcast %cst_264 : f32 to vector<4x16xf32>
    %959 = arith.minimumf %958, %957 : vector<4x16xf32>
    %cst_265 = arith.constant 0.166666672 : f32
    %960 = vector.broadcast %cst_265 : f32 to vector<4x16xf32>
    %961 = arith.mulf %959, %960 : vector<4x16xf32>
    %962 = arith.mulf %953, %961 : vector<4x16xf32>
    %c0_266 = arith.constant 0 : index
    %c0_267 = arith.constant 0 : index
    %c208 = arith.constant 208 : index
    %963 = vector.load %arg5[%c0_266, %c0_267, %c208] : memref<1x4x256xf32, #tpu.memory_space<vmem>>, vector<1x4x16xf32>
    %964 = vector.shape_cast %963 : vector<1x4x16xf32> to vector<4x16xf32>
    %965 = vector.shape_cast %962 : vector<4x16xf32> to vector<1x4x16xf32>
    tpu.vector_store %arg5[%c0_266, %c0_267, %c208], %965 {strides = array<i32>} : memref<1x4x256xf32, #tpu.memory_space<vmem>>, vector<1x4x16xf32>,
    %cst_268 = arith.constant dense<0.000000e+00> : vector<4xf32>
    %966 = vector.multi_reduction <add>, %962, %cst_268 [1] : vector<4x16xf32> to vector<4xf32>
    %967 = vector.shape_cast %966 : vector<4xf32> to vector<4x1xf32>
    %968 = arith.addf %899, %967 : vector<4x1xf32>
    %cst_269 = arith.constant 0.000000e+00 : f32
    %969 = vector.broadcast %cst_269 : f32 to vector<4x16xf32>
    %c0_270 = arith.constant 0 : index
    %c0_271 = arith.constant 0 : index
    %c14_272 = arith.constant 14 : index
    %c0_273 = arith.constant 0 : index
    %970 = vector.load %arg2[%c0_270, %c0_271, %c14_272, %c0_273] : memref<1x4x18x18xf32, #tpu.memory_space<vmem>>, vector<1x4x1x18xf32>
    %971 = vector.shape_cast %970 : vector<1x4x1x18xf32> to vector<4x18xf32>
    %972 = vector.extract_strided_slice %971 {offsets = [0, 0], sizes = [4, 16], strides = [1, 1]} : vector<4x18xf32> to vector<4x16xf32>
    %973 = vector.extract_strided_slice %0 {offsets = [0, 0], sizes = [4, 1], strides = [1, 1]} : vector<4x9xf32> to vector<4x1xf32>
    %974 = vector.broadcast %973 : vector<4x1xf32> to vector<4x16xf32>
    %975 = arith.mulf %972, %974 : vector<4x16xf32>
    %976 = arith.addf %969, %975 : vector<4x16xf32>
    %977 = vector.extract_strided_slice %971 {offsets = [0, 1], sizes = [4, 16], strides = [1, 1]} : vector<4x18xf32> to vector<4x16xf32>
    %978 = vector.extract_strided_slice %0 {offsets = [0, 1], sizes = [4, 1], strides = [1, 1]} : vector<4x9xf32> to vector<4x1xf32>
    %979 = vector.broadcast %978 : vector<4x1xf32> to vector<4x16xf32>
    %980 = arith.mulf %977, %979 : vector<4x16xf32>
    %981 = arith.addf %976, %980 : vector<4x16xf32>
    %982 = vector.extract_strided_slice %971 {offsets = [0, 2], sizes = [4, 16], strides = [1, 1]} : vector<4x18xf32> to vector<4x16xf32>
    %983 = vector.extract_strided_slice %0 {offsets = [0, 2], sizes = [4, 1], strides = [1, 1]} : vector<4x9xf32> to vector<4x1xf32>
    %984 = vector.broadcast %983 : vector<4x1xf32> to vector<4x16xf32>
    %985 = arith.mulf %982, %984 : vector<4x16xf32>
    %986 = arith.addf %981, %985 : vector<4x16xf32>
    %c0_274 = arith.constant 0 : index
    %c0_275 = arith.constant 0 : index
    %c15_276 = arith.constant 15 : index
    %c0_277 = arith.constant 0 : index
    %987 = vector.load %arg2[%c0_274, %c0_275, %c15_276, %c0_277] : memref<1x4x18x18xf32, #tpu.memory_space<vmem>>, vector<1x4x1x18xf32>
    %988 = vector.shape_cast %987 : vector<1x4x1x18xf32> to vector<4x18xf32>
    %989 = vector.extract_strided_slice %988 {offsets = [0, 0], sizes = [4, 16], strides = [1, 1]} : vector<4x18xf32> to vector<4x16xf32>
    %990 = vector.extract_strided_slice %0 {offsets = [0, 3], sizes = [4, 1], strides = [1, 1]} : vector<4x9xf32> to vector<4x1xf32>
    %991 = vector.broadcast %990 : vector<4x1xf32> to vector<4x16xf32>
    %992 = arith.mulf %989, %991 : vector<4x16xf32>
    %993 = arith.addf %986, %992 : vector<4x16xf32>
    %994 = vector.extract_strided_slice %988 {offsets = [0, 1], sizes = [4, 16], strides = [1, 1]} : vector<4x18xf32> to vector<4x16xf32>
    %995 = vector.extract_strided_slice %0 {offsets = [0, 4], sizes = [4, 1], strides = [1, 1]} : vector<4x9xf32> to vector<4x1xf32>
    %996 = vector.broadcast %995 : vector<4x1xf32> to vector<4x16xf32>
    %997 = arith.mulf %994, %996 : vector<4x16xf32>
    %998 = arith.addf %993, %997 : vector<4x16xf32>
    %999 = vector.extract_strided_slice %988 {offsets = [0, 2], sizes = [4, 16], strides = [1, 1]} : vector<4x18xf32> to vector<4x16xf32>
    %1000 = vector.extract_strided_slice %0 {offsets = [0, 5], sizes = [4, 1], strides = [1, 1]} : vector<4x9xf32> to vector<4x1xf32>
    %1001 = vector.broadcast %1000 : vector<4x1xf32> to vector<4x16xf32>
    %1002 = arith.mulf %999, %1001 : vector<4x16xf32>
    %1003 = arith.addf %998, %1002 : vector<4x16xf32>
    %c0_278 = arith.constant 0 : index
    %c0_279 = arith.constant 0 : index
    %c16_280 = arith.constant 16 : index
    %c0_281 = arith.constant 0 : index
    %1004 = vector.load %arg2[%c0_278, %c0_279, %c16_280, %c0_281] : memref<1x4x18x18xf32, #tpu.memory_space<vmem>>, vector<1x4x1x18xf32>
    %1005 = vector.shape_cast %1004 : vector<1x4x1x18xf32> to vector<4x18xf32>
    %1006 = vector.extract_strided_slice %1005 {offsets = [0, 0], sizes = [4, 16], strides = [1, 1]} : vector<4x18xf32> to vector<4x16xf32>
    %1007 = vector.extract_strided_slice %0 {offsets = [0, 6], sizes = [4, 1], strides = [1, 1]} : vector<4x9xf32> to vector<4x1xf32>
    %1008 = vector.broadcast %1007 : vector<4x1xf32> to vector<4x16xf32>
    %1009 = arith.mulf %1006, %1008 : vector<4x16xf32>
    %1010 = arith.addf %1003, %1009 : vector<4x16xf32>
    %1011 = vector.extract_strided_slice %1005 {offsets = [0, 1], sizes = [4, 16], strides = [1, 1]} : vector<4x18xf32> to vector<4x16xf32>
    %1012 = vector.extract_strided_slice %0 {offsets = [0, 7], sizes = [4, 1], strides = [1, 1]} : vector<4x9xf32> to vector<4x1xf32>
    %1013 = vector.broadcast %1012 : vector<4x1xf32> to vector<4x16xf32>
    %1014 = arith.mulf %1011, %1013 : vector<4x16xf32>
    %1015 = arith.addf %1010, %1014 : vector<4x16xf32>
    %1016 = vector.extract_strided_slice %1005 {offsets = [0, 2], sizes = [4, 16], strides = [1, 1]} : vector<4x18xf32> to vector<4x16xf32>
    %1017 = vector.extract_strided_slice %0 {offsets = [0, 8], sizes = [4, 1], strides = [1, 1]} : vector<4x9xf32> to vector<4x1xf32>
    %1018 = vector.broadcast %1017 : vector<4x1xf32> to vector<4x16xf32>
    %1019 = arith.mulf %1016, %1018 : vector<4x16xf32>
    %1020 = arith.addf %1015, %1019 : vector<4x16xf32>
    %1021 = vector.broadcast %1 : vector<4x1xf32> to vector<4x16xf32>
    %1022 = arith.addf %1020, %1021 : vector<4x16xf32>
    %cst_282 = arith.constant 3.000000e+00 : f32
    %1023 = vector.broadcast %cst_282 : f32 to vector<4x16xf32>
    %1024 = arith.addf %1022, %1023 : vector<4x16xf32>
    %cst_283 = arith.constant 0.000000e+00 : f32
    %cst_284 = arith.constant 6.000000e+00 : f32
    %1025 = vector.broadcast %cst_283 : f32 to vector<4x16xf32>
    %1026 = arith.maximumf %1025, %1024 : vector<4x16xf32>
    %1027 = vector.broadcast %cst_284 : f32 to vector<4x16xf32>
    %1028 = arith.minimumf %1027, %1026 : vector<4x16xf32>
    %cst_285 = arith.constant 0.166666672 : f32
    %1029 = vector.broadcast %cst_285 : f32 to vector<4x16xf32>
    %1030 = arith.mulf %1028, %1029 : vector<4x16xf32>
    %1031 = arith.mulf %1022, %1030 : vector<4x16xf32>
    %c0_286 = arith.constant 0 : index
    %c0_287 = arith.constant 0 : index
    %c224 = arith.constant 224 : index
    %1032 = vector.load %arg5[%c0_286, %c0_287, %c224] : memref<1x4x256xf32, #tpu.memory_space<vmem>>, vector<1x4x16xf32>
    %1033 = vector.shape_cast %1032 : vector<1x4x16xf32> to vector<4x16xf32>
    %1034 = vector.shape_cast %1031 : vector<4x16xf32> to vector<1x4x16xf32>
    tpu.vector_store %arg5[%c0_286, %c0_287, %c224], %1034 {strides = array<i32>} : memref<1x4x256xf32, #tpu.memory_space<vmem>>, vector<1x4x16xf32>,
    %cst_288 = arith.constant dense<0.000000e+00> : vector<4xf32>
    %1035 = vector.multi_reduction <add>, %1031, %cst_288 [1] : vector<4x16xf32> to vector<4xf32>
    %1036 = vector.shape_cast %1035 : vector<4xf32> to vector<4x1xf32>
    %1037 = arith.addf %968, %1036 : vector<4x1xf32>
    %cst_289 = arith.constant 0.000000e+00 : f32
    %1038 = vector.broadcast %cst_289 : f32 to vector<4x16xf32>
    %c0_290 = arith.constant 0 : index
    %c0_291 = arith.constant 0 : index
    %c15_292 = arith.constant 15 : index
    %c0_293 = arith.constant 0 : index
    %1039 = vector.load %arg2[%c0_290, %c0_291, %c15_292, %c0_293] : memref<1x4x18x18xf32, #tpu.memory_space<vmem>>, vector<1x4x1x18xf32>
    %1040 = vector.shape_cast %1039 : vector<1x4x1x18xf32> to vector<4x18xf32>
    %1041 = vector.extract_strided_slice %1040 {offsets = [0, 0], sizes = [4, 16], strides = [1, 1]} : vector<4x18xf32> to vector<4x16xf32>
    %1042 = vector.extract_strided_slice %0 {offsets = [0, 0], sizes = [4, 1], strides = [1, 1]} : vector<4x9xf32> to vector<4x1xf32>
    %1043 = vector.broadcast %1042 : vector<4x1xf32> to vector<4x16xf32>
    %1044 = arith.mulf %1041, %1043 : vector<4x16xf32>
    %1045 = arith.addf %1038, %1044 : vector<4x16xf32>
    %1046 = vector.extract_strided_slice %1040 {offsets = [0, 1], sizes = [4, 16], strides = [1, 1]} : vector<4x18xf32> to vector<4x16xf32>
    %1047 = vector.extract_strided_slice %0 {offsets = [0, 1], sizes = [4, 1], strides = [1, 1]} : vector<4x9xf32> to vector<4x1xf32>
    %1048 = vector.broadcast %1047 : vector<4x1xf32> to vector<4x16xf32>
    %1049 = arith.mulf %1046, %1048 : vector<4x16xf32>
    %1050 = arith.addf %1045, %1049 : vector<4x16xf32>
    %1051 = vector.extract_strided_slice %1040 {offsets = [0, 2], sizes = [4, 16], strides = [1, 1]} : vector<4x18xf32> to vector<4x16xf32>
    %1052 = vector.extract_strided_slice %0 {offsets = [0, 2], sizes = [4, 1], strides = [1, 1]} : vector<4x9xf32> to vector<4x1xf32>
    %1053 = vector.broadcast %1052 : vector<4x1xf32> to vector<4x16xf32>
    %1054 = arith.mulf %1051, %1053 : vector<4x16xf32>
    %1055 = arith.addf %1050, %1054 : vector<4x16xf32>
    %c0_294 = arith.constant 0 : index
    %c0_295 = arith.constant 0 : index
    %c16_296 = arith.constant 16 : index
    %c0_297 = arith.constant 0 : index
    %1056 = vector.load %arg2[%c0_294, %c0_295, %c16_296, %c0_297] : memref<1x4x18x18xf32, #tpu.memory_space<vmem>>, vector<1x4x1x18xf32>
    %1057 = vector.shape_cast %1056 : vector<1x4x1x18xf32> to vector<4x18xf32>
    %1058 = vector.extract_strided_slice %1057 {offsets = [0, 0], sizes = [4, 16], strides = [1, 1]} : vector<4x18xf32> to vector<4x16xf32>
    %1059 = vector.extract_strided_slice %0 {offsets = [0, 3], sizes = [4, 1], strides = [1, 1]} : vector<4x9xf32> to vector<4x1xf32>
    %1060 = vector.broadcast %1059 : vector<4x1xf32> to vector<4x16xf32>
    %1061 = arith.mulf %1058, %1060 : vector<4x16xf32>
    %1062 = arith.addf %1055, %1061 : vector<4x16xf32>
    %1063 = vector.extract_strided_slice %1057 {offsets = [0, 1], sizes = [4, 16], strides = [1, 1]} : vector<4x18xf32> to vector<4x16xf32>
    %1064 = vector.extract_strided_slice %0 {offsets = [0, 4], sizes = [4, 1], strides = [1, 1]} : vector<4x9xf32> to vector<4x1xf32>
    %1065 = vector.broadcast %1064 : vector<4x1xf32> to vector<4x16xf32>
    %1066 = arith.mulf %1063, %1065 : vector<4x16xf32>
    %1067 = arith.addf %1062, %1066 : vector<4x16xf32>
    %1068 = vector.extract_strided_slice %1057 {offsets = [0, 2], sizes = [4, 16], strides = [1, 1]} : vector<4x18xf32> to vector<4x16xf32>
    %1069 = vector.extract_strided_slice %0 {offsets = [0, 5], sizes = [4, 1], strides = [1, 1]} : vector<4x9xf32> to vector<4x1xf32>
    %1070 = vector.broadcast %1069 : vector<4x1xf32> to vector<4x16xf32>
    %1071 = arith.mulf %1068, %1070 : vector<4x16xf32>
    %1072 = arith.addf %1067, %1071 : vector<4x16xf32>
    %c0_298 = arith.constant 0 : index
    %c0_299 = arith.constant 0 : index
    %c17 = arith.constant 17 : index
    %c0_300 = arith.constant 0 : index
    %1073 = vector.load %arg2[%c0_298, %c0_299, %c17, %c0_300] : memref<1x4x18x18xf32, #tpu.memory_space<vmem>>, vector<1x4x1x18xf32>
    %1074 = vector.shape_cast %1073 : vector<1x4x1x18xf32> to vector<4x18xf32>
    %1075 = vector.extract_strided_slice %1074 {offsets = [0, 0], sizes = [4, 16], strides = [1, 1]} : vector<4x18xf32> to vector<4x16xf32>
    %1076 = vector.extract_strided_slice %0 {offsets = [0, 6], sizes = [4, 1], strides = [1, 1]} : vector<4x9xf32> to vector<4x1xf32>
    %1077 = vector.broadcast %1076 : vector<4x1xf32> to vector<4x16xf32>
    %1078 = arith.mulf %1075, %1077 : vector<4x16xf32>
    %1079 = arith.addf %1072, %1078 : vector<4x16xf32>
    %1080 = vector.extract_strided_slice %1074 {offsets = [0, 1], sizes = [4, 16], strides = [1, 1]} : vector<4x18xf32> to vector<4x16xf32>
    %1081 = vector.extract_strided_slice %0 {offsets = [0, 7], sizes = [4, 1], strides = [1, 1]} : vector<4x9xf32> to vector<4x1xf32>
    %1082 = vector.broadcast %1081 : vector<4x1xf32> to vector<4x16xf32>
    %1083 = arith.mulf %1080, %1082 : vector<4x16xf32>
    %1084 = arith.addf %1079, %1083 : vector<4x16xf32>
    %1085 = vector.extract_strided_slice %1074 {offsets = [0, 2], sizes = [4, 16], strides = [1, 1]} : vector<4x18xf32> to vector<4x16xf32>
    %1086 = vector.extract_strided_slice %0 {offsets = [0, 8], sizes = [4, 1], strides = [1, 1]} : vector<4x9xf32> to vector<4x1xf32>
    %1087 = vector.broadcast %1086 : vector<4x1xf32> to vector<4x16xf32>
    %1088 = arith.mulf %1085, %1087 : vector<4x16xf32>
    %1089 = arith.addf %1084, %1088 : vector<4x16xf32>
    %1090 = vector.broadcast %1 : vector<4x1xf32> to vector<4x16xf32>
    %1091 = arith.addf %1089, %1090 : vector<4x16xf32>
    %cst_301 = arith.constant 3.000000e+00 : f32
    %1092 = vector.broadcast %cst_301 : f32 to vector<4x16xf32>
    %1093 = arith.addf %1091, %1092 : vector<4x16xf32>
    %cst_302 = arith.constant 0.000000e+00 : f32
    %cst_303 = arith.constant 6.000000e+00 : f32
    %1094 = vector.broadcast %cst_302 : f32 to vector<4x16xf32>
    %1095 = arith.maximumf %1094, %1093 : vector<4x16xf32>
    %1096 = vector.broadcast %cst_303 : f32 to vector<4x16xf32>
    %1097 = arith.minimumf %1096, %1095 : vector<4x16xf32>
    %cst_304 = arith.constant 0.166666672 : f32
    %1098 = vector.broadcast %cst_304 : f32 to vector<4x16xf32>
    %1099 = arith.mulf %1097, %1098 : vector<4x16xf32>
    %1100 = arith.mulf %1091, %1099 : vector<4x16xf32>
    %c0_305 = arith.constant 0 : index
    %c0_306 = arith.constant 0 : index
    %c240 = arith.constant 240 : index
    %1101 = vector.load %arg5[%c0_305, %c0_306, %c240] : memref<1x4x256xf32, #tpu.memory_space<vmem>>, vector<1x4x16xf32>
    %1102 = vector.shape_cast %1101 : vector<1x4x16xf32> to vector<4x16xf32>
    %1103 = vector.shape_cast %1100 : vector<4x16xf32> to vector<1x4x16xf32>
    tpu.vector_store %arg5[%c0_305, %c0_306, %c240], %1103 {strides = array<i32>} : memref<1x4x256xf32, #tpu.memory_space<vmem>>, vector<1x4x16xf32>,
    %cst_307 = arith.constant dense<0.000000e+00> : vector<4xf32>
    %1104 = vector.multi_reduction <add>, %1100, %cst_307 [1] : vector<4x16xf32> to vector<4xf32>
    %1105 = vector.shape_cast %1104 : vector<4xf32> to vector<4x1xf32>
    %1106 = arith.addf %1037, %1105 : vector<4x1xf32>
    %c0_308 = arith.constant 0 : index
    %c0_309 = arith.constant 0 : index
    %c0_310 = arith.constant 0 : index
    %1107 = vector.load %arg6[%c0_308, %c0_309, %c0_310] : memref<1x4x1xf32, #tpu.memory_space<vmem>>, vector<1x4x1xf32>
    %1108 = vector.shape_cast %1107 : vector<1x4x1xf32> to vector<4x1xf32>
    %1109 = vector.shape_cast %1106 : vector<4x1xf32> to vector<1x4x1xf32>
    tpu.vector_store %arg6[%c0_308, %c0_309, %c0_310], %1109 {strides = array<i32>} : memref<1x4x1xf32, #tpu.memory_space<vmem>>, vector<1x4x1xf32>,
    return
  }
  func.func @transform_0(%arg0: i32, %arg1: i32) -> (i32, i32, i32, i32) {
    %c0_i32 = arith.constant 0 : i32
    %c0_i32_0 = arith.constant 0 : i32
    %c0_i32_1 = arith.constant 0 : i32
    return %arg0, %arg1, %c0_i32, %c0_i32_0 : i32, i32, i32, i32
  }
  func.func @transform_1(%arg0: i32, %arg1: i32) -> (i32, i32) {
    %c0_i32 = arith.constant 0 : i32
    %c0_i32_0 = arith.constant 0 : i32
    return %arg1, %c0_i32 : i32, i32
  }
  func.func @transform_2(%arg0: i32, %arg1: i32) -> (i32, i32) {
    %c0_i32 = arith.constant 0 : i32
    %c0_i32_0 = arith.constant 0 : i32
    return %arg1, %c0_i32 : i32, i32
  }
  func.func @transform_3(%arg0: i32, %arg1: i32) -> (i32, i32, i32) {
    %c0_i32 = arith.constant 0 : i32
    %c0_i32_0 = arith.constant 0 : i32
    return %arg0, %arg1, %c0_i32 : i32, i32, i32
  }
  func.func @transform_4(%arg0: i32, %arg1: i32) -> (i32, i32, i32) {
    %c0_i32 = arith.constant 0 : i32
    %c0_i32_0 = arith.constant 0 : i32
    return %arg0, %arg1, %c0_i32 : i32, i32, i32
  }
}

module attributes {stable_mosaic.version = 11 : i64} {
  func.func @_pw_conv_kernel(%arg0: i32, %arg1: i32, %arg2: memref<1x4x256xf32, #tpu.memory_space<vmem>>, %arg3: memref<1x4x1xf32, #tpu.memory_space<vmem>>, %arg4: memref<8x4xf32, #tpu.memory_space<vmem>>, %arg5: memref<8x1xf32, #tpu.memory_space<vmem>>, %arg6: memref<1x8x256xf32, #tpu.memory_space<vmem>>) attributes {dimension_semantics = [#tpu.dimension_semantics<parallel>, #tpu.dimension_semantics<parallel>], iteration_bounds = array<i64: 2, 1>, scalar_prefetch = 0 : i64, scratch_operands = 0 : i64, tpu.core_type = #tpu.core_type<tc>, window_params = [{transform_indices = @transform_0, window_bounds = array<i64: 1, 4, 256>}, {transform_indices = @transform_1, window_bounds = array<i64: 1, 4, 1>}, {pipeline_mode = #tpu.pipeline_mode<synchronous>, transform_indices = @transform_2, window_bounds = array<i64: 8, 4>}, {pipeline_mode = #tpu.pipeline_mode<synchronous>, transform_indices = @transform_3, window_bounds = array<i64: 8, 1>}, {transform_indices = @transform_4, window_bounds = array<i64: 1, 8, 256>}]} {
    %c0 = arith.constant 0 : index
    %c0_0 = arith.constant 0 : index
    %c0_1 = arith.constant 0 : index
    %0 = vector.load %arg2[%c0, %c0_0, %c0_1] : memref<1x4x256xf32, #tpu.memory_space<vmem>>, vector<1x4x256xf32>
    %1 = vector.shape_cast %0 : vector<1x4x256xf32> to vector<4x256xf32>
    %c0_2 = arith.constant 0 : index
    %c0_3 = arith.constant 0 : index
    %c0_4 = arith.constant 0 : index
    %2 = vector.load %arg3[%c0_2, %c0_3, %c0_4] : memref<1x4x1xf32, #tpu.memory_space<vmem>>, vector<1x4x1xf32>
    %3 = vector.shape_cast %2 : vector<1x4x1xf32> to vector<4x1xf32>
    %4 = vector.broadcast %3 : vector<4x1xf32> to vector<4x256xf32>
    %5 = arith.mulf %1, %4 : vector<4x256xf32>
    %c0_5 = arith.constant 0 : index
    %c0_6 = arith.constant 0 : index
    %6 = vector.load %arg4[%c0_5, %c0_6] : memref<8x4xf32, #tpu.memory_space<vmem>>, vector<8x4xf32>
    %cst = arith.constant dense<0.000000e+00> : vector<8x256xf32>
    %7 = tpu.matmul %6, %5, %cst {dimension_numbers = #tpu.dot_dimension_numbers<[1], [0], [0], [1], [0, 0, 1, 1], [], []>, precision = #tpu.contract_precision<fp32>} : vector<8x4xf32>, vector<4x256xf32>, vector<8x256xf32> -> vector<8x256xf32>
    %c0_7 = arith.constant 0 : index
    %c0_8 = arith.constant 0 : index
    %8 = vector.load %arg5[%c0_7, %c0_8] : memref<8x1xf32, #tpu.memory_space<vmem>>, vector<8x1xf32>
    %9 = vector.broadcast %8 : vector<8x1xf32> to vector<8x256xf32>
    %10 = arith.addf %7, %9 : vector<8x256xf32>
    %cst_9 = arith.constant 3.000000e+00 : f32
    %11 = vector.broadcast %cst_9 : f32 to vector<8x256xf32>
    %12 = arith.addf %10, %11 : vector<8x256xf32>
    %cst_10 = arith.constant 0.000000e+00 : f32
    %cst_11 = arith.constant 6.000000e+00 : f32
    %13 = vector.broadcast %cst_10 : f32 to vector<8x256xf32>
    %14 = arith.maximumf %13, %12 : vector<8x256xf32>
    %15 = vector.broadcast %cst_11 : f32 to vector<8x256xf32>
    %16 = arith.minimumf %15, %14 : vector<8x256xf32>
    %cst_12 = arith.constant 0.166666672 : f32
    %17 = vector.broadcast %cst_12 : f32 to vector<8x256xf32>
    %18 = arith.mulf %16, %17 : vector<8x256xf32>
    %19 = arith.mulf %10, %18 : vector<8x256xf32>
    %c0_13 = arith.constant 0 : index
    %c0_14 = arith.constant 0 : index
    %c0_15 = arith.constant 0 : index
    %20 = vector.load %arg6[%c0_13, %c0_14, %c0_15] : memref<1x8x256xf32, #tpu.memory_space<vmem>>, vector<1x8x256xf32>
    %21 = vector.shape_cast %20 : vector<1x8x256xf32> to vector<8x256xf32>
    %22 = vector.shape_cast %19 : vector<8x256xf32> to vector<1x8x256xf32>
    tpu.vector_store %arg6[%c0_13, %c0_14, %c0_15], %22 {strides = array<i32>} : memref<1x8x256xf32, #tpu.memory_space<vmem>>, vector<1x8x256xf32>,
    return
  }
  func.func @transform_0(%arg0: i32, %arg1: i32) -> (i32, i32, i32) {
    %c0_i32 = arith.constant 0 : i32
    %c0_i32_0 = arith.constant 0 : i32
    return %arg0, %c0_i32, %arg1 : i32, i32, i32
  }
  func.func @transform_1(%arg0: i32, %arg1: i32) -> (i32, i32, i32) {
    %c0_i32 = arith.constant 0 : i32
    %c0_i32_0 = arith.constant 0 : i32
    %c0_i32_1 = arith.constant 0 : i32
    return %arg0, %c0_i32, %c0_i32_0 : i32, i32, i32
  }
  func.func @transform_2(%arg0: i32, %arg1: i32) -> (i32, i32) {
    %c0_i32 = arith.constant 0 : i32
    %c0_i32_0 = arith.constant 0 : i32
    %c0_i32_1 = arith.constant 0 : i32
    return %c0_i32, %c0_i32_0 : i32, i32
  }
  func.func @transform_3(%arg0: i32, %arg1: i32) -> (i32, i32) {
    %c0_i32 = arith.constant 0 : i32
    %c0_i32_0 = arith.constant 0 : i32
    %c0_i32_1 = arith.constant 0 : i32
    return %c0_i32, %c0_i32_0 : i32, i32
  }
  func.func @transform_4(%arg0: i32, %arg1: i32) -> (i32, i32, i32) {
    %c0_i32 = arith.constant 0 : i32
    %c0_i32_0 = arith.constant 0 : i32
    return %arg0, %c0_i32, %arg1 : i32, i32, i32
  }
}

</mosaic_0001>

<bundles_post_ra>
// kernel: depthwise_separable_forward.5
= control target key start
LH: loop header
LB: loop body
LE: loop exit
PB: predicated region body
PF: predicated region fallthrough
CT: control target
= control target key end

     0   :  { %s781_s15 = smov 0   ;;  %s783_s16 = smov 0   ;;  %s828_s0 = inlined_call_operand.vmem [shape: f32[2,4,256], index: 0, kind: input, shape index: {}]   ;;  %s829_s1 = inlined_call_operand.vmem [shape: f32[2,4,1], index: 1, kind: input, shape index: {}]   ;;  %s830_s2 = inlined_call_operand.vmem [shape: f32[8,4], index: 2, kind: input, shape index: {}]   ;;  %s831_s3 = inlined_call_operand.vmem [shape: f32[8,1], index: 3, kind: input, shape index: {}]   ;;  %s832_s4 = inlined_call_operand.vmem [shape: f32[2,8,256], index: 4, kind: output, shape index: {}]  }
   0x1   :  { %s785_s17 = smov 0  }
   0x2 LB: > { %s26_s18 = sadd.s32 1, %s748_s16  ;;  %p693_p0 = scmp.ge.s32.totalorder %s752_s17, 1  ;;  %s752_s17 = sphi %s785_s17, %s14_s17   ;;  %s748_s16 = sphi %s783_s16, %s834_s16   ;;  %s744_s15 = sphi %s781_s15, %s833_s15  }
   0x3   : > { %p28_p1 = scmp.ge.s32.totalorder %s26_s18, 2  ;;  %p192_p2 = scmp.lt.s32.totalorder %s752_s17, 3 }
   0x5   : > { %s836_s18 = smov (%p28_p1, %s26_s18), 0  ;;  %p193_p3 = pnand %p693_p0, %p192_p2 }
   0x6   : > { %p231_p4 = scmp.lt.s32.totalorder (!%p193_p3), %s744_s15, 1 }
   0x7   : > { %196 = sbr.rel (%p193_p3) target bundleno = 314 (0x13a), region = 36 }
   0xc   : > { %v754_v0 = vmov 0   ;;  %s838_s15 = smov (!%p231_p4, %s744_s15), 1  ;;  %v267_v2 = vld [vmem:[%s831_s3] sm:$0xff]  ;;  %vm277_vm0 = vcmask 31744   ;;  %v755_v4 = vmov 839922192  }
   0xd   : > { %729 = vset.pattern.permute.xlu0 %v754_v0  ;;  %s696_s19 = sshll.u32 %s838_s15, 2  ;;  %v266_v3 = vld [vmem:[%s830_s2] sm:$0xff]  ;;  %v261_v5 = vunpack.c.l.s4 %v755_v4  ;;  %s701_s27 = sshll.u32 %s838_s15, 3  ;;  %vm281_vm1 = vcmask 1043456  }
   0xe   : > { %s243_s22 = scalar_lea.vmem %s829_s1, %s696_s19  ;;  %v279_v6 = vsel %vm277_vm0, %v266_v3, 0  ;;  %s238_s30 = scalar_lea.vmem %s828_s0, %s701_s27 }
   0xf   : > { %v255_v1 = vld [vmem:[%s243_s22] sm:$0xf]  ;;  %v262_v7 = vunpack.c.0.s8 %v261_v5  ;;  %v303_v8 = vand.u32 4294901760, %v279_v6  ;;  %s702_s5 = sshll.u32 %s838_s15, 4 }
  0x10   : > { %258 = vperm.xlu0 %729, %v255_v1   ;;  %v254_v10 = vld [vmem:[%s238_s30] sm:$0xff]  ;;  %s252_s8 = scalar_lea.vmem %s832_s4, %s702_s5 }
  0x11   : > { %v304_v12 = vsub.f32 %v279_v6, %v303_v8 }
  0x13   : > { %v305_v14 = vand.u32 4294901760, %v304_v12 }
  0x15   : > { %v306_v15 = vsub.f32 %v304_v12, %v305_v14 }
  0x17   : > { %v307_v19 = vand.u32 4294901760, %v306_v15 }
  0x18   : > { %270 = vperm.xlu0 %729, %v267_v2  }
  0x82   : > { %v259_v9 = vpop.permute.xlu0 %258 }
  0x83   : > { %v263_v11 = vperm.slane %v259_v9, %v262_v7 }
  0x85   : > { %v265_v13 = vmul.f32 %v263_v11, %v254_v10 }
  0x87   : > { %274 = vst [vmem:[#allocation1] ss:$2 sm:$0xff] %v265_v13 }
  0x8a   : > { %v271_v32 = vpop.permute.xlu0 %270 }
  0x8e   : > { %v275_v16 = vld.sshfl [vmem:[#allocation1] sm:$0xff pattern:$0x75316420]  ;;  %v276_v17 = vld.sshfl [vmem:[#allocation1 + $0x8] sm:$0xff pattern:$0x75316420] }
  0x8f   : > { %v282_v18 = vsel %vm281_vm1, %v275_v16, 0  ;;  %v284_v20 = vsel %vm281_vm1, %v276_v17, 0 }
  0x90   : > { %v301_v21 = vand.u32 4294901760, %v282_v18  ;;  %v447_v22 = vand.u32 4294901760, %v284_v20 }
  0x92   : > { %302 = vmatpush.msra.mxu0 %v301_v21  ;;  %378 = vmatpush.msra.mxu3 %v301_v21  ;;  %v328_v23 = vsub.f32 %v282_v18, %v301_v21  ;;  %v474_v24 = vsub.f32 %v284_v20, %v447_v22 }
  0x93   : > { %308 = vmatmul.f32.vlgmr.msra.gmra.mxu0 %v307_v19  ;;  %382 = vmatmul.f32.vlgmr.msra.gmra.mxu3 %v305_v14 }
  0x94   : > { %355 = vmatpush.msra.mxu2 %v328_v23  ;;  %v329_v25 = vand.u32 4294901760, %v328_v23  ;;  %v475_v26 = vand.u32 4294901760, %v474_v24 }
  0x95   : > { %358 = vmatmul.f32.vlgmr.msra.gmra.mxu2 %v304_v12 }
  0x96   : > { %448 = vmatpush.msrb.mxu2 %v447_v22  ;;  %404 = vmatpush.msrb.mxu0 %v329_v25  ;;  %v330_v27 = vsub.f32 %v328_v23, %v329_v25  ;;  %v476_v28 = vsub.f32 %v474_v24, %v475_v26 }
  0x98   : > { %550 = vmatpush.msra.mxu2 %v475_v26  ;;  %501 = vmatpush.msra.mxu0 %v474_v24  ;;  %v331_v29 = vand.u32 4294901760, %v330_v27  ;;  %v477_v30 = vand.u32 4294901760, %v476_v28 }
  0x9a   : > { %332 = vmatpush.msra.mxu1 %v331_v29  ;;  %478 = vmatpush.msrb.mxu3 %v477_v30 }
  0x9b   : > { %334 = vmatmul.f32.vlgmr.msra.gmra.mxu1 %v303_v8  ;;  %406 = vmatmul.f32.vlgmr.msrb.gmra.mxu0 %v303_v8 }
  0x9c   : > { %572 = vmatpush.msra.mxu3 %v447_v22  ;;  %426 = vmatpush.msrb.mxu1 %v301_v21 }
  0x9d   : > { %454 = vmatmul.f32.vlgmr.msrb.gmra.mxu2 %v307_v19  ;;  %480 = vmatmul.f32.vlgmr.msrb.gmra.mxu3 %v303_v8 }
  0x9e   : > { %524 = vmatpush.msra.mxu1 %v447_v22 }
  0xa3   : > { %428 = vmatmul.f32.vlgmr.msrb.gmra.mxu1 %v303_v8  ;;  %504 = vmatmul.f32.vlgmr.msra.gmra.mxu0 %v304_v12 }
  0xa5   : > { %552 = vmatmul.f32.vlgmr.msra.gmra.mxu2 %v303_v8  ;;  %574 = vmatmul.f32.vlgmr.msra.gmra.mxu3 %v303_v8 }
  0xab   : > { %528 = vmatmul.f32.vlgmr.msra.gmra.mxu1 %v305_v14 }
 0x110   : > { %v309_v31 = vpop.f32.mrf.mxu0 }
 0x111   : > { %v310_v33 = vadd.f32 %v309_v31, %v271_v32 }
 0x116   : > { %v383_v34 = vpop.f32.mrf.mxu3 }
 0x118   : > { %v335_v35 = vpop.f32.mrf.mxu1  ;;  %v359_v36 = vpop.f32.mrf.mxu2 }
 0x119   : > { %v336_v37 = vadd.f32 %v335_v35, %v310_v33  ;;  %v407_v38 = vpop.f32.mrf.mxu0 }
 0x11b   : > { %v360_v39 = vadd.f32 %v359_v36, %v336_v37 }
 0x11d   : > { %v384_v40 = vadd.f32 %v383_v34, %v360_v39 }
 0x11f   : > { %v408_v41 = vadd.f32 %v407_v38, %v384_v40 }
 0x120   : > { %v429_v42 = vpop.f32.mrf.mxu1  ;;  %v455_v43 = vpop.f32.mrf.mxu2 }
 0x121   : > { %v430_v44 = vadd.f32 %v429_v42, %v408_v41  ;;  %v456_v45 = vadd.f32 %v455_v43, %v271_v32  ;;  %v481_v46 = vpop.f32.mrf.mxu3  ;;  %v505_v49 = vpop.f32.mrf.mxu0 }
 0x123   : > { %v578_v47 = vadd.f32 3.0, %v430_v44  ;;  %v482_v48 = vadd.f32 %v481_v46, %v456_v45 }
 0x125   : > { %v580_v50 = vmax.f32 %v578_v47, 0.0  ;;  %v506_v52 = vadd.f32 %v505_v49, %v482_v48 }
 0x127   : > { %v582_v51 = vmin.f32 %v580_v50, 6.0 }
 0x128   : > { %v529_v53 = vpop.f32.mrf.mxu1  ;;  %v553_v54 = vpop.f32.mrf.mxu2 }
 0x129   : > { %v584_v55 = vmul.f32 0.16666667, %v582_v51  ;;  %v530_v56 = vadd.f32 %v529_v53, %v506_v52  ;;  %v575_v57 = vpop.f32.mrf.mxu3 }
 0x12b   : > { %v586_v58 = vmul.f32 %v584_v55, %v430_v44  ;;  %v554_v59 = vadd.f32 %v553_v54, %v530_v56 }
 0x12d   : > { %588 = vst [vmem:[%s252_s8] sm:$0xff] %v586_v58  ;;  %v576_v60 = vadd.f32 %v575_v57, %v554_v59 }
 0x12f   : > { %v579_v61 = vadd.f32 3.0, %v576_v60 }
 0x131   : > { %v581_v62 = vmax.f32 %v579_v61, 0.0 }
 0x133   : > { %v583_v63 = vmin.f32 %v581_v62, 6.0 }
 0x135   : > { %v585_v0 = vmul.f32 0.16666667, %v583_v63 }
 0x137   : > { %v587_v1 = vmul.f32 %v585_v0, %v576_v60 }
 0x139   : > { %589 = vst [vmem:[%s252_s8 + $0x8] sm:$0xff] %v587_v1 }
 0x13a PF: > { %s14_s17 = sadd.s32 1, %s752_s17   ;;  %s833_s15 = smov %s748_s16 }
 0x13b   : > { %p11_p5 = scmp.ge.s32.totalorder %s14_s17, 4   ;;  %s834_s16 = smov %s836_s18 }
 0x13d   :  { %13 = sbr.rel (!%p11_p5) target bundleno = 2 (0x2), region = 69 }

// kernel: depthwise_separable_forward.4
= control target key start
LH: loop header
LB: loop body
LE: loop exit
PB: predicated region body
PF: predicated region fallthrough
CT: control target
= control target key end

     0   :  { %vm31_vm0 = vcmask 1043456   ;;  %vm27_vm1 = vcmask 31744   ;;  %vm187_vm2 = vcmask 64512   ;;  %s399_s1 = inlined_call_operand.vmem [shape: f32[4,8], index: 1, kind: input, shape index: {}]   ;;  %s400_s0 = inlined_call_operand.vmem [shape: f32[8,4], index: 0, kind: input, shape index: {}]   ;;  %s401_s2 = inlined_call_operand.vmem [shape: f32[1,8], index: 2, kind: input, shape index: {}]   ;;  %s402_s3 = inlined_call_operand.vmem [shape: f32[8,4], index: 3, kind: input, shape index: {}]   ;;  %s403_s4 = inlined_call_operand.vmem [shape: f32[1,4], index: 4, kind: input, shape index: {}]   ;;  %s404_s5 = inlined_call_operand.vmem [shape: f32[8,4], index: 5, kind: output, shape index: {}]  }
   0x1   :  { %v22_v0 = vld [vmem:[%s399_s1] sm:$0xf] }
   0x2   :  { %v20_v1 = vld [vmem:[%s400_s0] sm:$0xff]  ;;  %v33_v2 = vsel %vm31_vm0, %v22_v0, 0 }
   0x3   :  { %v21_v3 = vmul.f32 0.00390625, %v20_v1  ;;  %v50_v4 = vand.u32 4294901760, %v33_v2  ;;  %v182_v15 = vld [vmem:[%s402_s3] sm:$0xff] }
   0x4   :  { %v206_v16 = vand.u32 4294901760, %v182_v15  ;;  %v347_v21 = vld [vmem:[%s401_s2] ss:$0 sm:$0xff] }
   0x5   :  { %v29_v5 = vsel %vm27_vm1, %v21_v3, 0  ;;  %v77_v6 = vsub.f32 %v33_v2, %v50_v4  ;;  %51 = vmatpush.msra.mxu0 %v50_v4  ;;  %127 = vmatpush.msra.mxu3 %v50_v4  ;;  %v348_v41 = vld [vmem:[%s403_s4] ss:$0 sm:$0xff] }
   0x6   :  { %v52_v7 = vand.u32 4294901760, %v29_v5  ;;  %v233_v17 = vsub.f32 %v182_v15, %v206_v16 }
   0x7   :  { %104 = vmatpush.msra.mxu2 %v77_v6  ;;  %v78_v9 = vand.u32 4294901760, %v77_v6 }
   0x8   :  { %v53_v8 = vsub.f32 %v29_v5, %v52_v7  ;;  %v234_v18 = vand.u32 4294901760, %v233_v17 }
   0x9   :  { %153 = vmatpush.msrb.mxu0 %v78_v9  ;;  %v79_v11 = vsub.f32 %v77_v6, %v78_v9  ;;  %207 = vmatpush.msrb.mxu2 %v206_v16 }
   0xa   :  { %107 = vmatmul.f32.vlgmr.msra.gmra.mxu2 %v53_v8  ;;  %v54_v10 = vand.u32 4294901760, %v53_v8  ;;  %v235_v19 = vsub.f32 %v233_v17, %v234_v18 }
   0xb   :  { %v80_v13 = vand.u32 4294901760, %v79_v11  ;;  %309 = vmatpush.msra.mxu2 %v234_v18 }
   0xc   :  { %v55_v12 = vsub.f32 %v53_v8, %v54_v10  ;;  %131 = vmatmul.f32.vlgmr.msra.gmra.mxu3 %v54_v10  ;;  %v236_v20 = vand.u32 4294901760, %v235_v19 }
   0xd   :  { %81 = vmatpush.msra.mxu1 %v80_v13 }
   0xe   :  { %v56_v14 = vand.u32 4294901760, %v55_v12  ;;  %83 = vmatmul.f32.vlgmr.msra.gmra.mxu1 %v52_v7  ;;  %237 = vmatpush.msrb.mxu3 %v236_v20 }
   0xf   :  { %175 = vmatpush.msrb.mxu1 %v50_v4 }
  0x10   :  { %57 = vmatmul.f32.vlgmr.msra.gmra.mxu0 %v56_v14  ;;  %331 = vmatpush.msra.mxu3 %v206_v16 }
  0x11   :  { %283 = vmatpush.msra.mxu1 %v206_v16  ;;  %260 = vmatpush.msra.mxu0 %v233_v17 }
  0x16   :  { %177 = vmatmul.f32.vlgmr.msrb.gmra.mxu1 %v52_v7 }
  0x18   :  { %155 = vmatmul.f32.vlgmr.msrb.gmra.mxu0 %v52_v7 }
  0x8b   :  { %v84_v22 = vpop.f32.mrf.mxu1 }
  0x8d   :  { %v58_v23 = vpop.f32.mrf.mxu0  ;;  %v108_v25 = vpop.f32.mrf.mxu2 }
  0x8e   :  { %v59_v24 = vadd.f32 %v347_v21, %v58_v23 }
  0x8f   :  { %v132_v27 = vpop.f32.mrf.mxu3 }
  0x90   :  { %v85_v26 = vadd.f32 %v84_v22, %v59_v24 }
  0x92   :  { %v109_v28 = vadd.f32 %v108_v25, %v85_v26 }
  0x93   :  { %v178_v31 = vpop.f32.mrf.mxu1 }
  0x94   :  { %v133_v29 = vadd.f32 %v132_v27, %v109_v28 }
  0x95   :  { %v156_v30 = vpop.f32.mrf.mxu0 }
  0x96   :  { %v157_v32 = vadd.f32 %v156_v30, %v133_v29 }
  0x98   :  { %v179_v33 = vadd.f32 %v178_v31, %v157_v32 }
  0x9a   :  { %v181_v34 = vmax.f32 %v179_v33, 0.0 }
  0x9c   :  { %v189_v35 = vsel %vm187_vm2, %v181_v34, 0 }
  0x9d   :  { %v208_v36 = vand.u32 4294901760, %v189_v35 }
  0x9f   :  { %v209_v37 = vsub.f32 %v189_v35, %v208_v36  ;;  %239 = vmatmul.f32.vlgmr.msrb.gmra.mxu3 %v208_v36 }
  0xa1   :  { %263 = vmatmul.f32.vlgmr.msra.gmra.mxu0 %v209_v37  ;;  %v210_v38 = vand.u32 4294901760, %v209_v37 }
  0xa3   :  { %287 = vmatmul.f32.vlgmr.msra.gmra.mxu1 %v210_v38  ;;  %v211_v39 = vsub.f32 %v209_v37, %v210_v38 }
  0xa5   :  { %v212_v40 = vand.u32 4294901760, %v211_v39 }
  0xa7   :  { %213 = vmatmul.f32.vlgmr.msrb.gmra.mxu2 %v212_v40  ;;  %333 = vmatmul.f32.vlgmr.msra.gmra.mxu3 %v208_v36 }
  0xaf   :  { %311 = vmatmul.f32.vlgmr.msra.gmra.mxu2 %v208_v36 }
 0x11e   :  { %v264_v46 = vpop.f32.mrf.mxu0 }
 0x120   :  { %v288_v48 = vpop.f32.mrf.mxu1 }
 0x122   :  { %v240_v42 = vpop.f32.mrf.mxu3 }
 0x12a   :  { %v214_v43 = vpop.f32.mrf.mxu2  ;;  %v334_v52 = vpop.f32.mrf.mxu3 }
 0x12b   :  { %v215_v44 = vadd.f32 %v348_v41, %v214_v43 }
 0x12d   :  { %v241_v45 = vadd.f32 %v240_v42, %v215_v44 }
 0x12f   :  { %v265_v47 = vadd.f32 %v264_v46, %v241_v45 }
 0x131   :  { %v289_v49 = vadd.f32 %v288_v48, %v265_v47 }
 0x132   :  { %v312_v50 = vpop.f32.mrf.mxu2 }
 0x133   :  { %v313_v51 = vadd.f32 %v312_v50, %v289_v49 }
 0x135   :  { %v335_v53 = vadd.f32 %v334_v52, %v313_v51 }
 0x137   :  { %v337_v54 = vmul.f32 1.2, %v335_v53 }
 0x139   :  { %v338_v55 = vadd.f32 3.0, %v337_v54 }
 0x13b   :  { %v339_v56 = vmax.f32 %v338_v55, 0.0 }
 0x13d   :  { %v340_v57 = vmin.f32 %v339_v56, 6.0 }
 0x13f   :  { %v341_v58 = vmul.f32 0.16666667, %v340_v57 }
 0x141   :  { %342 = vst.msk [vmem:[%s404_s5] sm:$0xff] %vm27_vm1, %v341_v58 }

// kernel: depthwise_separable_forward.3
= control target key start
LH: loop header
LB: loop body
LE: loop exit
PB: predicated region body
PF: predicated region fallthrough
CT: control target
= control target key end

     0   :  { %s4353_s15 = smov 0   ;;  %s4355_s16 = smov 0   ;;  %s7060_s0 = inlined_call_operand.vmem [shape: f32[2,4,18,18], index: 0, kind: input, shape index: {}]   ;;  %s7061_s1 = inlined_call_operand.vmem [shape: f32[4,9], index: 1, kind: input, shape index: {}]   ;;  %s7062_s2 = inlined_call_operand.vmem [shape: f32[4,1], index: 2, kind: input, shape index: {}]   ;;  %s7063_s3 = inlined_call_operand.vmem [shape: f32[2,4,256], index: 3, kind: output, shape index: {0}]   ;;  %s7064_s4 = inlined_call_operand.vmem [shape: f32[2,4,1], index: 4, kind: output, shape index: {1}]  }
   0x1   :  { %s4357_s17 = smov 0  }
   0x2 LB: > { %s27_s18 = sadd.s32 1, %s4304_s16  ;;  %p4226_p0 = scmp.ge.s32.totalorder %s4308_s17, 1  ;;  %s4308_s17 = sphi %s4357_s17, %s15_s17   ;;  %s4304_s16 = sphi %s4355_s16, %s7610_s16   ;;  %s4300_s15 = sphi %s4353_s15, %s7609_s15  }
   0x3   : > { %p29_p1 = scmp.ge.s32.totalorder %s27_s18, 2  ;;  %p207_p2 = scmp.lt.s32.totalorder %s4308_s17, 3 }
   0x5   : > { %s7612_s18 = smov (%p29_p1, %s27_s18), 0  ;;  %p208_p3 = pnand %p4226_p0, %p207_p2 }
   0x7   : > { %211 = sbr.rel (%p208_p3) target bundleno = 3078 (0xc06), region = 32 }
   0xc   : > { %v292_v0 = vld [vmem:[%s7061_s1] sm:$0xf]  ;;  %v4310_v1 = vmov 2   ;;  %v4311_v2 = vmov 1   ;;  %v4312_v3 = vmov 4   ;;  %v4313_v4 = vmov 3  }
   0xd   : > { %4278 = vset.pattern.permute.xlu1 %v4310_v1  ;;  %4277 = vset.pattern.permute.xlu0 %v4311_v2  ;;  %v4314_v5 = vmov 5   ;;  %v4315_v6 = vmov 6   ;;  %v4316_v7 = vmov 7   ;;  %v4317_v8 = vmov 0   ;;  %v293_v9 = vld [vmem:[%s7062_s2] sm:$0xf] }
   0xe   : > { %352 = vperm.xlu1 %4278, %v292_v0   ;;  %318 = vperm.xlu0 %4277, %v292_v0   ;;  %v4318_v10 = vmov 8   ;;  %p258_p4 = scmp.lt.s32.totalorder %s4300_s15, 1  ;;  %s4319_s27 = smov 126   ;;  %vm605_vm0 = vcmask 1041409   ;;  %vm607_vm1 = vcmask 1045509   ;;  %vm610_vm2 = vcmask 1042434  }
   0xf   : > { %s4320_s28 = smov 127   ;;  %vm612_vm3 = vcmask 1046534   ;;  %vm615_vm4 = vcmask 1043459   ;;  %vm620_vm5 = vcmask 125952   ;;  %vm617_vm6 = vcmask 1047559   ;;  %s4321_s7 = smov 16  }
  0x10   : > { %s7614_s15 = smov (!%p258_p4, %s4300_s15), 1  ;;  %s4322_s8 = smov 32   ;;  %vm849_vm7 = vcmask 257152   ;;  %vm1078_vm8 = vcmask 388352   ;;  %vm1307_vm9 = vcmask 519552   ;;  %vm1536_vm10 = vcmask 650752  }
  0x11   : > { %s4234_s23 = smul.u32 96, %s7614_s15  ;;  %s4233_s29 = sshll.u32 %s7614_s15, 3  ;;  %vm1765_vm11 = vcmask 781952   ;;  %vm1994_vm12 = vcmask 913152   ;;  %vm2223_vm13 = vcmask 1044352   ;;  %vm4054_vm14 = vcmask 3072  }
  0x12   : > { %s4887_s6 = scalar_lea.vmem %s7063_s3, %s4233_s29  ;;  %s4323_s9 = smov 48  }
  0x13   : > { %s4387_s26 = scalar_lea.vmem %s7060_s0, %s4234_s23  ;;  %s4324_s10 = smov 64  }
  0x14   : > { %v4390_v11 = vld [vmem:[%s4387_s26 + $0x1] sm:$0x1]  ;;  %v4393_v12 = vld [vmem:[%s4387_s26] sm:$0x1]  ;;  %v4415_v20 = vld [vmem:[%s4387_s26 + $0x18] sm:$0x1] }
  0x15   : > { %v4418_v21 = vld [vmem:[%s4387_s26 + $0x1] sm:$0x1]  ;;  %v4438_v28 = vld [vmem:[%s4387_s26 + $0x49] sm:$0x1]  ;;  %v4441_v29 = vld [vmem:[%s4387_s26 + $0x30] sm:$0x1] }
  0x16   : > { %4280 = vset.pattern.permute.xlu1 %v4312_v3  ;;  %4279 = vset.pattern.permute.xlu0 %v4313_v4  ;;  %v4461_v36 = vld [vmem:[%s4387_s26 + $0x19] sm:$0x1]  ;;  %v4464_v37 = vld [vmem:[%s4387_s26 + $0x2] sm:$0x1]  ;;  %v4484_v44 = vld [vmem:[%s4387_s26 + $0x4a] sm:$0x1] }
  0x17   : > { %408 = vperm.xlu1 %4280, %v292_v0   ;;  %390 = vperm.xlu0 %4279, %v292_v0   ;;  %v4489_v46 = vld [vmem:[%s4387_s26 + $0x31] sm:$0x1]  ;;  %v4507_v52 = vld [vmem:[%s4387_s26 + $0x1a] sm:$0x1]  ;;  %v4530_v60 = vld [vmem:[%s4387_s26 + $0x32] sm:$0x1] }
  0x18   : > { %v4525_v58 = vld [vmem:[%s4387_s26 + $0x31] sm:$0x1]  ;;  %v4554_v4 = vld [vmem:[%s4387_s26 + $0x48] sm:$0x1]  ;;  %s4325_s11 = smov 80   ;;  %s4326_s12 = smov 96  }
  0x19   : > { %s4327_s13 = smov 112   ;;  %s4230_s14 = sshll.u32 %s7614_s15, 2 }
  0x1a   : > { %s291_s21 = scalar_lea.vmem %s7064_s4, %s4230_s14 }
  0x1f   : > { %4281 = vset.pattern.permute.xlu1 %v4314_v5  ;;  %4282 = vset.pattern.permute.xlu0 %v4315_v6  ;;  %v4561_v6 = vld [vmem:[%s4387_s26 + $0x2] sm:$0x1] }
  0x20   : > { %442 = vperm.xlu1 %4281, %v292_v0   ;;  %480 = vperm.xlu0 %4282, %v292_v0  }
  0x28   : > { %4284 = vset.pattern.permute.xlu1 %v4316_v7  ;;  %4283 = vset.pattern.permute.xlu0 %v4317_v8  ;;  %v4564_v7 = vld [vmem:[%s4387_s26 + $0x1b] sm:$0x1] }
  0x29   : > { %498 = vperm.xlu1 %4284, %v292_v0   ;;  %300 = vperm.xlu0 %4283, %v292_v0  }
  0x31   : > { %4285 = vset.pattern.permute.xlu1 %v4318_v10  ;;  %567 = vperm.xlu0 %4283, %v293_v9  }
  0x32   : > { %532 = vperm.xlu1 %4285, %v292_v0   ;;  %v4543_v0 = vld [vmem:[%s4387_s26 + $0x32] sm:$0x1] }
  0x33   : > { %7272 = vst [vmem:[#allocation21_spill] sm:$0xff] %v4543_v0 }
  0x80   : > { %v4395_v13 = vpop.permute.xlu1 %352  ;;  %v4397_v14 = vpop.permute.xlu0 %318 }
  0x81   : > { %7253 = vst [vmem:[#allocation2_spill] sm:$0xff] %v4395_v13  ;;  %v665_v15 = vmul.f32 %v4390_v11, %v4395_v13  ;;  %v361_v16 = vmul.f32 %v4395_v13, %v4393_v12  ;;  %v327_v17 = vmul.f32 %v4397_v14, %v4393_v12  ;;  %v4408_v18 = vrot.slane %v4397_v14, 1 }
  0x82   : > { %7254 = vst [vmem:[#allocation3_spill] sm:$0xff] %v4397_v14  ;;  %v4412_v19 = vrot.slane %v4395_v13, 1  ;;  %v4435_v27 = vrot.slane %v4395_v13, 2  ;;  %v641_v55 = vmul.f32 %v4390_v11, %v4397_v14  ;;  %v4518_v56 = vrot.slane %v4397_v14, 2 }
  0x83   : > { %673 = vrot.lane.b32.xlu0 %v665_v15, %s4319_s27  ;;  %369 = vrot.lane.b32.xlu2 %v361_v16, %s4319_s27  ;;  %7255 = vst [vmem:[#allocation4_spill] sm:$0xff] %v4408_v18  ;;  %v328_v23 = vmul.f32 %v4408_v18, %v4415_v20  ;;  %v4546_v1 = vrot.slane %v4397_v14, 3  ;;  %v4567_v8 = vrot.slane %v4395_v13, 3  ;;  %v4579_v16 = vld [vmem:[%s4387_s26 + $0x4a] sm:$0x1] }
  0x84   : > { %335 = vrot.lane.b32.xlu1 %v327_v17, %s4320_s28  ;;  %7256 = vst [vmem:[#allocation5_spill] sm:$0xff] %v4412_v19  ;;  %v362_v24 = vmul.f32 %v4412_v19, %v4415_v20  ;;  %v363_v32 = vmul.f32 %v4435_v27, %v4441_v29  ;;  %v643_v59 = vmul.f32 %v4525_v58, %v4518_v56 }
  0x85   : > { %7259 = vst [vmem:[#allocation8_spill] sm:$0xff] %v4435_v27  ;;  %v329_v62 = vmul.f32 %v4518_v56, %v4441_v29  ;;  %v667_v2 = vmul.f32 %v4525_v58, %v4435_v27  ;;  %v330_v5 = vmul.f32 %v4546_v1, %v4554_v4  ;;  %v364_v15 = vmul.f32 %v4567_v8, %v4554_v4 }
  0x86   : > { %7269 = vst [vmem:[#allocation18_spill] sm:$0xff] %v4518_v56 }
  0x87   : > { %7273 = vst [vmem:[#allocation22_spill] sm:$0xff] %v4546_v1 }
  0x88   : > { %7274 = vst [vmem:[#allocation23_spill] sm:$0xff] %v4567_v8 }
  0x89   : > { %v4420_v22 = vpop.permute.xlu1 %408 }
  0x8a   : > { %7257 = vst [vmem:[#allocation6_spill] sm:$0xff] %v4420_v22  ;;  %v417_v25 = vmul.f32 %v4420_v22, %v4418_v21  ;;  %v4432_v26 = vrot.slane %v4420_v22, 3  ;;  %v4458_v35 = vrot.slane %v4420_v22, 1  ;;  %v4539_v63 = vrot.slane %v4420_v22, 2 }
  0x8b   : > { %371 = vrot.lane.b32.xlu0 %v362_v24, %s4319_s27  ;;  %v701_v9 = vmul.f32 %v4561_v6, %v4420_v22 }
  0x8c   : > { %425 = vrot.lane.b32.xlu2 %v417_v25, %s4320_s28  ;;  %337 = vrot.lane.b32.xlu1 %v328_v23, %s4320_s28  ;;  %7258 = vst [vmem:[#allocation7_spill] sm:$0xff] %v4432_v26  ;;  %v420_v31 = vmul.f32 %v4432_v26, %v4438_v28  ;;  %v418_v40 = vmul.f32 %v4458_v35, %v4461_v36  ;;  %v4584_v23 = vld [vmem:[%s4387_s26 + $0x3] sm:$0x1] }
  0x8d   : > { %7262 = vst [vmem:[#allocation11_spill] sm:$0xff] %v4458_v35  ;;  %v703_v3 = vmul.f32 %v4543_v0, %v4539_v63  ;;  %v704_v17 = vmul.f32 %v4579_v16, %v4432_v26  ;;  %v419_v25 = vmul.f32 %v4539_v63, %v4489_v46 }
  0x8e   : > { %7271 = vst [vmem:[#allocation20_spill] sm:$0xff] %v4539_v63 }
  0x8f   : > { %7275 = vst [vmem:[#allocation24_spill] sm:$0xff] %v4584_v23 }
  0x92   : > { %v4443_v30 = vpop.permute.xlu1 %442 }
  0x93   : > { %7260 = vst [vmem:[#allocation9_spill] sm:$0xff] %v4443_v30  ;;  %v451_v33 = vmul.f32 %v4443_v30, %v4418_v21  ;;  %431 = vrot.lane.b32.xlu0 %v420_v31, %s4320_s28  ;;  %v4455_v34 = vrot.slane %v4443_v30, 1  ;;  %v4481_v43 = vrot.slane %v4443_v30, 2 }
  0x94   : > { %373 = vrot.lane.b32.xlu1 %v363_v32, %s4319_s27  ;;  %v4596_v32 = vpop.permute.xlu0 %390 }
  0x95   : > { %459 = vrot.lane.b32.xlu2 %v451_v33, %s4319_s27  ;;  %7261 = vst [vmem:[#allocation10_spill] sm:$0xff] %v4455_v34  ;;  %v452_v38 = vmul.f32 %v4455_v34, %v4461_v36  ;;  %v453_v47 = vmul.f32 %v4481_v43, %v4489_v46  ;;  %v4599_v33 = vrot.slane %v4443_v30, 3 }
  0x96   : > { %7265 = vst [vmem:[#allocation14_spill] sm:$0xff] %v4481_v43 }
  0x97   : > { %7277 = vst [vmem:[#allocation26_spill] sm:$0xff] %v4599_v33 }
  0x9b   : > { %v4468_v39 = vpop.permute.xlu1 %498  ;;  %461 = vrot.lane.b32.xlu0 %v452_v38, %s4319_s27  ;;  %v4602_v38 = vld [vmem:[%s4387_s26 + $0x1a] sm:$0x1] }
  0x9c   : > { %7263 = vst [vmem:[#allocation12_spill] sm:$0xff] %v4468_v39  ;;  %v507_v41 = vmul.f32 %v4468_v39, %v4464_v37  ;;  %427 = vrot.lane.b32.xlu1 %v418_v40, %s4320_s28  ;;  %v4477_v42 = vrot.slane %v4468_v39, 3  ;;  %v4503_v51 = vrot.slane %v4468_v39, 1  ;;  %v726_v40 = vmul.f32 %v4602_v38, %v4455_v34 }
  0x9e   : > { %7264 = vst [vmem:[#allocation13_spill] sm:$0xff] %v4477_v42  ;;  %515 = vrot.lane.b32.xlu2 %v507_v41, %s4320_s28  ;;  %v510_v45 = vmul.f32 %v4477_v42, %v4484_v44  ;;  %v508_v54 = vmul.f32 %v4503_v51, %v4507_v52  ;;  %v762_v10 = vmul.f32 %v4564_v7, %v4503_v51  ;;  %v4607_v41 = vld [vmem:[%s4387_s26 + $0x4b] sm:$0x1] }
  0x9f   : > { %7268 = vst [vmem:[#allocation17_spill] sm:$0xff] %v4503_v51 }
  0xa3   : > { %521 = vrot.lane.b32.xlu0 %v510_v45, %s4320_s28 }
  0xa4   : > { %v4494_v48 = vpop.permute.xlu1 %532  ;;  %463 = vrot.lane.b32.xlu1 %v453_v47, %s4319_s27  ;;  %v454_v47 = vmul.f32 %v4599_v33, %v4438_v28 }
  0xa5   : > { %7266 = vst [vmem:[#allocation15_spill] sm:$0xff] %v4494_v48  ;;  %v541_v49 = vmul.f32 %v4494_v48, %v4464_v37  ;;  %v4500_v50 = vrot.slane %v4494_v48, 1  ;;  %v4521_v57 = vrot.slane %v4494_v48, 2  ;;  %v785_v24 = vmul.f32 %v4584_v23, %v4494_v48 }
  0xa6   : > { %v4593_v31 = vrot.slane %v4494_v48, 3 }
  0xa7   : > { %7267 = vst [vmem:[#allocation16_spill] sm:$0xff] %v4500_v50  ;;  %549 = vrot.lane.b32.xlu2 %v541_v49, %s4319_s27  ;;  %v542_v53 = vmul.f32 %v4500_v50, %v4507_v52  ;;  %v543_v61 = vmul.f32 %v4521_v57, %v4530_v60  ;;  %v4617_v49 = vrot.slane %v4468_v39, 2 }
  0xa8   : > { %7270 = vst [vmem:[#allocation19_spill] sm:$0xff] %v4521_v57  ;;  %v788_v45 = vmul.f32 %v4607_v41, %v4593_v31 }
  0xa9   : > { %7276 = vst [vmem:[#allocation25_spill] sm:$0xff] %v4593_v31 }
  0xaa   : > { %7278 = vst [vmem:[#allocation27_spill] sm:$0xff] %v4617_v49 }
  0xab   : > { %551 = vrot.lane.b32.xlu0 %v542_v53, %s4319_s27  ;;  %v4619_v53 = vpop.permute.xlu0 %480 }
  0xac   : > { %517 = vrot.lane.b32.xlu1 %v508_v54, %s4320_s28  ;;  %v728_v54 = vmul.f32 %v4579_v16, %v4599_v33 }
  0xaf   : > { %649 = vrot.lane.b32.xlu2 %v641_v55, %s4320_s28  ;;  %v4624_v55 = vld [vmem:[%s4387_s26 + $0x2] sm:$0x1] }
  0xb0   : > { %7279 = vst [vmem:[#allocation28_spill] sm:$0xff] %v4624_v55 }
  0xb3   : > { %653 = vrot.lane.b32.xlu0 %v643_v59, %s4320_s28  ;;  %v870_v59 = vmul.f32 %v4624_v55, %v4397_v14 }
  0xb4   : > { %553 = vrot.lane.b32.xlu1 %v543_v61, %s4319_s27  ;;  %v509_v61 = vmul.f32 %v4617_v49, %v4530_v60 }
  0xb7   : > { %339 = vrot.lane.b32.xlu2 %v329_v62, %s4320_s28 }
  0xbb   : > { %677 = vrot.lane.b32.xlu0 %v667_v2, %s4319_s27  ;;  %v4634_v2 = vld [vmem:[%s4387_s26 + $0x33] sm:$0x1] }
  0xbc   : > { %713 = vrot.lane.b32.xlu1 %v703_v3, %s4320_s28  ;;  %v763_v3 = vmul.f32 %v4634_v2, %v4617_v49 }
  0xbf   : > { %341 = vrot.lane.b32.xlu2 %v330_v5, %s4320_s28  ;;  %v4639_v5 = vld [vmem:[%s4387_s26 + $0x32] sm:$0x1] }
  0xc0   : > { %7280 = vst [vmem:[#allocation29_spill] sm:$0xff] %v4639_v5 }
  0xc3   : > { %709 = vrot.lane.b32.xlu0 %v701_v9, %s4320_s28  ;;  %v872_v9 = vmul.f32 %v4639_v5, %v4518_v56 }
  0xc4   : > { %771 = vrot.lane.b32.xlu1 %v762_v10, %s4320_s28  ;;  %v4643_v10 = vpop.permute.xlu0 %300 }
  0xc5   : > { %7281 = vst [vmem:[#allocation30_spill] sm:$0xff] %v4643_v10 }
  0xc7   : > { %375 = vrot.lane.b32.xlu2 %v364_v15, %s4319_s27  ;;  %v544_v15 = vmul.f32 %v4593_v31, %v4484_v44 }
  0xcb   : > { %715 = vrot.lane.b32.xlu0 %v704_v17, %s4320_s28 }
  0xcc   : > { %793 = vrot.lane.b32.xlu1 %v785_v24, %s4319_s27  ;;  %v786_v24 = vmul.f32 %v4564_v7, %v4500_v50 }
  0xcf   : > { %429 = vrot.lane.b32.xlu2 %v419_v25, %s4320_s28  ;;  %v894_v25 = vmul.f32 %v4624_v55, %v4395_v13 }
  0xd3   : > { %735 = vrot.lane.b32.xlu0 %v726_v40, %s4319_s27  ;;  %v4656_v40 = vld [vmem:[%s4387_s26 + $0x19] sm:$0x1] }
  0xd4   : > { %799 = vrot.lane.b32.xlu1 %v788_v45, %s4319_s27  ;;  %v642_v45 = vmul.f32 %v4656_v40, %v4408_v18 }
  0xd7   : > { %465 = vrot.lane.b32.xlu2 %v454_v47, %s4319_s27  ;;  %v4661_v47 = vpop.permute.xlu0 %567 }
  0xdb   : > { %739 = vrot.lane.b32.xlu0 %v728_v54, %s4319_s27 }
  0xdc   : > { %878 = vrot.lane.b32.xlu1 %v870_v59, %s4320_s28  ;;  %v4665_v59 = vld [vmem:[%s4387_s26 + $0x1a] sm:$0x1] }
  0xdd   : > { %v370_v62 = vpop.permute.xlu2 %369  ;;  %7282 = vst [vmem:[#allocation31_spill] sm:$0xff] %v4665_v59 }
  0xdf   : > { %519 = vrot.lane.b32.xlu2 %v509_v61, %s4320_s28  ;;  %v871_v61 = vmul.f32 %v4665_v59, %v4408_v18 }
  0xe3   : > { %773 = vrot.lane.b32.xlu0 %v763_v3, %s4320_s28  ;;  %v896_v3 = vmul.f32 %v4639_v5, %v4435_v27  ;;  %v4684_v27 = vld [vmem:[%s4387_s26 + $0x3] sm:$0x1] }
  0xe4   : > { %882 = vrot.lane.b32.xlu1 %v872_v9, %s4320_s28  ;;  %v4673_v9 = vld [vmem:[%s4387_s26 + $0x49] sm:$0x1]  ;;  %7283 = vst [vmem:[#allocation32_spill] sm:$0xff] %v4684_v27 }
  0xe6   : > { %v426_v17 = vpop.permute.xlu2 %425 }
  0xe7   : > { %555 = vrot.lane.b32.xlu2 %v544_v15, %s4319_s27  ;;  %v644_v15 = vmul.f32 %v4673_v9, %v4546_v1 }
  0xeb   : > { %795 = vrot.lane.b32.xlu0 %v786_v24, %s4319_s27 }
  0xec   : > { %902 = vrot.lane.b32.xlu1 %v894_v25, %s4319_s27  ;;  %v309_v25 = vmul.f32 %v4643_v10, %v4393_v12  ;;  %v930_v12 = vmul.f32 %v4684_v27, %v4420_v22 }
  0xef   : > { %651 = vrot.lane.b32.xlu2 %v642_v45, %s4320_s28  ;;  %v460_v54 = vpop.permute.xlu2 %459 }
  0xf3   : > { %880 = vrot.lane.b32.xlu0 %v871_v61, %s4320_s28  ;;  %v4687_v61 = vld [vmem:[%s4387_s26 + $0x4a] sm:$0x1] }
  0xf4   : > { %906 = vrot.lane.b32.xlu1 %v896_v3, %s4319_s27  ;;  %7284 = vst [vmem:[#allocation33_spill] sm:$0xff] %v4687_v61  ;;  %v399_v3 = vmul.f32 %v4596_v32, %v4418_v21  ;;  %v873_v14 = vmul.f32 %v4687_v61, %v4546_v1  ;;  %v489_v21 = vmul.f32 %v4619_v53, %v4464_v37 }
  0xf5   : > { %v4678_v24 = vpop.permute.xlu0 %673  ;;  %v668_v37 = vmul.f32 %v4673_v9, %v4567_v8 }
  0xf6   : > { %v336_v45 = vpop.permute.xlu1 %335 }
  0xf7   : > { %655 = vrot.lane.b32.xlu2 %v644_v15, %s4320_s28  ;;  %v347_v13 = vadd.f32 %v336_v45, %v309_v25  ;;  %v666_v15 = vmul.f32 %v4656_v40, %v4412_v19 }
  0xf8   : > { %v516_v18 = vpop.permute.xlu2 %515 }
  0xf9   : > { %v381_v56 = vadd.f32 %v370_v62, %v347_v13  ;;  %v4701_v13 = vrot.slane %v4643_v10, 1 }
  0xfb   : > { %v403_v5 = vadd.f32 %v399_v3, %v381_v56  ;;  %884 = vrot.lane.b32.xlu0 %v873_v14, %s4320_s28  ;;  %7285 = vst [vmem:[#allocation34_spill] sm:$0xff] %v4701_v13  ;;  %v4706_v56 = vld [vmem:[%s4387_s26 + $0x4b] sm:$0x1] }
  0xfc   : > { %938 = vrot.lane.b32.xlu1 %v930_v12, %s4320_s28  ;;  %7286 = vst [vmem:[#allocation35_spill] sm:$0xff] %v4706_v56  ;;  %v895_v12 = vmul.f32 %v4665_v59, %v4412_v19  ;;  %v957_v19 = vmul.f32 %v4706_v56, %v4599_v33  ;;  %v4778_v33 = vld [vmem:[%s4387_s26 + $0x33] sm:$0x1] }
  0xfd   : > { %v437_v25 = vadd.f32 %v426_v17, %v403_v5  ;;  %v372_v45 = vpop.permute.xlu0 %371  ;;  %v933_v5 = vmul.f32 %v4706_v56, %v4432_v26  ;;  %v310_v17 = vmul.f32 %v4701_v13, %v4415_v20  ;;  %v897_v20 = vmul.f32 %v4687_v61, %v4567_v8 }
  0xfe   : > { %v338_v55 = vpop.permute.xlu1 %337 }
  0xff   : > { %675 = vrot.lane.b32.xlu2 %v666_v15, %s4319_s27  ;;  %v471_v62 = vadd.f32 %v460_v54, %v437_v25  ;;  %v348_v54 = vadd.f32 %v338_v55, %v310_v17  ;;  %v702_v17 = vmul.f32 %v4602_v38, %v4458_v35 }
 0x101   : > { %v550_v14 = vpop.permute.xlu2 %549  ;;  %v493_v3 = vadd.f32 %v489_v21, %v471_v62  ;;  %v4722_v21 = vrot.slane %v4596_v32, 1  ;;  %v382_v26 = vadd.f32 %v372_v45, %v348_v54  ;;  %v4740_v45 = vrot.slane %v4619_v53, 1 }
 0x103   : > { %904 = vrot.lane.b32.xlu0 %v895_v12, %s4319_s27  ;;  %7287 = vst [vmem:[#allocation36_spill] sm:$0xff] %v4722_v21  ;;  %v4729_v12 = vld [vmem:[%s4387_s26 + $0x1b] sm:$0x1]  ;;  %v400_v55 = vmul.f32 %v4722_v21, %v4461_v36  ;;  %v527_v1 = vadd.f32 %v516_v18, %v493_v3  ;;  %v954_v18 = vmul.f32 %v4684_v27, %v4443_v30 }
 0x104   : > { %944 = vrot.lane.b32.xlu1 %v933_v5, %s4320_s28  ;;  %7288 = vst [vmem:[#allocation37_spill] sm:$0xff] %v4729_v12  ;;  %v955_v5 = vmul.f32 %v4729_v12, %v4455_v34  ;;  %v931_v36 = vmul.f32 %v4729_v12, %v4458_v35  ;;  %v956_v35 = vmul.f32 %v4778_v33, %v4481_v43 }
 0x105   : > { %v4718_v15 = vpop.permute.xlu0 %431  ;;  %v404_v54 = vadd.f32 %v400_v55, %v382_v26 }
 0x106   : > { %v374_v25 = vpop.permute.xlu1 %373 }
 0x107   : > { %679 = vrot.lane.b32.xlu2 %v668_v37, %s4319_s27 }
 0x109   : > { %v4724_v62 = vpop.permute.xlu2 %649 }
 0x10b   : > { %908 = vrot.lane.b32.xlu0 %v897_v20, %s4319_s27 }
 0x10c   : > { %964 = vrot.lane.b32.xlu1 %v955_v5, %s4319_s27  ;;  %v490_v5 = vmul.f32 %v4740_v45, %v4507_v52 }
 0x10d   : > { %v462_v37 = vpop.permute.xlu0 %461 }
 0x10e   : > { %v428_v8 = vpop.permute.xlu1 %427 }
 0x10f   : > { %711 = vrot.lane.b32.xlu2 %v702_v17, %s4320_s28  ;;  %v438_v34 = vadd.f32 %v428_v8, %v404_v54  ;;  %v725_v8 = vmul.f32 %v4561_v6, %v4443_v30  ;;  %v561_v17 = vadd.f32 %v550_v14, %v527_v1  ;;  %v4760_v54 = vrot.slane %v4643_v10, 2 }
 0x110   : > { %v727_v1 = vmul.f32 %v4543_v0, %v4481_v43  ;;  %v4784_v30 = vrot.slane %v4661_v47, 1 }
 0x111   : > { %v340_v22 = vpop.permute.xlu2 %339  ;;  %v472_v20 = vadd.f32 %v462_v37, %v438_v34  ;;  %v4757_v37 = vld [vmem:[%s4387_s26 + $0x34] sm:$0x1]  ;;  %7289 = vst [vmem:[#allocation38_spill] sm:$0xff] %v4760_v54  ;;  %v576_v3 = vadd.f32 %v4661_v47, %v561_v17  ;;  %v311_v14 = vmul.f32 %v4760_v54, %v4441_v29 }
 0x112   : > { %7291 = vst [vmem:[#allocation40_spill] sm:$0xff] %v4784_v30 }
 0x113   : > { %940 = vrot.lane.b32.xlu0 %v931_v36, %s4320_s28  ;;  %v494_v26 = vadd.f32 %v490_v5, %v472_v20  ;;  %v4775_v5 = vrot.slane %v4643_v10, 3  ;;  %v349_v17 = vadd.f32 %v340_v22, %v311_v14 }
 0x114   : > { %968 = vrot.lane.b32.xlu1 %v957_v19, %s4319_s27  ;;  %v992_v19 = vmul.f32 %v4757_v37, %v4617_v49 }
 0x115   : > { %v4753_v55 = vpop.permute.xlu0 %521  ;;  %7290 = vst [vmem:[#allocation39_spill] sm:$0xff] %v4775_v5  ;;  %v312_v14 = vmul.f32 %v4775_v5, %v4554_v4  ;;  %v4808_v4 = vrot.slane %v4619_v53, 2 }
 0x116   : > { %v464_v34 = vpop.permute.xlu1 %463 }
 0x117   : > { %733 = vrot.lane.b32.xlu2 %v725_v8, %s4319_s27  ;;  %v580_v8 = vadd.f32 3.0, %v576_v3 }
 0x119   : > { %v342_v52 = vpop.permute.xlu2 %341  ;;  %v584_v22 = vmax.f32 %v580_v8, 0.0 }
 0x11a   : > { %v350_v43 = vadd.f32 %v342_v52, %v312_v14 }
 0x11b   : > { %962 = vrot.lane.b32.xlu0 %v954_v18, %s4319_s27 }
 0x11c   : > { %1002 = vrot.lane.b32.xlu1 %v992_v19, %s4320_s28  ;;  %v4781_v19 = vrot.slane %v4596_v32, 2 }
 0x11d   : > { %v552_v20 = vpop.permute.xlu0 %551 }
 0x11e   : > { %v518_v36 = vpop.permute.xlu1 %517 }
 0x11f   : > { %737 = vrot.lane.b32.xlu2 %v727_v1, %s4319_s27  ;;  %v528_v49 = vadd.f32 %v518_v36, %v494_v26  ;;  %v4789_v1 = vld [vmem:[%s4387_s26 + $0x1c] sm:$0x1]  ;;  %v383_v26 = vadd.f32 %v374_v25, %v349_v17  ;;  %v401_v25 = vmul.f32 %v4781_v19, %v4489_v46 }
 0x120   : > { %v1015_v27 = vmul.f32 %v4789_v1, %v4500_v50 }
 0x121   : > { %v376_v18 = vpop.permute.xlu2 %375  ;;  %v562_v29 = vadd.f32 %v552_v20, %v528_v49  ;;  %v761_v49 = vmul.f32 %v4584_v23, %v4468_v39  ;;  %v4801_v20 = vrot.slane %v4596_v32, 3  ;;  %v405_v56 = vadd.f32 %v401_v25, %v383_v26 }
 0x123   : > { %v577_v36 = vadd.f32 %v4784_v30, %v562_v29  ;;  %966 = vrot.lane.b32.xlu0 %v956_v35, %s4319_s27  ;;  %v588_v35 = vmin.f32 %v584_v22, 6.0  ;;  %v384_v29 = vadd.f32 %v376_v18, %v350_v43  ;;  %v402_v14 = vmul.f32 %v4801_v20, %v4438_v28 }
 0x124   : > { %1024 = vrot.lane.b32.xlu1 %v1015_v27, %s4319_s27  ;;  %v4812_v27 = vld [vmem:[%s4387_s26 + $0x4] sm:$0x1]  ;;  %v491_v30 = vmul.f32 %v4808_v4, %v4530_v60  ;;  %v764_v43 = vmul.f32 %v4607_v41, %v4477_v42  ;;  %v4832_v60 = vld [vmem:[%s4387_s26 + $0x4c] sm:$0x1] }
 0x125   : > { %v581_v50 = vadd.f32 3.0, %v577_v36  ;;  %v4803_v12 = vpop.permute.xlu0 %653  ;;  %v990_v46 = vmul.f32 %v4812_v27, %v4468_v39  ;;  %v406_v0 = vadd.f32 %v402_v14, %v384_v29  ;;  %v1016_v14 = vmul.f32 %v4757_v37, %v4521_v57 }
 0x126   : > { %v554_v8 = vpop.permute.xlu1 %553 }
 0x127   : > { %769 = vrot.lane.b32.xlu2 %v761_v49, %s4320_s28  ;;  %v585_v17 = vmax.f32 %v581_v50, 0.0  ;;  %v592_v49 = vmul.f32 0.16666667, %v588_v35  ;;  %v4824_v50 = vrot.slane %v4619_v53, 3  ;;  %v440_v26 = vadd.f32 %v4718_v15, %v406_v0 }
 0x129   : > { %v430_v59 = vpop.permute.xlu2 %429  ;;  %v589_v52 = vmin.f32 %v585_v17, 6.0  ;;  %v492_v35 = vmul.f32 %v4824_v50, %v4484_v44 }
 0x12a   : > { %v439_v61 = vadd.f32 %v430_v59, %v405_v56 }
 0x12b   : > { %v593_v23 = vmul.f32 0.16666667, %v589_v52  ;;  %998 = vrot.lane.b32.xlu0 %v990_v46, %s4320_s28  ;;  %v4852_v46 = vrot.slane %v4661_v47, 2 }
 0x12c   : > { %v473_v22 = vadd.f32 %v464_v34, %v439_v61  ;;  %v596_v61 = vmul.f32 %v592_v49, %v576_v3  ;;  %v787_v3 = vmul.f32 %v4634_v2, %v4521_v57 }
 0x12d   : > { %v597_v28 = vmul.f32 %v593_v23, %v577_v36  ;;  %v4826_v59 = vpop.permute.xlu0 %677 }
 0x12e   : > { %v495_v56 = vadd.f32 %v491_v30, %v473_v22  ;;  %v4828_v18 = vpop.permute.xlu1 %713  ;;  %v993_v30 = vmul.f32 %v4832_v60, %v4477_v42  ;;  %v932_v22 = vmul.f32 %v4778_v33, %v4539_v63 }
 0x12f   : > { %775 = vrot.lane.b32.xlu2 %v764_v43, %s4320_s28  ;;  %v604_v34 = vrot.slane %v597_v28, 7 }
 0x131   : > { %v466_v25 = vpop.permute.xlu2 %465  ;;  %v606_v36 = vsel %vm605_vm0, %v604_v34, %v596_v61 }
 0x132   : > { %v474_v23 = vadd.f32 %v466_v25, %v440_v26  ;;  %v608_v17 = vsel %vm607_vm1, %v604_v34, %v606_v36  ;;  %v4865_v25 = vrot.slane %v4661_v47, 3 }
 0x133   : > { %1004 = vrot.lane.b32.xlu0 %v993_v30, %s4320_s28 }
 0x134   : > { %v496_v29 = vadd.f32 %v492_v35, %v474_v23  ;;  %7292 = vst [vmem:[#allocation41_spill] sm:$0xff] %v4865_v25 }
 0x135   : > { %v4844_v0 = vpop.permute.xlu0 %709 }
 0x136   : > { %v4846_v15 = vpop.permute.xlu1 %771  ;;  %v530_v34 = vadd.f32 %v4753_v55, %v496_v29 }
 0x137   : > { %797 = vrot.lane.b32.xlu2 %v787_v3, %s4319_s27  ;;  %v991_v3 = vmul.f32 %v4789_v1, %v4503_v51 }
 0x139   : > { %v520_v44 = vpop.permute.xlu2 %519 }
 0x13a   : > { %v529_v52 = vadd.f32 %v520_v44, %v495_v56 }
 0x13b   : > { %1026 = vrot.lane.b32.xlu0 %v1016_v14, %s4319_s27 }
 0x13c   : > { %v563_v49 = vadd.f32 %v554_v8, %v529_v52 }
 0x13d   : > { %v4858_v28 = vpop.permute.xlu0 %715 }
 0x13e   : > { %v578_v43 = vadd.f32 %v4852_v46, %v563_v49  ;;  %v4860_v61 = vpop.permute.xlu1 %793 }
 0x13f   : > { %942 = vrot.lane.b32.xlu2 %v932_v22, %s4320_s28 }
 0x140   : > { %v582_v56 = vadd.f32 3.0, %v578_v43 }
 0x141   : > { %v556_v26 = vpop.permute.xlu2 %555 }
 0x142   : > { %v586_v8 = vmax.f32 %v582_v56, 0.0  ;;  %v564_v35 = vadd.f32 %v556_v26, %v530_v34 }
 0x144   : > { %v590_v23 = vmin.f32 %v586_v8, 6.0  ;;  %v579_v30 = vadd.f32 %v4865_v25, %v564_v35 }
 0x145   : > { %v4870_v14 = vpop.permute.xlu0 %735 }
 0x146   : > { %v594_v44 = vmul.f32 0.16666667, %v590_v23  ;;  %v583_v52 = vadd.f32 3.0, %v579_v30  ;;  %v4872_v49 = vpop.permute.xlu1 %799  ;;  %v1014_v23 = vmul.f32 %v4812_v27, %v4494_v48 }
 0x147   : > { %1000 = vrot.lane.b32.xlu2 %v991_v3, %s4320_s28 }
 0x148   : > { %v598_v55 = vmul.f32 %v594_v44, %v578_v43  ;;  %v587_v29 = vmax.f32 %v583_v52, 0.0 }
 0x149   : > { %v652_v22 = vpop.permute.xlu2 %651 }
 0x14a   : > { %v591_v56 = vmin.f32 %v587_v29, 6.0  ;;  %v609_v34 = vrot.slane %v598_v55, 6 }
 0x14c   : > { %v595_v26 = vmul.f32 0.16666667, %v591_v56  ;;  %v622_v8 = vsel %vm610_vm2, %v609_v34, %v606_v36  ;;  %v611_v35 = vsel %vm610_vm2, %v609_v34, %v608_v17 }
 0x14d   : > { %v613_v57 = vsel %vm612_vm3, %v609_v34, %v611_v35  ;;  %v740_v39 = vpop.permute.xlu0 %739 }
 0x14e   : > { %v599_v42 = vmul.f32 %v595_v26, %v579_v30  ;;  %v4881_v43 = vpop.permute.xlu1 %878 }
 0x14f   : > { %1022 = vrot.lane.b32.xlu2 %v1014_v23, %s4319_s27 }
 0x150   : > { %v614_v3 = vrot.slane %v599_v42, 5  ;;  %v1017_v42 = vmul.f32 %v4832_v60, %v4593_v31 }
 0x151   : > { %v656_v44 = vpop.permute.xlu2 %655 }
 0x152   : > { %v623_v36 = vsel %vm615_vm4, %v614_v3, %v622_v8  ;;  %v616_v17 = vsel %vm615_vm4, %v614_v3, %v613_v57  ;;  %v636_v57 = vmul.f32 %v4673_v9, %v4775_v5  ;;  %v634_v8 = vmul.f32 %v4656_v40, %v4701_v13 }
 0x153   : > { %v625_v30 = vsel %vm620_vm5, %v623_v36, 0.0  ;;  %v618_v52 = vsel %vm617_vm6, %v614_v3, %v616_v17  ;;  %v696_v36 = vmul.f32 %v4579_v16, %v4801_v20  ;;  %v694_v40 = vmul.f32 %v4602_v38, %v4722_v21 }
 0x154   : > { %626 = vadd.xlane.f32.xlu1 %v625_v30  ;;  %621 = vst.msk [vmem:[%s4887_s6] sm:$0xf] %vm620_vm5, %v618_v52  ;;  %v664_v35 = vadd.f32 %v656_v44, %v636_v57  ;;  %v662_v3 = vadd.f32 %v652_v22, %v634_v8  ;;  %v633_v30 = vmul.f32 %v4390_v11, %v4643_v10 }
 0x155   : > { %v4897_v55 = vpop.permute.xlu0 %773  ;;  %v756_v16 = vmul.f32 %v4607_v41, %v4824_v50  ;;  %v754_v38 = vmul.f32 %v4564_v7, %v4740_v45  ;;  %v7294_v7 = vld [vmem:[#allocation24_spill] sm:$0xff] }
 0x156   : > { %v4899_v29 = vpop.permute.xlu1 %882  ;;  %v661_v9 = vadd.f32 %v4724_v62, %v633_v30  ;;  %v635_v62 = vmul.f32 %v4525_v58, %v4760_v54 }
 0x157   : > { %1028 = vrot.lane.b32.xlu2 %v1017_v42, %s4319_s27 }
 0x158   : > { %v685_v11 = vadd.f32 %v4678_v24, %v661_v9 }
 0x159   : > { %v676_v56 = vpop.permute.xlu2 %675 }
 0x15a   : > { %v686_v52 = vadd.f32 %v676_v56, %v662_v3 }
 0x15c   : > { %v698_v22 = vadd.f32 %v694_v40, %v686_v52 }
 0x15d   : > { %v796_v34 = vpop.permute.xlu0 %795 }
 0x15e   : > { %v4904_v26 = vpop.permute.xlu1 %902 }
 0x161   : > { %v680_v23 = vpop.permute.xlu2 %679 }
 0x162   : > { %v688_v17 = vadd.f32 %v680_v23, %v664_v35 }
 0x164   : > { %v700_v42 = vadd.f32 %v696_v36, %v688_v17 }
 0x165   : > { %v881_v48 = vpop.permute.xlu0 %880 }
 0x166   : > { %v724_v31 = vadd.f32 %v4858_v28, %v700_v42  ;;  %v4916_v44 = vpop.permute.xlu1 %906  ;;  %v693_v28 = vmul.f32 %v4561_v6, %v4596_v32  ;;  %v7293_v6 = vld [vmem:[#allocation21_spill] sm:$0xff] }
 0x167   : > { %v695_v52 = vmul.f32 %v7293_v6, %v4781_v19 }
 0x168   : > { %v748_v57 = vadd.f32 %v740_v39, %v724_v31  ;;  %v663_v31 = vadd.f32 %v4803_v12, %v635_v62  ;;  %v697_v41 = vadd.f32 %v693_v28, %v685_v11 }
 0x169   : > { %v712_v8 = vpop.permute.xlu2 %711 }
 0x16a   : > { %v722_v56 = vadd.f32 %v712_v8, %v698_v22  ;;  %v4921_v35 = vadd.f32 %v756_v16, %v748_v57  ;;  %v687_v36 = vadd.f32 %v4826_v59, %v663_v31  ;;  %v721_v17 = vadd.f32 %v4844_v0, %v697_v41  ;;  %v7295_v59 = vld [vmem:[#allocation40_spill] sm:$0xff] }
 0x16c   : > { %v746_v39 = vadd.f32 %v4870_v14, %v722_v56  ;;  %v753_v14 = vmul.f32 %v7294_v7, %v4619_v53  ;;  %v699_v9 = vadd.f32 %v695_v52, %v687_v36  ;;  %v7296_v56 = vld [vmem:[#allocation33_spill] sm:$0xff]  ;;  %v7299_v7 = vld [vmem:[#allocation28_spill] sm:$0xff] }
 0x16d   : > { %v885_v3 = vpop.permute.xlu0 %884  ;;  %v865_v62 = vmul.f32 %v7296_v56, %v4775_v5 }
 0x16e   : > { %v758_v23 = vadd.f32 %v754_v38, %v746_v39  ;;  %v939_v24 = vpop.permute.xlu1 %938  ;;  %v723_v16 = vadd.f32 %v4828_v18, %v699_v9  ;;  %v7297_v39 = vld [vmem:[#allocation31_spill] sm:$0xff]  ;;  %v7300_v9 = vld [vmem:[#allocation37_spill] sm:$0xff] }
 0x16f   : > { %v893_v31 = vadd.f32 %v885_v3, %v865_v62 }
 0x170   : > { %v782_v58 = vadd.f32 %v4846_v15, %v758_v23  ;;  %v755_v15 = vmul.f32 %v4634_v2, %v4808_v4 }
 0x171   : > { %v734_v30 = vpop.permute.xlu2 %733 }
 0x172   : > { %v745_v42 = vadd.f32 %v734_v30, %v721_v17  ;;  %v806_v12 = vadd.f32 %v796_v34, %v782_v58  ;;  %v863_v34 = vmul.f32 %v7297_v39, %v4701_v13  ;;  %v7298_v17 = vld [vmem:[#allocation35_spill] sm:$0xff] }
 0x173   : > { %v925_v58 = vmul.f32 %v7298_v17, %v4801_v20 }
 0x174   : > { %v757_v40 = vadd.f32 %v753_v14, %v745_v42  ;;  %v810_v8 = vadd.f32 %v806_v12, %v7295_v59  ;;  %v891_v23 = vadd.f32 %v881_v48, %v863_v34  ;;  %v862_v14 = vmul.f32 %v7299_v7, %v4643_v10 }
 0x175   : > { %v905_v22 = vpop.permute.xlu0 %904  ;;  %v923_v12 = vmul.f32 %v7300_v9, %v4722_v21  ;;  %v985_v34 = vmul.f32 %v4832_v60, %v4824_v50 }
 0x176   : > { %v945_v57 = vpop.permute.xlu1 %944  ;;  %v814_v28 = vadd.f32 3.0, %v810_v8  ;;  %v915_v6 = vadd.f32 %v905_v22, %v891_v23  ;;  %v890_v48 = vadd.f32 %v4881_v43, %v862_v14  ;;  %v7302_v14 = vld [vmem:[#allocation29_spill] sm:$0xff] }
 0x177   : > { %v864_v9 = vmul.f32 %v7302_v14, %v4760_v54 }
 0x178   : > { %v818_v30 = vmax.f32 %v814_v28, 0.0  ;;  %v914_v22 = vadd.f32 %v4904_v26, %v890_v48 }
 0x179   : > { %v738_v0 = vpop.permute.xlu2 %737 }
 0x17a   : > { %v747_v11 = vadd.f32 %v738_v0, %v723_v16  ;;  %v822_v16 = vmin.f32 %v818_v30, 6.0  ;;  %v927_v0 = vadd.f32 %v923_v12, %v915_v6 }
 0x17c   : > { %v759_v38 = vadd.f32 %v755_v15, %v747_v11 }
 0x17d   : > { %v909_v41 = vpop.permute.xlu0 %908 }
 0x17e   : > { %v917_v36 = vadd.f32 %v909_v41, %v893_v31  ;;  %v965_v18 = vpop.permute.xlu1 %964  ;;  %v826_v31 = vmul.f32 0.16666667, %v822_v16  ;;  %v783_v16 = vadd.f32 %v4897_v55, %v759_v38  ;;  %v924_v55 = vmul.f32 %v4778_v33, %v4781_v19 }
 0x180   : > { %v929_v52 = vadd.f32 %v925_v58, %v917_v36  ;;  %v983_v36 = vmul.f32 %v4789_v1, %v4740_v45  ;;  %v830_v60 = vmul.f32 %v826_v31, %v810_v8 }
 0x181   : > { %v770_v2 = vpop.permute.xlu2 %769 }
 0x182   : > { %v781_v42 = vadd.f32 %v770_v2, %v757_v40  ;;  %v953_v56 = vadd.f32 %v945_v57, %v929_v52  ;;  %v837_v48 = vrot.slane %v830_v60, 7 }
 0x184   : > { %v805_v3 = vadd.f32 %v4860_v61, %v781_v42  ;;  %v7301_v61 = vld [vmem:[#allocation32_spill] sm:$0xff] }
 0x185   : > { %v941_v11 = vpop.permute.xlu0 %940  ;;  %v922_v41 = vmul.f32 %v7301_v61, %v4596_v32 }
 0x186   : > { %v809_v15 = vadd.f32 %v805_v3, %v4661_v47  ;;  %v951_v62 = vadd.f32 %v941_v11, %v927_v0  ;;  %v969_v40 = vpop.permute.xlu1 %968 }
 0x187   : > { %v977_v39 = vadd.f32 %v969_v40, %v953_v56  ;;  %v926_v58 = vadd.f32 %v922_v41, %v914_v22 }
 0x188   : > { %v813_v28 = vadd.f32 3.0, %v809_v15  ;;  %v975_v23 = vadd.f32 %v965_v18, %v951_v62 }
 0x189   : > { %v776_v43 = vpop.permute.xlu2 %775  ;;  %v4963_v26 = vadd.f32 %v985_v34, %v977_v39  ;;  %v950_v52 = vadd.f32 %v939_v24, %v926_v58  ;;  %v892_v24 = vadd.f32 %v4899_v29, %v864_v9 }
 0x18a   : > { %v817_v17 = vmax.f32 %v813_v28, 0.0  ;;  %v784_v57 = vadd.f32 %v776_v43, %v4921_v35  ;;  %v987_v30 = vadd.f32 %v983_v36, %v975_v23  ;;  %v982_v35 = vmul.f32 %v4812_v27, %v4619_v53 }
 0x18b   : > { %v916_v62 = vadd.f32 %v4916_v44, %v892_v24  ;;  %v984_v44 = vmul.f32 %v4757_v37, %v4808_v4 }
 0x18c   : > { %v821_v6 = vmin.f32 %v817_v17, 6.0  ;;  %v808_v2 = vadd.f32 %v4872_v49, %v784_v57 }
 0x18d   : > { %v963_v18 = vpop.permute.xlu0 %962  ;;  %v928_v39 = vadd.f32 %v924_v55, %v916_v62 }
 0x18e   : > { %v825_v42 = vmul.f32 0.16666667, %v821_v6  ;;  %v812_v7 = vadd.f32 %v808_v2, %v4865_v25  ;;  %v974_v1 = vadd.f32 %v963_v18, %v950_v52  ;;  %v1003_v34 = vpop.permute.xlu1 %1002 }
 0x190   : > { %v829_v12 = vmul.f32 %v825_v42, %v809_v15  ;;  %v816_v3 = vadd.f32 3.0, %v812_v7  ;;  %v986_v49 = vadd.f32 %v982_v35, %v974_v1 }
 0x191   : > { %v798_v0 = vpop.permute.xlu2 %797 }
 0x192   : > { %v820_v8 = vmax.f32 %v816_v3, 0.0  ;;  %v807_v11 = vadd.f32 %v798_v0, %v783_v16  ;;  %v838_v56 = vsel %vm605_vm0, %v837_v48, %v829_v12 }
 0x193   : > { %v839_v22 = vsel %vm607_vm1, %v837_v48, %v838_v56 }
 0x194   : > { %v811_v40 = vadd.f32 %v807_v11, %v4852_v46  ;;  %v824_v27 = vmin.f32 %v820_v8, 6.0 }
 0x195   : > { %v967_v28 = vpop.permute.xlu0 %966 }
 0x196   : > { %v815_v15 = vadd.f32 3.0, %v811_v40  ;;  %v828_v31 = vmul.f32 0.16666667, %v824_v27  ;;  %v1025_v18 = vpop.permute.xlu1 %1024 }
 0x198   : > { %v819_v38 = vmax.f32 %v815_v15, 0.0  ;;  %v832_v36 = vmul.f32 %v828_v31, %v812_v7 }
 0x199   : > { %v943_v29 = vpop.permute.xlu2 %942 }
 0x19a   : > { %v823_v61 = vmin.f32 %v819_v38, 6.0  ;;  %v952_v41 = vadd.f32 %v943_v29, %v928_v39  ;;  %v843_v60 = vrot.slane %v832_v36, 5 }
 0x19c   : > { %v827_v23 = vmul.f32 0.16666667, %v823_v61  ;;  %v976_v43 = vadd.f32 %v967_v28, %v952_v41 }
 0x19d   : > { %v999_v57 = vpop.permute.xlu0 %998 }
 0x19e   : > { %v831_v17 = vmul.f32 %v827_v23, %v811_v40  ;;  %v988_v58 = vadd.f32 %v984_v44, %v976_v43  ;;  %v1010_v3 = vadd.f32 %v999_v57, %v986_v49 }
 0x1a0   : > { %v840_v6 = vrot.slane %v831_v17, 6 }
 0x1a1   : > { %v1001_v2 = vpop.permute.xlu2 %1000 }
 0x1a2   : > { %v1011_v33 = vadd.f32 %v1001_v2, %v987_v30  ;;  %v851_v52 = vsel %vm610_vm2, %v840_v6, %v838_v56  ;;  %v841_v42 = vsel %vm610_vm2, %v840_v6, %v839_v22  ;;  %v1012_v56 = vadd.f32 %v1003_v34, %v988_v58  ;;  %v4997_v2 = vld [vmem:[%s4387_s26 + $0x3] sm:$0x1] }
 0x1a3   : > { %v852_v14 = vsel %vm615_vm4, %v843_v60, %v851_v52  ;;  %v842_v9 = vsel %vm612_vm3, %v840_v6, %v841_v42 }
 0x1a4   : > { %v1035_v1 = vadd.f32 %v1025_v18, %v1011_v33  ;;  %v854_v37 = vsel %vm620_vm5, %v852_v14, 0.0  ;;  %v844_v7 = vsel %vm615_vm4, %v843_v60, %v842_v9  ;;  %v7303_v33 = vld [vmem:[#allocation3_spill] sm:$0xff] }
 0x1a5   : > { %855 = vadd.xlane.f32.xlu2 %v854_v37  ;;  %v845_v35 = vsel %vm617_vm6, %v843_v60, %v844_v7  ;;  %v1005_v30 = vpop.permute.xlu0 %1004  ;;  %v1099_v52 = vmul.f32 %v4997_v2, %v7303_v33 }
 0x1a6   : > { %v1039_v12 = vadd.f32 %v1035_v1, %v7295_v59  ;;  %846 = vrot.lane.b32.xlu0 %v845_v35, %s4321_s7  ;;  %v1013_v15 = vadd.f32 %v1005_v30, %v4963_v26 }
 0x1a8   : > { %v1043_v16 = vadd.f32 3.0, %v1039_v12 }
 0x1a9   : > { %v1023_v48 = vpop.permute.xlu2 %1022 }
 0x1aa   : > { %v1047_v0 = vmax.f32 %v1043_v16, 0.0  ;;  %v1034_v24 = vadd.f32 %v1023_v48, %v1010_v3  ;;  %v7304_v16 = vld [vmem:[#allocation18_spill] sm:$0xff] }
 0x1ac   : > { %v1051_v8 = vmin.f32 %v1047_v0, 6.0  ;;  %v1038_v11 = vadd.f32 %v1034_v24, %v4661_v47  ;;  %v5016_v0 = vld [vmem:[%s4387_s26 + $0x1b] sm:$0x1]  ;;  %v7305_v24 = vld [vmem:[#allocation4_spill] sm:$0xff] }
 0x1ad   : > { %v1027_v40 = vpop.permute.xlu0 %1026 }
 0x1ae   : > { %v1055_v22 = vmul.f32 0.16666667, %v1051_v8  ;;  %v1042_v62 = vadd.f32 3.0, %v1038_v11  ;;  %v1036_v27 = vadd.f32 %v1027_v40, %v1012_v56  ;;  %v1100_v8 = vmul.f32 %v5016_v0, %v7305_v24  ;;  %v7307_v40 = vld [vmem:[#allocation22_spill] sm:$0xff] }
 0x1b0   : > { %v1046_v28 = vmax.f32 %v1042_v62, 0.0  ;;  %v1040_v55 = vadd.f32 %v1036_v27, %v4852_v46  ;;  %v1059_v39 = vmul.f32 %v1055_v22, %v1039_v12  ;;  %v5007_v12 = vld [vmem:[%s4387_s26 + $0x33] sm:$0x1]  ;;  %v5026_v62 = vld [vmem:[%s4387_s26 + $0x4b] sm:$0x1] }
 0x1b1   : > { %v1029_v38 = vpop.permute.xlu2 %1028  ;;  %v1101_v48 = vmul.f32 %v5007_v12, %v7304_v16  ;;  %v1102_v27 = vmul.f32 %v5026_v62, %v7307_v40 }
 0x1b2   : > { %v1050_v49 = vmin.f32 %v1046_v28, 6.0  ;;  %v1037_v29 = vadd.f32 %v1029_v38, %v1013_v15  ;;  %v1044_v31 = vadd.f32 3.0, %v1040_v55  ;;  %v1066_v34 = vrot.slane %v1059_v39, 7  ;;  %v7308_v15 = vld [vmem:[#allocation8_spill] sm:$0xff]  ;;  %v7309_v38 = vld [vmem:[#allocation5_spill] sm:$0xff] }
 0x1b3   : > { %v1125_v28 = vmul.f32 %v5007_v12, %v7308_v15  ;;  %v1124_v39 = vmul.f32 %v5016_v0, %v7309_v38 }
 0x1b4   : > { %v1054_v61 = vmul.f32 0.16666667, %v1050_v49  ;;  %v1041_v41 = vadd.f32 %v1037_v29, %v4865_v25  ;;  %v1048_v23 = vmax.f32 %v1044_v31, 0.0  ;;  %v7310_v49 = vld [vmem:[#allocation6_spill] sm:$0xff]  ;;  %v5044_v31 = vld [vmem:[%s4387_s26 + $0x4c] sm:$0x1] }
 0x1b6   : > { %v1058_v43 = vmul.f32 %v1054_v61, %v1038_v11  ;;  %v1045_v44 = vadd.f32 3.0, %v1041_v41  ;;  %v1052_v36 = vmin.f32 %v1048_v23, 6.0  ;;  %v7306_v11 = vld [vmem:[#allocation2_spill] sm:$0xff]  ;;  %v5047_v61 = vld [vmem:[%s4387_s26 + $0x34] sm:$0x1] }
 0x1b7   : > { %v1123_v56 = vmul.f32 %v4997_v2, %v7306_v11 }
 0x1b8   : > { %v1067_v17 = vsel %vm605_vm0, %v1066_v34, %v1058_v43  ;;  %v1049_v26 = vmax.f32 %v1045_v44, 0.0  ;;  %v1056_v57 = vmul.f32 0.16666667, %v1052_v36  ;;  %v1161_v44 = vmul.f32 %v5047_v61, %v4539_v63  ;;  %v5059_v36 = vld [vmem:[%s4387_s26 + $0x1d] sm:$0x1] }
 0x1b9   : > { %v1068_v58 = vsel %vm607_vm1, %v1066_v34, %v1067_v17  ;;  %v7312_v34 = vld [vmem:[#allocation23_spill] sm:$0xff]  ;;  %v5188_v63 = vld [vmem:[%s4387_s26 + $0x5] sm:$0x1] }
 0x1ba   : > { %v1053_v6 = vmin.f32 %v1049_v26, 6.0  ;;  %v1060_v60 = vmul.f32 %v1056_v57, %v1040_v55  ;;  %v5035_v55 = vld [vmem:[%s4387_s26 + $0x4] sm:$0x1]  ;;  %v1126_v43 = vmul.f32 %v5026_v62, %v7312_v34  ;;  %v1220_v26 = vmul.f32 %v5059_v36, %v4503_v51  ;;  %v7313_v57 = vld [vmem:[#allocation11_spill] sm:$0xff]  ;;  %7335 = vst [vmem:[#allocation42_spill] sm:$0xff] %v5188_v63 }
 0x1bb   : > { %v1159_v29 = vmul.f32 %v5035_v55, %v7310_v49 }
 0x1bc   : > { %v1057_v42 = vmul.f32 0.16666667, %v1053_v6  ;;  %v1069_v18 = vrot.slane %v1060_v60, 6  ;;  %v7314_v6 = vld [vmem:[#allocation10_spill] sm:$0xff] }
 0x1bd   : > { %1107 = vrot.lane.b32.xlu2 %v1099_v52, %s4320_s28  ;;  %v5074_v52 = vld [vmem:[%s4387_s26 + $0x5] sm:$0x1] }
 0x1be   : > { %v1061_v14 = vmul.f32 %v1057_v42, %v1041_v41  ;;  %v1070_v9 = vsel %vm610_vm2, %v1069_v18, %v1068_v58  ;;  %v1080_v1 = vsel %vm610_vm2, %v1069_v18, %v1067_v17  ;;  %v7311_v41 = vld [vmem:[#allocation7_spill] sm:$0xff]  ;;  %v5062_v17 = vld [vmem:[%s4387_s26 + $0x1c] sm:$0x1] }
 0x1bf   : > { %v1071_v37 = vsel %vm612_vm3, %v1069_v18, %v1070_v9  ;;  %v1162_v23 = vmul.f32 %v5044_v31, %v7311_v41  ;;  %v1160_v58 = vmul.f32 %v5062_v17, %v7313_v57  ;;  %v1184_v60 = vmul.f32 %v5062_v17, %v7314_v6  ;;  %v7315_v42 = vld [vmem:[#allocation15_spill] sm:$0xff] }
 0x1c0   : > { %v1072_v7 = vrot.slane %v1061_v14, 5  ;;  %v1243_v18 = vmul.f32 %v5074_v52, %v7315_v42  ;;  %v7316_v14 = vld [vmem:[#allocation9_spill] sm:$0xff]  ;;  %v1154_v57 = vmul.f32 %v5044_v31, %v4801_v20 }
 0x1c1   : > { %v1183_v9 = vmul.f32 %v5035_v55, %v7316_v14 }
 0x1c2   : > { %v1073_v35 = vsel %vm615_vm4, %v1072_v7, %v1071_v37  ;;  %v1081_v30 = vsel %vm615_vm4, %v1072_v7, %v1080_v1  ;;  %v7317_v1 = vld [vmem:[#allocation26_spill] sm:$0xff] }
 0x1c3   : > { %v1074_v3 = vsel %vm617_vm6, %v1072_v7, %v1073_v35  ;;  %v1083_v22 = vsel %vm620_vm5, %v1081_v30, 0.0  ;;  %v1186_v37 = vmul.f32 %v5044_v31, %v7317_v1  ;;  %v5086_v7 = vld [vmem:[%s4387_s26 + $0x35] sm:$0x1]  ;;  %v5089_v35 = vld [vmem:[%s4387_s26 + $0x4d] sm:$0x1]  ;;  %v7318_v30 = vld [vmem:[#allocation25_spill] sm:$0xff] }
 0x1c4   : > { %1075 = vrot.lane.b32.xlu1 %v1074_v3, %s4322_s8  ;;  %v1246_v3 = vmul.f32 %v5089_v35, %v7318_v30 }
 0x1c5   : > { %1111 = vrot.lane.b32.xlu2 %v1101_v48, %s4320_s28  ;;  %v7319_v48 = vld [vmem:[#allocation14_spill] sm:$0xff] }
 0x1cc   : > { %1109 = vrot.lane.b32.xlu1 %v1100_v8, %s4320_s28  ;;  %v1185_v8 = vmul.f32 %v5047_v61, %v7319_v48  ;;  %v5168_v48 = vld [vmem:[%s4387_s26 + $0x6] sm:$0x1] }
 0x1cd   : > { %1131 = vrot.lane.b32.xlu2 %v1123_v56, %s4319_s27  ;;  %v7320_v56 = vld [vmem:[#allocation27_spill] sm:$0xff]  ;;  %7333 = vst [vmem:[#allocation32_spill] sm:$0xff] %v5168_v48 }
 0x1d0   : > { %1084 = vadd.xlane.f32.xlu0 %v1083_v22  ;;  %v1221_v22 = vmul.f32 %v5086_v7, %v7320_v56 }
 0x1d4   : > { %1113 = vrot.lane.b32.xlu1 %v1102_v27, %s4320_s28  ;;  %v5101_v27 = vld [vmem:[%s4387_s26 + $0x4] sm:$0x1] }
 0x1d5   : > { %1135 = vrot.lane.b32.xlu2 %v1125_v28, %s4319_s27  ;;  %7321 = vst [vmem:[#allocation21_spill] sm:$0xff] %v5101_v27  ;;  %v1328_v28 = vmul.f32 %v5101_v27, %v7303_v33 }
 0x1dc   : > { %1133 = vrot.lane.b32.xlu1 %v1124_v39, %s4319_s27  ;;  %v7322_v39 = vld [vmem:[#allocation12_spill] sm:$0xff] }
 0x1dd   : > { %1167 = vrot.lane.b32.xlu2 %v1159_v29, %s4320_s28  ;;  %v1219_v29 = vmul.f32 %v5074_v52, %v7322_v39 }
 0x1e4   : > { %1173 = vrot.lane.b32.xlu0 %v1162_v23, %s4320_s28  ;;  %1137 = vrot.lane.b32.xlu1 %v1126_v43, %s4319_s27  ;;  %v7323_v23 = vld [vmem:[#allocation16_spill] sm:$0xff] }
 0x1e5   : > { %1171 = vrot.lane.b32.xlu2 %v1161_v44, %s4320_s28  ;;  %v1244_v43 = vmul.f32 %v5059_v36, %v7323_v23  ;;  %v5113_v44 = vld [vmem:[%s4387_s26 + $0x34] sm:$0x1] }
 0x1e6   : > { %7324 = vst [vmem:[#allocation24_spill] sm:$0xff] %v5113_v44 }
 0x1ec   : > { %1229 = vrot.lane.b32.xlu0 %v1220_v26, %s4320_s28  ;;  %1169 = vrot.lane.b32.xlu1 %v1160_v58, %s4320_s28  ;;  %v1330_v26 = vmul.f32 %v5113_v44, %v7304_v16  ;;  %v7325_v58 = vld [vmem:[#allocation13_spill] sm:$0xff] }
 0x1ed   : > { %1193 = vrot.lane.b32.xlu2 %v1184_v60, %s4319_s27  ;;  %v1222_v60 = vmul.f32 %v5089_v35, %v7325_v58 }
 0x1f4   : > { %1251 = vrot.lane.b32.xlu0 %v1243_v18, %s4319_s27  ;;  %1191 = vrot.lane.b32.xlu1 %v1183_v9, %s4319_s27  ;;  %v1352_v18 = vmul.f32 %v5101_v27, %v7306_v11  ;;  %v7326_v9 = vld [vmem:[#allocation19_spill] sm:$0xff]  ;;  %v5162_v27 = vld [vmem:[%s4387_s26 + $0x1e] sm:$0x1] }
 0x1f5   : > { %1197 = vrot.lane.b32.xlu2 %v1186_v37, %s4319_s27  ;;  %v1245_v37 = vmul.f32 %v5086_v7, %v7326_v9  ;;  %7332 = vst [vmem:[#allocation37_spill] sm:$0xff] %v5162_v27  ;;  %v1449_v58 = vmul.f32 %v5162_v27, %v4503_v51 }
 0x1fc   : > { %1257 = vrot.lane.b32.xlu0 %v1246_v3, %s4319_s27  ;;  %1195 = vrot.lane.b32.xlu1 %v1185_v8, %s4319_s27 }
 0x1fd   : > { %1231 = vrot.lane.b32.xlu2 %v1221_v22, %s4320_s28  ;;  %v1354_v22 = vmul.f32 %v5113_v44, %v7308_v15 }
 0x204   : > { %1336 = vrot.lane.b32.xlu0 %v1328_v28, %s4320_s28  ;;  %1227 = vrot.lane.b32.xlu1 %v1219_v29, %s4320_s28  ;;  %v5135_v28 = vld [vmem:[%s4387_s26 + $0x5] sm:$0x1] }
 0x205   : > { %1253 = vrot.lane.b32.xlu2 %v1244_v43, %s4319_s27  ;;  %7328 = vst [vmem:[#allocation33_spill] sm:$0xff] %v5135_v28  ;;  %v1388_v43 = vmul.f32 %v5135_v28, %v7310_v49  ;;  %v5174_v28 = vld [vmem:[%s4387_s26 + $0x4e] sm:$0x1] }
 0x206   : > { %v1475_v51 = vmul.f32 %v5174_v28, %v7318_v30 }
 0x20c   : > { %1340 = vrot.lane.b32.xlu0 %v1330_v26, %s4320_s28  ;;  %1233 = vrot.lane.b32.xlu1 %v1222_v60, %s4320_s28  ;;  %v5141_v26 = vld [vmem:[%s4387_s26 + $0x4d] sm:$0x1] }
 0x20d   : > { %7329 = vst [vmem:[#allocation31_spill] sm:$0xff] %v5141_v26 }
 0x214   : > { %1360 = vrot.lane.b32.xlu0 %v1352_v18, %s4319_s27  ;;  %1255 = vrot.lane.b32.xlu1 %v1245_v37, %s4319_s27  ;;  %v1391_v18 = vmul.f32 %v5141_v26, %v7311_v41  ;;  %v5148_v37 = vpop.xlane.xlu1 %626 }
 0x215   : > { %7330 = vst [vmem:[#allocation35_spill] sm:$0xff] %v5148_v37 }
 0x218   : > { %v5127_v3 = vpop.xlane.xlu2 %855  ;;  %v847_v8 = vpop.permute.xlu0 %846 }
 0x219   : > { %7327 = vst [vmem:[#allocation40_spill] sm:$0xff] %v5127_v3 }
 0x21a   : > { %850 = vst.msk [vmem:[%s4887_s6] sm:$0xf] %vm849_vm7, %v847_v8 }
 0x21c   : > { %1364 = vrot.lane.b32.xlu0 %v1354_v22, %s4319_s27  ;;  %v5151_v22 = vld [vmem:[%s4387_s26 + $0x1d] sm:$0x1] }
 0x21d   : > { %7331 = vst [vmem:[#allocation28_spill] sm:$0xff] %v5151_v22  ;;  %v1413_v3 = vmul.f32 %v5151_v22, %v7314_v6 }
 0x220   : > { %v1108_v29 = vpop.permute.xlu2 %1107 }
 0x224   : > { %1396 = vrot.lane.b32.xlu0 %v1388_v43, %s4320_s28 }
 0x228   : > { %v5143_v60 = vpop.permute.xlu2 %1111 }
 0x22c   : > { %1402 = vrot.lane.b32.xlu0 %v1391_v18, %s4320_s28  ;;  %v1415_v18 = vmul.f32 %v5141_v26, %v7317_v1 }
 0x230   : > { %v1132_v8 = vpop.permute.xlu2 %1131 }
 0x234   : > { %1422 = vrot.lane.b32.xlu0 %v1413_v3, %s4319_s27 }
 0x236   : > { %v1076_v43 = vpop.permute.xlu1 %1075 }
 0x237   : > { %1079 = vst.msk [vmem:[%s4887_s6] sm:$0xf] %vm1078_vm8, %v1076_v43  ;;  %v1472_v43 = vmul.f32 %v5168_v48, %v7315_v42  ;;  %v1092_v42 = vmul.f32 %v5016_v0, %v4701_v13 }
 0x238   : > { %v1136_v44 = vpop.permute.xlu2 %1135 }
 0x23c   : > { %1426 = vrot.lane.b32.xlu0 %v1415_v18, %s4319_s27 }
 0x23e   : > { %v1110_v37 = vpop.permute.xlu1 %1109 }
 0x23f   : > { %v1120_v22 = vadd.f32 %v1110_v37, %v1092_v42  ;;  %v1152_v42 = vmul.f32 %v5062_v17, %v4722_v21  ;;  %v1212_v17 = vmul.f32 %v5059_v36, %v4740_v45  ;;  %v1211_v36 = vmul.f32 %v5074_v52, %v4619_v53 }
 0x240   : > { %v1168_v9 = vpop.permute.xlu2 %1167  ;;  %v1213_v52 = vmul.f32 %v5086_v7, %v4808_v4 }
 0x243   : > { %v5176_v14 = vpop.xlane.xlu0 %1084 }
 0x244   : > { %1458 = vrot.lane.b32.xlu0 %v1449_v58, %s4320_s28  ;;  %7334 = vst [vmem:[#allocation29_spill] sm:$0xff] %v5176_v14  ;;  %v1094_v58 = vmul.f32 %v5026_v62, %v4775_v5  ;;  %v1557_v62 = vmul.f32 %v5188_v63, %v7303_v33 }
 0x246   : > { %v1114_v3 = vpop.permute.xlu1 %1113 }
 0x247   : > { %v1122_v48 = vadd.f32 %v1114_v3, %v1094_v58 }
 0x248   : > { %v1172_v39 = vpop.permute.xlu2 %1171 }
 0x24c   : > { %1480 = vrot.lane.b32.xlu0 %v1472_v43, %s4319_s27 }
 0x24e   : > { %v1134_v26 = vpop.permute.xlu1 %1133 }
 0x24f   : > { %v1144_v14 = vadd.f32 %v1134_v26, %v1120_v22 }
 0x250   : > { %v1194_v18 = vpop.permute.xlu2 %1193 }
 0x251   : > { %v1156_v26 = vadd.f32 %v1152_v42, %v1144_v14  ;;  %v1093_v14 = vmul.f32 %v5007_v12, %v4760_v54 }
 0x254   : > { %1486 = vrot.lane.b32.xlu0 %v1475_v51, %s4319_s27  ;;  %v1091_v51 = vmul.f32 %v4997_v2, %v4643_v10  ;;  %v1151_v2 = vmul.f32 %v5035_v55, %v4596_v32 }
 0x256   : > { %v1138_v43 = vpop.permute.xlu1 %1137  ;;  %v1174_v30 = vpop.permute.xlu0 %1173  ;;  %v1119_v31 = vadd.f32 %v1108_v29, %v1091_v51 }
 0x257   : > { %v1146_v27 = vadd.f32 %v1138_v43, %v1122_v48 }
 0x258   : > { %v1198_v34 = vpop.permute.xlu2 %1197  ;;  %v1143_v37 = vadd.f32 %v1132_v8, %v1119_v31  ;;  %v1121_v8 = vadd.f32 %v5143_v60, %v1093_v14  ;;  %v1153_v31 = vmul.f32 %v5047_v61, %v4781_v19 }
 0x259   : > { %v1158_v38 = vadd.f32 %v1154_v57, %v1146_v27  ;;  %v1214_v57 = vmul.f32 %v5089_v35, %v4824_v50 }
 0x25a   : > { %v1155_v35 = vadd.f32 %v1151_v2, %v1143_v37 }
 0x25b   : > { %v1182_v0 = vadd.f32 %v1174_v30, %v1158_v38  ;;  %v5202_v30 = vld [vmem:[%s4387_s26 + $0x35] sm:$0x1] }
 0x25c   : > { %1565 = vrot.lane.b32.xlu0 %v1557_v62, %s4320_s28  ;;  %7336 = vst [vmem:[#allocation43_spill] sm:$0xff] %v5202_v30  ;;  %v1179_v43 = vadd.f32 %v1168_v9, %v1155_v35  ;;  %v1145_v62 = vadd.f32 %v1136_v44, %v1121_v8  ;;  %v1583_v61 = vmul.f32 %v5202_v30, %v7308_v15 }
 0x25d   : > { %v1206_v48 = vadd.f32 %v1198_v34, %v1182_v0  ;;  %v1559_v34 = vmul.f32 %v5202_v30, %v7304_v16 }
 0x25e   : > { %v1170_v27 = vpop.permute.xlu1 %1169  ;;  %v1230_v55 = vpop.permute.xlu0 %1229  ;;  %v1157_v60 = vadd.f32 %v1153_v31, %v1145_v62 }
 0x25f   : > { %v1180_v22 = vadd.f32 %v1170_v27, %v1156_v26  ;;  %v1218_v3 = vadd.f32 %v1214_v57, %v1206_v48  ;;  %v1581_v26 = vmul.f32 %v5188_v63, %v7306_v11 }
 0x260   : > { %v1232_v58 = vpop.permute.xlu2 %1231  ;;  %v1181_v9 = vadd.f32 %v1172_v39, %v1157_v60  ;;  %v5226_v39 = vld [vmem:[%s4387_s26 + $0x6] sm:$0x1] }
 0x261   : > { %v1204_v38 = vadd.f32 %v1194_v18, %v1180_v22  ;;  %v1617_v7 = vmul.f32 %v5226_v39, %v7310_v49 }
 0x263   : > { %v1216_v29 = vadd.f32 %v1212_v17, %v1204_v38 }
 0x264   : > { %1569 = vrot.lane.b32.xlu0 %v1559_v34, %s4320_s28 }
 0x265   : > { %v1240_v0 = vadd.f32 %v1230_v55, %v1216_v29 }
 0x266   : > { %v1192_v18 = vpop.permute.xlu1 %1191  ;;  %v1252_v38 = vpop.permute.xlu0 %1251 }
 0x267   : > { %v1203_v51 = vadd.f32 %v1192_v18, %v1179_v43 }
 0x268   : > { %v1254_v42 = vpop.permute.xlu2 %1253 }
 0x269   : > { %v1264_v12 = vadd.f32 %v1254_v42, %v1240_v0  ;;  %v1215_v48 = vadd.f32 %v1211_v36, %v1203_v51  ;;  %v5233_v51 = vld [vmem:[%s4387_s26 + $0x4e] sm:$0x1] }
 0x26a   : > { %7337 = vst [vmem:[#allocation44_spill] sm:$0xff] %v5233_v51 }
 0x26b   : > { %v1268_v44 = vadd.f32 %v1264_v12, %v7295_v59  ;;  %v1620_v12 = vmul.f32 %v5233_v51, %v7311_v41 }
 0x26c   : > { %1589 = vrot.lane.b32.xlu0 %v1581_v26, %s4319_s27 }
 0x26d   : > { %v1272_v37 = vadd.f32 3.0, %v1268_v44 }
 0x26e   : > { %v1196_v57 = vpop.permute.xlu1 %1195  ;;  %v1258_v0 = vpop.permute.xlu0 %1257 }
 0x26f   : > { %v1205_v27 = vadd.f32 %v1196_v57, %v1181_v9  ;;  %v1276_v2 = vmax.f32 %v1272_v37, 0.0 }
 0x271   : > { %v1217_v22 = vadd.f32 %v1213_v52, %v1205_v27  ;;  %v1280_v14 = vmin.f32 %v1276_v2, 6.0 }
 0x273   : > { %v1284_v8 = vmul.f32 0.16666667, %v1280_v14  ;;  %v1241_v52 = vadd.f32 %v1232_v58, %v1217_v22 }
 0x274   : > { %1593 = vrot.lane.b32.xlu0 %v1583_v61, %s4319_s27 }
 0x275   : > { %v1288_v36 = vmul.f32 %v1284_v8, %v1268_v44 }
 0x276   : > { %v1228_v17 = vpop.permute.xlu1 %1227 }
 0x277   : > { %v1239_v34 = vadd.f32 %v1228_v17, %v1215_v48  ;;  %v1295_v60 = vrot.slane %v1288_v36, 7  ;;  %v5254_v36 = vld [vmem:[%s4387_s26 + $0x37] sm:$0x1] }
 0x278   : > { %7338 = vst [vmem:[#allocation45_spill] sm:$0xff] %v5254_v36 }
 0x279   : > { %v1263_v35 = vadd.f32 %v1252_v38, %v1239_v34  ;;  %v5243_v38 = vld [vmem:[%s4387_s26 + $0x1e] sm:$0x1] }
 0x27a   : > { %v1642_v34 = vmul.f32 %v5243_v38, %v7314_v6 }
 0x27b   : > { %v1267_v29 = vadd.f32 %v1263_v35, %v4661_v47 }
 0x27c   : > { %1625 = vrot.lane.b32.xlu0 %v1617_v7, %s4320_s28 }
 0x27d   : > { %v1271_v43 = vadd.f32 3.0, %v1267_v29 }
 0x27e   : > { %v1234_v55 = vpop.permute.xlu1 %1233 }
 0x27f   : > { %v1275_v18 = vmax.f32 %v1271_v43, 0.0  ;;  %v1242_v62 = vadd.f32 %v1234_v55, %v1218_v3 }
 0x281   : > { %v1279_v42 = vmin.f32 %v1275_v18, 6.0  ;;  %v1266_v31 = vadd.f32 %v1258_v0, %v1242_v62 }
 0x283   : > { %v1283_v48 = vmul.f32 0.16666667, %v1279_v42  ;;  %v1270_v26 = vadd.f32 %v1266_v31, %v4865_v25 }
 0x284   : > { %1631 = vrot.lane.b32.xlu0 %v1620_v12, %s4320_s28 }
 0x285   : > { %v1287_v9 = vmul.f32 %v1283_v48, %v1267_v29  ;;  %v1274_v57 = vadd.f32 3.0, %v1270_v26  ;;  %v1644_v29 = vmul.f32 %v5233_v51, %v7317_v1 }
 0x286   : > { %v1256_v3 = vpop.permute.xlu1 %1255 }
 0x287   : > { %v1278_v27 = vmax.f32 %v1274_v57, 0.0  ;;  %v1265_v37 = vadd.f32 %v1256_v3, %v1241_v52  ;;  %v1296_v44 = vsel %vm605_vm0, %v1295_v60, %v1287_v9  ;;  %v1317_v9 = vld [vmem:[%s4387_s26 + $0x1c] sm:$0x1]  ;;  %v5268_v52 = vld [vmem:[%s4387_s26 + $0x1f] sm:$0x1] }
 0x288   : > { %v1297_v61 = vsel %vm607_vm1, %v1295_v60, %v1296_v44  ;;  %v1679_v60 = vmul.f32 %v5254_v36, %v7320_v56  ;;  %v1329_v57 = vmul.f32 %v1317_v9, %v7305_v24  ;;  %v1702_v3 = vmul.f32 %v5268_v52, %v7323_v23 }
 0x289   : > { %v1269_v2 = vadd.f32 %v1265_v37, %v4852_v46  ;;  %v1282_v17 = vmin.f32 %v1278_v27, 6.0  ;;  %v1319_v27 = vld [vmem:[%s4387_s26 + $0x4c] sm:$0x1] }
 0x28a   : > { %v1331_v37 = vmul.f32 %v1319_v27, %v7307_v40  ;;  %v1323_v63 = vmul.f32 %v1319_v27, %v4775_v5 }
 0x28b   : > { %v1273_v14 = vadd.f32 3.0, %v1269_v2  ;;  %v1286_v22 = vmul.f32 0.16666667, %v1282_v17  ;;  %v7340_v17 = vld [vmem:[#allocation5_spill] sm:$0xff] }
 0x28c   : > { %1651 = vrot.lane.b32.xlu0 %v1642_v34, %s4319_s27  ;;  %v1353_v34 = vmul.f32 %v1317_v9, %v7340_v17 }
 0x28d   : > { %v1277_v58 = vmax.f32 %v1273_v14, 0.0  ;;  %v1290_v8 = vmul.f32 %v1286_v22, %v1270_v26  ;;  %v5286_v14 = vld [vmem:[%s4387_s26 + $0x36] sm:$0x1]  ;;  %v7341_v22 = vld [vmem:[#allocation23_spill] sm:$0xff] }
 0x28f   : > { %v1281_v35 = vmin.f32 %v1277_v58, 6.0  ;;  %v1301_v18 = vrot.slane %v1290_v8, 5  ;;  %v1450_v58 = vmul.f32 %v5286_v14, %v7320_v56  ;;  %v7343_v8 = vld [vmem:[#allocation11_spill] sm:$0xff] }
 0x291   : > { %v1285_v7 = vmul.f32 0.16666667, %v1281_v35  ;;  %v1355_v35 = vmul.f32 %v1319_v27, %v7341_v22 }
 0x293   : > { %v1289_v43 = vmul.f32 %v1285_v7, %v1269_v2  ;;  %v7342_v7 = vld [vmem:[#allocation37_spill] sm:$0xff] }
 0x294   : > { %1655 = vrot.lane.b32.xlu0 %v1644_v29, %s4319_s27  ;;  %v1473_v29 = vmul.f32 %v7342_v7, %v7323_v23 }
 0x295   : > { %v1298_v55 = vrot.slane %v1289_v43, 6  ;;  %v7344_v43 = vld [vmem:[#allocation28_spill] sm:$0xff] }
 0x297   : > { %v1309_v62 = vsel %vm610_vm2, %v1298_v55, %v1296_v44  ;;  %v1299_v0 = vsel %vm610_vm2, %v1298_v55, %v1297_v61  ;;  %v5278_v44 = vld [vmem:[%s4387_s26 + $0x35] sm:$0x1] }
 0x298   : > { %v1310_v42 = vsel %vm615_vm4, %v1301_v18, %v1309_v62  ;;  %v1300_v31 = vsel %vm612_vm3, %v1298_v55, %v1299_v0  ;;  %v7339_v61 = vld [vmem:[#allocation20_spill] sm:$0xff]  ;;  %v1389_v55 = vmul.f32 %v7344_v43, %v7343_v8  ;;  %v7346_v62 = vld [vmem:[#allocation33_spill] sm:$0xff] }
 0x299   : > { %v1312_v12 = vsel %vm620_vm5, %v1310_v42, 0.0  ;;  %v1302_v48 = vsel %vm615_vm4, %v1301_v18, %v1300_v31  ;;  %v1390_v2 = vmul.f32 %v5278_v44, %v7339_v61  ;;  %v7347_v42 = vld [vmem:[#allocation14_spill] sm:$0xff] }
 0x29a   : > { %1313 = vadd.xlane.f32.xlu1 %v1312_v12  ;;  %v1303_v26 = vsel %vm617_vm6, %v1301_v18, %v1302_v48  ;;  %v7345_v18 = vld [vmem:[#allocation9_spill] sm:$0xff]  ;;  %v1414_v31 = vmul.f32 %v5278_v44, %v7347_v42  ;;  %v1337_v12 = vpop.permute.xlu0 %1336  ;;  %v7348_v48 = vld [vmem:[#allocation12_spill] sm:$0xff] }
 0x29b   : > { %1304 = vrot.lane.b32.xlu2 %v1303_v26, %s4323_s9  ;;  %v1412_v0 = vmul.f32 %v7346_v62, %v7345_v18  ;;  %v7349_v26 = vld [vmem:[#allocation32_spill] sm:$0xff] }
 0x29c   : > { %1689 = vrot.lane.b32.xlu0 %v1679_v60, %s4320_s28  ;;  %v1448_v60 = vmul.f32 %v7349_v26, %v7348_v48 }
 0x2a3   : > { %1338 = vrot.lane.b32.xlu2 %v1329_v57, %s4320_s28  ;;  %v1341_v57 = vpop.permute.xlu0 %1340 }
 0x2a4   : > { %1711 = vrot.lane.b32.xlu0 %v1702_v3, %s4319_s27  ;;  %v7350_v3 = vld [vmem:[#allocation13_spill] sm:$0xff] }
 0x2ab   : > { %1342 = vrot.lane.b32.xlu2 %v1331_v37, %s4320_s28  ;;  %v1451_v37 = vmul.f32 %v5174_v28, %v7350_v3  ;;  %v1381_v3 = vmul.f32 %v7344_v43, %v4722_v21 }
 0x2b3   : > { %1400 = vrot.lane.b32.xlu1 %v1390_v2, %s4320_s28  ;;  %1362 = vrot.lane.b32.xlu2 %v1353_v34, %s4319_s27  ;;  %v1361_v2 = vpop.permute.xlu0 %1360  ;;  %v7351_v34 = vld [vmem:[#allocation19_spill] sm:$0xff] }
 0x2bb   : > { %1460 = vrot.lane.b32.xlu1 %v1450_v58, %s4320_s28  ;;  %1366 = vrot.lane.b32.xlu2 %v1355_v35, %s4319_s27  ;;  %v1474_v58 = vmul.f32 %v5286_v14, %v7351_v34  ;;  %v1365_v35 = vpop.permute.xlu0 %1364 }
 0x2c3   : > { %1482 = vrot.lane.b32.xlu1 %v1473_v29, %s4319_s27  ;;  %1398 = vrot.lane.b32.xlu2 %v1389_v55, %s4320_s28  ;;  %v1397_v55 = vpop.permute.xlu0 %1396 }
 0x2cb   : > { %1420 = vrot.lane.b32.xlu2 %v1412_v0, %s4319_s27 }
 0x2d3   : > { %1424 = vrot.lane.b32.xlu2 %v1414_v31, %s4319_s27 }
 0x2db   : > { %1456 = vrot.lane.b32.xlu2 %v1448_v60, %s4320_s28  ;;  %v1403_v60 = vpop.permute.xlu0 %1402 }
 0x2e3   : > { %1462 = vrot.lane.b32.xlu2 %v1451_v37, %s4320_s28  ;;  %v1423_v51 = vpop.permute.xlu0 %1422  ;;  %v1321_v37 = vmul.f32 %v1317_v9, %v4701_v13 }
 0x2eb   : > { %1484 = vrot.lane.b32.xlu2 %v1474_v58, %s4319_s27  ;;  %v7352_v58 = vld [vmem:[#allocation31_spill] sm:$0xff]  ;;  %v1427_v11 = vpop.permute.xlu0 %1426 }
 0x2ec   : > { %v1383_v6 = vmul.f32 %v7352_v58, %v4801_v20 }
 0x2f5   : > { %v1305_v29 = vpop.permute.xlu2 %1304 }
 0x2f6   : > { %1308 = vst.msk [vmem:[%s4887_s6] sm:$0xf] %vm1307_vm9, %v1305_v29  ;;  %v7353_v29 = vld [vmem:[#allocation21_spill] sm:$0xff] }
 0x2f7   : > { %v1320_v34 = vmul.f32 %v7353_v29, %v4643_v10 }
 0x2f9   : > { %v1348_v27 = vadd.f32 %v1337_v12, %v1320_v34 }
 0x2fd   : > { %v1339_v0 = vpop.permute.xlu2 %1338 }
 0x2fe   : > { %v1349_v1 = vadd.f32 %v1339_v0, %v1321_v37 }
 0x305   : > { %v1343_v31 = vpop.permute.xlu2 %1342 }
 0x306   : > { %v1351_v23 = vadd.f32 %v1343_v31, %v1323_v63  ;;  %v1443_v63 = vmul.f32 %v5174_v28, %v4824_v50 }
 0x30d   : > { %v1363_v30 = vpop.permute.xlu2 %1362  ;;  %v5326_v0 = vpop.xlane.xlu1 %1313 }
 0x30e   : > { %v1373_v49 = vadd.f32 %v1363_v30, %v1349_v1  ;;  %7354 = vst [vmem:[#allocation37_spill] sm:$0xff] %v5326_v0  ;;  %v1441_v30 = vmul.f32 %v7342_v7, %v4740_v45 }
 0x310   : > { %v1385_v5 = vadd.f32 %v1381_v3, %v1373_v49 }
 0x315   : > { %v1367_v56 = vpop.permute.xlu2 %1366 }
 0x316   : > { %v1375_v41 = vadd.f32 %v1367_v56, %v1351_v23  ;;  %v1372_v56 = vadd.f32 %v1361_v2, %v1348_v27 }
 0x318   : > { %v1387_v36 = vadd.f32 %v1383_v6, %v1375_v41  ;;  %v1380_v6 = vmul.f32 %v7346_v62, %v4596_v32 }
 0x31a   : > { %v1411_v15 = vadd.f32 %v1403_v60, %v1387_v36  ;;  %v7355_v36 = vld [vmem:[#allocation24_spill] sm:$0xff]  ;;  %v1459_v60 = vpop.permute.xlu0 %1458 }
 0x31b   : > { %v1322_v49 = vmul.f32 %v7355_v36, %v4760_v54 }
 0x31c   : > { %v1435_v9 = vadd.f32 %v1427_v11, %v1411_v15  ;;  %v1384_v11 = vadd.f32 %v1380_v6, %v1372_v56 }
 0x31d   : > { %v1399_v31 = vpop.permute.xlu2 %1398  ;;  %v1350_v43 = vadd.f32 %v1341_v57, %v1322_v49  ;;  %v1442_v57 = vmul.f32 %v5286_v14, %v4808_v4 }
 0x31e   : > { %v1409_v1 = vadd.f32 %v1399_v31, %v1385_v5  ;;  %v1447_v41 = vadd.f32 %v1443_v63, %v1435_v9  ;;  %v1408_v28 = vadd.f32 %v1397_v55, %v1384_v11  ;;  %v1440_v5 = vmul.f32 %v7349_v26, %v4619_v53 }
 0x31f   : > { %v1374_v34 = vadd.f32 %v1365_v35, %v1350_v43 }
 0x320   : > { %v1433_v23 = vadd.f32 %v1423_v51, %v1409_v1  ;;  %v1382_v51 = vmul.f32 %v5278_v44, %v4781_v19 }
 0x322   : > { %v1445_v15 = vadd.f32 %v1441_v30, %v1433_v23  ;;  %v1386_v7 = vadd.f32 %v1382_v51, %v1374_v34  ;;  %v1481_v9 = vpop.permute.xlu0 %1480 }
 0x324   : > { %v1469_v35 = vadd.f32 %v1459_v60, %v1445_v15 }
 0x325   : > { %v1401_v12 = vpop.permute.xlu1 %1400  ;;  %v1421_v3 = vpop.permute.xlu2 %1420 }
 0x326   : > { %v1432_v2 = vadd.f32 %v1421_v3, %v1408_v28  ;;  %v1410_v37 = vadd.f32 %v1401_v12, %v1386_v7 }
 0x328   : > { %v1444_v62 = vadd.f32 %v1440_v5, %v1432_v2 }
 0x32a   : > { %v1487_v28 = vpop.permute.xlu0 %1486 }
 0x32d   : > { %v1461_v58 = vpop.permute.xlu1 %1460  ;;  %v1425_v29 = vpop.permute.xlu2 %1424 }
 0x32e   : > { %v1434_v55 = vadd.f32 %v1425_v29, %v1410_v37 }
 0x330   : > { %v1446_v27 = vadd.f32 %v1442_v57, %v1434_v55 }
 0x332   : > { %v1470_v7 = vadd.f32 %v1461_v58, %v1446_v27 }
 0x335   : > { %v1483_v63 = vpop.permute.xlu1 %1482  ;;  %v1457_v31 = vpop.permute.xlu2 %1456 }
 0x336   : > { %v1493_v56 = vadd.f32 %v1483_v63, %v1469_v35  ;;  %v1468_v26 = vadd.f32 %v1457_v31, %v1444_v62 }
 0x338   : > { %v1497_v1 = vadd.f32 %v1493_v56, %v7295_v59  ;;  %v1492_v44 = vadd.f32 %v1481_v9, %v1468_v26 }
 0x33a   : > { %v1501_v6 = vadd.f32 3.0, %v1497_v1  ;;  %v1496_v23 = vadd.f32 %v1492_v44, %v4661_v47 }
 0x33c   : > { %v1505_v30 = vmax.f32 %v1501_v6, 0.0  ;;  %v1500_v36 = vadd.f32 3.0, %v1496_v23 }
 0x33d   : > { %v1463_v49 = vpop.permute.xlu2 %1462 }
 0x33e   : > { %v1509_v11 = vmin.f32 %v1505_v30, 6.0  ;;  %v1504_v43 = vmax.f32 %v1500_v36, 0.0  ;;  %v1471_v14 = vadd.f32 %v1463_v49, %v1447_v41 }
 0x340   : > { %v1513_v12 = vmul.f32 0.16666667, %v1509_v11  ;;  %v1508_v3 = vmin.f32 %v1504_v43, 6.0  ;;  %v1495_v15 = vadd.f32 %v1487_v28, %v1471_v14  ;;  %v5355_v28 = vld [vmem:[%s4387_s26 + $0x1d] sm:$0x1] }
 0x342   : > { %v1517_v34 = vmul.f32 %v1513_v12, %v1497_v1  ;;  %v1512_v2 = vmul.f32 0.16666667, %v1508_v3  ;;  %v1499_v5 = vadd.f32 %v1495_v15, %v4865_v25  ;;  %v1558_v12 = vmul.f32 %v5355_v28, %v7305_v24  ;;  %v5361_v3 = vld [vmem:[%s4387_s26 + $0x4d] sm:$0x1] }
 0x343   : > { %v1560_v15 = vmul.f32 %v5361_v3, %v7307_v40 }
 0x344   : > { %v1524_v51 = vrot.slane %v1517_v34, 7  ;;  %v1516_v62 = vmul.f32 %v1512_v2, %v1496_v23  ;;  %v1503_v60 = vadd.f32 3.0, %v1499_v5  ;;  %v5367_v34 = vld [vmem:[%s4387_s26 + $0x36] sm:$0x1] }
 0x345   : > { %v1485_v37 = vpop.permute.xlu2 %1484  ;;  %v1619_v2 = vmul.f32 %v5367_v34, %v7339_v61 }
 0x346   : > { %v1507_v29 = vmax.f32 %v1503_v60, 0.0  ;;  %v1494_v57 = vadd.f32 %v1485_v37, %v1470_v7  ;;  %v1525_v55 = vsel %vm605_vm0, %v1524_v51, %v1516_v62  ;;  %v1584_v60 = vmul.f32 %v5361_v3, %v7341_v22  ;;  %v5382_v7 = vld [vmem:[%s4387_s26 + $0x7] sm:$0x1]  ;;  %v7357_v37 = vld [vmem:[#allocation15_spill] sm:$0xff] }
 0x347   : > { %v1526_v9 = vsel %vm607_vm1, %v1524_v51, %v1525_v55  ;;  %v7356_v51 = vld [vmem:[#allocation17_spill] sm:$0xff] }
 0x348   : > { %v1498_v41 = vadd.f32 %v1494_v57, %v4852_v46  ;;  %v1511_v35 = vmin.f32 %v1507_v29, 6.0  ;;  %v1678_v62 = vmul.f32 %v5268_v52, %v7356_v51  ;;  %v1701_v29 = vmul.f32 %v5382_v7, %v7357_v37 }
 0x349   : > { %v1618_v57 = vmul.f32 %v5243_v38, %v7343_v8 }
 0x34a   : > { %v1502_v63 = vadd.f32 3.0, %v1498_v41  ;;  %v1515_v56 = vmul.f32 0.16666667, %v1511_v35  ;;  %v1641_v35 = vmul.f32 %v5226_v39, %v7345_v18 }
 0x34c   : > { %v1506_v31 = vmax.f32 %v1502_v63, 0.0  ;;  %v1519_v44 = vmul.f32 %v1515_v56, %v1499_v5  ;;  %v1582_v5 = vmul.f32 %v5355_v28, %v7340_v17  ;;  %v5400_v63 = vld [vmem:[%s4387_s26 + $0x6] sm:$0x1]  ;;  %v1643_v56 = vmul.f32 %v5367_v34, %v7347_v42 }
 0x34d   : > { %7359 = vst [vmem:[#allocation28_spill] sm:$0xff] %v5400_v63 }
 0x34e   : > { %v1510_v26 = vmin.f32 %v1506_v31, 6.0  ;;  %v1530_v27 = vrot.slane %v1519_v44, 5  ;;  %v1786_v31 = vmul.f32 %v5400_v63, %v7303_v33  ;;  %v1677_v44 = vmul.f32 %v5382_v7, %v7348_v48 }
 0x350   : > { %v1514_v1 = vmul.f32 0.16666667, %v1510_v26  ;;  %v5409_v26 = vld [vmem:[%s4387_s26 + $0x36] sm:$0x1] }
 0x351   : > { %7360 = vst [vmem:[#allocation33_spill] sm:$0xff] %v5409_v26 }
 0x352   : > { %v1518_v6 = vmul.f32 %v1514_v1, %v1498_v41  ;;  %v1788_v1 = vmul.f32 %v5409_v26, %v7304_v16 }
 0x354   : > { %v1527_v58 = vrot.slane %v1518_v6, 6  ;;  %v7361_v6 = vld [vmem:[#allocation2_spill] sm:$0xff] }
 0x356   : > { %v1538_v23 = vsel %vm610_vm2, %v1527_v58, %v1525_v55  ;;  %v1528_v30 = vsel %vm610_vm2, %v1527_v58, %v1526_v9  ;;  %v5391_v55 = vld [vmem:[%s4387_s26 + $0x4f] sm:$0x1]  ;;  %v7358_v9 = vld [vmem:[#allocation25_spill] sm:$0xff] }
 0x357   : > { %v1539_v36 = vsel %vm615_vm4, %v1530_v27, %v1538_v23  ;;  %v1529_v49 = vsel %vm612_vm3, %v1527_v58, %v1528_v30  ;;  %v1704_v41 = vmul.f32 %v5391_v55, %v7358_v9  ;;  %v1810_v58 = vmul.f32 %v5400_v63, %v7361_v6  ;;  %v7363_v30 = vld [vmem:[#allocation8_spill] sm:$0xff] }
 0x358   : > { %v1541_v11 = vsel %vm620_vm5, %v1539_v36, 0.0  ;;  %v1531_v43 = vsel %vm615_vm4, %v1530_v27, %v1529_v49  ;;  %v1812_v36 = vmul.f32 %v5409_v26, %v7363_v30  ;;  %v7364_v49 = vld [vmem:[#allocation19_spill] sm:$0xff]  ;;  %v1610_v6 = vmul.f32 %v5243_v38, %v4722_v21 }
 0x359   : > { %1542 = vadd.xlane.f32.xlu2 %v1541_v11  ;;  %v1532_v14 = vsel %vm617_vm6, %v1530_v27, %v1531_v43  ;;  %v7362_v27 = vld [vmem:[#allocation13_spill] sm:$0xff]  ;;  %v1670_v38 = vmul.f32 %v5268_v52, %v4740_v45  ;;  %v1611_v52 = vmul.f32 %v5367_v34, %v4781_v19 }
 0x35a   : > { %1533 = vrot.lane.b32.xlu1 %v1532_v14, %s4324_s10  ;;  %v1680_v23 = vmul.f32 %v5391_v55, %v7362_v27  ;;  %v7365_v11 = vld [vmem:[#allocation45_spill] sm:$0xff]  ;;  %v5430_v14 = vld [vmem:[%s4387_s26 + $0x7] sm:$0x1] }
 0x35b   : > { %v1703_v43 = vmul.f32 %v7365_v11, %v7364_v49 }
 0x362   : > { %1567 = vrot.lane.b32.xlu1 %v1558_v12, %s4320_s28  ;;  %v7366_v12 = vld [vmem:[#allocation6_spill] sm:$0xff] }
 0x36a   : > { %1571 = vrot.lane.b32.xlu1 %v1560_v15, %s4320_s28  ;;  %v1846_v15 = vmul.f32 %v5430_v14, %v7366_v12 }
 0x371   : > { %1629 = vrot.lane.b32.xlu2 %v1619_v2, %s4320_s28  ;;  %v1566_v2 = vpop.permute.xlu0 %1565 }
 0x372   : > { %1591 = vrot.lane.b32.xlu1 %v1582_v5, %s4319_s27  ;;  %v5436_v5 = vld [vmem:[%s4387_s26 + $0x4f] sm:$0x1] }
 0x373   : > { %7367 = vst [vmem:[#allocation32_spill] sm:$0xff] %v5436_v5 }
 0x379   : > { %1687 = vrot.lane.b32.xlu2 %v1678_v62, %s4320_s28  ;;  %v7368_v62 = vld [vmem:[#allocation7_spill] sm:$0xff] }
 0x37a   : > { %1595 = vrot.lane.b32.xlu1 %v1584_v60, %s4319_s27  ;;  %v1849_v60 = vmul.f32 %v5436_v5, %v7368_v62 }
 0x381   : > { %1709 = vrot.lane.b32.xlu2 %v1701_v29, %s4319_s27  ;;  %v1570_v29 = vpop.permute.xlu0 %1569 }
 0x382   : > { %1627 = vrot.lane.b32.xlu1 %v1618_v57, %s4320_s28  ;;  %v5442_v57 = vld [vmem:[%s4387_s26 + $0x1f] sm:$0x1] }
 0x389   : > { %1715 = vrot.lane.b32.xlu2 %v1704_v41, %s4319_s27  ;;  %v7369_v41 = vld [vmem:[#allocation10_spill] sm:$0xff] }
 0x38a   : > { %1649 = vrot.lane.b32.xlu1 %v1641_v35, %s4319_s27  ;;  %v1871_v35 = vmul.f32 %v5442_v57, %v7369_v41 }
 0x391   : > { %1794 = vrot.lane.b32.xlu2 %v1786_v31, %s4320_s28  ;;  %v1590_v31 = vpop.permute.xlu0 %1589 }
 0x392   : > { %1653 = vrot.lane.b32.xlu1 %v1643_v56, %s4319_s27  ;;  %v7370_v56 = vld [vmem:[#allocation26_spill] sm:$0xff] }
 0x399   : > { %1798 = vrot.lane.b32.xlu2 %v1788_v1, %s4320_s28  ;;  %v1873_v1 = vmul.f32 %v5436_v5, %v7370_v56 }
 0x39a   : > { %1685 = vrot.lane.b32.xlu1 %v1677_v44, %s4320_s28 }
 0x3a1   : > { %1818 = vrot.lane.b32.xlu2 %v1810_v58, %s4319_s27  ;;  %v5451_v58 = vld [vmem:[%s4387_s26 + $0x38] sm:$0x1] }
 0x3a2   : > { %1691 = vrot.lane.b32.xlu1 %v1680_v23, %s4320_s28  ;;  %7371 = vst [vmem:[#allocation31_spill] sm:$0xff] %v5451_v58  ;;  %v1594_v23 = vpop.permute.xlu0 %1593 }
 0x3a9   : > { %1822 = vrot.lane.b32.xlu2 %v1812_v36, %s4319_s27  ;;  %v7372_v36 = vld [vmem:[#allocation27_spill] sm:$0xff] }
 0x3aa   : > { %1713 = vrot.lane.b32.xlu1 %v1703_v43, %s4319_s27  ;;  %v1908_v43 = vmul.f32 %v5451_v58, %v7372_v36  ;;  %v1626_v26 = vpop.permute.xlu0 %1625  ;;  %v7375_v36 = vld [vmem:[#allocation42_spill] sm:$0xff] }
 0x3ab   : > { %v1549_v62 = vmul.f32 %v7375_v36, %v4643_v10 }
 0x3ad   : > { %v1577_v12 = vadd.f32 %v1566_v2, %v1549_v62  ;;  %v7376_v2 = vld [vmem:[#allocation39_spill] sm:$0xff] }
 0x3b1   : > { %1854 = vrot.lane.b32.xlu2 %v1846_v15, %s4320_s28 }
 0x3b2   : > { %v1632_v5 = vpop.permute.xlu0 %1631 }
 0x3b9   : > { %1860 = vrot.lane.b32.xlu2 %v1849_v60, %s4320_s28  ;;  %v5459_v60 = vld [vmem:[%s4387_s26 + $0x20] sm:$0x1] }
 0x3ba   : > { %v1652_v56 = vpop.permute.xlu0 %1651 }
 0x3c1   : > { %1880 = vrot.lane.b32.xlu2 %v1871_v35, %s4319_s27  ;;  %v7373_v35 = vld [vmem:[#allocation16_spill] sm:$0xff] }
 0x3c2   : > { %v1931_v0 = vmul.f32 %v5459_v60, %v7373_v35  ;;  %v1601_v35 = vadd.f32 %v1590_v31, %v1577_v12  ;;  %v1656_v27 = vpop.permute.xlu0 %1655 }
 0x3c9   : > { %1884 = vrot.lane.b32.xlu2 %v1873_v1, %s4319_s27 }
 0x3ca   : > { %v1690_v31 = vpop.permute.xlu0 %1689 }
 0x3cc   : > { %v1534_v44 = vpop.permute.xlu1 %1533  ;;  %v5464_v41 = vpop.xlane.xlu2 %1542 }
 0x3cd   : > { %1537 = vst.msk [vmem:[%s4887_s6] sm:$0xf] %vm1536_vm10, %v1534_v44 }
 0x3ce   : > { %7374 = vst [vmem:[#allocation21_spill] sm:$0xff] %v5464_v41 }
 0x3d1   : > { %1918 = vrot.lane.b32.xlu2 %v1908_v43, %s4320_s28  ;;  %v1550_v43 = vmul.f32 %v5355_v28, %v4701_v13  ;;  %v1669_v28 = vmul.f32 %v5382_v7, %v4619_v53 }
 0x3d4   : > { %v1568_v15 = vpop.permute.xlu1 %1567  ;;  %v1630_v48 = vpop.permute.xlu2 %1629 }
 0x3d5   : > { %v1578_v58 = vadd.f32 %v1568_v15, %v1550_v43 }
 0x3d9   : > { %1940 = vrot.lane.b32.xlu2 %v1931_v0, %s4319_s27  ;;  %v1609_v0 = vmul.f32 %v5226_v39, %v4596_v32 }
 0x3db   : > { %v1613_v41 = vadd.f32 %v1609_v0, %v1601_v35 }
 0x3dc   : > { %v1572_v1 = vpop.permute.xlu1 %1571 }
 0x3dd   : > { %v1637_v42 = vadd.f32 %v1626_v26, %v1613_v41  ;;  %v1712_v41 = vpop.permute.xlu0 %1711 }
 0x3e4   : > { %v1592_v63 = vpop.permute.xlu1 %1591 }
 0x3e5   : > { %v1602_v30 = vadd.f32 %v1592_v63, %v1578_v58  ;;  %v1552_v63 = vmul.f32 %v5361_v3, %v7376_v2  ;;  %v1688_v58 = vpop.permute.xlu2 %1687 }
 0x3e7   : > { %v1614_v16 = vadd.f32 %v1610_v6, %v1602_v30  ;;  %v1580_v39 = vadd.f32 %v1572_v1, %v1552_v63 }
 0x3ec   : > { %v1596_v44 = vpop.permute.xlu1 %1595 }
 0x3ed   : > { %v1604_v15 = vadd.f32 %v1596_v44, %v1580_v39  ;;  %v1710_v1 = vpop.permute.xlu2 %1709 }
 0x3f4   : > { %v1628_v49 = vpop.permute.xlu1 %1627 }
 0x3f5   : > { %v1638_v36 = vadd.f32 %v1628_v49, %v1614_v16  ;;  %v7377_v16 = vld [vmem:[#allocation44_spill] sm:$0xff] }
 0x3f7   : > { %v1662_v12 = vadd.f32 %v1652_v56, %v1638_v36 }
 0x3f9   : > { %v1674_v6 = vadd.f32 %v1670_v38, %v1662_v12 }
 0x3fb   : > { %v1698_v49 = vadd.f32 %v1688_v58, %v1674_v6  ;;  %v1716_v6 = vpop.permute.xlu2 %1715 }
 0x3fc   : > { %v1650_v10 = vpop.permute.xlu1 %1649 }
 0x3fd   : > { %v1661_v33 = vadd.f32 %v1650_v10, %v1637_v42  ;;  %v1612_v10 = vmul.f32 %v7377_v16, %v4801_v20  ;;  %v7378_v42 = vld [vmem:[#allocation43_spill] sm:$0xff]  ;;  %v1722_v35 = vadd.f32 %v1712_v41, %v1698_v49 }
 0x3fe   : > { %v1551_v7 = vmul.f32 %v7378_v42, %v4760_v54 }
 0x3ff   : > { %v1673_v62 = vadd.f32 %v1669_v28, %v1661_v33  ;;  %v1616_v30 = vadd.f32 %v1612_v10, %v1604_v15  ;;  %v1726_v36 = vadd.f32 %v1722_v35, %v7295_v59  ;;  %v1671_v15 = vmul.f32 %v7365_v11, %v4808_v4 }
 0x400   : > { %v1579_v3 = vadd.f32 %v1570_v29, %v1551_v7  ;;  %v1672_v29 = vmul.f32 %v5391_v55, %v4824_v50 }
 0x401   : > { %v1640_v56 = vadd.f32 %v1632_v5, %v1616_v30 }
 0x402   : > { %v1603_v33 = vadd.f32 %v1594_v23, %v1579_v3  ;;  %v1730_v23 = vadd.f32 3.0, %v1726_v36 }
 0x403   : > { %v1664_v63 = vadd.f32 %v1656_v27, %v1640_v56 }
 0x404   : > { %v1654_v26 = vpop.permute.xlu1 %1653  ;;  %v1615_v0 = vadd.f32 %v1611_v52, %v1603_v33  ;;  %v1734_v16 = vmax.f32 %v1730_v23, 0.0 }
 0x405   : > { %v1676_v38 = vadd.f32 %v1672_v29, %v1664_v63 }
 0x406   : > { %v1639_v12 = vadd.f32 %v1630_v48, %v1615_v0  ;;  %v1738_v49 = vmin.f32 %v1734_v16, 6.0 }
 0x408   : > { %v1663_v5 = vadd.f32 %v1654_v26, %v1639_v12  ;;  %v1742_v56 = vmul.f32 0.16666667, %v1738_v49 }
 0x40a   : > { %v1675_v10 = vadd.f32 %v1671_v15, %v1663_v5  ;;  %v1746_v52 = vmul.f32 %v1742_v56, %v1726_v36  ;;  %v5541_v56 = vld [vmem:[%s4387_s26 + $0x50] sm:$0x1] }
 0x40c   : > { %v1686_v43 = vpop.permute.xlu1 %1685  ;;  %v1699_v30 = vadd.f32 %v1690_v31, %v1675_v10  ;;  %v1753_v12 = vrot.slane %v1746_v52, 7  ;;  %v5505_v10 = vld [vmem:[%s4387_s26 + $0x1e] sm:$0x1] }
 0x40d   : > { %v1697_v44 = vadd.f32 %v1686_v43, %v1673_v62  ;;  %v1811_v49 = vmul.f32 %v5505_v10, %v7340_v17 }
 0x40f   : > { %v1721_v28 = vadd.f32 %v1710_v1, %v1697_v44 }
 0x411   : > { %v1725_v39 = vadd.f32 %v1721_v28, %v4661_v47 }
 0x413   : > { %v1729_v34 = vadd.f32 3.0, %v1725_v39 }
 0x414   : > { %v1692_v58 = vpop.permute.xlu1 %1691 }
 0x415   : > { %v1700_v62 = vadd.f32 %v1692_v58, %v1676_v38  ;;  %v1733_v27 = vmax.f32 %v1729_v34, 0.0 }
 0x417   : > { %v1724_v42 = vadd.f32 %v1716_v6, %v1700_v62  ;;  %v1737_v3 = vmin.f32 %v1733_v27, 6.0  ;;  %v5511_v27 = vld [vmem:[%s4387_s26 + $0x4e] sm:$0x1] }
 0x419   : > { %v1728_v48 = vadd.f32 %v1724_v42, %v4865_v25  ;;  %v1741_v35 = vmul.f32 0.16666667, %v1737_v3  ;;  %v1787_v42 = vmul.f32 %v5505_v10, %v7305_v24  ;;  %v1813_v3 = vmul.f32 %v5511_v27, %v7341_v22 }
 0x41b   : > { %v1732_v7 = vadd.f32 3.0, %v1728_v48  ;;  %v1745_v0 = vmul.f32 %v1741_v35, %v1725_v39  ;;  %v1870_v35 = vmul.f32 %v5430_v14, %v7345_v18 }
 0x41c   : > { %v1714_v55 = vpop.permute.xlu1 %1713 }
 0x41d   : > { %v1736_v26 = vmax.f32 %v1732_v7, 0.0  ;;  %v1723_v41 = vadd.f32 %v1714_v55, %v1699_v30  ;;  %v1754_v23 = vsel %vm605_vm0, %v1753_v12, %v1745_v0  ;;  %v5517_v7 = vld [vmem:[%s4387_s26 + $0x37] sm:$0x1]  ;;  %v1907_v55 = vmul.f32 %v5459_v60, %v7356_v51 }
 0x41e   : > { %v1755_v38 = vsel %vm607_vm1, %v1753_v12, %v1754_v23  ;;  %v1848_v30 = vmul.f32 %v5517_v7, %v7339_v61 }
 0x41f   : > { %v1727_v33 = vadd.f32 %v1723_v41, %v4852_v46  ;;  %v1740_v11 = vmin.f32 %v1736_v26, 6.0  ;;  %v5532_v26 = vld [vmem:[%s4387_s26 + $0x8] sm:$0x1] }
 0x420   : > { %v1930_v41 = vmul.f32 %v5532_v26, %v7357_v37 }
 0x421   : > { %v1731_v1 = vadd.f32 3.0, %v1727_v33  ;;  %v1744_v44 = vmul.f32 0.16666667, %v1740_v11  ;;  %v1933_v11 = vmul.f32 %v5541_v56, %v7358_v9 }
 0x423   : > { %v1735_v43 = vmax.f32 %v1731_v1, 0.0  ;;  %v1748_v29 = vmul.f32 %v1744_v44, %v1728_v48  ;;  %v1789_v48 = vmul.f32 %v5511_v27, %v7307_v40  ;;  %v5550_v1 = vld [vmem:[%s4387_s26 + $0x7] sm:$0x1] }
 0x424   : > { %7379 = vst [vmem:[#allocation24_spill] sm:$0xff] %v5550_v1  ;;  %v7381_v44 = vld [vmem:[#allocation14_spill] sm:$0xff] }
 0x425   : > { %v1739_v28 = vmin.f32 %v1735_v43, 6.0  ;;  %v1759_v58 = vrot.slane %v1748_v29, 5  ;;  %v7380_v43 = vld [vmem:[#allocation3_spill] sm:$0xff]  ;;  %v1872_v0 = vmul.f32 %v5517_v7, %v7381_v44  ;;  %v7384_v29 = vld [vmem:[#allocation12_spill] sm:$0xff] }
 0x426   : > { %v2015_v52 = vmul.f32 %v5550_v1, %v7380_v43  ;;  %v1838_v43 = vmul.f32 %v5430_v14, %v4596_v32 }
 0x427   : > { %v1743_v63 = vmul.f32 0.16666667, %v1739_v28  ;;  %v5559_v28 = vld [vmem:[%s4387_s26 + $0x37] sm:$0x1] }
 0x428   : > { %7382 = vst [vmem:[#allocation45_spill] sm:$0xff] %v5559_v28 }
 0x429   : > { %v1747_v31 = vmul.f32 %v1743_v63, %v1727_v33  ;;  %v1847_v33 = vmul.f32 %v5442_v57, %v7343_v8  ;;  %v7383_v63 = vld [vmem:[#allocation18_spill] sm:$0xff] }
 0x42a   : > { %v2017_v12 = vmul.f32 %v5559_v28, %v7383_v63 }
 0x42b   : > { %v1756_v5 = vrot.slane %v1747_v31, 6  ;;  %v1906_v31 = vmul.f32 %v5532_v26, %v7384_v29 }
 0x42d   : > { %v1767_v15 = vsel %vm610_vm2, %v1756_v5, %v1754_v23  ;;  %v1757_v36 = vsel %vm610_vm2, %v1756_v5, %v1755_v38  ;;  %v7385_v23 = vld [vmem:[#allocation2_spill] sm:$0xff]  ;;  %v7386_v38 = vld [vmem:[#allocation13_spill] sm:$0xff] }
 0x42e   : > { %v1768_v39 = vsel %vm615_vm4, %v1759_v58, %v1767_v15  ;;  %v1758_v34 = vsel %vm612_vm3, %v1756_v5, %v1757_v36  ;;  %v2039_v5 = vmul.f32 %v5550_v1, %v7385_v23  ;;  %v1795_v15 = vpop.permute.xlu2 %1794  ;;  %v7387_v36 = vld [vmem:[#allocation8_spill] sm:$0xff] }
 0x42f   : > { %v1770_v62 = vsel %vm620_vm5, %v1768_v39, 0.0  ;;  %v1760_v6 = vsel %vm615_vm4, %v1759_v58, %v1758_v34  ;;  %v2041_v39 = vmul.f32 %v5559_v28, %v7387_v36  ;;  %v7388_v34 = vld [vmem:[#allocation19_spill] sm:$0xff]  ;;  %v7397_v28 = vld [vmem:[#allocation16_spill] sm:$0xff] }
 0x430   : > { %1771 = vadd.xlane.f32.xlu1 %v1770_v62  ;;  %v1761_v16 = vsel %vm617_vm6, %v1759_v58, %v1760_v6  ;;  %v1909_v58 = vmul.f32 %v5541_v56, %v7386_v38  ;;  %v7389_v62 = vld [vmem:[#allocation31_spill] sm:$0xff]  ;;  %v7400_v36 = vld [vmem:[#allocation28_spill] sm:$0xff] }
 0x431   : > { %1762 = vrot.lane.b32.xlu0 %v1761_v16, %s4325_s11  ;;  %v1932_v6 = vmul.f32 %v7389_v62, %v7388_v34  ;;  %v5580_v16 = vld [vmem:[%s4387_s26 + $0x8] sm:$0x1]  ;;  %v7399_v34 = vld [vmem:[#allocation30_spill] sm:$0xff] }
 0x432   : > { %v1778_v38 = vmul.f32 %v7400_v36, %v7399_v34 }
 0x439   : > { %1796 = vrot.lane.b32.xlu0 %v1787_v42, %s4320_s28  ;;  %v5582_v42 = vpop.permute.xlu2 %1798 }
 0x441   : > { %1800 = vrot.lane.b32.xlu0 %v1789_v48, %s4320_s28  ;;  %v7390_v48 = vld [vmem:[#allocation6_spill] sm:$0xff] }
 0x449   : > { %1858 = vrot.lane.b32.xlu1 %v1848_v30, %s4320_s28  ;;  %1820 = vrot.lane.b32.xlu0 %v1811_v49, %s4319_s27  ;;  %v2075_v30 = vmul.f32 %v5580_v16, %v7390_v48  ;;  %v5588_v49 = vld [vmem:[%s4387_s26 + $0x50] sm:$0x1] }
 0x44a   : > { %7391 = vst [vmem:[#allocation42_spill] sm:$0xff] %v5588_v49 }
 0x451   : > { %1916 = vrot.lane.b32.xlu1 %v1907_v55, %s4320_s28  ;;  %1824 = vrot.lane.b32.xlu0 %v1813_v3, %s4319_s27  ;;  %v1819_v55 = vpop.permute.xlu2 %1818  ;;  %v7392_v3 = vld [vmem:[#allocation7_spill] sm:$0xff] }
 0x459   : > { %1938 = vrot.lane.b32.xlu1 %v1930_v41, %s4319_s27  ;;  %1856 = vrot.lane.b32.xlu0 %v1847_v33, %s4320_s28  ;;  %v2078_v41 = vmul.f32 %v5588_v49, %v7392_v3  ;;  %v5594_v33 = vld [vmem:[%s4387_s26 + $0x20] sm:$0x1] }
 0x461   : > { %1944 = vrot.lane.b32.xlu1 %v1933_v11, %s4319_s27  ;;  %1878 = vrot.lane.b32.xlu0 %v1870_v35, %s4319_s27  ;;  %v7393_v11 = vld [vmem:[#allocation10_spill] sm:$0xff] }
 0x462   : > { %v2100_v35 = vmul.f32 %v5594_v33, %v7393_v11 }
 0x469   : > { %2023 = vrot.lane.b32.xlu1 %v2015_v52, %s4320_s28  ;;  %1882 = vrot.lane.b32.xlu0 %v1872_v0, %s4319_s27  ;;  %v1823_v52 = vpop.permute.xlu2 %1822  ;;  %v7394_v0 = vld [vmem:[#allocation26_spill] sm:$0xff] }
 0x471   : > { %2027 = vrot.lane.b32.xlu1 %v2017_v12, %s4320_s28  ;;  %1914 = vrot.lane.b32.xlu0 %v1906_v31, %s4320_s28  ;;  %v2102_v12 = vmul.f32 %v5588_v49, %v7394_v0  ;;  %v1855_v31 = vpop.permute.xlu2 %1854 }
 0x479   : > { %2047 = vrot.lane.b32.xlu1 %v2039_v5, %s4319_s27  ;;  %1920 = vrot.lane.b32.xlu0 %v1909_v58, %s4320_s28  ;;  %v5605_v58 = vld [vmem:[%s4387_s26 + $0x39] sm:$0x1] }
 0x47a   : > { %7395 = vst [vmem:[#allocation44_spill] sm:$0xff] %v5605_v58 }
 0x481   : > { %2051 = vrot.lane.b32.xlu1 %v2041_v39, %s4319_s27  ;;  %1942 = vrot.lane.b32.xlu0 %v1932_v6, %s4319_s27  ;;  %v7396_v39 = vld [vmem:[#allocation27_spill] sm:$0xff] }
 0x482   : > { %v2137_v6 = vmul.f32 %v5605_v58, %v7396_v39  ;;  %v1779_v39 = vmul.f32 %v5505_v10, %v4701_v13  ;;  %v1899_v10 = vmul.f32 %v5459_v60, %v4740_v45 }
 0x489   : > { %2083 = vrot.lane.b32.xlu1 %v2075_v30, %s4320_s28 }
 0x491   : > { %2089 = vrot.lane.b32.xlu1 %v2078_v41, %s4320_s28  ;;  %v1861_v41 = vpop.permute.xlu2 %1860 }
 0x499   : > { %2109 = vrot.lane.b32.xlu1 %v2100_v35, %s4319_s27  ;;  %v5611_v35 = vld [vmem:[%s4387_s26 + $0x21] sm:$0x1]  ;;  %v1881_v1 = vpop.permute.xlu2 %1880 }
 0x49a   : > { %v2160_v49 = vmul.f32 %v5611_v35, %v7397_v28  ;;  %v1839_v28 = vmul.f32 %v5442_v57, %v4722_v21 }
 0x4a1   : > { %2113 = vrot.lane.b32.xlu1 %v2102_v12, %s4319_s27  ;;  %v1885_v11 = vpop.permute.xlu2 %1884 }
 0x4a3   : > { %v1763_v5 = vpop.permute.xlu0 %1762 }
 0x4a4   : > { %1766 = vst.msk [vmem:[%s4887_s6] sm:$0xf] %vm1765_vm11, %v1763_v5  ;;  %v5616_v5 = vpop.xlane.xlu1 %1771 }
 0x4a5   : > { %7398 = vst [vmem:[#allocation43_spill] sm:$0xff] %v5616_v5 }
 0x4a9   : > { %2147 = vrot.lane.b32.xlu1 %v2137_v6, %s4320_s28  ;;  %v1919_v29 = vpop.permute.xlu2 %1918 }
 0x4ab   : > { %v1797_v30 = vpop.permute.xlu0 %1796 }
 0x4ac   : > { %v1807_v6 = vadd.f32 %v1797_v30, %v1779_v39 }
 0x4b1   : > { %2169 = vrot.lane.b32.xlu1 %v2160_v49, %s4319_s27  ;;  %v1806_v49 = vadd.f32 %v1795_v15, %v1778_v38  ;;  %v1941_v38 = vpop.permute.xlu2 %1940 }
 0x4b3   : > { %v1801_v12 = vpop.permute.xlu0 %1800  ;;  %v1830_v44 = vadd.f32 %v1819_v55, %v1806_v49  ;;  %v7402_v55 = vld [vmem:[#allocation33_spill] sm:$0xff] }
 0x4b5   : > { %v1842_v39 = vadd.f32 %v1838_v43, %v1830_v44  ;;  %v7401_v43 = vld [vmem:[#allocation32_spill] sm:$0xff] }
 0x4b6   : > { %v1841_v44 = vmul.f32 %v7401_v43, %v4801_v20 }
 0x4b7   : > { %v1866_v36 = vadd.f32 %v1855_v31, %v1842_v39 }
 0x4bb   : > { %v1821_v0 = vpop.permute.xlu0 %1820  ;;  %v1859_v58 = vpop.permute.xlu1 %1858 }
 0x4bc   : > { %v1831_v48 = vadd.f32 %v1821_v0, %v1807_v6 }
 0x4be   : > { %v1843_v23 = vadd.f32 %v1839_v28, %v1831_v48  ;;  %v1898_v28 = vmul.f32 %v5532_v26, %v4619_v53 }
 0x4c3   : > { %v1825_v3 = vpop.permute.xlu0 %1824  ;;  %v1917_v6 = vpop.permute.xlu1 %1916 }
 0x4cb   : > { %v1857_v63 = vpop.permute.xlu0 %1856 }
 0x4cc   : > { %v1867_v5 = vadd.f32 %v1857_v63, %v1843_v23  ;;  %v1781_v63 = vmul.f32 %v5511_v27, %v7376_v2 }
 0x4ce   : > { %v1891_v0 = vadd.f32 %v1881_v1, %v1867_v5  ;;  %v1809_v15 = vadd.f32 %v1801_v12, %v1781_v63 }
 0x4d0   : > { %v1903_v30 = vadd.f32 %v1899_v10, %v1891_v0  ;;  %v1833_v48 = vadd.f32 %v1825_v3, %v1809_v15  ;;  %v1840_v3 = vmul.f32 %v5517_v7, %v4781_v19  ;;  %v1900_v15 = vmul.f32 %v7389_v62, %v4808_v4 }
 0x4d2   : > { %v1927_v34 = vadd.f32 %v1917_v6, %v1903_v30  ;;  %v1845_v31 = vadd.f32 %v1841_v44, %v1833_v48 }
 0x4d3   : > { %v1879_v13 = vpop.permute.xlu0 %1878 }
 0x4d4   : > { %v1890_v57 = vadd.f32 %v1879_v13, %v1866_v36  ;;  %v1951_v23 = vadd.f32 %v1941_v38, %v1927_v34  ;;  %v1780_v13 = vmul.f32 %v7402_v55, %v4760_v54  ;;  %v1869_v10 = vadd.f32 %v1861_v41, %v1845_v31  ;;  %v1939_v34 = vpop.permute.xlu1 %1938 }
 0x4d5   : > { %v1901_v38 = vmul.f32 %v5541_v56, %v4824_v50 }
 0x4d6   : > { %v1902_v14 = vadd.f32 %v1898_v28, %v1890_v57  ;;  %v1955_v60 = vadd.f32 %v1951_v23, %v7295_v59  ;;  %v1808_v26 = vadd.f32 %v5582_v42, %v1780_v13  ;;  %v1893_v6 = vadd.f32 %v1885_v11, %v1869_v10 }
 0x4d8   : > { %v1959_v5 = vadd.f32 3.0, %v1955_v60  ;;  %v1832_v49 = vadd.f32 %v1823_v52, %v1808_v26  ;;  %v1905_v41 = vadd.f32 %v1901_v38, %v1893_v6 }
 0x4da   : > { %v1963_v27 = vmax.f32 %v1959_v5, 0.0  ;;  %v1844_v39 = vadd.f32 %v1840_v3, %v1832_v49 }
 0x4db   : > { %v1883_v1 = vpop.permute.xlu0 %1882 }
 0x4dc   : > { %v1967_v36 = vmin.f32 %v1963_v27, 6.0  ;;  %v1868_v57 = vadd.f32 %v1859_v58, %v1844_v39  ;;  %v1945_v48 = vpop.permute.xlu1 %1944 }
 0x4de   : > { %v1892_v42 = vadd.f32 %v1883_v1, %v1868_v57  ;;  %v1971_v63 = vmul.f32 0.16666667, %v1967_v36 }
 0x4e0   : > { %v1904_v43 = vadd.f32 %v1900_v15, %v1892_v42  ;;  %v1975_v58 = vmul.f32 %v1971_v63, %v1955_v60  ;;  %v5658_v15 = vld [vmem:[%s4387_s26 + $0x1f] sm:$0x1] }
 0x4e2   : > { %v1928_v1 = vadd.f32 %v1919_v29, %v1904_v43  ;;  %v1982_v5 = vrot.slane %v1975_v58, 7  ;;  %v5669_v43 = vld [vmem:[%s4387_s26 + $0x38] sm:$0x1]  ;;  %v2136_v58 = vmul.f32 %v5611_v35, %v7356_v51 }
 0x4e3   : > { %v1915_v0 = vpop.permute.xlu0 %1914 }
 0x4e4   : > { %v1926_v12 = vadd.f32 %v1915_v0, %v1902_v14 }
 0x4e6   : > { %v1950_v30 = vadd.f32 %v1939_v34, %v1926_v12 }
 0x4e8   : > { %v1954_v28 = vadd.f32 %v1950_v30, %v4661_v47 }
 0x4ea   : > { %v1958_v52 = vadd.f32 3.0, %v1954_v28 }
 0x4eb   : > { %v1921_v23 = vpop.permute.xlu0 %1920 }
 0x4ec   : > { %v1962_v7 = vmax.f32 %v1958_v52, 0.0  ;;  %v1929_v14 = vadd.f32 %v1921_v23, %v1905_v41 }
 0x4ee   : > { %v1966_v11 = vmin.f32 %v1962_v7, 6.0  ;;  %v1953_v44 = vadd.f32 %v1945_v48, %v1929_v14  ;;  %v2016_v7 = vmul.f32 %v5658_v15, %v7305_v24  ;;  %v5664_v14 = vld [vmem:[%s4387_s26 + $0x4f] sm:$0x1] }
 0x4ef   : > { %v2018_v48 = vmul.f32 %v5664_v14, %v7307_v40 }
 0x4f0   : > { %v1970_v55 = vmul.f32 0.16666667, %v1966_v11  ;;  %v1957_v13 = vadd.f32 %v1953_v44, %v4865_v25  ;;  %v2077_v11 = vmul.f32 %v5669_v43, %v7339_v61  ;;  %v2040_v44 = vmul.f32 %v5658_v15, %v7340_v17 }
 0x4f2   : > { %v1974_v31 = vmul.f32 %v1970_v55, %v1954_v28  ;;  %v1961_v56 = vadd.f32 3.0, %v1957_v13  ;;  %v2042_v55 = vmul.f32 %v5664_v14, %v7341_v22 }
 0x4f3   : > { %v1943_v26 = vpop.permute.xlu0 %1942 }
 0x4f4   : > { %v1965_v49 = vmax.f32 %v1961_v56, 0.0  ;;  %v1952_v10 = vadd.f32 %v1943_v26, %v1928_v1  ;;  %v1983_v27 = vsel %vm605_vm0, %v1982_v5, %v1974_v31  ;;  %v2076_v56 = vmul.f32 %v5594_v33, %v7343_v8  ;;  %v5694_v1 = vld [vmem:[%s4387_s26 + $0x51] sm:$0x1] }
 0x4f5   : > { %v1984_v62 = vsel %vm607_vm1, %v1982_v5, %v1983_v27  ;;  %v2162_v5 = vmul.f32 %v5694_v1, %v7358_v9  ;;  %v2099_v26 = vmul.f32 %v5580_v16, %v7345_v18 }
 0x4f6   : > { %v1956_v34 = vadd.f32 %v1952_v10, %v4852_v46  ;;  %v1969_v0 = vmin.f32 %v1965_v49, 6.0  ;;  %v5703_v49 = vld [vmem:[%s4387_s26 + $0x8] sm:$0x1] }
 0x4f7   : > { %7403 = vst [vmem:[#allocation31_spill] sm:$0xff] %v5703_v49  ;;  %v7404_v10 = vld [vmem:[#allocation3_spill] sm:$0xff] }
 0x4f8   : > { %v1960_v3 = vadd.f32 3.0, %v1956_v34  ;;  %v1973_v60 = vmul.f32 0.16666667, %v1969_v0 }
 0x4fa   : > { %v1964_v12 = vmax.f32 %v1960_v3, 0.0  ;;  %v1977_v6 = vmul.f32 %v1973_v60, %v1957_v13  ;;  %v5685_v13 = vld [vmem:[%s4387_s26 + $0x9] sm:$0x1]  ;;  %v5712_v3 = vld [vmem:[%s4387_s26 + $0x38] sm:$0x1] }
 0x4fb   : > { %v2159_v31 = vmul.f32 %v5685_v13, %v7357_v37  ;;  %7406 = vst [vmem:[#allocation28_spill] sm:$0xff] %v5712_v3 }
 0x4fc   : > { %v1968_v39 = vmin.f32 %v1964_v12, 6.0  ;;  %v1988_v57 = vrot.slane %v1977_v6, 5  ;;  %v7407_v12 = vld [vmem:[#allocation18_spill] sm:$0xff] }
 0x4fd   : > { %v2246_v60 = vmul.f32 %v5712_v3, %v7407_v12 }
 0x4fe   : > { %v1972_v30 = vmul.f32 0.16666667, %v1968_v39  ;;  %v7408_v39 = vld [vmem:[#allocation12_spill] sm:$0xff] }
 0x500   : > { %v1976_v36 = vmul.f32 %v1972_v30, %v1956_v34  ;;  %v7405_v34 = vld [vmem:[#allocation14_spill] sm:$0xff]  ;;  %v2135_v30 = vmul.f32 %v5685_v13, %v7408_v39 }
 0x501   : > { %v2101_v0 = vmul.f32 %v5669_v43, %v7405_v34 }
 0x502   : > { %v1985_v29 = vrot.slane %v1976_v36, 6  ;;  %v7409_v36 = vld [vmem:[#allocation2_spill] sm:$0xff] }
 0x504   : > { %v1996_v28 = vsel %vm610_vm2, %v1985_v29, %v1983_v27  ;;  %v1986_v38 = vsel %vm610_vm2, %v1985_v29, %v1984_v62  ;;  %v2244_v27 = vmul.f32 %v5703_v49, %v7404_v10  ;;  %v2024_v62 = vpop.permute.xlu1 %2023  ;;  %v7424_v10 = vld [vmem:[#allocation30_spill] sm:$0xff] }
 0x505   : > { %v1997_v42 = vsel %vm615_vm4, %v1988_v57, %v1996_v28  ;;  %v1987_v52 = vsel %vm612_vm3, %v1985_v29, %v1986_v38  ;;  %v2268_v29 = vmul.f32 %v5703_v49, %v7409_v36  ;;  %v5766_v49 = vld [vmem:[%s4387_s26 + $0x22] sm:$0x1] }
 0x506   : > { %v1999_v41 = vsel %vm620_vm5, %v1997_v42, 0.0  ;;  %v1989_v63 = vsel %vm615_vm4, %v1988_v57, %v1987_v52  ;;  %v7411_v42 = vld [vmem:[#allocation8_spill] sm:$0xff] }
 0x507   : > { %2000 = vadd.xlane.f32.xlu0 %v1999_v41  ;;  %v1990_v23 = vsel %vm617_vm6, %v1988_v57, %v1989_v63  ;;  %v7410_v57 = vld [vmem:[#allocation13_spill] sm:$0xff]  ;;  %v2270_v52 = vmul.f32 %v5712_v3, %v7411_v42  ;;  %v7412_v41 = vld [vmem:[#allocation19_spill] sm:$0xff]  ;;  %v7413_v63 = vld [vmem:[#allocation44_spill] sm:$0xff] }
 0x508   : > { %1991 = vrot.lane.b32.xlu2 %v1990_v23, %s4326_s12  ;;  %v2138_v28 = vmul.f32 %v5694_v1, %v7410_v57  ;;  %v2161_v23 = vmul.f32 %v7413_v63, %v7412_v41 }
 0x50c   : > { %v5719_v6 = vpop.permute.xlu1 %2027 }
 0x510   : > { %2025 = vrot.lane.b32.xlu2 %v2016_v7, %s4320_s28  ;;  %v5734_v7 = vld [vmem:[%s4387_s26 + $0x9] sm:$0x1] }
 0x514   : > { %v2048_v38 = vpop.permute.xlu1 %2047 }
 0x518   : > { %2029 = vrot.lane.b32.xlu2 %v2018_v48, %s4320_s28  ;;  %v7414_v48 = vld [vmem:[#allocation6_spill] sm:$0xff] }
 0x51b   : > { %2087 = vrot.lane.b32.xlu0 %v2077_v11, %s4320_s28  ;;  %v2304_v11 = vmul.f32 %v5734_v7, %v7414_v48 }
 0x520   : > { %2049 = vrot.lane.b32.xlu2 %v2040_v44, %s4319_s27  ;;  %v5739_v44 = vpop.permute.xlu1 %2051 }
 0x523   : > { %2145 = vrot.lane.b32.xlu0 %v2136_v58, %s4320_s28  ;;  %v5743_v58 = vld [vmem:[%s4387_s26 + $0x51] sm:$0x1] }
 0x524   : > { %7415 = vst [vmem:[#allocation32_spill] sm:$0xff] %v5743_v58 }
 0x528   : > { %2053 = vrot.lane.b32.xlu2 %v2042_v55, %s4319_s27  ;;  %v7416_v55 = vld [vmem:[#allocation7_spill] sm:$0xff] }
 0x52b   : > { %2167 = vrot.lane.b32.xlu0 %v2159_v31, %s4319_s27  ;;  %v2307_v31 = vmul.f32 %v5743_v58, %v7416_v55 }
 0x530   : > { %2085 = vrot.lane.b32.xlu2 %v2076_v56, %s4320_s28 }
 0x533   : > { %2173 = vrot.lane.b32.xlu0 %v2162_v5, %s4319_s27  ;;  %v2084_v5 = vpop.permute.xlu1 %2083 }
 0x538   : > { %2107 = vrot.lane.b32.xlu2 %v2099_v26, %s4319_s27  ;;  %v5751_v26 = vld [vmem:[%s4387_s26 + $0x21] sm:$0x1] }
 0x53b   : > { %2252 = vrot.lane.b32.xlu0 %v2244_v27, %s4320_s28  ;;  %v7417_v27 = vld [vmem:[#allocation10_spill] sm:$0xff] }
 0x540   : > { %2111 = vrot.lane.b32.xlu2 %v2101_v0, %s4319_s27  ;;  %v2329_v0 = vmul.f32 %v5751_v26, %v7417_v27  ;;  %v7421_v27 = vld [vmem:[#allocation16_spill] sm:$0xff] }
 0x543   : > { %2256 = vrot.lane.b32.xlu0 %v2246_v60, %s4320_s28 }
 0x548   : > { %2143 = vrot.lane.b32.xlu2 %v2135_v30, %s4320_s28  ;;  %v2090_v30 = vpop.permute.xlu1 %2089 }
 0x54b   : > { %2276 = vrot.lane.b32.xlu0 %v2268_v29, %s4319_s27  ;;  %v7418_v29 = vld [vmem:[#allocation26_spill] sm:$0xff] }
 0x550   : > { %2149 = vrot.lane.b32.xlu2 %v2138_v28, %s4320_s28  ;;  %v2331_v28 = vmul.f32 %v5743_v58, %v7418_v29  ;;  %v2389_v58 = vmul.f32 %v5766_v49, %v7421_v27  ;;  %v7422_v29 = vld [vmem:[#allocation34_spill] sm:$0xff]  ;;  %v2068_v27 = vmul.f32 %v5594_v33, %v4722_v21 }
 0x553   : > { %2280 = vrot.lane.b32.xlu0 %v2270_v52, %s4319_s27 }
 0x558   : > { %2171 = vrot.lane.b32.xlu2 %v2161_v23, %s4319_s27  ;;  %v5760_v23 = vld [vmem:[%s4387_s26 + $0x3a] sm:$0x1] }
 0x559   : > { %7419 = vst [vmem:[#allocation33_spill] sm:$0xff] %v5760_v23 }
 0x55b   : > { %2312 = vrot.lane.b32.xlu0 %v2304_v11, %s4320_s28  ;;  %v2110_v11 = vpop.permute.xlu1 %2109 }
 0x562   : > { %v1992_v56 = vpop.permute.xlu2 %1991 }
 0x563   : > { %1995 = vst.msk [vmem:[%s4887_s6] sm:$0xf] %vm1994_vm12, %v1992_v56  ;;  %2318 = vrot.lane.b32.xlu0 %v2307_v31, %s4320_s28  ;;  %v7420_v31 = vld [vmem:[#allocation27_spill] sm:$0xff]  ;;  %v2114_v48 = vpop.permute.xlu1 %2113 }
 0x564   : > { %v2366_v56 = vmul.f32 %v5760_v23, %v7420_v31  ;;  %v7425_v23 = vld [vmem:[#allocation24_spill] sm:$0xff] }
 0x565   : > { %v2007_v41 = vmul.f32 %v7425_v23, %v7424_v10 }
 0x56a   : > { %v2026_v60 = vpop.permute.xlu2 %2025 }
 0x56b   : > { %2338 = vrot.lane.b32.xlu0 %v2329_v0, %s4319_s27  ;;  %v2010_v0 = vmul.f32 %v5664_v14, %v7376_v2  ;;  %v7426_v14 = vld [vmem:[#allocation42_spill] sm:$0xff] }
 0x56c   : > { %v2070_v2 = vmul.f32 %v7426_v14, %v4801_v20  ;;  %v2130_v14 = vmul.f32 %v5694_v1, %v4824_v50  ;;  %v7427_v1 = vld [vmem:[#allocation45_spill] sm:$0xff] }
 0x572   : > { %v2030_v52 = vpop.permute.xlu2 %2029 }
 0x573   : > { %2342 = vrot.lane.b32.xlu0 %v2331_v28, %s4319_s27  ;;  %v2008_v28 = vmul.f32 %v5658_v15, %v7422_v29  ;;  %v2038_v42 = vadd.f32 %v2030_v52, %v2010_v0  ;;  %v2035_v15 = vadd.f32 %v2024_v62, %v2007_v41 }
 0x575   : > { %v2036_v31 = vadd.f32 %v2026_v60, %v2008_v28  ;;  %v2059_v0 = vadd.f32 %v2048_v38, %v2035_v15  ;;  %v2067_v60 = vmul.f32 %v5580_v16, %v4596_v32 }
 0x57a   : > { %v2050_v3 = vpop.permute.xlu2 %2049  ;;  %v5775_v36 = vpop.xlane.xlu0 %2000 }
 0x57b   : > { %2376 = vrot.lane.b32.xlu0 %v2366_v56, %s4320_s28  ;;  %7423 = vst [vmem:[#allocation44_spill] sm:$0xff] %v5775_v36  ;;  %v2060_v12 = vadd.f32 %v2050_v3, %v2036_v31  ;;  %v2071_v31 = vadd.f32 %v2067_v60, %v2059_v0  ;;  %v2069_v0 = vmul.f32 %v5669_v43, %v4781_v19 }
 0x57d   : > { %v2072_v57 = vadd.f32 %v2068_v27, %v2060_v12  ;;  %v2095_v28 = vadd.f32 %v2084_v5, %v2071_v31  ;;  %v2127_v12 = vmul.f32 %v5685_v13, %v4619_v53 }
 0x582   : > { %v2054_v55 = vpop.permute.xlu2 %2053 }
 0x583   : > { %2398 = vrot.lane.b32.xlu0 %v2389_v58, %s4319_s27  ;;  %v2062_v56 = vadd.f32 %v2054_v55, %v2038_v42  ;;  %v2148_v42 = vpop.permute.xlu1 %2147 }
 0x585   : > { %v2074_v29 = vadd.f32 %v2070_v2, %v2062_v56  ;;  %v2128_v2 = vmul.f32 %v5611_v35, %v4740_v45 }
 0x587   : > { %v2098_v3 = vadd.f32 %v2090_v30, %v2074_v29 }
 0x589   : > { %v2122_v36 = vadd.f32 %v2114_v48, %v2098_v3 }
 0x58a   : > { %v2086_v52 = vpop.permute.xlu2 %2085 }
 0x58b   : > { %v2096_v58 = vadd.f32 %v2086_v52, %v2072_v57  ;;  %v2134_v57 = vadd.f32 %v2130_v14, %v2122_v36  ;;  %v2170_v30 = vpop.permute.xlu1 %2169 }
 0x58d   : > { %v2088_v55 = vpop.permute.xlu0 %2087  ;;  %v2120_v23 = vadd.f32 %v2110_v11, %v2096_v58  ;;  %v2009_v11 = vmul.f32 %v7427_v1, %v4760_v54 }
 0x58f   : > { %v2132_v16 = vadd.f32 %v2128_v2, %v2120_v23  ;;  %v2037_v35 = vadd.f32 %v5719_v6, %v2009_v11  ;;  %v2129_v6 = vmul.f32 %v7413_v63, %v4808_v4 }
 0x591   : > { %v2061_v15 = vadd.f32 %v5739_v44, %v2037_v35 }
 0x592   : > { %v2108_v33 = vpop.permute.xlu2 %2107 }
 0x593   : > { %v2119_v62 = vadd.f32 %v2108_v33, %v2095_v28  ;;  %v2073_v60 = vadd.f32 %v2069_v0, %v2061_v15 }
 0x595   : > { %v2146_v38 = vpop.permute.xlu0 %2145  ;;  %v2131_v41 = vadd.f32 %v2127_v12, %v2119_v62  ;;  %v2097_v23 = vadd.f32 %v2088_v55, %v2073_v60 }
 0x596   : > { %v2156_v27 = vadd.f32 %v2146_v38, %v2132_v16 }
 0x598   : > { %v2180_v29 = vadd.f32 %v2170_v30, %v2156_v27 }
 0x59a   : > { %v2184_v48 = vadd.f32 %v2180_v29, %v7295_v59  ;;  %v2112_v5 = vpop.permute.xlu2 %2111 }
 0x59b   : > { %v2121_v33 = vadd.f32 %v2112_v5, %v2097_v23 }
 0x59c   : > { %v2188_v56 = vadd.f32 3.0, %v2184_v48 }
 0x59d   : > { %v2168_v13 = vpop.permute.xlu0 %2167  ;;  %v2133_v27 = vadd.f32 %v2129_v6, %v2121_v33 }
 0x59e   : > { %v2192_v52 = vmax.f32 %v2188_v56, 0.0 }
 0x59f   : > { %v2157_v56 = vadd.f32 %v2148_v42, %v2133_v27 }
 0x5a0   : > { %v2196_v3 = vmin.f32 %v2192_v52, 6.0 }
 0x5a2   : > { %v2144_v36 = vpop.permute.xlu2 %2143  ;;  %v2200_v14 = vmul.f32 0.16666667, %v2196_v3 }
 0x5a3   : > { %v2155_v58 = vadd.f32 %v2144_v36, %v2131_v41 }
 0x5a4   : > { %v2204_v38 = vmul.f32 %v2200_v14, %v2184_v48 }
 0x5a5   : > { %v2179_v31 = vadd.f32 %v2168_v13, %v2155_v58  ;;  %v2174_v16 = vpop.permute.xlu0 %2173 }
 0x5a6   : > { %v2211_v55 = vrot.slane %v2204_v38, 7  ;;  %v5820_v38 = vld [vmem:[%s4387_s26 + $0x50] sm:$0x1] }
 0x5a7   : > { %v2183_v28 = vadd.f32 %v2179_v31, %v4661_v47  ;;  %v2247_v27 = vmul.f32 %v5820_v38, %v7307_v40 }
 0x5a9   : > { %v2187_v2 = vadd.f32 3.0, %v2183_v28 }
 0x5aa   : > { %v2150_v62 = vpop.permute.xlu2 %2149 }
 0x5ab   : > { %v2191_v44 = vmax.f32 %v2187_v2, 0.0  ;;  %v2158_v12 = vadd.f32 %v2150_v62, %v2134_v57 }
 0x5ad   : > { %v2195_v43 = vmin.f32 %v2191_v44, 6.0  ;;  %v2182_v41 = vadd.f32 %v2174_v16, %v2158_v12  ;;  %v5814_v12 = vld [vmem:[%s4387_s26 + $0x20] sm:$0x1] }
 0x5ae   : > { %v2245_v16 = vmul.f32 %v5814_v12, %v7305_v24 }
 0x5af   : > { %v2199_v30 = vmul.f32 0.16666667, %v2195_v43  ;;  %v2186_v29 = vadd.f32 %v2182_v41, %v4865_v25  ;;  %v5826_v43 = vld [vmem:[%s4387_s26 + $0x39] sm:$0x1] }
 0x5b0   : > { %v2306_v41 = vmul.f32 %v5826_v43, %v7339_v61 }
 0x5b1   : > { %v2203_v1 = vmul.f32 %v2199_v30, %v2183_v28  ;;  %v2190_v11 = vadd.f32 3.0, %v2186_v29  ;;  %v2269_v30 = vmul.f32 %v5814_v12, %v7340_v17 }
 0x5b2   : > { %v2172_v5 = vpop.permute.xlu2 %2171 }
 0x5b3   : > { %v2194_v35 = vmax.f32 %v2190_v11, 0.0  ;;  %v2181_v15 = vadd.f32 %v2172_v5, %v2157_v56  ;;  %v2212_v52 = vsel %vm605_vm0, %v2211_v55, %v2203_v1  ;;  %v5841_v1 = vld [vmem:[%s4387_s26 + $0xa] sm:$0x1]  ;;  %v2305_v56 = vmul.f32 %v5751_v26, %v7343_v8  ;;  %v5850_v5 = vld [vmem:[%s4387_s26 + $0x52] sm:$0x1] }
 0x5b4   : > { %v2213_v63 = vsel %vm607_vm1, %v2211_v55, %v2212_v52  ;;  %v2271_v55 = vmul.f32 %v5820_v38, %v7341_v22  ;;  %v2388_v11 = vmul.f32 %v5841_v1, %v7357_v37 }
 0x5b5   : > { %v2185_v57 = vadd.f32 %v2181_v15, %v4852_v46  ;;  %v2198_v48 = vmin.f32 %v2194_v35, 6.0  ;;  %v2391_v35 = vmul.f32 %v5850_v5, %v7358_v9  ;;  %v2328_v15 = vmul.f32 %v5734_v7, %v7345_v18 }
 0x5b7   : > { %v2189_v13 = vadd.f32 3.0, %v2185_v57  ;;  %v2202_v0 = vmul.f32 0.16666667, %v2198_v48  ;;  %v5868_v48 = vld [vmem:[%s4387_s26 + $0x51] sm:$0x1] }
 0x5b8   : > { %7429 = vst [vmem:[#allocation24_spill] sm:$0xff] %v5868_v48 }
 0x5b9   : > { %v2193_v36 = vmax.f32 %v2189_v13, 0.0  ;;  %v2206_v3 = vmul.f32 %v2202_v0, %v2186_v29  ;;  %v2365_v29 = vmul.f32 %v5766_v49, %v7356_v51  ;;  %v2473_v13 = vmul.f32 %v5868_v48, %v7307_v40  ;;  %v7448_v40 = vld [vmem:[#allocation27_spill] sm:$0xff] }
 0x5bb   : > { %v2197_v58 = vmin.f32 %v2193_v36, 6.0  ;;  %v2217_v23 = vrot.slane %v2206_v3, 5  ;;  %v2364_v36 = vmul.f32 %v5841_v1, %v7408_v39  ;;  %v2497_v3 = vmul.f32 %v5868_v48, %v7341_v22 }
 0x5bd   : > { %v2201_v60 = vmul.f32 0.16666667, %v2197_v58  ;;  %v7430_v58 = vld [vmem:[#allocation13_spill] sm:$0xff] }
 0x5bf   : > { %v2205_v31 = vmul.f32 %v2201_v60, %v2185_v57  ;;  %v2330_v57 = vmul.f32 %v5826_v43, %v7405_v34  ;;  %v2367_v60 = vmul.f32 %v5850_v5, %v7430_v58 }
 0x5c1   : > { %v2214_v42 = vrot.slane %v2205_v31, 6  ;;  %v7431_v31 = vld [vmem:[#allocation19_spill] sm:$0xff] }
 0x5c3   : > { %v2225_v28 = vsel %vm610_vm2, %v2214_v42, %v2212_v52  ;;  %v2215_v14 = vsel %vm610_vm2, %v2214_v42, %v2213_v63  ;;  %v5859_v52 = vld [vmem:[%s4387_s26 + $0x21] sm:$0x1] }
 0x5c4   : > { %v2226_v33 = vsel %vm615_vm4, %v2217_v23, %v2225_v28  ;;  %v2216_v2 = vsel %vm612_vm3, %v2214_v42, %v2215_v14  ;;  %7428 = vst [vmem:[#allocation30_spill] sm:$0xff] %v5859_v52  ;;  %v2471_v63 = vmul.f32 %v5859_v52, %v7305_v24  ;;  %v2495_v0 = vmul.f32 %v5859_v52, %v7340_v17  ;;  %v7432_v42 = vld [vmem:[#allocation33_spill] sm:$0xff]  ;;  %v5889_v28 = vld [vmem:[%s4387_s26 + $0x22] sm:$0x1] }
 0x5c5   : > { %v2228_v62 = vsel %vm620_vm5, %v2226_v33, 0.0  ;;  %v2218_v6 = vsel %vm615_vm4, %v2217_v23, %v2216_v2  ;;  %7433 = vst [vmem:[#allocation42_spill] sm:$0xff] %v5889_v28  ;;  %v2531_v14 = vmul.f32 %v5889_v28, %v7343_v8  ;;  %v5894_v33 = vld [vmem:[%s4387_s26 + $0x9] sm:$0x1]  ;;  %v5896_v2 = vpop.permute.xlu0 %2252  ;;  %v5969_v8 = vld [vmem:[%s4387_s26 + $0x3a] sm:$0x1] }
 0x5c6   : > { %2229 = vadd.xlane.f32.xlu2 %v2228_v62  ;;  %v2219_v44 = vsel %vm617_vm6, %v2217_v23, %v2218_v6  ;;  %v2390_v23 = vmul.f32 %v7432_v42, %v7431_v31  ;;  %v7434_v62 = vld [vmem:[#allocation3_spill] sm:$0xff]  ;;  %7445 = vst [vmem:[#allocation48_spill] sm:$0xff] %v5969_v8 }
 0x5c7   : > { %2220 = vrot.lane.b32.xlu1 %v2219_v44, %s4327_s13  ;;  %v2470_v6 = vmul.f32 %v5894_v33, %v7434_v62  ;;  %v5903_v44 = vld [vmem:[%s4387_s26 + $0xa] sm:$0x1] }
 0x5cf   : > { %2254 = vrot.lane.b32.xlu1 %v2245_v16, %s4320_s28  ;;  %v2554_v16 = vmul.f32 %v5903_v44, %v7345_v18 }
 0x5d7   : > { %2258 = vrot.lane.b32.xlu1 %v2247_v27, %s4320_s28  ;;  %v5908_v27 = vld [vmem:[%s4387_s26 + $0x39] sm:$0x1] }
 0x5d8   : > { %7435 = vst [vmem:[#allocation45_spill] sm:$0xff] %v5908_v27 }
 0x5de   : > { %2316 = vrot.lane.b32.xlu2 %v2306_v41, %s4320_s28  ;;  %v7436_v41 = vld [vmem:[#allocation18_spill] sm:$0xff] }
 0x5df   : > { %2278 = vrot.lane.b32.xlu1 %v2269_v30, %s4319_s27  ;;  %v2472_v30 = vmul.f32 %v5908_v27, %v7436_v41 }
 0x5e6   : > { %2374 = vrot.lane.b32.xlu2 %v2365_v29, %s4320_s28  ;;  %v5913_v29 = vpop.permute.xlu0 %2256 }
 0x5e7   : > { %2282 = vrot.lane.b32.xlu1 %v2271_v55, %s4319_s27  ;;  %v5917_v55 = vld [vmem:[%s4387_s26 + $0x3a] sm:$0x1] }
 0x5ee   : > { %2396 = vrot.lane.b32.xlu2 %v2388_v11, %s4319_s27  ;;  %v2556_v11 = vmul.f32 %v5917_v55, %v7405_v34 }
 0x5ef   : > { %2314 = vrot.lane.b32.xlu1 %v2305_v56, %s4320_s28  ;;  %v7437_v56 = vld [vmem:[#allocation2_spill] sm:$0xff] }
 0x5f6   : > { %2402 = vrot.lane.b32.xlu2 %v2391_v35, %s4319_s27  ;;  %v2494_v35 = vmul.f32 %v5894_v33, %v7437_v56 }
 0x5f7   : > { %2336 = vrot.lane.b32.xlu1 %v2328_v15, %s4319_s27  ;;  %v2277_v15 = vpop.permute.xlu0 %2276 }
 0x5fe   : > { %2480 = vrot.lane.b32.xlu2 %v2471_v63, %s4320_s28  ;;  %v5926_v63 = vld [vmem:[%s4387_s26 + $0x23] sm:$0x1] }
 0x5ff   : > { %2340 = vrot.lane.b32.xlu1 %v2330_v57, %s4319_s27  ;;  %7438 = vst [vmem:[#allocation33_spill] sm:$0xff] %v5926_v63  ;;  %v2591_v57 = vmul.f32 %v5926_v63, %v7356_v51  ;;  %v7444_v51 = vld [vmem:[#allocation10_spill] sm:$0xff] }
 0x600   : > { %v2555_v34 = vmul.f32 %v5889_v28, %v7444_v51  ;;  %v7450_v28 = vld [vmem:[#allocation16_spill] sm:$0xff] }
 0x601   : > { %v2615_v52 = vmul.f32 %v5926_v63, %v7450_v28 }
 0x606   : > { %2484 = vrot.lane.b32.xlu2 %v2473_v13, %s4320_s28  ;;  %v7439_v13 = vld [vmem:[#allocation8_spill] sm:$0xff] }
 0x607   : > { %2372 = vrot.lane.b32.xlu1 %v2364_v36, %s4320_s28  ;;  %v2496_v36 = vmul.f32 %v5908_v27, %v7439_v13 }
 0x60e   : > { %2504 = vrot.lane.b32.xlu2 %v2495_v0, %s4319_s27 }
 0x60f   : > { %2378 = vrot.lane.b32.xlu1 %v2367_v60, %s4320_s28  ;;  %v5936_v60 = vpop.permute.xlu0 %2280 }
 0x616   : > { %2508 = vrot.lane.b32.xlu2 %v2497_v3, %s4319_s27  ;;  %v5939_v3 = vld [vmem:[%s4387_s26 + $0xb] sm:$0x1] }
 0x617   : > { %2400 = vrot.lane.b32.xlu1 %v2390_v23, %s4319_s27  ;;  %v2614_v23 = vmul.f32 %v5939_v3, %v7357_v37 }
 0x61e   : > { %2540 = vrot.lane.b32.xlu2 %v2531_v14, %s4320_s28  ;;  %v7440_v14 = vld [vmem:[#allocation6_spill] sm:$0xff] }
 0x61f   : > { %2478 = vrot.lane.b32.xlu1 %v2470_v6, %s4320_s28  ;;  %v2530_v6 = vmul.f32 %v5903_v44, %v7440_v14 }
 0x626   : > { %2562 = vrot.lane.b32.xlu2 %v2554_v16, %s4319_s27 }
 0x627   : > { %2482 = vrot.lane.b32.xlu1 %v2472_v30, %s4320_s28  ;;  %v5948_v30 = vld [vmem:[%s4387_s26 + $0x52] sm:$0x1] }
 0x628   : > { %7441 = vst [vmem:[#allocation46_spill] sm:$0xff] %v5948_v30 }
 0x62e   : > { %2566 = vrot.lane.b32.xlu2 %v2556_v11, %s4319_s27  ;;  %v5951_v11 = vld [vmem:[%s4387_s26 + $0x53] sm:$0x1] }
 0x62f   : > { %2502 = vrot.lane.b32.xlu1 %v2494_v35, %s4319_s27  ;;  %v2617_v35 = vmul.f32 %v5951_v11, %v7358_v9 }
 0x636   : > { %2600 = vrot.lane.b32.xlu2 %v2591_v57, %s4320_s28  ;;  %v2313_v57 = vpop.permute.xlu0 %2312 }
 0x637   : > { %2506 = vrot.lane.b32.xlu1 %v2496_v36, %s4319_s27  ;;  %v7442_v36 = vld [vmem:[#allocation7_spill] sm:$0xff] }
 0x639   : > { %v2221_v0 = vpop.permute.xlu1 %2220 }
 0x63a   : > { %2224 = vst.msk [vmem:[%s4887_s6] sm:$0xf] %vm2223_vm13, %v2221_v0  ;;  %v2533_v0 = vmul.f32 %v5948_v30, %v7442_v36  ;;  %v5978_v36 = vld [vmem:[%s4387_s26 + $0x3b] sm:$0x1] }
 0x63b   : > { %v2592_v24 = vmul.f32 %v5978_v36, %v7448_v40 }
 0x63e   : > { %2622 = vrot.lane.b32.xlu2 %v2614_v23, %s4319_s27  ;;  %v2319_v9 = vpop.permute.xlu0 %2318 }
 0x63f   : > { %2538 = vrot.lane.b32.xlu1 %v2530_v6, %s4320_s28  ;;  %v5960_v6 = vld [vmem:[%s4387_s26 + $0xa] sm:$0x1] }
 0x640   : > { %7443 = vst [vmem:[#allocation47_spill] sm:$0xff] %v5960_v6  ;;  %v2698_v37 = vmul.f32 %v5960_v6, %v7434_v62 }
 0x641   : > { %v2255_v16 = vpop.permute.xlu1 %2254 }
 0x646   : > { %2628 = vrot.lane.b32.xlu2 %v2617_v35, %s4319_s27  ;;  %v2700_v35 = vmul.f32 %v5969_v8, %v7436_v41  ;;  %v2339_v62 = vpop.permute.xlu0 %2338  ;;  %v7449_v41 = vld [vmem:[#allocation34_spill] sm:$0xff] }
 0x647   : > { %2544 = vrot.lane.b32.xlu1 %v2533_v0, %s4320_s28  ;;  %v7446_v0 = vld [vmem:[#allocation26_spill] sm:$0xff]  ;;  %v2237_v27 = vmul.f32 %v5814_v12, %v7449_v41 }
 0x648   : > { %v2557_v22 = vmul.f32 %v5948_v30, %v7446_v0 }
 0x649   : > { %v2259_v23 = vpop.permute.xlu1 %2258 }
 0x64e   : > { %2706 = vrot.lane.b32.xlu2 %v2698_v37, %s4320_s28  ;;  %v5980_v37 = vpop.xlane.xlu2 %2229  ;;  %v2343_v48 = vpop.permute.xlu0 %2342 }
 0x64f   : > { %2564 = vrot.lane.b32.xlu1 %v2555_v34, %s4319_s27  ;;  %7447 = vst [vmem:[#allocation49_spill] sm:$0xff] %v5980_v37  ;;  %v2722_v34 = vmul.f32 %v5960_v6, %v7437_v56  ;;  %v2297_v37 = vmul.f32 %v5751_v26, %v4722_v21  ;;  %v2724_v6 = vmul.f32 %v5969_v8, %v7439_v13  ;;  %v7452_v8 = vld [vmem:[#allocation39_spill] sm:$0xff] }
 0x650   : > { %v2239_v13 = vmul.f32 %v5820_v38, %v7452_v8 }
 0x651   : > { %v2279_v18 = vpop.permute.xlu1 %2278 }
 0x656   : > { %2710 = vrot.lane.b32.xlu2 %v2700_v35, %s4320_s28  ;;  %v2317_v56 = vpop.permute.xlu2 %2316 }
 0x657   : > { %2568 = vrot.lane.b32.xlu1 %v2557_v22, %s4319_s27  ;;  %v2265_v22 = vadd.f32 %v2255_v16, %v2237_v27 }
 0x659   : > { %v2283_v17 = vpop.permute.xlu1 %2282  ;;  %v2289_v30 = vadd.f32 %v2279_v18, %v2265_v22 }
 0x65b   : > { %v2301_v12 = vadd.f32 %v2297_v37, %v2289_v30  ;;  %v2267_v37 = vadd.f32 %v2259_v23, %v2239_v13  ;;  %v7454_v13 = vld [vmem:[#allocation28_spill] sm:$0xff] }
 0x65c   : > { %v2238_v23 = vmul.f32 %v7454_v13, %v4760_v54 }
 0x65e   : > { %2730 = vrot.lane.b32.xlu2 %v2722_v34, %s4319_s27  ;;  %v6001_v34 = vld [vmem:[%s4387_s26 + $0xb] sm:$0x1] }
 0x65f   : > { %2602 = vrot.lane.b32.xlu1 %v2592_v24, %s4320_s28  ;;  %v7451_v24 = vld [vmem:[#allocation31_spill] sm:$0xff]  ;;  %v2758_v30 = vmul.f32 %v6001_v34, %v7440_v14 }
 0x660   : > { %v2236_v27 = vmul.f32 %v7451_v24, %v7424_v10 }
 0x661   : > { %v2315_v35 = vpop.permute.xlu1 %2314 }
 0x662   : > { %v2325_v18 = vadd.f32 %v2315_v35, %v2301_v12  ;;  %v2264_v26 = vadd.f32 %v5896_v2, %v2236_v27  ;;  %v2357_v35 = vmul.f32 %v5766_v49, %v4740_v45  ;;  %v2375_v12 = vpop.permute.xlu2 %2374  ;;  %v6014_v27 = vld [vmem:[%s4387_s26 + $0x3b] sm:$0x1] }
 0x664   : > { %v2288_v22 = vadd.f32 %v2277_v15, %v2264_v26  ;;  %v2349_v63 = vadd.f32 %v2339_v62, %v2325_v18  ;;  %v2291_v15 = vadd.f32 %v2283_v17, %v2267_v37  ;;  %v7453_v18 = vld [vmem:[#allocation32_spill] sm:$0xff]  ;;  %v2266_v17 = vadd.f32 %v5913_v29, %v2238_v23 }
 0x665   : > { %v2299_v26 = vmul.f32 %v7453_v18, %v4801_v20 }
 0x666   : > { %2734 = vrot.lane.b32.xlu2 %v2724_v6, %s4319_s27  ;;  %v2377_v6 = vpop.permute.xlu0 %2376  ;;  %v2361_v24 = vadd.f32 %v2357_v35, %v2349_v63  ;;  %v2356_v63 = vmul.f32 %v5841_v1, %v4619_v53 }
 0x667   : > { %2624 = vrot.lane.b32.xlu1 %v2615_v52, %s4319_s27  ;;  %v2296_v52 = vmul.f32 %v5734_v7, %v4596_v32  ;;  %v2760_v7 = vmul.f32 %v6014_v27, %v7339_v61  ;;  %v2303_v49 = vadd.f32 %v2299_v26, %v2291_v15  ;;  %v2298_v15 = vmul.f32 %v5826_v43, %v4781_v19 }
 0x668   : > { %v2359_v43 = vmul.f32 %v5850_v5, %v4824_v50 }
 0x669   : > { %v2337_v16 = vpop.permute.xlu1 %2336  ;;  %v2300_v2 = vadd.f32 %v2296_v52, %v2288_v22  ;;  %v2290_v22 = vadd.f32 %v5936_v60, %v2266_v17  ;;  %v2327_v52 = vadd.f32 %v2319_v9, %v2303_v49  ;;  %v2358_v49 = vmul.f32 %v7432_v42, %v4808_v4 }
 0x66b   : > { %v2324_v62 = vadd.f32 %v2313_v57, %v2300_v2  ;;  %v2397_v2 = vpop.permute.xlu2 %2396  ;;  %v2351_v60 = vadd.f32 %v2343_v48, %v2327_v52  ;;  %v6042_v48 = vld [vmem:[%s4387_s26 + $0x53] sm:$0x1] }
 0x66c   : > { %v2785_v52 = vmul.f32 %v6042_v48, %v7446_v0 }
 0x66d   : > { %v2348_v14 = vadd.f32 %v2337_v16, %v2324_v62  ;;  %v6030_v16 = vld [vmem:[%s4387_s26 + $0x23] sm:$0x1]  ;;  %v2363_v13 = vadd.f32 %v2359_v43, %v2351_v60 }
 0x66e   : > { %2766 = vrot.lane.b32.xlu2 %v2758_v30, %s4320_s28  ;;  %v2385_v30 = vadd.f32 %v2375_v12, %v2361_v24  ;;  %v2399_v57 = vpop.permute.xlu0 %2398  ;;  %v2783_v29 = vmul.f32 %v6030_v16, %v7444_v51  ;;  %v2302_v24 = vadd.f32 %v2298_v15, %v2290_v22 }
 0x66f   : > { %v2360_v35 = vadd.f32 %v2356_v63, %v2348_v14 }
 0x670   : > { %v2409_v37 = vadd.f32 %v2399_v57, %v2385_v30  ;;  %v2326_v9 = vadd.f32 %v2317_v56, %v2302_v24 }
 0x671   : > { %v2341_v38 = vpop.permute.xlu1 %2340 }
 0x672   : > { %v2413_v1 = vadd.f32 %v2409_v37, %v7295_v59 }
 0x673   : > { %v2403_v63 = vpop.permute.xlu2 %2402 }
 0x674   : > { %v2417_v26 = vadd.f32 3.0, %v2413_v1 }
 0x676   : > { %2770 = vrot.lane.b32.xlu2 %v2760_v7, %s4320_s28  ;;  %v2350_v7 = vadd.f32 %v2341_v38, %v2326_v9  ;;  %v2421_v56 = vmax.f32 %v2417_v26, 0.0 }
 0x678   : > { %v2362_v57 = vadd.f32 %v2358_v49, %v2350_v7  ;;  %v2425_v42 = vmin.f32 %v2421_v56, 6.0 }
 0x679   : > { %v2373_v18 = vpop.permute.xlu1 %2372 }
 0x67a   : > { %v2384_v12 = vadd.f32 %v2373_v18, %v2360_v35  ;;  %v2386_v35 = vadd.f32 %v2377_v6, %v2362_v57  ;;  %v6049_v18 = vld [vmem:[%s4387_s26 + $0x3c] sm:$0x1]  ;;  %v2429_v60 = vmul.f32 0.16666667, %v2425_v42 }
 0x67c   : > { %v2408_v62 = vadd.f32 %v2397_v2, %v2384_v12  ;;  %v2433_v7 = vmul.f32 %v2429_v60, %v2413_v1  ;;  %v2590_v60 = vmul.f32 %v5939_v3, %v7408_v39 }
 0x67e   : > { %v2412_v14 = vadd.f32 %v2408_v62, %v4661_v47  ;;  %2792 = vrot.lane.b32.xlu2 %v2783_v29, %s4319_s27  ;;  %v2820_v62 = vmul.f32 %v6049_v18, %v7448_v40  ;;  %v2440_v56 = vrot.slane %v2433_v7, 7  ;;  %v2616_v7 = vmul.f32 %v5978_v36, %v7431_v31 }
 0x680   : > { %v2416_v30 = vadd.f32 3.0, %v2412_v14 }
 0x681   : > { %v2379_v23 = vpop.permute.xlu1 %2378 }
 0x682   : > { %v2387_v17 = vadd.f32 %v2379_v23, %v2363_v13  ;;  %v2420_v5 = vmax.f32 %v2416_v30, 0.0  ;;  %v6056_v30 = vld [vmem:[%s4387_s26 + $0x24] sm:$0x1] }
 0x684   : > { %v2411_v22 = vadd.f32 %v2403_v63, %v2387_v17  ;;  %v2424_v15 = vmin.f32 %v2420_v5, 6.0  ;;  %v2843_v63 = vmul.f32 %v6056_v30, %v7450_v28 }
 0x686   : > { %v2415_v38 = vadd.f32 %v2411_v22, %v4865_v25  ;;  %2796 = vrot.lane.b32.xlu2 %v2785_v52, %s4319_s27  ;;  %v2428_v43 = vmul.f32 0.16666667, %v2424_v15 }
 0x688   : > { %v2419_v37 = vadd.f32 3.0, %v2415_v38  ;;  %v2432_v23 = vmul.f32 %v2428_v43, %v2412_v14  ;;  %v2593_v43 = vmul.f32 %v5951_v11, %v7430_v58 }
 0x689   : > { %v2401_v2 = vpop.permute.xlu1 %2400 }
 0x68a   : > { %v2423_v12 = vmax.f32 %v2419_v37, 0.0  ;;  %v2410_v29 = vadd.f32 %v2401_v2, %v2386_v35  ;;  %v2441_v52 = vsel %vm605_vm0, %v2440_v56, %v2432_v23  ;;  %v2462_v23 = vmul.f32 %v5894_v33, %v7424_v10 }
 0x68b   : > { %v2442_v37 = vsel %vm607_vm1, %v2440_v56, %v2441_v52  ;;  %v2582_v33 = vmul.f32 %v5939_v3, %v4619_v53 }
 0x68c   : > { %v2414_v24 = vadd.f32 %v2410_v29, %v4852_v46  ;;  %v2427_v9 = vmin.f32 %v2423_v12, 6.0  ;;  %v2532_v29 = vmul.f32 %v5917_v55, %v7339_v61 }
 0x68e   : > { %v2418_v26 = vadd.f32 3.0, %v2414_v24  ;;  %2830 = vrot.lane.b32.xlu2 %v2820_v62, %s4320_s28  ;;  %v2431_v13 = vmul.f32 0.16666667, %v2427_v9 }
 0x690   : > { %v2422_v6 = vmax.f32 %v2418_v26, 0.0  ;;  %v2435_v57 = vmul.f32 %v2431_v13, %v2415_v38  ;;  %v2481_v38 = vpop.permute.xlu2 %2480 }
 0x691   : > { %v2479_v12 = vpop.permute.xlu1 %2478 }
 0x692   : > { %v2426_v49 = vmin.f32 %v2422_v6, 6.0  ;;  %v2446_v1 = vrot.slane %v2435_v57, 5  ;;  %v2522_v57 = vmul.f32 %v5903_v44, %v4596_v32 }
 0x694   : > { %v2430_v17 = vmul.f32 0.16666667, %v2426_v49  ;;  %v2490_v49 = vadd.f32 %v2479_v12, %v2462_v23 }
 0x696   : > { %v2434_v22 = vmul.f32 %v2430_v17, %v2414_v24  ;;  %2852 = vrot.lane.b32.xlu2 %v2843_v63, %s4319_s27 }
 0x698   : > { %v2443_v5 = vrot.slane %v2434_v22, 6  ;;  %v2485_v24 = vpop.permute.xlu2 %2484 }
 0x699   : > { %v2483_v62 = vpop.permute.xlu1 %2482 }
 0x69a   : > { %v2451_v14 = vsel %vm610_vm2, %v2443_v5, %v2441_v52  ;;  %v2444_v35 = vsel %vm610_vm2, %v2443_v5, %v2442_v37 }
 0x69b   : > { %v2452_v42 = vsel %vm615_vm4, %v2446_v1, %v2451_v14  ;;  %v2445_v2 = vsel %vm612_vm3, %v2443_v5, %v2444_v35 }
 0x69c   : > { %v2454_v15 = vsel %vm620_vm5, %v2452_v42, 0.0  ;;  %v2447_v56 = vsel %vm615_vm4, %v2446_v1, %v2445_v2  ;;  %v7455_v2 = vld [vmem:[#allocation30_spill] sm:$0xff] }
 0x69d   : > { %2455 = vadd.xlane.f32.xlu0 %v2454_v15  ;;  %v2448_v5 = vsel %vm617_vm6, %v2446_v1, %v2447_v56 }
 0x69e   : > { %2450 = vst.msk [vmem:[%s4887_s6 + $0x4] sm:$0xf] %vm620_vm5, %v2448_v5 }
 0x6a0   : > { %v2505_v9 = vpop.permute.xlu2 %2504 }
 0x6a1   : > { %v2503_v26 = vpop.permute.xlu1 %2502 }
 0x6a2   : > { %v2514_v63 = vadd.f32 %v2503_v26, %v2490_v49  ;;  %v7456_v26 = vld [vmem:[#allocation42_spill] sm:$0xff] }
 0x6a3   : > { %v2523_v1 = vmul.f32 %v7456_v26, %v4722_v21 }
 0x6a4   : > { %v2526_v52 = vadd.f32 %v2522_v57, %v2514_v63  ;;  %v7457_v57 = vld [vmem:[#allocation33_spill] sm:$0xff] }
 0x6a5   : > { %v2583_v3 = vmul.f32 %v7457_v57, %v4740_v45 }
 0x6a8   : > { %v2509_v6 = vpop.permute.xlu2 %2508 }
 0x6a9   : > { %v2507_v13 = vpop.permute.xlu1 %2506 }
 0x6b0   : > { %v2541_v17 = vpop.permute.xlu2 %2540 }
 0x6b1   : > { %2542 = vrot.lane.b32.xlu0 %v2532_v29, %s4320_s28  ;;  %v2539_v22 = vpop.permute.xlu1 %2538 }
 0x6b2   : > { %v2550_v37 = vadd.f32 %v2539_v22, %v2526_v52 }
 0x6b8   : > { %v2563_v14 = vpop.permute.xlu2 %2562 }
 0x6b9   : > { %2598 = vrot.lane.b32.xlu0 %v2590_v60, %s4320_s28  ;;  %v2574_v35 = vadd.f32 %v2563_v14, %v2550_v37  ;;  %v2545_v15 = vpop.permute.xlu1 %2544  ;;  %v2463_v60 = vmul.f32 %v7455_v2, %v7449_v41 }
 0x6bb   : > { %v2586_v42 = vadd.f32 %v2582_v33, %v2574_v35  ;;  %v2491_v44 = vadd.f32 %v2481_v38, %v2463_v60  ;;  %v7459_v38 = vld [vmem:[#allocation24_spill] sm:$0xff] }
 0x6c0   : > { %v2567_v23 = vpop.permute.xlu2 %2566 }
 0x6c1   : > { %2604 = vrot.lane.b32.xlu0 %v2593_v43, %s4320_s28  ;;  %v2565_v12 = vpop.permute.xlu1 %2564  ;;  %v2515_v43 = vadd.f32 %v2505_v9, %v2491_v44  ;;  %v2465_v9 = vmul.f32 %v7459_v38, %v7452_v8 }
 0x6c3   : > { %v2493_v60 = vadd.f32 %v2485_v24, %v2465_v9 }
 0x6c5   : > { %v2517_v44 = vadd.f32 %v2509_v6, %v2493_v60 }
 0x6c8   : > { %v2601_v52 = vpop.permute.xlu2 %2600 }
 0x6c9   : > { %2626 = vrot.lane.b32.xlu0 %v2616_v7, %s4319_s27  ;;  %v2569_v29 = vpop.permute.xlu1 %2568  ;;  %v2527_v7 = vadd.f32 %v2523_v1, %v2515_v43 }
 0x6cb   : > { %v2551_v63 = vadd.f32 %v2541_v17, %v2527_v7  ;;  %v7460_v17 = vld [vmem:[#allocation45_spill] sm:$0xff]  ;;  %v7461_v7 = vld [vmem:[#allocation46_spill] sm:$0xff] }
 0x6cd   : > { %v2575_v56 = vadd.f32 %v2565_v12, %v2551_v63  ;;  %v2464_v12 = vmul.f32 %v7460_v17, %v4760_v54  ;;  %v2525_v63 = vmul.f32 %v7461_v7, %v4801_v20 }
 0x6cf   : > { %v2587_v22 = vadd.f32 %v2583_v3, %v2575_v56  ;;  %v2492_v43 = vadd.f32 %v2483_v62, %v2464_v12  ;;  %v2529_v56 = vadd.f32 %v2525_v63, %v2517_v44  ;;  %v2524_v3 = vmul.f32 %v5917_v55, %v4781_v19 }
 0x6d1   : > { %v2603_v49 = vpop.permute.xlu1 %2602  ;;  %v2611_v14 = vadd.f32 %v2601_v52, %v2587_v22  ;;  %v2516_v1 = vadd.f32 %v2507_v13, %v2492_v43  ;;  %v2623_v22 = vpop.permute.xlu2 %2622  ;;  %v2585_v13 = vmul.f32 %v5951_v11, %v4824_v50 }
 0x6d9   : > { %v2625_v5 = vpop.permute.xlu1 %2624 }
 0x6da   : > { %v2635_v35 = vadd.f32 %v2625_v5, %v2611_v14  ;;  %v2553_v5 = vadd.f32 %v2545_v15, %v2529_v56  ;;  %v2528_v14 = vadd.f32 %v2524_v3, %v2516_v1  ;;  %v2584_v15 = vmul.f32 %v5978_v36, %v4808_v4 }
 0x6dc   : > { %v2639_v33 = vadd.f32 %v2635_v35, %v7295_v59  ;;  %v2577_v35 = vadd.f32 %v2569_v29, %v2553_v5 }
 0x6de   : > { %v2643_v26 = vadd.f32 3.0, %v2639_v33  ;;  %v2589_v44 = vadd.f32 %v2585_v13, %v2577_v35 }
 0x6e0   : > { %v2647_v57 = vmax.f32 %v2643_v26, 0.0 }
 0x6e2   : > { %v2651_v38 = vmin.f32 %v2647_v57, 6.0 }
 0x6e4   : > { %v2655_v60 = vmul.f32 0.16666667, %v2651_v38 }
 0x6e6   : > { %v2659_v29 = vmul.f32 %v2655_v60, %v2639_v33 }
 0x6e8   : > { %v2666_v57 = vrot.slane %v2659_v29, 7  ;;  %v6125_v29 = vld [vmem:[%s4387_s26 + $0x22] sm:$0x1] }
 0x710   : > { %v6096_v37 = vpop.xlane.xlu0 %2455 }
 0x711   : > { %7458 = vst [vmem:[#allocation31_spill] sm:$0xff] %v6096_v37 }
 0x723   : > { %v2543_v2 = vpop.permute.xlu0 %2542 }
 0x724   : > { %v2552_v9 = vadd.f32 %v2543_v2, %v2528_v14 }
 0x726   : > { %v2576_v17 = vadd.f32 %v2567_v23, %v2552_v9 }
 0x728   : > { %v2588_v7 = vadd.f32 %v2584_v15, %v2576_v17 }
 0x72a   : > { %v2612_v23 = vadd.f32 %v2603_v49, %v2588_v7  ;;  %v6131_v7 = vld [vmem:[%s4387_s26 + $0x52] sm:$0x1] }
 0x72b   : > { %v2599_v52 = vpop.permute.xlu0 %2598 }
 0x72c   : > { %v2610_v24 = vadd.f32 %v2599_v52, %v2586_v42  ;;  %v2629_v42 = vpop.permute.xlu2 %2628 }
 0x72e   : > { %v2634_v6 = vadd.f32 %v2623_v22, %v2610_v24 }
 0x730   : > { %v2638_v62 = vadd.f32 %v2634_v6, %v4661_v47 }
 0x732   : > { %v2642_v12 = vadd.f32 3.0, %v2638_v62 }
 0x733   : > { %v2605_v43 = vpop.permute.xlu0 %2604 }
 0x734   : > { %v2646_v55 = vmax.f32 %v2642_v12, 0.0  ;;  %v2613_v26 = vadd.f32 %v2605_v43, %v2589_v44 }
 0x736   : > { %v2650_v1 = vmin.f32 %v2646_v55, 6.0  ;;  %v2637_v2 = vadd.f32 %v2629_v42, %v2613_v26 }
 0x738   : > { %v2654_v63 = vmul.f32 0.16666667, %v2650_v1  ;;  %v2641_v56 = vadd.f32 %v2637_v2, %v4865_v25  ;;  %v7462_v1 = vld [vmem:[#allocation4_spill] sm:$0xff] }
 0x739   : > { %v2699_v2 = vmul.f32 %v6125_v29, %v7462_v1 }
 0x73a   : > { %v2658_v11 = vmul.f32 %v2654_v63, %v2638_v62  ;;  %v2645_v3 = vadd.f32 3.0, %v2641_v56  ;;  %v7463_v63 = vld [vmem:[#allocation22_spill] sm:$0xff] }
 0x73b   : > { %v2627_v22 = vpop.permute.xlu0 %2626 }
 0x73c   : > { %v2649_v52 = vmax.f32 %v2645_v3, 0.0  ;;  %v2636_v5 = vadd.f32 %v2627_v22, %v2612_v23  ;;  %v2667_v14 = vsel %vm605_vm0, %v2666_v57, %v2658_v11  ;;  %v7465_v3 = vld [vmem:[#allocation5_spill] sm:$0xff]  ;;  %v6142_v22 = vld [vmem:[%s4387_s26 + $0xc] sm:$0x1] }
 0x73d   : > { %v2668_v24 = vsel %vm607_vm1, %v2666_v57, %v2667_v14  ;;  %v7464_v57 = vld [vmem:[#allocation7_spill] sm:$0xff]  ;;  %v2723_v23 = vmul.f32 %v6125_v29, %v7465_v3 }
 0x73e   : > { %v2640_v36 = vadd.f32 %v2636_v5, %v4852_v46  ;;  %v2653_v33 = vmin.f32 %v2649_v52, 6.0  ;;  %v2761_v11 = vmul.f32 %v6042_v48, %v7464_v57  ;;  %v2818_v52 = vmul.f32 %v6142_v22, %v7408_v39  ;;  %v7466_v5 = vld [vmem:[#allocation23_spill] sm:$0xff]  ;;  %v6231_v39 = vld [vmem:[%s4387_s26 + $0x25] sm:$0x1] }
 0x740   : > { %v2644_v35 = vadd.f32 3.0, %v2640_v36  ;;  %v2657_v9 = vmul.f32 0.16666667, %v2653_v33  ;;  %v7467_v33 = vld [vmem:[#allocation11_spill] sm:$0xff] }
 0x742   : > { %v2648_v38 = vmax.f32 %v2644_v35, 0.0  ;;  %v2661_v60 = vmul.f32 %v2657_v9, %v2641_v56  ;;  %v2701_v56 = vmul.f32 %v6131_v7, %v7463_v63  ;;  %v2759_v35 = vmul.f32 %v6030_v16, %v7467_v33  ;;  %v7468_v9 = vld [vmem:[#allocation9_spill] sm:$0xff] }
 0x744   : > { %v2652_v6 = vmin.f32 %v2648_v38, 6.0  ;;  %v2672_v17 = vrot.slane %v2661_v60, 5  ;;  %v2844_v38 = vmul.f32 %v6049_v18, %v7431_v31  ;;  %v6219_v31 = vld [vmem:[%s4387_s26 + $0x54] sm:$0x1] }
 0x746   : > { %v2656_v13 = vmul.f32 0.16666667, %v2652_v6  ;;  %v2782_v6 = vmul.f32 %v6001_v34, %v7468_v9  ;;  %v7486_v9 = vld [vmem:[#allocation47_spill] sm:$0xff] }
 0x748   : > { %v2660_v62 = vmul.f32 %v2656_v13, %v2640_v36  ;;  %v7469_v13 = vld [vmem:[#allocation14_spill] sm:$0xff] }
 0x749   : > { %v2784_v60 = vmul.f32 %v6014_v27, %v7469_v13 }
 0x74a   : > { %v2669_v49 = vrot.slane %v2660_v62, 6  ;;  %v7470_v62 = vld [vmem:[#allocation17_spill] sm:$0xff] }
 0x74c   : > { %v2679_v12 = vsel %vm610_vm2, %v2669_v49, %v2667_v14  ;;  %v2670_v44 = vsel %vm610_vm2, %v2669_v49, %v2668_v24  ;;  %v2725_v14 = vmul.f32 %v6131_v7, %v7466_v5  ;;  %v6151_v24 = vld [vmem:[%s4387_s26 + $0x54] sm:$0x1] }
 0x74d   : > { %v2680_v43 = vsel %vm615_vm4, %v2672_v17, %v2679_v12  ;;  %v2671_v55 = vsel %vm612_vm3, %v2669_v49, %v2670_v44  ;;  %v2821_v36 = vmul.f32 %v6151_v24, %v7430_v58  ;;  %v2819_v49 = vmul.f32 %v6056_v30, %v7470_v62  ;;  %v7472_v44 = vld [vmem:[#allocation25_spill] sm:$0xff] }
 0x74e   : > { %v2682_v26 = vsel %vm620_vm5, %v2680_v43, 0.0  ;;  %v2673_v15 = vsel %vm615_vm4, %v2672_v17, %v2671_v55  ;;  %v2845_v43 = vmul.f32 %v6151_v24, %v7472_v44  ;;  %v6179_v55 = vld [vmem:[%s4387_s26 + $0xb] sm:$0x1]  ;;  %v6225_v58 = vld [vmem:[%s4387_s26 + $0x3d] sm:$0x1]  ;;  %v2690_v44 = vmul.f32 %v7486_v9, %v7424_v10 }
 0x74f   : > { %2683 = vadd.xlane.f32.xlu0 %v2682_v26  ;;  %v2674_v42 = vsel %vm617_vm6, %v2672_v17, %v2673_v15  ;;  %v7471_v17 = vld [vmem:[#allocation15_spill] sm:$0xff]  ;;  %7473 = vst [vmem:[#allocation32_spill] sm:$0xff] %v6179_v55  ;;  %v2750_v9 = vmul.f32 %v6001_v34, %v4596_v32 }
 0x750   : > { %2675 = vrot.lane.b32.xlu1 %v2674_v42, %s4321_s7  ;;  %v2842_v12 = vmul.f32 %v6142_v22, %v7471_v17  ;;  %v7474_v26 = vld [vmem:[#allocation3_spill] sm:$0xff]  ;;  %v2707_v42 = vpop.permute.xlu2 %2706  ;;  %7484 = vst [vmem:[#allocation45_spill] sm:$0xff] %v6225_v58 }
 0x751   : > { %v2926_v15 = vmul.f32 %v6179_v55, %v7474_v26 }
 0x758   : > { %2708 = vrot.lane.b32.xlu1 %v2699_v2, %s4320_s28  ;;  %v6185_v2 = vld [vmem:[%s4387_s26 + $0x3b] sm:$0x1] }
 0x759   : > { %7475 = vst [vmem:[#allocation28_spill] sm:$0xff] %v6185_v2 }
 0x760   : > { %2712 = vrot.lane.b32.xlu1 %v2701_v56, %s4320_s28  ;;  %v7476_v56 = vld [vmem:[#allocation18_spill] sm:$0xff] }
 0x763   : > { %2772 = vrot.lane.b32.xlu0 %v2761_v11, %s4320_s28  ;;  %v2928_v11 = vmul.f32 %v6185_v2, %v7476_v56  ;;  %v3071_v56 = vmul.f32 %v6231_v39, %v7450_v28  ;;  %v2752_v28 = vmul.f32 %v6014_v27, %v4781_v19  ;;  %v2812_v27 = vmul.f32 %v6049_v18, %v4808_v4 }
 0x764   : > { %v2810_v18 = vmul.f32 %v6142_v22, %v4619_v53 }
 0x768   : > { %2732 = vrot.lane.b32.xlu1 %v2723_v23, %s4319_s27  ;;  %v2711_v23 = vpop.permute.xlu2 %2710 }
 0x76b   : > { %2826 = vrot.lane.b32.xlu0 %v2818_v52, %s4320_s28  ;;  %v7477_v52 = vld [vmem:[#allocation2_spill] sm:$0xff] }
 0x770   : > { %2736 = vrot.lane.b32.xlu1 %v2725_v14, %s4319_s27  ;;  %v2950_v14 = vmul.f32 %v6179_v55, %v7477_v52 }
 0x773   : > { %2832 = vrot.lane.b32.xlu0 %v2821_v36, %s4320_s28  ;;  %v2731_v36 = vpop.permute.xlu2 %2730 }
 0x778   : > { %2768 = vrot.lane.b32.xlu1 %v2759_v35, %s4320_s28  ;;  %v7478_v35 = vld [vmem:[#allocation8_spill] sm:$0xff] }
 0x77b   : > { %2854 = vrot.lane.b32.xlu0 %v2844_v38, %s4319_s27  ;;  %v2952_v38 = vmul.f32 %v6185_v2, %v7478_v35  ;;  %v6211_v2 = vld [vmem:[%s4387_s26 + $0x24] sm:$0x1] }
 0x77c   : > { %7482 = vst [vmem:[#allocation33_spill] sm:$0xff] %v6211_v2  ;;  %v3011_v55 = vmul.f32 %v6211_v2, %v7444_v51  ;;  %v3048_v51 = vmul.f32 %v6225_v58, %v7448_v40  ;;  %v2718_v2 = vadd.f32 %v2707_v42, %v2690_v44 }
 0x77e   : > { %v2742_v33 = vadd.f32 %v2731_v36, %v2718_v2  ;;  %v2753_v36 = vmul.f32 %v6042_v48, %v4801_v20 }
 0x780   : > { %2790 = vrot.lane.b32.xlu1 %v2782_v6, %s4319_s27 }
 0x788   : > { %2794 = vrot.lane.b32.xlu1 %v2784_v60, %s4319_s27  ;;  %v6199_v60 = vld [vmem:[%s4387_s26 + $0xc] sm:$0x1] }
 0x789   : > { %7479 = vst [vmem:[#allocation30_spill] sm:$0xff] %v6199_v60 }
 0x790   : > { %2828 = vrot.lane.b32.xlu1 %v2819_v49, %s4320_s28  ;;  %v7480_v49 = vld [vmem:[#allocation6_spill] sm:$0xff] }
 0x798   : > { %2850 = vrot.lane.b32.xlu1 %v2842_v12, %s4319_s27  ;;  %v2986_v12 = vmul.f32 %v6199_v60, %v7480_v49 }
 0x7a0   : > { %2856 = vrot.lane.b32.xlu1 %v2845_v43, %s4319_s27  ;;  %v2735_v43 = vpop.permute.xlu2 %2734 }
 0x7a8   : > { %2934 = vrot.lane.b32.xlu1 %v2926_v15, %s4320_s28 }
 0x7b0   : > { %2938 = vrot.lane.b32.xlu1 %v2928_v11, %s4320_s28  ;;  %v6205_v11 = vld [vmem:[%s4387_s26 + $0x3c] sm:$0x1] }
 0x7b1   : > { %7481 = vst [vmem:[#allocation42_spill] sm:$0xff] %v6205_v11 }
 0x7b8   : > { %2958 = vrot.lane.b32.xlu1 %v2950_v14, %s4319_s27  ;;  %v2988_v14 = vmul.f32 %v6205_v11, %v7339_v61  ;;  %v3013_v61 = vmul.f32 %v6219_v31, %v7446_v0  ;;  %v7485_v0 = vld [vmem:[#allocation48_spill] sm:$0xff]  ;;  %v2691_v11 = vmul.f32 %v6125_v29, %v7449_v41 }
 0x7c0   : > { %2962 = vrot.lane.b32.xlu1 %v2952_v38, %s4319_s27  ;;  %v2767_v38 = vpop.permute.xlu2 %2766 }
 0x7c2   : > { %v2676_v6 = vpop.permute.xlu1 %2675 }
 0x7c3   : > { %2678 = vst.msk [vmem:[%s4887_s6 + $0x4] sm:$0xf] %vm849_vm7, %v2676_v6 }
 0x7c8   : > { %2994 = vrot.lane.b32.xlu1 %v2986_v12, %s4320_s28  ;;  %v6216_v12 = vpop.xlane.xlu0 %2683  ;;  %v2771_v49 = vpop.permute.xlu2 %2770 }
 0x7c9   : > { %7483 = vst [vmem:[#allocation24_spill] sm:$0xff] %v6216_v12 }
 0x7ca   : > { %v2709_v15 = vpop.permute.xlu1 %2708 }
 0x7cb   : > { %v2719_v40 = vadd.f32 %v2709_v15, %v2691_v11  ;;  %v2754_v15 = vadd.f32 %v2750_v9, %v2742_v33 }
 0x7cd   : > { %v2778_v2 = vadd.f32 %v2767_v38, %v2754_v15 }
 0x7d0   : > { %2998 = vrot.lane.b32.xlu1 %v2988_v14, %s4320_s28  ;;  %v2793_v52 = vpop.permute.xlu2 %2792 }
 0x7d2   : > { %v2713_v6 = vpop.permute.xlu1 %2712 }
 0x7d5   : > { %v2773_v14 = vpop.permute.xlu0 %2772 }
 0x7d8   : > { %3020 = vrot.lane.b32.xlu1 %v3011_v55, %s4319_s27  ;;  %v2797_v13 = vpop.permute.xlu2 %2796 }
 0x7da   : > { %v2733_v37 = vpop.permute.xlu1 %2732 }
 0x7db   : > { %v2743_v60 = vadd.f32 %v2733_v37, %v2719_v40 }
 0x7dd   : > { %v2827_v12 = vpop.permute.xlu0 %2826 }
 0x7e0   : > { %3024 = vrot.lane.b32.xlu1 %v3013_v61, %s4319_s27  ;;  %v2692_v61 = vmul.f32 %v7485_v0, %v4760_v54  ;;  %v2751_v0 = vmul.f32 %v6030_v16, %v4722_v21  ;;  %v2831_v40 = vpop.permute.xlu2 %2830 }
 0x7e2   : > { %v2737_v35 = vpop.permute.xlu1 %2736  ;;  %v2720_v26 = vadd.f32 %v2711_v23, %v2692_v61  ;;  %v2755_v41 = vadd.f32 %v2751_v0, %v2743_v60  ;;  %v2693_v23 = vmul.f32 %v6131_v7, %v7452_v8 }
 0x7e5   : > { %v2833_v54 = vpop.permute.xlu0 %2832 }
 0x7e8   : > { %3058 = vrot.lane.b32.xlu1 %v3048_v51, %s4320_s28  ;;  %v2744_v51 = vadd.f32 %v2735_v43, %v2720_v26  ;;  %v2721_v43 = vadd.f32 %v2713_v6, %v2693_v23 }
 0x7ea   : > { %v2769_v55 = vpop.permute.xlu1 %2768  ;;  %v2756_v29 = vadd.f32 %v2752_v28, %v2744_v51  ;;  %v2745_v44 = vadd.f32 %v2737_v35, %v2721_v43  ;;  %v2853_v35 = vpop.permute.xlu2 %2852 }
 0x7eb   : > { %v2779_v26 = vadd.f32 %v2769_v55, %v2755_v41  ;;  %v2811_v41 = vmul.f32 %v6056_v30, %v4740_v45 }
 0x7ed   : > { %v2803_v28 = vadd.f32 %v2793_v52, %v2779_v26  ;;  %v2855_v60 = vpop.permute.xlu0 %2854  ;;  %v2813_v26 = vmul.f32 %v6151_v24, %v4824_v50 }
 0x7ef   : > { %v2815_v6 = vadd.f32 %v2811_v41, %v2803_v28 }
 0x7f0   : > { %3080 = vrot.lane.b32.xlu1 %v3071_v56, %s4319_s27  ;;  %v2780_v56 = vadd.f32 %v2771_v49, %v2756_v29  ;;  %v2757_v49 = vadd.f32 %v2753_v36, %v2745_v44 }
 0x7f2   : > { %v2791_v58 = vpop.permute.xlu1 %2790  ;;  %v2781_v38 = vadd.f32 %v2773_v14, %v2757_v49 }
 0x7f3   : > { %v2802_v34 = vadd.f32 %v2791_v58, %v2778_v2 }
 0x7f4   : > { %v2805_v29 = vadd.f32 %v2797_v13, %v2781_v38 }
 0x7f5   : > { %v2814_v61 = vadd.f32 %v2810_v18, %v2802_v34 }
 0x7f6   : > { %v2817_v9 = vadd.f32 %v2813_v26, %v2805_v29  ;;  %v6275_v29 = vld [vmem:[%s4387_s26 + $0x23] sm:$0x1]  ;;  %v2989_v26 = vmul.f32 %v6219_v31, %v7464_v57 }
 0x7f7   : > { %v2838_v58 = vadd.f32 %v2827_v12, %v2814_v61 }
 0x7f8   : > { %v2841_v44 = vadd.f32 %v2833_v54, %v2817_v9  ;;  %v6299_v9 = vld [vmem:[%s4387_s26 + $0xd] sm:$0x1] }
 0x7fa   : > { %v2795_v37 = vpop.permute.xlu1 %2794 }
 0x7fb   : > { %v2804_v16 = vadd.f32 %v2795_v37, %v2780_v56 }
 0x7fd   : > { %v2816_v42 = vadd.f32 %v2812_v27, %v2804_v16 }
 0x7ff   : > { %v2840_v7 = vadd.f32 %v2831_v40, %v2816_v42 }
 0x801   : > { %v2864_v11 = vadd.f32 %v2855_v60, %v2840_v7 }
 0x802   : > { %v2829_v55 = vpop.permute.xlu1 %2828 }
 0x803   : > { %v2868_v33 = vadd.f32 %v2864_v11, %v4852_v46  ;;  %v2839_v52 = vadd.f32 %v2829_v55, %v2815_v6 }
 0x805   : > { %v2872_v48 = vadd.f32 3.0, %v2868_v33  ;;  %v2863_v51 = vadd.f32 %v2853_v35, %v2839_v52 }
 0x807   : > { %v2867_v0 = vadd.f32 %v2863_v51, %v7295_v59  ;;  %v2876_v30 = vmax.f32 %v2872_v48, 0.0 }
 0x809   : > { %v2871_v56 = vadd.f32 3.0, %v2867_v0  ;;  %v2880_v37 = vmin.f32 %v2876_v30, 6.0 }
 0x80a   : > { %v2851_v23 = vpop.permute.xlu1 %2850 }
 0x80b   : > { %v2875_v40 = vmax.f32 %v2871_v56, 0.0  ;;  %v2862_v22 = vadd.f32 %v2851_v23, %v2838_v58  ;;  %v2884_v15 = vmul.f32 0.16666667, %v2880_v37  ;;  %v2927_v56 = vmul.f32 %v6275_v29, %v7462_v1  ;;  %v6281_v58 = vld [vmem:[%s4387_s26 + $0x53] sm:$0x1] }
 0x80c   : > { %v2929_v23 = vmul.f32 %v6281_v58, %v7463_v63  ;;  %v2953_v37 = vmul.f32 %v6281_v58, %v7466_v5 }
 0x80d   : > { %v2879_v43 = vmin.f32 %v2875_v40, 6.0  ;;  %v2866_v14 = vadd.f32 %v2862_v22, %v4661_v47  ;;  %v2888_v36 = vmul.f32 %v2884_v15, %v2868_v33  ;;  %v2951_v40 = vmul.f32 %v6275_v29, %v7465_v3  ;;  %v6308_v15 = vld [vmem:[%s4387_s26 + $0x55] sm:$0x1] }
 0x80e   : > { %v3047_v22 = vmul.f32 %v6231_v39, %v7470_v62 }
 0x80f   : > { %v2883_v27 = vmul.f32 0.16666667, %v2879_v43  ;;  %v2870_v16 = vadd.f32 3.0, %v2866_v14  ;;  %v2897_v34 = vrot.slane %v2888_v36, 6  ;;  %v3070_v43 = vmul.f32 %v6299_v9, %v7471_v17  ;;  %v7493_v36 = vld [vmem:[#allocation3_spill] sm:$0xff] }
 0x811   : > { %v2874_v28 = vmax.f32 %v2870_v16, 0.0  ;;  %v2887_v13 = vmul.f32 %v2883_v27, %v2867_v0  ;;  %v7488_v27 = vld [vmem:[#allocation33_spill] sm:$0xff] }
 0x812   : > { %v2857_v42 = vpop.permute.xlu1 %2856 }
 0x813   : > { %v2878_v2 = vmin.f32 %v2874_v28, 6.0  ;;  %v2865_v12 = vadd.f32 %v2857_v42, %v2841_v44  ;;  %v2894_v41 = vrot.slane %v2887_v13, 7  ;;  %v7489_v44 = vld [vmem:[#allocation25_spill] sm:$0xff]  ;;  %v7491_v13 = vld [vmem:[#allocation30_spill] sm:$0xff] }
 0x814   : > { %v3073_v28 = vmul.f32 %v6308_v15, %v7489_v44  ;;  %v7490_v42 = vld [vmem:[#allocation9_spill] sm:$0xff] }
 0x815   : > { %v2882_v7 = vmul.f32 0.16666667, %v2878_v2  ;;  %v2869_v24 = vadd.f32 %v2865_v12, %v4865_v25  ;;  %v3010_v2 = vmul.f32 %v7491_v13, %v7490_v42  ;;  %v6317_v12 = vld [vmem:[%s4387_s26 + $0xc] sm:$0x1] }
 0x816   : > { %7492 = vst [vmem:[#allocation46_spill] sm:$0xff] %v6317_v12 }
 0x817   : > { %v2886_v60 = vmul.f32 %v2882_v7, %v2866_v14  ;;  %v2873_v49 = vadd.f32 3.0, %v2869_v24  ;;  %v7487_v14 = vld [vmem:[#allocation11_spill] sm:$0xff]  ;;  %v3154_v7 = vmul.f32 %v6317_v12, %v7493_v36 }
 0x818   : > { %v2987_v16 = vmul.f32 %v7488_v27, %v7487_v14 }
 0x819   : > { %v2877_v11 = vmax.f32 %v2873_v49, 0.0  ;;  %v2895_v6 = vsel %vm605_vm0, %v2894_v41, %v2886_v60  ;;  %v7495_v60 = vld [vmem:[#allocation42_spill] sm:$0xff] }
 0x81a   : > { %v2896_v55 = vsel %vm607_vm1, %v2894_v41, %v2895_v6  ;;  %v2907_v54 = vsel %vm610_vm2, %v2897_v34, %v2895_v6  ;;  %v7494_v41 = vld [vmem:[#allocation14_spill] sm:$0xff] }
 0x81b   : > { %v2881_v18 = vmin.f32 %v2877_v11, 6.0  ;;  %v2898_v52 = vsel %vm610_vm2, %v2897_v34, %v2896_v55  ;;  %v3012_v49 = vmul.f32 %v7495_v60, %v7494_v41  ;;  %v7497_v11 = vld [vmem:[#allocation18_spill] sm:$0xff]  ;;  %v7498_v55 = vld [vmem:[#allocation12_spill] sm:$0xff] }
 0x81c   : > { %v2899_v33 = vsel %vm612_vm3, %v2897_v34, %v2898_v52  ;;  %v6326_v34 = vld [vmem:[%s4387_s26 + $0x3c] sm:$0x1]  ;;  %v7499_v52 = vld [vmem:[#allocation2_spill] sm:$0xff] }
 0x81d   : > { %v2885_v35 = vmul.f32 0.16666667, %v2881_v18  ;;  %7496 = vst [vmem:[#allocation4_spill] sm:$0xff] %v6326_v34  ;;  %v3156_v6 = vmul.f32 %v6326_v34, %v7497_v11 }
 0x81f   : > { %v2889_v38 = vmul.f32 %v2885_v35, %v2869_v24  ;;  %v2935_v24 = vpop.permute.xlu1 %2934  ;;  %v7500_v35 = vld [vmem:[#allocation13_spill] sm:$0xff] }
 0x821   : > { %v2900_v61 = vrot.slane %v2889_v38, 5  ;;  %v3049_v38 = vmul.f32 %v6308_v15, %v7500_v35 }
 0x823   : > { %v2908_v48 = vsel %vm615_vm4, %v2900_v61, %v2907_v54  ;;  %v2901_v51 = vsel %vm615_vm4, %v2900_v61, %v2899_v33  ;;  %v3046_v54 = vmul.f32 %v6299_v9, %v7498_v55  ;;  %v3178_v33 = vmul.f32 %v6317_v12, %v7499_v52  ;;  %v7519_v55 = vld [vmem:[#allocation27_spill] sm:$0xff] }
 0x824   : > { %v2910_v0 = vsel %vm620_vm5, %v2908_v48, 0.0  ;;  %v2902_v30 = vsel %vm617_vm6, %v2900_v61, %v2901_v51  ;;  %v7501_v48 = vld [vmem:[#allocation8_spill] sm:$0xff] }
 0x825   : > { %2911 = vadd.xlane.f32.xlu0 %v2910_v0  ;;  %2903 = vrot.lane.b32.xlu2 %v2902_v30, %s4322_s8  ;;  %v3180_v51 = vmul.f32 %v6326_v34, %v7501_v48  ;;  %v7502_v0 = vld [vmem:[#allocation19_spill] sm:$0xff]  ;;  %v7503_v30 = vld [vmem:[#allocation45_spill] sm:$0xff]  ;;  %v7513_v48 = vld [vmem:[#allocation26_spill] sm:$0xff] }
 0x827   : > { %v6333_v18 = vpop.permute.xlu1 %2938 }
 0x82d   : > { %2936 = vrot.lane.b32.xlu2 %v2927_v56, %s4320_s28  ;;  %v3072_v56 = vmul.f32 %v7503_v30, %v7502_v0 }
 0x82f   : > { %v2959_v61 = vpop.permute.xlu1 %2958 }
 0x835   : > { %2940 = vrot.lane.b32.xlu2 %v2929_v23, %s4320_s28  ;;  %v6348_v23 = vld [vmem:[%s4387_s26 + $0xd] sm:$0x1] }
 0x839   : > { %3000 = vrot.lane.b32.xlu0 %v2989_v26, %s4320_s28  ;;  %v7504_v26 = vld [vmem:[#allocation6_spill] sm:$0xff] }
 0x83d   : > { %2960 = vrot.lane.b32.xlu2 %v2951_v40, %s4319_s27  ;;  %v3214_v40 = vmul.f32 %v6348_v23, %v7504_v26 }
 0x841   : > { %3056 = vrot.lane.b32.xlu0 %v3047_v22, %s4320_s28  ;;  %v6353_v22 = vpop.permute.xlu1 %2962 }
 0x845   : > { %2964 = vrot.lane.b32.xlu2 %v2953_v37, %s4319_s27  ;;  %v6357_v37 = vld [vmem:[%s4387_s26 + $0x55] sm:$0x1] }
 0x846   : > { %7505 = vst [vmem:[#allocation22_spill] sm:$0xff] %v6357_v37 }
 0x849   : > { %3078 = vrot.lane.b32.xlu0 %v3070_v43, %s4319_s27 }
 0x84d   : > { %2996 = vrot.lane.b32.xlu2 %v2987_v16, %s4320_s28  ;;  %v3217_v16 = vmul.f32 %v6357_v37, %v7464_v57  ;;  %v7512_v57 = vld [vmem:[#allocation43_spill] sm:$0xff] }
 0x851   : > { %3084 = vrot.lane.b32.xlu0 %v3073_v28, %s4319_s27  ;;  %v2995_v28 = vpop.permute.xlu1 %2994 }
 0x855   : > { %3018 = vrot.lane.b32.xlu2 %v3010_v2, %s4319_s27  ;;  %v6365_v2 = vld [vmem:[%s4387_s26 + $0x25] sm:$0x1] }
 0x859   : > { %3162 = vrot.lane.b32.xlu0 %v3154_v7, %s4320_s28  ;;  %v7506_v7 = vld [vmem:[#allocation35_spill] sm:$0xff] }
 0x85d   : > { %3022 = vrot.lane.b32.xlu2 %v3012_v49, %s4319_s27  ;;  %v7507_v49 = vld [vmem:[#allocation40_spill] sm:$0xff] }
 0x861   : > { %3166 = vrot.lane.b32.xlu0 %v3156_v6, %s4320_s28  ;;  %v857_v6 = vadd.f32 %v7507_v49, %v7506_v7  ;;  %v3241_v7 = vmul.f32 %v6357_v37, %v7513_v48  ;;  %v7514_v49 = vld [vmem:[#allocation44_spill] sm:$0xff] }
 0x865   : > { %3054 = vrot.lane.b32.xlu2 %v3046_v54, %s4320_s28 }
 0x869   : > { %3186 = vrot.lane.b32.xlu0 %v3178_v33, %s4319_s27  ;;  %v7508_v33 = vld [vmem:[#allocation10_spill] sm:$0xff] }
 0x86d   : > { %3060 = vrot.lane.b32.xlu2 %v3049_v38, %s4320_s28  ;;  %v3239_v38 = vmul.f32 %v6365_v2, %v7508_v33 }
 0x871   : > { %3190 = vrot.lane.b32.xlu0 %v3180_v51, %s4319_s27  ;;  %v7509_v51 = vld [vmem:[#allocation29_spill] sm:$0xff] }
 0x875   : > { %3082 = vrot.lane.b32.xlu2 %v3072_v56, %s4319_s27  ;;  %v1086_v56 = vadd.f32 %v7509_v51, %v857_v6  ;;  %v7515_v6 = vld [vmem:[#allocation49_spill] sm:$0xff] }
 0x879   : > { %3222 = vrot.lane.b32.xlu0 %v3214_v40, %s4320_s28  ;;  %v7510_v40 = vld [vmem:[#allocation37_spill] sm:$0xff] }
 0x87a   : > { %v1315_v34 = vadd.f32 %v7510_v40, %v1086_v56  ;;  %v7517_v56 = vld [vmem:[#allocation31_spill] sm:$0xff] }
 0x87f   : > { %v2904_v43 = vpop.permute.xlu2 %2903 }
 0x880   : > { %2906 = vst.msk [vmem:[%s4887_s6 + $0x4] sm:$0xf] %vm1078_vm8, %v2904_v43  ;;  %v7511_v43 = vld [vmem:[#allocation21_spill] sm:$0xff] }
 0x881   : > { %3228 = vrot.lane.b32.xlu0 %v3217_v16, %s4320_s28  ;;  %v1544_v12 = vadd.f32 %v7511_v43, %v1315_v34  ;;  %v6375_v16 = vpop.permute.xlu1 %2998  ;;  %v7518_v34 = vld [vmem:[#allocation24_spill] sm:$0xff] }
 0x883   : > { %v1773_v26 = vadd.f32 %v7512_v57, %v1544_v12 }
 0x885   : > { %v2002_v35 = vadd.f32 %v7514_v49, %v1773_v26  ;;  %v6394_v26 = vld [vmem:[%s4387_s26 + $0x26] sm:$0x1] }
 0x887   : > { %v2937_v54 = vpop.permute.xlu2 %2936  ;;  %v2231_v51 = vadd.f32 %v7515_v6, %v2002_v35  ;;  %v7521_v35 = vld [vmem:[#allocation16_spill] sm:$0xff]  ;;  %v7522_v6 = vld [vmem:[#allocation34_spill] sm:$0xff] }
 0x888   : > { %v3299_v49 = vmul.f32 %v6394_v26, %v7521_v35  ;;  %v2978_v35 = vmul.f32 %v7491_v13, %v4596_v32  ;;  %v2921_v13 = vmul.f32 %v6281_v58, %v7452_v8 }
 0x889   : > { %3248 = vrot.lane.b32.xlu0 %v3239_v38, %s4319_s27  ;;  %v6384_v38 = vld [vmem:[%s4387_s26 + $0x3e] sm:$0x1]  ;;  %v2457_v40 = vadd.f32 %v7517_v56, %v2231_v51  ;;  %v3021_v33 = vpop.permute.xlu1 %3020  ;;  %v2919_v51 = vmul.f32 %v6275_v29, %v7522_v6 }
 0x88a   : > { %7516 = vst [vmem:[#allocation5_spill] sm:$0xff] %v6384_v38  ;;  %v3276_v57 = vmul.f32 %v6384_v38, %v7519_v55 }
 0x88b   : > { %v2685_v43 = vadd.f32 %v7518_v34, %v2457_v40  ;;  %v2947_v40 = vadd.f32 %v2937_v54, %v2919_v51  ;;  %v7523_v34 = vld [vmem:[#allocation32_spill] sm:$0xff] }
 0x88c   : > { %v2918_v37 = vmul.f32 %v7523_v34, %v7424_v10 }
 0x88f   : > { %v2941_v0 = vpop.permute.xlu2 %2940 }
 0x891   : > { %3252 = vrot.lane.b32.xlu0 %v3241_v7, %s4319_s27  ;;  %v3025_v56 = vpop.permute.xlu1 %3024 }
 0x897   : > { %v2961_v52 = vpop.permute.xlu2 %2960 }
 0x898   : > { %v2912_v12 = vpop.xlane.xlu0 %2911 }
 0x899   : > { %v6390_v11 = vadd.f32 %v2912_v12, %v2685_v43  ;;  %3286 = vrot.lane.b32.xlu0 %v3276_v57, %s4320_s28  ;;  %v2971_v43 = vadd.f32 %v2961_v52, %v2947_v40  ;;  %v2946_v12 = vadd.f32 %v2935_v24, %v2918_v37  ;;  %v2979_v57 = vmul.f32 %v7488_v27, %v4722_v21  ;;  %v3059_v29 = vpop.permute.xlu1 %3058 }
 0x89a   : > { %v3039_v24 = vmul.f32 %v6231_v39, %v4740_v45  ;;  %v3038_v27 = vmul.f32 %v6299_v9, %v4619_v53  ;;  %v2949_v40 = vadd.f32 %v2941_v0, %v2921_v13  ;;  %v2981_v9 = vmul.f32 %v6219_v31, %v4801_v20 }
 0x89b   : > { %7520 = vst [vmem:[#allocation23_spill] sm:$0xff] %v6390_v11  ;;  %v2970_v11 = vadd.f32 %v2959_v61, %v2946_v12  ;;  %v2983_v48 = vadd.f32 %v2979_v57, %v2971_v43 }
 0x89d   : > { %v2982_v41 = vadd.f32 %v2978_v35, %v2970_v11  ;;  %v7525_v35 = vld [vmem:[#allocation28_spill] sm:$0xff] }
 0x89f   : > { %v2965_v7 = vpop.permute.xlu2 %2964 }
 0x8a1   : > { %3308 = vrot.lane.b32.xlu0 %v3299_v49, %s4319_s27  ;;  %v3006_v49 = vadd.f32 %v2995_v28, %v2982_v41  ;;  %v2973_v28 = vadd.f32 %v2965_v7, %v2949_v40  ;;  %v2980_v7 = vmul.f32 %v7495_v60, %v4781_v19  ;;  %v3040_v60 = vmul.f32 %v7503_v30, %v4808_v4 }
 0x8a3   : > { %v2985_v43 = vadd.f32 %v2981_v9, %v2973_v28 }
 0x8a7   : > { %v2997_v55 = vpop.permute.xlu2 %2996 }
 0x8a8   : > { %v3007_v38 = vadd.f32 %v2997_v55, %v2983_v48  ;;  %v3081_v48 = vpop.permute.xlu1 %3080 }
 0x8aa   : > { %v3031_v54 = vadd.f32 %v3021_v33, %v3007_v38  ;;  %v7524_v38 = vld [vmem:[#allocation38_spill] sm:$0xff] }
 0x8ab   : > { %v3001_v6 = vpop.permute.xlu0 %3000  ;;  %v2920_v39 = vmul.f32 %v7525_v35, %v7524_v38 }
 0x8ac   : > { %v3043_v52 = vadd.f32 %v3039_v24, %v3031_v54  ;;  %v3009_v12 = vadd.f32 %v3001_v6, %v2985_v43 }
 0x8ae   : > { %v3033_v24 = vadd.f32 %v3025_v56, %v3009_v12 }
 0x8af   : > { %v3019_v51 = vpop.permute.xlu2 %3018 }
 0x8b0   : > { %v3030_v36 = vadd.f32 %v3019_v51, %v3006_v49 }
 0x8b2   : > { %v3042_v61 = vadd.f32 %v3038_v27, %v3030_v36  ;;  %v2948_v36 = vadd.f32 %v6333_v18, %v2920_v39  ;;  %v3041_v18 = vmul.f32 %v6308_v15, %v4824_v50 }
 0x8b3   : > { %v3057_v37 = vpop.permute.xlu0 %3056 }
 0x8b4   : > { %v3067_v55 = vadd.f32 %v3057_v37, %v3043_v52  ;;  %v2972_v58 = vadd.f32 %v6353_v22, %v2948_v36 }
 0x8b6   : > { %v3091_v11 = vadd.f32 %v3081_v48, %v3067_v55  ;;  %v2984_v51 = vadd.f32 %v2980_v7, %v2972_v58  ;;  %v3045_v55 = vadd.f32 %v3041_v18, %v3033_v24 }
 0x8b7   : > { %v3023_v41 = vpop.permute.xlu2 %3022 }
 0x8b8   : > { %v3095_v33 = vadd.f32 %v3091_v11, %v7295_v59  ;;  %v3008_v31 = vadd.f32 %v6375_v16, %v2984_v51 }
 0x8ba   : > { %v3099_v34 = vadd.f32 3.0, %v3095_v33  ;;  %v3032_v6 = vadd.f32 %v3023_v41, %v3008_v31 }
 0x8bb   : > { %v3079_v0 = vpop.permute.xlu0 %3078 }
 0x8bc   : > { %v3103_v57 = vmax.f32 %v3099_v34, 0.0  ;;  %v3044_v28 = vadd.f32 %v3040_v60, %v3032_v6  ;;  %v6441_v60 = vld [vmem:[%s4387_s26 + $0x24] sm:$0x1] }
 0x8be   : > { %v3107_v27 = vmin.f32 %v3103_v57, 6.0  ;;  %v3068_v41 = vadd.f32 %v3059_v29, %v3044_v28  ;;  %v7526_v28 = vld [vmem:[#allocation20_spill] sm:$0xff] }
 0x8bf   : > { %v3055_v49 = vpop.permute.xlu2 %3054 }
 0x8c0   : > { %v3066_v54 = vadd.f32 %v3055_v49, %v3042_v61  ;;  %v3111_v22 = vmul.f32 0.16666667, %v3107_v27 }
 0x8c2   : > { %v3090_v52 = vadd.f32 %v3079_v0, %v3066_v54  ;;  %v3115_v11 = vmul.f32 %v3111_v22, %v3095_v33 }
 0x8c3   : > { %v3085_v56 = vpop.permute.xlu0 %3084 }
 0x8c4   : > { %v3094_v37 = vadd.f32 %v3090_v52, %v4661_v47  ;;  %v3122_v34 = vrot.slane %v3115_v11, 7  ;;  %v6453_v11 = vld [vmem:[%s4387_s26 + $0x3d] sm:$0x1] }
 0x8c6   : > { %v3098_v13 = vadd.f32 3.0, %v3094_v37 }
 0x8c7   : > { %v3061_v48 = vpop.permute.xlu2 %3060 }
 0x8c8   : > { %v3102_v61 = vmax.f32 %v3098_v13, 0.0  ;;  %v3069_v40 = vadd.f32 %v3061_v48, %v3045_v55 }
 0x8ca   : > { %v3106_v35 = vmin.f32 %v3102_v61, 6.0  ;;  %v3093_v16 = vadd.f32 %v3085_v56, %v3069_v40  ;;  %v3155_v61 = vmul.f32 %v6441_v60, %v7462_v1  ;;  %v6447_v40 = vld [vmem:[%s4387_s26 + $0x54] sm:$0x1] }
 0x8cb   : > { %v3157_v56 = vmul.f32 %v6447_v40, %v7463_v63 }
 0x8cc   : > { %v3110_v39 = vmul.f32 0.16666667, %v3106_v35  ;;  %v3097_v9 = vadd.f32 %v3093_v16, %v4865_v25  ;;  %v3216_v35 = vmul.f32 %v6453_v11, %v7526_v28  ;;  %v3179_v16 = vmul.f32 %v6441_v60, %v7465_v3 }
 0x8ce   : > { %v3114_v15 = vmul.f32 %v3110_v39, %v3094_v37  ;;  %v3101_v36 = vadd.f32 3.0, %v3097_v9  ;;  %v3275_v39 = vmul.f32 %v6394_v26, %v7470_v62 }
 0x8cf   : > { %v3083_v43 = vpop.permute.xlu2 %3082 }
 0x8d0   : > { %v3105_v58 = vmax.f32 %v3101_v36, 0.0  ;;  %v3092_v12 = vadd.f32 %v3083_v43, %v3068_v41  ;;  %v3123_v57 = vsel %vm605_vm0, %v3122_v34, %v3114_v15  ;;  %v3215_v36 = vmul.f32 %v6365_v2, %v7487_v14  ;;  %v6477_v41 = vld [vmem:[%s4387_s26 + $0x56] sm:$0x1] }
 0x8d1   : > { %v3124_v30 = vsel %vm607_vm1, %v3122_v34, %v3123_v57  ;;  %v6468_v34 = vld [vmem:[%s4387_s26 + $0xe] sm:$0x1]  ;;  %v3301_v43 = vmul.f32 %v6477_v41, %v7489_v44 }
 0x8d2   : > { %v3096_v0 = vadd.f32 %v3092_v12, %v4852_v46  ;;  %v3109_v33 = vmin.f32 %v3105_v58, 6.0  ;;  %v3298_v15 = vmul.f32 %v6468_v34, %v7471_v17  ;;  %v3238_v58 = vmul.f32 %v6348_v23, %v7490_v42  ;;  %v6486_v12 = vld [vmem:[%s4387_s26 + $0xd] sm:$0x1] }
 0x8d3   : > { %7527 = vst [vmem:[#allocation15_spill] sm:$0xff] %v6486_v12 }
 0x8d4   : > { %v3100_v49 = vadd.f32 3.0, %v3096_v0  ;;  %v3113_v54 = vmul.f32 0.16666667, %v3109_v33 }
 0x8d6   : > { %v3104_v7 = vmax.f32 %v3100_v49, 0.0  ;;  %v3117_v27 = vmul.f32 %v3113_v54, %v3097_v9  ;;  %v3181_v9 = vmul.f32 %v6447_v40, %v7466_v5  ;;  %v6495_v49 = vld [vmem:[%s4387_s26 + $0x3d] sm:$0x1] }
 0x8d7   : > { %7530 = vst [vmem:[#allocation48_spill] sm:$0xff] %v6495_v49 }
 0x8d8   : > { %v3108_v51 = vmin.f32 %v3104_v7, 6.0  ;;  %v3128_v31 = vrot.slane %v3117_v27, 5  ;;  %v7531_v7 = vld [vmem:[#allocation18_spill] sm:$0xff] }
 0x8d9   : > { %v3384_v54 = vmul.f32 %v6495_v49, %v7531_v7  ;;  %v7533_v27 = vld [vmem:[#allocation2_spill] sm:$0xff]  ;;  %v3207_v7 = vmul.f32 %v6365_v2, %v4722_v21 }
 0x8da   : > { %v3112_v24 = vmul.f32 0.16666667, %v3108_v51  ;;  %v7532_v51 = vld [vmem:[#allocation12_spill] sm:$0xff] }
 0x8dc   : > { %v3116_v52 = vmul.f32 %v3112_v24, %v3096_v0  ;;  %v7529_v0 = vld [vmem:[#allocation14_spill] sm:$0xff]  ;;  %v3274_v24 = vmul.f32 %v6468_v34, %v7532_v51 }
 0x8dd   : > { %v3240_v33 = vmul.f32 %v6453_v11, %v7529_v0 }
 0x8de   : > { %v3125_v29 = vrot.slane %v3116_v52, 6  ;;  %v3406_v52 = vmul.f32 %v6486_v12, %v7533_v27 }
 0x8e0   : > { %v3135_v37 = vsel %vm610_vm2, %v3125_v29, %v3123_v57  ;;  %v3126_v18 = vsel %vm610_vm2, %v3125_v29, %v3124_v30  ;;  %v7528_v57 = vld [vmem:[#allocation3_spill] sm:$0xff] }
 0x8e1   : > { %v3136_v22 = vsel %vm615_vm4, %v3128_v31, %v3135_v37  ;;  %v3127_v6 = vsel %vm612_vm3, %v3125_v29, %v3126_v18  ;;  %v3382_v30 = vmul.f32 %v6486_v12, %v7528_v57  ;;  %v7534_v29 = vld [vmem:[#allocation13_spill] sm:$0xff]  ;;  %v3163_v37 = vpop.permute.xlu0 %3162  ;;  %v7535_v18 = vld [vmem:[#allocation8_spill] sm:$0xff] }
 0x8e2   : > { %v3138_v13 = vsel %vm620_vm5, %v3136_v22, 0.0  ;;  %v3129_v55 = vsel %vm615_vm4, %v3128_v31, %v3127_v6  ;;  %v3408_v22 = vmul.f32 %v6495_v49, %v7535_v18  ;;  %v7536_v6 = vld [vmem:[#allocation19_spill] sm:$0xff] }
 0x8e3   : > { %3139 = vadd.xlane.f32.xlu2 %v3138_v13  ;;  %v3130_v48 = vsel %vm617_vm6, %v3128_v31, %v3129_v55  ;;  %v3277_v31 = vmul.f32 %v6477_v41, %v7534_v29  ;;  %v7537_v13 = vld [vmem:[#allocation5_spill] sm:$0xff] }
 0x8e4   : > { %3131 = vrot.lane.b32.xlu1 %v3130_v48, %s4323_s9  ;;  %v3300_v55 = vmul.f32 %v7537_v13, %v7536_v6  ;;  %v6516_v48 = vld [vmem:[%s4387_s26 + $0xe] sm:$0x1] }
 0x8ec   : > { %3164 = vrot.lane.b32.xlu1 %v3155_v61, %s4320_s28  ;;  %v6518_v61 = vpop.permute.xlu0 %3166 }
 0x8f4   : > { %3168 = vrot.lane.b32.xlu1 %v3157_v56, %s4320_s28  ;;  %v7538_v56 = vld [vmem:[#allocation6_spill] sm:$0xff] }
 0x8fb   : > { %3226 = vrot.lane.b32.xlu2 %v3216_v35, %s4320_s28  ;;  %v3442_v35 = vmul.f32 %v6516_v48, %v7538_v56 }
 0x8fc   : > { %3188 = vrot.lane.b32.xlu1 %v3179_v16, %s4319_s27  ;;  %v6524_v16 = vld [vmem:[%s4387_s26 + $0x56] sm:$0x1] }
 0x8fd   : > { %7539 = vst [vmem:[#allocation47_spill] sm:$0xff] %v6524_v16 }
 0x903   : > { %3284 = vrot.lane.b32.xlu2 %v3275_v39, %s4320_s28  ;;  %v3187_v39 = vpop.permute.xlu0 %3186 }
 0x904   : > { %3192 = vrot.lane.b32.xlu1 %v3181_v9, %s4319_s27  ;;  %v7540_v9 = vld [vmem:[#allocation7_spill] sm:$0xff] }
 0x90b   : > { %3306 = vrot.lane.b32.xlu2 %v3298_v15, %s4319_s27  ;;  %v3445_v15 = vmul.f32 %v6524_v16, %v7540_v9 }
 0x90c   : > { %3224 = vrot.lane.b32.xlu1 %v3215_v36, %s4320_s28  ;;  %v6530_v36 = vld [vmem:[%s4387_s26 + $0x26] sm:$0x1] }
 0x913   : > { %3312 = vrot.lane.b32.xlu2 %v3301_v43, %s4319_s27  ;;  %v7541_v43 = vld [vmem:[#allocation10_spill] sm:$0xff] }
 0x914   : > { %3246 = vrot.lane.b32.xlu1 %v3238_v58, %s4319_s27  ;;  %v3467_v58 = vmul.f32 %v6530_v36, %v7541_v43 }
 0x91b   : > { %3390 = vrot.lane.b32.xlu2 %v3382_v30, %s4320_s28  ;;  %v3191_v30 = vpop.permute.xlu0 %3190 }
 0x91c   : > { %3250 = vrot.lane.b32.xlu1 %v3240_v33, %s4319_s27  ;;  %v7542_v33 = vld [vmem:[#allocation26_spill] sm:$0xff] }
 0x923   : > { %3394 = vrot.lane.b32.xlu2 %v3384_v54, %s4320_s28  ;;  %v3469_v54 = vmul.f32 %v6524_v16, %v7542_v33  ;;  %v6550_v33 = vld [vmem:[%s4387_s26 + $0x27] sm:$0x1] }
 0x924   : > { %3282 = vrot.lane.b32.xlu1 %v3274_v24, %s4320_s28  ;;  %v3223_v24 = vpop.permute.xlu0 %3222 }
 0x92b   : > { %3414 = vrot.lane.b32.xlu2 %v3406_v52, %s4319_s27 }
 0x92c   : > { %3288 = vrot.lane.b32.xlu1 %v3277_v31, %s4320_s28  ;;  %v3229_v12 = vpop.permute.xlu0 %3228 }
 0x933   : > { %3418 = vrot.lane.b32.xlu2 %v3408_v22, %s4319_s27  ;;  %v6539_v22 = vld [vmem:[%s4387_s26 + $0x3f] sm:$0x1] }
 0x934   : > { %3310 = vrot.lane.b32.xlu1 %v3300_v55, %s4319_s27  ;;  %7543 = vst [vmem:[#allocation11_spill] sm:$0xff] %v6539_v22  ;;  %v7544_v55 = vld [vmem:[#allocation23_spill] sm:$0xff]  ;;  %v3249_v9 = vpop.permute.xlu0 %3248 }
 0x93b   : > { %3450 = vrot.lane.b32.xlu2 %v3442_v35, %s4320_s28 }
 0x943   : > { %3456 = vrot.lane.b32.xlu2 %v3445_v15, %s4320_s28  ;;  %v7546_v15 = vld [vmem:[#allocation27_spill] sm:$0xff] }
 0x944   : > { %v3504_v49 = vmul.f32 %v6539_v22, %v7546_v15  ;;  %v3149_v15 = vmul.f32 %v6447_v40, %v7452_v8 }
 0x94b   : > { %3476 = vrot.lane.b32.xlu2 %v3467_v58, %s4319_s27 }
 0x953   : > { %3480 = vrot.lane.b32.xlu2 %v3469_v54, %s4319_s27  ;;  %v7547_v54 = vld [vmem:[#allocation16_spill] sm:$0xff] }
 0x954   : > { %v3527_v16 = vmul.f32 %v6550_v33, %v7547_v54  ;;  %v7549_v54 = vld [vmem:[#allocation46_spill] sm:$0xff] }
 0x955   : > { %v3146_v27 = vmul.f32 %v7549_v54, %v7424_v10 }
 0x956   : > { %v3140_v52 = vpop.xlane.xlu2 %3139  ;;  %v3132_v31 = vpop.permute.xlu1 %3131 }
 0x957   : > { %v6542_v35 = vadd.f32 %v3140_v52, %v7544_v55  ;;  %3134 = vst.msk [vmem:[%s4887_s6 + $0x4] sm:$0xf] %vm1307_vm9, %v3132_v31  ;;  %v3253_v55 = vpop.permute.xlu0 %3252  ;;  %v3174_v0 = vadd.f32 %v3163_v37, %v3146_v27  ;;  %v3266_v37 = vmul.f32 %v6468_v34, %v4619_v53  ;;  %v3208_v34 = vmul.f32 %v6453_v11, %v4781_v19 }
 0x959   : > { %7545 = vst [vmem:[#allocation33_spill] sm:$0xff] %v6542_v35  ;;  %v7548_v35 = vld [vmem:[#allocation34_spill] sm:$0xff]  ;;  %v3198_v8 = vadd.f32 %v3187_v39, %v3174_v0  ;;  %v7551_v39 = vld [vmem:[#allocation4_spill] sm:$0xff] }
 0x95a   : > { %v3147_v31 = vmul.f32 %v6441_v60, %v7548_v35 }
 0x95b   : > { %3514 = vrot.lane.b32.xlu2 %v3504_v49, %s4320_s28 }
 0x95e   : > { %v3165_v58 = vpop.permute.xlu1 %3164  ;;  %v3227_v29 = vpop.permute.xlu2 %3226 }
 0x95f   : > { %v3175_v56 = vadd.f32 %v3165_v58, %v3147_v31  ;;  %v3287_v57 = vpop.permute.xlu0 %3286 }
 0x963   : > { %3536 = vrot.lane.b32.xlu2 %v3527_v16, %s4319_s27  ;;  %v7550_v16 = vld [vmem:[#allocation22_spill] sm:$0xff] }
 0x964   : > { %v3209_v51 = vmul.f32 %v7550_v16, %v4801_v20 }
 0x966   : > { %v3169_v43 = vpop.permute.xlu1 %3168  ;;  %v3285_v31 = vpop.permute.xlu2 %3284 }
 0x967   : > { %v3177_v22 = vadd.f32 %v3169_v43, %v3149_v15 }
 0x96e   : > { %v3189_v52 = vpop.permute.xlu1 %3188  ;;  %v3307_v16 = vpop.permute.xlu2 %3306 }
 0x96f   : > { %v3199_v6 = vadd.f32 %v3189_v52, %v3175_v56  ;;  %v3206_v56 = vmul.f32 %v6348_v23, %v4596_v32 }
 0x971   : > { %v3211_v35 = vadd.f32 %v3207_v7, %v3199_v6  ;;  %v3210_v54 = vadd.f32 %v3206_v56, %v3198_v8  ;;  %v3269_v7 = vmul.f32 %v6477_v41, %v4824_v50 }
 0x976   : > { %v3193_v49 = vpop.permute.xlu1 %3192 }
 0x977   : > { %v3201_v18 = vadd.f32 %v3193_v49, %v3177_v22  ;;  %v3267_v22 = vmul.f32 %v6394_v26, %v4740_v45  ;;  %v3234_v49 = vadd.f32 %v3223_v24, %v3210_v54 }
 0x979   : > { %v3213_v60 = vadd.f32 %v3209_v51, %v3201_v18 }
 0x97b   : > { %v3237_v43 = vadd.f32 %v3229_v12, %v3213_v60  ;;  %v3309_v12 = vpop.permute.xlu0 %3308 }
 0x97d   : > { %v3261_v27 = vadd.f32 %v3253_v55, %v3237_v43 }
 0x97e   : > { %v3225_v40 = vpop.permute.xlu1 %3224 }
 0x97f   : > { %v3235_v58 = vadd.f32 %v3225_v40, %v3211_v35  ;;  %v3273_v23 = vadd.f32 %v3269_v7, %v3261_v27  ;;  %v3313_v27 = vpop.permute.xlu2 %3312 }
 0x981   : > { %v3259_v15 = vadd.f32 %v3249_v9, %v3235_v58  ;;  %v3148_v9 = vmul.f32 %v7551_v39, %v7524_v38 }
 0x983   : > { %v3271_v52 = vadd.f32 %v3267_v22, %v3259_v15  ;;  %v3176_v35 = vadd.f32 %v6518_v61, %v3148_v9  ;;  %v3268_v61 = vmul.f32 %v7537_v13, %v4808_v4 }
 0x985   : > { %v3295_v2 = vadd.f32 %v3285_v31, %v3271_v52  ;;  %v3200_v55 = vadd.f32 %v3191_v30, %v3176_v35 }
 0x986   : > { %v3247_v51 = vpop.permute.xlu1 %3246 }
 0x987   : > { %v3258_v0 = vadd.f32 %v3247_v51, %v3234_v49  ;;  %v3319_v18 = vadd.f32 %v3309_v12, %v3295_v2  ;;  %v3212_v58 = vadd.f32 %v3208_v34, %v3200_v55 }
 0x989   : > { %v3270_v6 = vadd.f32 %v3266_v37, %v3258_v0  ;;  %v3323_v26 = vadd.f32 %v3319_v18, %v7295_v59  ;;  %v3236_v22 = vadd.f32 %v3227_v29, %v3212_v58 }
 0x98b   : > { %v3327_v24 = vadd.f32 3.0, %v3323_v26 }
 0x98d   : > { %v3331_v41 = vmax.f32 %v3327_v24, 0.0 }
 0x98e   : > { %v3251_v8 = vpop.permute.xlu1 %3250 }
 0x98f   : > { %v3335_v56 = vmin.f32 %v3331_v41, 6.0  ;;  %v3260_v52 = vadd.f32 %v3251_v8, %v3236_v22 }
 0x991   : > { %v3339_v54 = vmul.f32 0.16666667, %v3335_v56  ;;  %v3272_v7 = vadd.f32 %v3268_v61, %v3260_v52  ;;  %v6595_v61 = vld [vmem:[%s4387_s26 + $0x25] sm:$0x1] }
 0x993   : > { %v3343_v0 = vmul.f32 %v3339_v54, %v3323_v26 }
 0x995   : > { %v3350_v39 = vrot.slane %v3343_v0, 7  ;;  %v3503_v0 = vmul.f32 %v6550_v33, %v7470_v62 }
 0x996   : > { %v3283_v60 = vpop.permute.xlu1 %3282 }
 0x997   : > { %v3294_v40 = vadd.f32 %v3283_v60, %v3270_v6  ;;  %v3296_v6 = vadd.f32 %v3287_v57, %v3272_v7  ;;  %v6607_v7 = vld [vmem:[%s4387_s26 + $0x3e] sm:$0x1] }
 0x999   : > { %v3318_v43 = vadd.f32 %v3307_v16, %v3294_v40 }
 0x99b   : > { %v3322_v15 = vadd.f32 %v3318_v43, %v4661_v47 }
 0x99d   : > { %v3326_v31 = vadd.f32 3.0, %v3322_v15 }
 0x99e   : > { %v3289_v49 = vpop.permute.xlu1 %3288 }
 0x99f   : > { %v3330_v30 = vmax.f32 %v3326_v31, 0.0  ;;  %v3297_v2 = vadd.f32 %v3289_v49, %v3273_v23 }
 0x9a1   : > { %v3334_v51 = vmin.f32 %v3330_v30, 6.0  ;;  %v3321_v11 = vadd.f32 %v3313_v27, %v3297_v2  ;;  %v3383_v30 = vmul.f32 %v6595_v61, %v7462_v1  ;;  %v6601_v2 = vld [vmem:[%s4387_s26 + $0x55] sm:$0x1] }
 0x9a2   : > { %v3385_v27 = vmul.f32 %v6601_v2, %v7463_v63 }
 0x9a3   : > { %v3338_v37 = vmul.f32 0.16666667, %v3334_v51  ;;  %v3325_v12 = vadd.f32 %v3321_v11, %v4865_v25  ;;  %v3444_v51 = vmul.f32 %v6607_v7, %v7526_v28  ;;  %v3407_v11 = vmul.f32 %v6595_v61, %v7465_v3 }
 0x9a5   : > { %v3342_v29 = vmul.f32 %v3338_v37, %v3322_v15  ;;  %v3329_v18 = vadd.f32 3.0, %v3325_v12  ;;  %v3409_v37 = vmul.f32 %v6601_v2, %v7466_v5 }
 0x9a6   : > { %v3311_v8 = vpop.permute.xlu1 %3310 }
 0x9a7   : > { %v3333_v9 = vmax.f32 %v3329_v18, 0.0  ;;  %v3320_v24 = vadd.f32 %v3311_v8, %v3296_v6  ;;  %v3351_v35 = vsel %vm605_vm0, %v3350_v39, %v3342_v29  ;;  %v3443_v18 = vmul.f32 %v6530_v36, %v7487_v14  ;;  %v6631_v6 = vld [vmem:[%s4387_s26 + $0x57] sm:$0x1] }
 0x9a8   : > { %v3352_v13 = vsel %vm607_vm1, %v3350_v39, %v3351_v35  ;;  %v3529_v39 = vmul.f32 %v6631_v6, %v7489_v44  ;;  %v3466_v8 = vmul.f32 %v6516_v48, %v7490_v42 }
 0x9a9   : > { %v3324_v23 = vadd.f32 %v3320_v24, %v4852_v46  ;;  %v3337_v55 = vmin.f32 %v3333_v9, 6.0  ;;  %v6640_v9 = vld [vmem:[%s4387_s26 + $0xe] sm:$0x1] }
 0x9aa   : > { %v7552_v24 = vld [vmem:[#allocation3_spill] sm:$0xff] }
 0x9ab   : > { %v3328_v41 = vadd.f32 3.0, %v3324_v23  ;;  %v3341_v26 = vmul.f32 0.16666667, %v3337_v55  ;;  %v6649_v55 = vld [vmem:[%s4387_s26 + $0x3e] sm:$0x1] }
 0x9ad   : > { %v3332_v16 = vmax.f32 %v3328_v41, 0.0  ;;  %v3345_v40 = vmul.f32 %v3341_v26, %v3325_v12  ;;  %v6622_v12 = vld [vmem:[%s4387_s26 + $0xf] sm:$0x1]  ;;  %v7554_v41 = vld [vmem:[#allocation18_spill] sm:$0xff]  ;;  %v7555_v26 = vld [vmem:[#allocation12_spill] sm:$0xff] }
 0x9ae   : > { %v3526_v29 = vmul.f32 %v6622_v12, %v7471_v17 }
 0x9af   : > { %v3336_v60 = vmin.f32 %v3332_v16, 6.0  ;;  %v3356_v56 = vrot.slane %v3345_v40, 5  ;;  %v3612_v16 = vmul.f32 %v6649_v55, %v7554_v41 }
 0x9b1   : > { %v3340_v34 = vmul.f32 0.16666667, %v3336_v60  ;;  %v3502_v60 = vmul.f32 %v6622_v12, %v7555_v26 }
 0x9b3   : > { %v3344_v57 = vmul.f32 %v3340_v34, %v3324_v23  ;;  %v7556_v34 = vld [vmem:[#allocation2_spill] sm:$0xff] }
 0x9b4   : > { %v3634_v40 = vmul.f32 %v6640_v9, %v7556_v34 }
 0x9b5   : > { %v3353_v58 = vrot.slane %v3344_v57, 6  ;;  %v7557_v57 = vld [vmem:[#allocation13_spill] sm:$0xff] }
 0x9b7   : > { %v3363_v43 = vsel %vm610_vm2, %v3353_v58, %v3351_v35  ;;  %v3354_v22 = vsel %vm610_vm2, %v3353_v58, %v3352_v13  ;;  %v3610_v35 = vmul.f32 %v6640_v9, %v7552_v24  ;;  %v7553_v13 = vld [vmem:[#allocation14_spill] sm:$0xff] }
 0x9b8   : > { %v3364_v15 = vsel %vm615_vm4, %v3356_v56, %v3363_v43  ;;  %v3355_v54 = vsel %vm612_vm3, %v3353_v58, %v3354_v22  ;;  %v3468_v23 = vmul.f32 %v6607_v7, %v7553_v13  ;;  %v3505_v58 = vmul.f32 %v6631_v6, %v7557_v57  ;;  %v7558_v43 = vld [vmem:[#allocation8_spill] sm:$0xff]  ;;  %v7572_v13 = vld [vmem:[#allocation15_spill] sm:$0xff] }
 0x9b9   : > { %v3366_v52 = vsel %vm620_vm5, %v3364_v15, 0.0  ;;  %v3357_v31 = vsel %vm615_vm4, %v3356_v56, %v3355_v54  ;;  %v3636_v22 = vmul.f32 %v6649_v55, %v7558_v43  ;;  %v7559_v15 = vld [vmem:[#allocation19_spill] sm:$0xff] }
 0x9ba   : > { %3367 = vadd.xlane.f32.xlu1 %v3366_v52  ;;  %v3358_v49 = vsel %vm617_vm6, %v3356_v56, %v3357_v31  ;;  %v3391_v56 = vpop.permute.xlu2 %3390  ;;  %v7560_v54 = vld [vmem:[#allocation11_spill] sm:$0xff] }
 0x9bb   : > { %3359 = vrot.lane.b32.xlu0 %v3358_v49, %s4324_s10  ;;  %v3528_v52 = vmul.f32 %v7560_v54, %v7559_v15  ;;  %v6672_v49 = vld [vmem:[%s4387_s26 + $0xf] sm:$0x1] }
 0x9c2   : > { %v6669_v31 = vpop.permute.xlu2 %3394 }
 0x9c3   : > { %3392 = vrot.lane.b32.xlu0 %v3383_v30, %s4320_s28  ;;  %v7561_v30 = vld [vmem:[#allocation6_spill] sm:$0xff] }
 0x9cb   : > { %3396 = vrot.lane.b32.xlu0 %v3385_v27, %s4320_s28  ;;  %v3670_v27 = vmul.f32 %v6672_v49, %v7561_v30 }
 0x9d3   : > { %3454 = vrot.lane.b32.xlu1 %v3444_v51, %s4320_s28  ;;  %3416 = vrot.lane.b32.xlu0 %v3407_v11, %s4319_s27  ;;  %v6678_v51 = vld [vmem:[%s4387_s26 + $0x57] sm:$0x1]  ;;  %v3415_v11 = vpop.permute.xlu2 %3414 }
 0x9db   : > { %3512 = vrot.lane.b32.xlu1 %v3503_v0, %s4320_s28  ;;  %3420 = vrot.lane.b32.xlu0 %v3409_v37, %s4319_s27  ;;  %v7562_v0 = vld [vmem:[#allocation7_spill] sm:$0xff] }
 0x9dc   : > { %v3673_v37 = vmul.f32 %v6678_v51, %v7562_v0 }
 0x9e3   : > { %3534 = vrot.lane.b32.xlu1 %v3526_v29, %s4319_s27  ;;  %3452 = vrot.lane.b32.xlu0 %v3443_v18, %s4320_s28  ;;  %v6684_v29 = vld [vmem:[%s4387_s26 + $0x27] sm:$0x1] }
 0x9e4   : > { %7563 = vst [vmem:[#allocation9_spill] sm:$0xff] %v6684_v29  ;;  %v7564_v18 = vld [vmem:[#allocation10_spill] sm:$0xff] }
 0x9eb   : > { %3540 = vrot.lane.b32.xlu1 %v3529_v39, %s4319_s27  ;;  %3474 = vrot.lane.b32.xlu0 %v3466_v8, %s4319_s27  ;;  %v3695_v39 = vmul.f32 %v6684_v29, %v7564_v18  ;;  %v6688_v8 = vpop.permute.xlu2 %3418  ;;  %v6725_v18 = vld [vmem:[%s4387_s26 + $0x3f] sm:$0x1] }
 0x9ec   : > { %7570 = vst [vmem:[#allocation40_spill] sm:$0xff] %v6725_v18 }
 0x9f3   : > { %3618 = vrot.lane.b32.xlu1 %v3610_v35, %s4320_s28  ;;  %3478 = vrot.lane.b32.xlu0 %v3468_v23, %s4319_s27  ;;  %v6692_v35 = vld [vmem:[%s4387_s26 + $0x10] sm:$0x1] }
 0x9f4   : > { %7565 = vst [vmem:[#allocation30_spill] sm:$0xff] %v6692_v35  ;;  %v3730_v23 = vmul.f32 %v6692_v35, %v7555_v26 }
 0x9fb   : > { %3622 = vrot.lane.b32.xlu1 %v3612_v16, %s4320_s28  ;;  %3510 = vrot.lane.b32.xlu0 %v3502_v60, %s4320_s28  ;;  %v3451_v16 = vpop.permute.xlu2 %3450 }
 0xa03   : > { %3642 = vrot.lane.b32.xlu1 %v3634_v40, %s4319_s27  ;;  %3516 = vrot.lane.b32.xlu0 %v3505_v58, %s4320_s28  ;;  %v7566_v58 = vld [vmem:[#allocation33_spill] sm:$0xff] }
 0xa0b   : > { %3646 = vrot.lane.b32.xlu1 %v3636_v22, %s4319_s27  ;;  %3538 = vrot.lane.b32.xlu0 %v3528_v52, %s4319_s27  ;;  %v6703_v52 = vld [vmem:[%s4387_s26 + $0x58] sm:$0x1] }
 0xa0c   : > { %7568 = vst [vmem:[#allocation45_spill] sm:$0xff] %v6703_v52 }
 0xa13   : > { %3678 = vrot.lane.b32.xlu1 %v3670_v27, %s4320_s28  ;;  %v3733_v27 = vmul.f32 %v6703_v52, %v7557_v57 }
 0xa1b   : > { %3684 = vrot.lane.b32.xlu1 %v3673_v37, %s4320_s28 }
 0xa23   : > { %3704 = vrot.lane.b32.xlu1 %v3695_v39, %s4319_s27  ;;  %v6708_v39 = vpop.permute.xlu2 %3456 }
 0xa2b   : > { %3738 = vrot.lane.b32.xlu1 %v3730_v23, %s4320_s28  ;;  %v6711_v23 = vld [vmem:[%s4387_s26 + $0x40] sm:$0x1] }
 0xa2c   : > { %v3756_v44 = vmul.f32 %v6711_v23, %v7559_v15  ;;  %v3864_v15 = vmul.f32 %v6725_v18, %v7558_v43  ;;  %v3374_v43 = vmul.f32 %v7572_v13, %v7424_v10  ;;  %v3435_v18 = vmul.f32 %v6530_v36, %v4722_v21  ;;  %v7574_v21 = vld [vmem:[#allocation39_spill] sm:$0xff] }
 0xa2d   : > { %v3368_v60 = vpop.xlane.xlu1 %3367  ;;  %v3360_v40 = vpop.permute.xlu0 %3359  ;;  %v3495_v13 = vmul.f32 %v6550_v33, %v4740_v45  ;;  %v3377_v33 = vmul.f32 %v6601_v2, %v7574_v21  ;;  %v6770_v2 = vld [vmem:[%s4387_s26 + $0x41] sm:$0x1] }
 0xa2e   : > { %v6698_v22 = vadd.f32 %v3368_v60, %v7566_v58  ;;  %3362 = vst.msk [vmem:[%s4887_s6 + $0x4] sm:$0xf] %vm1536_vm10, %v3360_v40  ;;  %v3477_v40 = vpop.permute.xlu2 %3476  ;;  %v6717_v58 = vld [vmem:[%s4387_s26 + $0xf] sm:$0x1] }
 0xa2f   : > { %7569 = vst [vmem:[#allocation35_spill] sm:$0xff] %v6717_v58  ;;  %v3838_v52 = vmul.f32 %v6717_v58, %v7552_v24 }
 0xa30   : > { %7567 = vst [vmem:[#allocation42_spill] sm:$0xff] %v6698_v22 }
 0xa33   : > { %3744 = vrot.lane.b32.xlu1 %v3733_v27, %s4320_s28 }
 0xa35   : > { %v3393_v37 = vpop.permute.xlu0 %3392 }
 0xa36   : > { %v6729_v26 = vpop.permute.xlu2 %3480 }
 0xa3b   : > { %3766 = vrot.lane.b32.xlu1 %v3756_v44, %s4319_s27  ;;  %v7571_v44 = vld [vmem:[#allocation34_spill] sm:$0xff] }
 0xa3c   : > { %v3375_v34 = vmul.f32 %v6595_v61, %v7571_v44 }
 0xa3d   : > { %v3397_v60 = vpop.permute.xlu0 %3396 }
 0xa3e   : > { %v3403_v58 = vadd.f32 %v3393_v37, %v3375_v34  ;;  %v6744_v61 = vpop.permute.xlu2 %3514 }
 0xa43   : > { %3846 = vrot.lane.b32.xlu1 %v3838_v52, %s4320_s28  ;;  %v6735_v52 = vld [vmem:[%s4387_s26 + $0x28] sm:$0x1] }
 0xa44   : > { %v3899_v62 = vmul.f32 %v6735_v52, %v7487_v14 }
 0xa45   : > { %v6722_v27 = vpop.permute.xlu1 %3454  ;;  %v3417_v22 = vpop.permute.xlu0 %3416 }
 0xa46   : > { %v3427_v35 = vadd.f32 %v3417_v22, %v3403_v58  ;;  %v6747_v22 = vld [vmem:[%s4387_s26 + $0x58] sm:$0x1]  ;;  %v3434_v58 = vmul.f32 %v6516_v48, %v4596_v32  ;;  %v3494_v48 = vmul.f32 %v6622_v12, %v4619_v53  ;;  %v7575_v12 = vld [vmem:[#allocation47_spill] sm:$0xff] }
 0xa47   : > { %7573 = vst [vmem:[#allocation29_spill] sm:$0xff] %v6747_v22 }
 0xa48   : > { %v3439_v44 = vadd.f32 %v3435_v18, %v3427_v35 }
 0xa4b   : > { %3874 = vrot.lane.b32.xlu1 %v3864_v15, %s4319_s27  ;;  %v3402_v15 = vadd.f32 %v3391_v56, %v3374_v43 }
 0xa4d   : > { %v3513_v30 = vpop.permute.xlu1 %3512  ;;  %v3421_v24 = vpop.permute.xlu0 %3420  ;;  %v3426_v37 = vadd.f32 %v3415_v11, %v3402_v15 }
 0xa4f   : > { %v3438_v56 = vadd.f32 %v3434_v58, %v3426_v37 }
 0xa51   : > { %v3462_v18 = vadd.f32 %v3451_v16, %v3438_v56  ;;  %v3405_v16 = vadd.f32 %v3397_v60, %v3377_v33  ;;  %v7576_v56 = vld [vmem:[#allocation48_spill] sm:$0xff]  ;;  %v3436_v33 = vmul.f32 %v6607_v7, %v4781_v19 }
 0xa53   : > { %3908 = vrot.lane.b32.xlu1 %v3899_v62, %s4320_s28  ;;  %v3901_v62 = vmul.f32 %v6747_v22, %v7562_v0 }
 0xa55   : > { %v3535_v41 = vpop.permute.xlu1 %3534  ;;  %v3453_v34 = vpop.permute.xlu0 %3452 }
 0xa56   : > { %v3463_v29 = vadd.f32 %v3453_v34, %v3439_v44  ;;  %v3537_v34 = vpop.permute.xlu2 %3536 }
 0xa58   : > { %v3487_v36 = vadd.f32 %v3477_v40, %v3463_v29  ;;  %v6761_v40 = vld [vmem:[%s4387_s26 + $0x10] sm:$0x1] }
 0xa59   : > { %v3922_v37 = vmul.f32 %v6761_v40, %v7490_v42 }
 0xa5a   : > { %v3499_v43 = vadd.f32 %v3495_v13, %v3487_v36 }
 0xa5b   : > { %3912 = vrot.lane.b32.xlu1 %v3901_v62, %s4320_s28  ;;  %v3437_v62 = vmul.f32 %v7575_v12, %v4801_v20 }
 0xa5c   : > { %v3523_v11 = vadd.f32 %v3513_v30, %v3499_v43  ;;  %v3429_v30 = vadd.f32 %v3421_v24, %v3405_v16  ;;  %v3376_v43 = vmul.f32 %v7576_v56, %v7524_v38 }
 0xa5d   : > { %v3541_v35 = vpop.permute.xlu1 %3540  ;;  %v3475_v44 = vpop.permute.xlu0 %3474 }
 0xa5e   : > { %v3486_v15 = vadd.f32 %v3475_v44, %v3462_v18  ;;  %v3547_v29 = vadd.f32 %v3537_v34, %v3523_v11  ;;  %v3441_v18 = vadd.f32 %v3437_v62, %v3429_v30  ;;  %v3404_v60 = vadd.f32 %v6669_v31, %v3376_v43  ;;  %v7577_v44 = vld [vmem:[#allocation27_spill] sm:$0xff]  ;;  %v6783_v30 = vld [vmem:[%s4387_s26 + $0x59] sm:$0x1] }
 0xa5f   : > { %v3960_v24 = vmul.f32 %v6770_v2, %v7577_v44  ;;  %7578 = vst [vmem:[#allocation37_spill] sm:$0xff] %v6783_v30  ;;  %v3961_v43 = vmul.f32 %v6783_v30, %v7557_v57 }
 0xa60   : > { %v3498_v0 = vadd.f32 %v3494_v48, %v3486_v15  ;;  %v3551_v58 = vadd.f32 %v3547_v29, %v7295_v59  ;;  %v3428_v15 = vadd.f32 %v6688_v8, %v3404_v60  ;;  %v3465_v48 = vadd.f32 %v6708_v39, %v3441_v18 }
 0xa61   : > { %v3602_v39 = vmul.f32 %v6640_v9, %v7424_v10 }
 0xa62   : > { %v3555_v11 = vadd.f32 3.0, %v3551_v58  ;;  %v3440_v12 = vadd.f32 %v3436_v33, %v3428_v15  ;;  %v3489_v56 = vadd.f32 %v6729_v26, %v3465_v48 }
 0xa63   : > { %3930 = vrot.lane.b32.xlu1 %v3922_v37, %s4319_s27 }
 0xa64   : > { %v3559_v34 = vmax.f32 %v3555_v11, 0.0  ;;  %v3464_v8 = vadd.f32 %v6722_v27, %v3440_v12  ;;  %v3496_v27 = vmul.f32 %v7560_v54, %v4808_v4  ;;  %v3604_v54 = vmul.f32 %v6649_v55, %v7524_v38 }
 0xa65   : > { %v3619_v13 = vpop.permute.xlu1 %3618  ;;  %v3479_v36 = vpop.permute.xlu0 %3478 }
 0xa66   : > { %v3563_v31 = vmin.f32 %v3559_v34, 6.0  ;;  %v3488_v18 = vadd.f32 %v3479_v36, %v3464_v8  ;;  %v3630_v11 = vadd.f32 %v3619_v13, %v3602_v39  ;;  %v3662_v34 = vmul.f32 %v6672_v49, %v4596_v32 }
 0xa6b   : > { %3970 = vrot.lane.b32.xlu1 %v3960_v24, %s4320_s28 }
 0xa6d   : > { %v3623_v29 = vpop.permute.xlu1 %3622  ;;  %v3511_v37 = vpop.permute.xlu0 %3510 }
 0xa6e   : > { %v3522_v16 = vadd.f32 %v3511_v37, %v3498_v0  ;;  %v3497_v0 = vmul.f32 %v6631_v6, %v4824_v50  ;;  %v3500_v6 = vadd.f32 %v3496_v27, %v3488_v18  ;;  %v6800_v37 = vld [vmem:[%s4387_s26 + $0x11] sm:$0x1]  ;;  %v3632_v8 = vadd.f32 %v3623_v29, %v3604_v54 }
 0xa6f   : > { %v3982_v12 = vmul.f32 %v6800_v37, %v7471_v17 }
 0xa70   : > { %v3546_v62 = vadd.f32 %v3535_v41, %v3522_v16  ;;  %v3567_v41 = vmul.f32 0.16666667, %v3563_v31  ;;  %v3501_v60 = vadd.f32 %v3497_v0, %v3489_v56  ;;  %v3524_v56 = vadd.f32 %v6744_v61, %v3500_v6 }
 0xa72   : > { %v3550_v7 = vadd.f32 %v3546_v62, %v4661_v47  ;;  %v3571_v13 = vmul.f32 %v3567_v41, %v3551_v58 }
 0xa73   : > { %3972 = vrot.lane.b32.xlu1 %v3961_v43, %s4320_s28 }
 0xa74   : > { %v3554_v26 = vadd.f32 3.0, %v3550_v7  ;;  %v3578_v39 = vrot.slane %v3571_v13, 7 }
 0xa75   : > { %v3643_v57 = vpop.permute.xlu1 %3642  ;;  %v3517_v24 = vpop.permute.xlu0 %3516 }
 0xa76   : > { %v3558_v15 = vmax.f32 %v3554_v26, 0.0  ;;  %v3654_v9 = vadd.f32 %v3643_v57, %v3630_v11  ;;  %v3525_v48 = vadd.f32 %v3517_v24, %v3501_v60 }
 0xa78   : > { %v3562_v36 = vmin.f32 %v3558_v15, 6.0  ;;  %v3549_v33 = vadd.f32 %v3541_v35, %v3525_v48  ;;  %v3666_v16 = vadd.f32 %v3662_v34, %v3654_v9 }
 0xa7a   : > { %v3566_v31 = vmul.f32 0.16666667, %v3562_v36  ;;  %v3553_v62 = vadd.f32 %v3549_v33, %v4865_v25 }
 0xa7b   : > { %3990 = vrot.lane.b32.xlu1 %v3982_v12, %s4319_s27 }
 0xa7c   : > { %v3570_v43 = vmul.f32 %v3566_v31, %v3550_v7  ;;  %v3557_v35 = vadd.f32 3.0, %v3553_v62 }
 0xa7d   : > { %v3647_v0 = vpop.permute.xlu1 %3646  ;;  %v3539_v18 = vpop.permute.xlu0 %3538 }
 0xa7e   : > { %v3561_v58 = vmax.f32 %v3557_v35, 0.0  ;;  %v6809_v41 = vadd.f32 %v3647_v0, %v3632_v8  ;;  %v3548_v11 = vadd.f32 %v3539_v18, %v3524_v56  ;;  %v3579_v26 = vsel %vm605_vm0, %v3578_v39, %v3570_v43  ;;  %v6825_v56 = vld [vmem:[%s4387_s26 + $0x26] sm:$0x1]  ;;  %v6831_v43 = vld [vmem:[%s4387_s26 + $0x56] sm:$0x1] }
 0xa7f   : > { %v3580_v55 = vsel %vm607_vm1, %v3578_v39, %v3579_v26  ;;  %v3611_v8 = vmul.f32 %v6825_v56, %v7462_v1  ;;  %v3613_v35 = vmul.f32 %v6831_v43, %v7463_v63  ;;  %v6836_v39 = vld [vmem:[%s4387_s26 + $0x3f] sm:$0x1]  ;;  %v3635_v18 = vmul.f32 %v6825_v56, %v7465_v3 }
 0xa80   : > { %v3552_v60 = vadd.f32 %v3548_v11, %v4852_v46  ;;  %v3565_v27 = vmin.f32 %v3561_v58, 6.0  ;;  %v3672_v0 = vmul.f32 %v6836_v39, %v7526_v28  ;;  %v7579_v58 = vld [vmem:[#allocation26_spill] sm:$0xff] }
 0xa81   : > { %v3697_v11 = vmul.f32 %v6678_v51, %v7579_v58 }
 0xa82   : > { %v3556_v57 = vadd.f32 3.0, %v3552_v60  ;;  %v3569_v61 = vmul.f32 0.16666667, %v3565_v27 }
 0xa84   : > { %v3560_v24 = vmax.f32 %v3556_v57, 0.0  ;;  %v3573_v48 = vmul.f32 %v3569_v61, %v3553_v62  ;;  %v6858_v57 = vld [vmem:[%s4387_s26 + $0x28] sm:$0x1] }
 0xa85   : > { %v3679_v29 = vpop.permute.xlu1 %3678 }
 0xa86   : > { %v3564_v7 = vmin.f32 %v3560_v24, 6.0  ;;  %v6814_v15 = vadd.f32 %v3679_v29, %v3666_v16  ;;  %v3584_v36 = vrot.slane %v3573_v48, 5  ;;  %v7581_v24 = vld [vmem:[#allocation16_spill] sm:$0xff]  ;;  %v3694_v29 = vmul.f32 %v6672_v49, %v7490_v42  ;;  %v7585_v42 = vld [vmem:[#allocation17_spill] sm:$0xff] }
 0xa87   : > { %v3755_v61 = vmul.f32 %v6858_v57, %v7581_v24  ;;  %v3731_v49 = vmul.f32 %v6858_v57, %v7585_v42 }
 0xa88   : > { %v3568_v9 = vmul.f32 0.16666667, %v3564_v7  ;;  %v7583_v7 = vld [vmem:[#allocation40_spill] sm:$0xff] }
 0xa8a   : > { %v3572_v34 = vmul.f32 %v3568_v9, %v3552_v60  ;;  %v7580_v60 = vld [vmem:[#allocation9_spill] sm:$0xff] }
 0xa8b   : > { %v3671_v27 = vmul.f32 %v7580_v60, %v7487_v14  ;;  %v7584_v14 = vld [vmem:[#allocation14_spill] sm:$0xff] }
 0xa8c   : > { %v3581_v6 = vrot.slane %v3572_v34, 6  ;;  %v3696_v48 = vmul.f32 %v6836_v39, %v7584_v14  ;;  %v6872_v34 = vld [vmem:[%s4387_s26 + $0x27] sm:$0x1] }
 0xa8e   : > { %v3591_v33 = vsel %vm610_vm2, %v3581_v6, %v3579_v26  ;;  %v3582_v13 = vsel %vm610_vm2, %v3581_v6, %v3580_v55  ;;  %v3637_v26 = vmul.f32 %v6831_v43, %v7466_v5  ;;  %v3732_v55 = vmul.f32 %v6711_v23, %v7577_v44  ;;  %v7582_v44 = vld [vmem:[#allocation18_spill] sm:$0xff] }
 0xa8f   : > { %v3592_v12 = vsel %vm615_vm4, %v3584_v36, %v3591_v33  ;;  %v3583_v54 = vsel %vm612_vm3, %v3581_v6, %v3582_v13  ;;  %v3840_v9 = vmul.f32 %v7583_v7, %v7582_v44  ;;  %v3863_v6 = vmul.f32 %v6872_v34, %v7465_v3  ;;  %v7586_v13 = vld [vmem:[#allocation30_spill] sm:$0xff] }
 0xa90   : > { %v3594_v31 = vsel %vm620_vm5, %v3592_v12, 0.0  ;;  %v3585_v16 = vsel %vm615_vm4, %v3584_v36, %v3583_v54  ;;  %v3754_v12 = vmul.f32 %v7586_v13, %v7471_v17  ;;  %v7587_v3 = vld [vmem:[#allocation6_spill] sm:$0xff] }
 0xa91   : > { %3595 = vadd.xlane.f32.xlu0 %v3594_v31  ;;  %v3586_v62 = vsel %vm617_vm6, %v3584_v36, %v3585_v16  ;;  %v6881_v36 = vld [vmem:[%s4387_s26 + $0x57] sm:$0x1]  ;;  %v3898_v54 = vmul.f32 %v6761_v40, %v7587_v3  ;;  %v3839_v31 = vmul.f32 %v6872_v34, %v7462_v1  ;;  %v6897_v16 = vld [vmem:[%s4387_s26 + $0x40] sm:$0x1] }
 0xa92   : > { %3587 = vrot.lane.b32.xlu2 %v3586_v62, %s4325_s11  ;;  %v3865_v33 = vmul.f32 %v6881_v36, %v7466_v5  ;;  %v3924_v5 = vmul.f32 %v6897_v16, %v7584_v14  ;;  %v3841_v17 = vmul.f32 %v6881_v36, %v7463_v63  ;;  %v6905_v62 = vld [vmem:[%s4387_s26 + $0x29] sm:$0x1]  ;;  %v7591_v63 = vld [vmem:[#allocation12_spill] sm:$0xff]  ;;  %v7593_v14 = vld [vmem:[#allocation10_spill] sm:$0xff] }
 0xa93   : > { %7588 = vst [vmem:[#allocation21_spill] sm:$0xff] %v6905_v62 }
 0xa9a   : > { %3620 = vrot.lane.b32.xlu2 %v3611_v8, %s4320_s28  ;;  %v3959_v8 = vmul.f32 %v6905_v62, %v7585_v42 }
 0xaa2   : > { %3624 = vrot.lane.b32.xlu2 %v3613_v35, %s4320_s28  ;;  %v7589_v35 = vld [vmem:[#allocation2_spill] sm:$0xff] }
 0xaa5   : > { %3682 = vrot.lane.b32.xlu0 %v3672_v0, %s4320_s28  ;;  %v7590_v0 = vld [vmem:[#allocation35_spill] sm:$0xff] }
 0xaaa   : > { %3644 = vrot.lane.b32.xlu2 %v3635_v18, %s4319_s27  ;;  %v3862_v18 = vmul.f32 %v7590_v0, %v7589_v35 }
 0xaad   : > { %3708 = vrot.lane.b32.xlu0 %v3697_v11, %s4319_s27  ;;  %v6915_v11 = vpop.permute.xlu1 %3684 }
 0xab2   : > { %3648 = vrot.lane.b32.xlu2 %v3637_v26, %s4319_s27  ;;  %v3958_v26 = vmul.f32 %v6800_v37, %v7591_v63  ;;  %v7599_v63 = vld [vmem:[#allocation45_spill] sm:$0xff] }
 0xab5   : > { %3742 = vrot.lane.b32.xlu0 %v3732_v55, %s4320_s28  ;;  %v3705_v44 = vpop.permute.xlu1 %3704 }
 0xaba   : > { %3680 = vrot.lane.b32.xlu2 %v3671_v27, %s4320_s28  ;;  %v3900_v27 = vmul.f32 %v6897_v16, %v7526_v28 }
 0xabd   : > { %3764 = vrot.lane.b32.xlu0 %v3755_v61, %s4319_s27  ;;  %v7592_v61 = vld [vmem:[#allocation19_spill] sm:$0xff] }
 0xac2   : > { %3702 = vrot.lane.b32.xlu2 %v3694_v29, %s4319_s27  ;;  %v3984_v29 = vmul.f32 %v6770_v2, %v7592_v61 }
 0xac5   : > { %3850 = vrot.lane.b32.xlu0 %v3840_v9, %s4320_s28 }
 0xaca   : > { %3706 = vrot.lane.b32.xlu2 %v3696_v48, %s4319_s27  ;;  %v3923_v48 = vmul.f32 %v6735_v52, %v7593_v14 }
 0xacd   : > { %3872 = vrot.lane.b32.xlu0 %v3863_v6, %s4319_s27  ;;  %v7594_v6 = vld [vmem:[#allocation34_spill] sm:$0xff] }
 0xace   : > { %v3603_v42 = vmul.f32 %v6825_v56, %v7594_v6 }
 0xad2   : > { %3740 = vrot.lane.b32.xlu2 %v3731_v49, %s4320_s28 }
 0xad5   : > { %3876 = vrot.lane.b32.xlu0 %v3865_v33, %s4319_s27 }
 0xada   : > { %3762 = vrot.lane.b32.xlu2 %v3754_v12, %s4319_s27  ;;  %v7595_v12 = vld [vmem:[#allocation42_spill] sm:$0xff] }
 0xadd   : > { %3906 = vrot.lane.b32.xlu0 %v3898_v54, %s4320_s28 }
 0xae2   : > { %3848 = vrot.lane.b32.xlu2 %v3839_v31, %s4320_s28  ;;  %v3739_v31 = vpop.permute.xlu1 %3738 }
 0xae5   : > { %3934 = vrot.lane.b32.xlu0 %v3924_v5, %s4319_s27  ;;  %v3925_v5 = vmul.f32 %v6747_v22, %v7579_v58 }
 0xaea   : > { %3852 = vrot.lane.b32.xlu2 %v3841_v17, %s4320_s28  ;;  %v3605_v17 = vmul.f32 %v6831_v43, %v7574_v21  ;;  %v6942_v35 = vpop.permute.xlu1 %3744  ;;  %v3664_v43 = vmul.f32 %v6836_v39, %v4781_v19 }
 0xaeb   : > { %7597 = vst [vmem:[#allocation44_spill] sm:$0xff] %v6942_v35 }
 0xaec   : > { %v3588_v1 = vpop.permute.xlu2 %3587 }
 0xaed   : > { %3590 = vst.msk [vmem:[%s4887_s6 + $0x4] sm:$0xf] %vm1765_vm11, %v3588_v1  ;;  %3968 = vrot.lane.b32.xlu0 %v3959_v8, %s4320_s28 }
 0xaf2   : > { %3870 = vrot.lane.b32.xlu2 %v3862_v18, %s4319_s27  ;;  %v7598_v18 = vld [vmem:[#allocation25_spill] sm:$0xff] }
 0xaf3   : > { %v3985_v39 = vmul.f32 %v6783_v30, %v7598_v18 }
 0xaf4   : > { %v3621_v55 = vpop.permute.xlu2 %3620 }
 0xaf5   : > { %3966 = vrot.lane.b32.xlu0 %v3958_v26, %s4320_s28  ;;  %v3631_v49 = vadd.f32 %v3621_v55, %v3603_v42  ;;  %v3757_v26 = vmul.f32 %v7599_v63, %v7598_v18  ;;  %v7600_v55 = vld [vmem:[#allocation36_spill] sm:$0xff]  ;;  %v3724_v18 = vmul.f32 %v6711_v23, %v4808_v4 }
 0xafa   : > { %3910 = vrot.lane.b32.xlu2 %v3900_v27, %s4320_s28  ;;  %v3663_v27 = vmul.f32 %v7580_v60, %v7600_v55 }
 0xafc   : > { %v3625_v9 = vpop.permute.xlu2 %3624 }
 0xafd   : > { %3994 = vrot.lane.b32.xlu0 %v3984_v29, %s4319_s27  ;;  %v3633_v8 = vadd.f32 %v3625_v9, %v3605_v17  ;;  %v3668_v9 = vadd.f32 %v3664_v43, %v6809_v41 }
 0xb02   : > { %3932 = vrot.lane.b32.xlu2 %v3923_v48, %s4319_s27 }
 0xb04   : > { %v3596_v33 = vpop.xlane.xlu0 %3595  ;;  %v3645_v28 = vpop.permute.xlu2 %3644 }
 0xb05   : > { %v6933_v3 = vadd.f32 %v3596_v33, %v7595_v12  ;;  %v3655_v54 = vadd.f32 %v3645_v28, %v3631_v49  ;;  %v3983_v49 = vmul.f32 %v6905_v62, %v7581_v24  ;;  %v3767_v33 = vpop.permute.xlu1 %3766 }
 0xb07   : > { %7596 = vst [vmem:[#allocation43_spill] sm:$0xff] %v6933_v3  ;;  %v3667_v58 = vadd.f32 %v3663_v27, %v3655_v54 }
 0xb0a   : > { %3936 = vrot.lane.b32.xlu2 %v3925_v5, %s4319_s27 }
 0xb0c   : > { %v3649_v56 = vpop.permute.xlu2 %3648 }
 0xb0d   : > { %v6940_v1 = vadd.f32 %v3649_v56, %v3633_v8  ;;  %v3847_v41 = vpop.permute.xlu1 %3846 }
 0xb12   : > { %3768 = vrot.lane.b32.xlu2 %v3757_v26, %s4319_s27 }
 0xb14   : > { %v3681_v61 = vpop.permute.xlu2 %3680 }
 0xb15   : > { %v3691_v29 = vadd.f32 %v3681_v61, %v3667_v58  ;;  %v3875_v8 = vpop.permute.xlu1 %3874 }
 0xb17   : > { %v3715_v14 = vadd.f32 %v3705_v44, %v3691_v29  ;;  %v3683_v48 = vpop.permute.xlu0 %3682  ;;  %v3723_v29 = vmul.f32 %v6858_v57, %v4740_v45  ;;  %v3830_v57 = vmul.f32 %v7590_v0, %v7424_v10  ;;  %v3890_v10 = vmul.f32 %v6761_v40, %v4596_v32 }
 0xb18   : > { %v3692_v42 = vadd.f32 %v3683_v48, %v3668_v9  ;;  %v3722_v48 = vmul.f32 %v7586_v13, %v4619_v53  ;;  %v3892_v32 = vmul.f32 %v6897_v16, %v4781_v19  ;;  %v3891_v19 = vmul.f32 %v6735_v52, %v7600_v55 }
 0xb19   : > { %v3952_v52 = vmul.f32 %v6770_v2, %v4808_v4 }
 0xb1a   : > { %3992 = vrot.lane.b32.xlu2 %v3983_v49, %s4319_s27 }
 0xb1c   : > { %v3703_v60 = vpop.permute.xlu2 %3702 }
 0xb1d   : > { %v3714_v28 = vadd.f32 %v3703_v60, %v6814_v15  ;;  %v6961_v27 = vpop.permute.xlu1 %3908 }
 0xb1f   : > { %v6956_v12 = vpop.permute.xlu0 %3708  ;;  %v3726_v60 = vadd.f32 %v3722_v48, %v3714_v28 }
 0xb21   : > { %v3750_v25 = vadd.f32 %v3739_v31, %v3726_v60  ;;  %v3832_v31 = vmul.f32 %v7583_v7, %v7524_v38 }
 0xb22   : > { %3996 = vrot.lane.b32.xlu2 %v3985_v39, %s4319_s27 }
 0xb24   : > { %v3707_v44 = vpop.permute.xlu2 %3706 }
 0xb25   : > { %v3716_v54 = vadd.f32 %v3707_v44, %v3692_v42  ;;  %v6963_v61 = vpop.permute.xlu1 %3912  ;;  %v3727_v42 = vadd.f32 %v3723_v29, %v3715_v14 }
 0xb26   : > { %7601 = vst [vmem:[#allocation49_spill] sm:$0xff] %v6963_v61 }
 0xb27   : > { %v3743_v5 = vpop.permute.xlu0 %3742  ;;  %v3728_v9 = vadd.f32 %v3724_v18, %v3716_v54  ;;  %v3858_v54 = vadd.f32 %v3847_v41, %v3830_v57  ;;  %v3665_v41 = vmul.f32 %v6678_v51, %v4801_v20 }
 0xb29   : > { %v3752_v44 = vadd.f32 %v3743_v5, %v3728_v9  ;;  %v3831_v9 = vmul.f32 %v6872_v34, %v7594_v6  ;;  %v3669_v38 = vadd.f32 %v3665_v41, %v6940_v1  ;;  %v3833_v1 = vmul.f32 %v6881_v36, %v7574_v21 }
 0xb2b   : > { %v3776_v62 = vadd.f32 %v3767_v33, %v3752_v44 }
 0xb2c   : > { %v3741_v17 = vpop.permute.xlu2 %3740 }
 0xb2d   : > { %v3751_v39 = vadd.f32 %v3741_v17, %v3727_v42  ;;  %v3931_v3 = vpop.permute.xlu1 %3930  ;;  %v3780_v13 = vadd.f32 %v3776_v62, %v4852_v46 }
 0xb2f   : > { %v3765_v24 = vpop.permute.xlu0 %3764  ;;  %v3784_v18 = vadd.f32 3.0, %v3780_v13 }
 0xb30   : > { %v3775_v61 = vadd.f32 %v3765_v24, %v3751_v39 }
 0xb31   : > { %v3788_v62 = vmax.f32 %v3784_v18, 0.0  ;;  %v3950_v18 = vmul.f32 %v6800_v37, %v4619_v53 }
 0xb32   : > { %v3779_v22 = vadd.f32 %v3775_v61, %v7295_v59 }
 0xb34   : > { %v3763_v56 = vpop.permute.xlu2 %3762  ;;  %v3783_v17 = vadd.f32 3.0, %v3779_v22 }
 0xb35   : > { %v3774_v23 = vadd.f32 %v3763_v56, %v3750_v25  ;;  %v6978_v5 = vpop.permute.xlu1 %3970 }
 0xb36   : > { %v3787_v0 = vmax.f32 %v3783_v17, 0.0 }
 0xb37   : > { %v3851_v26 = vpop.permute.xlu0 %3850  ;;  %v3778_v14 = vadd.f32 %v3774_v23, %v4661_v47  ;;  %v3693_v23 = vadd.f32 %v6915_v11, %v3669_v38  ;;  %v3725_v11 = vmul.f32 %v7599_v63, %v4824_v50 }
 0xb38   : > { %v3860_v56 = vadd.f32 %v3851_v26, %v3832_v31  ;;  %v3792_v26 = vmin.f32 %v3788_v62, 6.0 }
 0xb39   : > { %v3782_v33 = vadd.f32 3.0, %v3778_v14 }
 0xb3a   : > { %v3884_v48 = vadd.f32 %v3875_v8, %v3860_v56  ;;  %v3796_v6 = vmul.f32 0.16666667, %v3792_v26 }
 0xb3b   : > { %v3786_v29 = vmax.f32 %v3782_v33, 0.0 }
 0xb3c   : > { %v3849_v58 = vpop.permute.xlu2 %3848  ;;  %v3896_v51 = vadd.f32 %v3892_v32, %v3884_v48 }
 0xb3d   : > { %v3859_v7 = vadd.f32 %v3849_v58, %v3831_v9  ;;  %v3790_v40 = vmin.f32 %v3786_v29, 6.0  ;;  %v6991_v44 = vpop.permute.xlu1 %3972 }
 0xb3f   : > { %v3873_v15 = vpop.permute.xlu0 %3872 }
 0xb40   : > { %v3883_v34 = vadd.f32 %v3873_v15, %v3859_v7 }
 0xb42   : > { %v3895_v31 = vadd.f32 %v3891_v19, %v3883_v34 }
 0xb44   : > { %v3853_v43 = vpop.permute.xlu2 %3852  ;;  %v3919_v53 = vadd.f32 %v6961_v27, %v3895_v31  ;;  %v7604_v27 = vld [vmem:[#allocation21_spill] sm:$0xff] }
 0xb45   : > { %v3861_v16 = vadd.f32 %v3853_v43, %v3833_v1  ;;  %v3991_v37 = vpop.permute.xlu1 %3990  ;;  %v3951_v41 = vmul.f32 %v7604_v27, %v4740_v45 }
 0xb47   : > { %v6971_v49 = vpop.permute.xlu0 %3876 }
 0xb48   : > { %v3885_v33 = vadd.f32 %v6971_v49, %v3861_v16 }
 0xb4c   : > { %v3871_v30 = vpop.permute.xlu2 %3870 }
 0xb4d   : > { %v3882_v25 = vadd.f32 %v3871_v30, %v3858_v54  ;;  %v3791_v30 = vmin.f32 %v3787_v0, 6.0  ;;  %v3794_v54 = vmul.f32 0.16666667, %v3790_v40  ;;  %v7603_v0 = vld [vmem:[#allocation44_spill] sm:$0xff] }
 0xb4f   : > { %v3907_v35 = vpop.permute.xlu0 %3906  ;;  %v3894_v61 = vadd.f32 %v3890_v10, %v3882_v25  ;;  %v3795_v57 = vmul.f32 0.16666667, %v3791_v30  ;;  %v3800_v25 = vmul.f32 %v3796_v6, %v3780_v13  ;;  %v7605_v30 = vld [vmem:[#allocation41_spill] sm:$0xff] }
 0xb51   : > { %v3918_v60 = vadd.f32 %v3907_v35, %v3894_v61  ;;  %v3717_v35 = vadd.f32 %v6956_v12, %v3693_v23  ;;  %v3799_v15 = vmul.f32 %v3795_v57, %v3779_v22  ;;  %v3809_v56 = vrot.slane %v3800_v25, 6  ;;  %v7602_v22 = vld [vmem:[#allocation29_spill] sm:$0xff] }
 0xb52   : > { %v3893_v63 = vmul.f32 %v7602_v22, %v4801_v20 }
 0xb53   : > { %v3942_v8 = vadd.f32 %v3931_v3, %v3918_v60  ;;  %v3729_v3 = vadd.f32 %v3725_v11, %v3717_v35  ;;  %v3806_v43 = vrot.slane %v3799_v15, 7  ;;  %v7606_v60 = vld [vmem:[#allocation49_spill] sm:$0xff] }
 0xb54   : > { %v3911_v28 = vpop.permute.xlu2 %3910  ;;  %v3897_v49 = vadd.f32 %v3893_v63, %v3885_v33 }
 0xb55   : > { %v3920_v58 = vadd.f32 %v3911_v28, %v3896_v51  ;;  %v3954_v36 = vadd.f32 %v3950_v18, %v3942_v8  ;;  %v3798_v28 = vmul.f32 %v3794_v54, %v3778_v14  ;;  %v3753_v14 = vadd.f32 %v7603_v0, %v3729_v3 }
 0xb56   : > { %v3921_v32 = vadd.f32 %v7606_v60, %v3897_v49 }
 0xb57   : > { %v3935_v24 = vpop.permute.xlu0 %3934  ;;  %v3807_v62 = vsel %vm605_vm0, %v3806_v43, %v3798_v28 }
 0xb58   : > { %v3944_v21 = vadd.f32 %v3935_v24, %v3920_v58  ;;  %v3808_v4 = vsel %vm607_vm1, %v3806_v43, %v3807_v62  ;;  %v3819_v2 = vsel %vm610_vm2, %v3809_v56, %v3807_v62 }
 0xb59   : > { %v3810_v9 = vsel %vm610_vm2, %v3809_v56, %v3808_v4 }
 0xb5a   : > { %v3956_v13 = vadd.f32 %v3952_v52, %v3944_v21  ;;  %v3811_v48 = vsel %vm612_vm3, %v3809_v56, %v3810_v9 }
 0xb5c   : > { %v3933_v42 = vpop.permute.xlu2 %3932  ;;  %v3980_v20 = vadd.f32 %v6978_v5, %v3956_v13  ;;  %v7607_v5 = vld [vmem:[#allocation37_spill] sm:$0xff] }
 0xb5d   : > { %v3943_v24 = vadd.f32 %v3933_v42, %v3919_v53  ;;  %v3953_v1 = vmul.f32 %v7607_v5, %v4824_v50 }
 0xb5f   : > { %v3969_v39 = vpop.permute.xlu0 %3968  ;;  %v3955_v42 = vadd.f32 %v3951_v41, %v3943_v24 }
 0xb61   : > { %v3979_v57 = vadd.f32 %v3969_v39, %v3955_v42 }
 0xb64   : > { %v3937_v17 = vpop.permute.xlu2 %3936 }
 0xb65   : > { %v3945_v23 = vadd.f32 %v3937_v17, %v3921_v32 }
 0xb67   : > { %v3967_v12 = vpop.permute.xlu0 %3966  ;;  %v3957_v54 = vadd.f32 %v3953_v1, %v3945_v23 }
 0xb68   : > { %v3978_v55 = vadd.f32 %v3967_v12, %v3954_v36 }
 0xb6a   : > { %v4002_v10 = vadd.f32 %v3991_v37, %v3978_v55 }
 0xb6c   : > { %v3769_v61 = vpop.permute.xlu2 %3768  ;;  %v4006_v38 = vadd.f32 %v4002_v10, %v4661_v47 }
 0xb6d   : > { %v3777_v29 = vadd.f32 %v3769_v61, %v3753_v14 }
 0xb6e   : > { %v4010_v34 = vadd.f32 3.0, %v4006_v38 }
 0xb6f   : > { %v3781_v7 = vadd.f32 %v3777_v29, %v7605_v30  ;;  %v3995_v26 = vpop.permute.xlu0 %3994 }
 0xb70   : > { %v4004_v40 = vadd.f32 %v3995_v26, %v3980_v20  ;;  %v4014_v19 = vmax.f32 %v4010_v34, 0.0 }
 0xb71   : > { %v3785_v51 = vadd.f32 3.0, %v3781_v7 }
 0xb72   : > { %v4008_v45 = vadd.f32 %v4004_v40, %v4852_v46  ;;  %v3981_v46 = vadd.f32 %v6991_v44, %v3957_v54  ;;  %v4018_v39 = vmin.f32 %v4014_v19, 6.0 }
 0xb73   : > { %v3789_v6 = vmax.f32 %v3785_v51, 0.0 }
 0xb74   : > { %v4012_v8 = vadd.f32 3.0, %v4008_v45  ;;  %v3993_v58 = vpop.permute.xlu2 %3992 }
 0xb75   : > { %v3793_v35 = vmin.f32 %v3789_v6, 6.0  ;;  %v4003_v47 = vadd.f32 %v3993_v58, %v3979_v57 }
 0xb76   : > { %v4016_v18 = vmax.f32 %v4012_v8, 0.0 }
 0xb77   : > { %v3797_v16 = vmul.f32 0.16666667, %v3793_v35  ;;  %v4007_v11 = vadd.f32 %v4003_v47, %v7295_v59  ;;  %v4022_v59 = vmul.f32 0.16666667, %v4018_v39 }
 0xb78   : > { %v4020_v25 = vmin.f32 %v4016_v18, 6.0 }
 0xb79   : > { %v3801_v15 = vmul.f32 %v3797_v16, %v3781_v7  ;;  %v4011_v17 = vadd.f32 3.0, %v4007_v11  ;;  %v4026_v56 = vmul.f32 %v4022_v59, %v4006_v38 }
 0xb7a   : > { %v4024_v55 = vmul.f32 0.16666667, %v4020_v25 }
 0xb7b   : > { %v3812_v31 = vrot.slane %v3801_v15, 5  ;;  %v4015_v21 = vmax.f32 %v4011_v17, 0.0 }
 0xb7c   : > { %v3997_v36 = vpop.permute.xlu2 %3996  ;;  %v4028_v22 = vmul.f32 %v4024_v55, %v4008_v45 }
 0xb7d   : > { %v4019_v50 = vmin.f32 %v4015_v21, 6.0  ;;  %v4005_v3 = vadd.f32 %v3997_v36, %v3981_v46  ;;  %v3820_v28 = vsel %vm615_vm4, %v3812_v31, %v3819_v2  ;;  %v3813_v12 = vsel %vm615_vm4, %v3812_v31, %v3811_v48 }
 0xb7e   : > { %v3822_v33 = vsel %vm620_vm5, %v3820_v28, 0.0  ;;  %v3814_v52 = vsel %vm617_vm6, %v3812_v31, %v3813_v12  ;;  %v4037_v14 = vrot.slane %v4028_v22, 6 }
 0xb7f   : > { %v4023_v43 = vmul.f32 0.16666667, %v4019_v50  ;;  %v4009_v44 = vadd.f32 %v4005_v3, %v7605_v30  ;;  %3823 = vadd.xlane.f32.xlu0 %v3822_v33  ;;  %3815 = vrot.lane.b32.xlu2 %v3814_v52, %s4326_s12  ;;  %v7608_v30 = vld [vmem:[#allocation43_spill] sm:$0xff] }
 0xb81   : > { %v4027_v53 = vmul.f32 %v4023_v43, %v4007_v11  ;;  %v4013_v37 = vadd.f32 3.0, %v4009_v44 }
 0xb83   : > { %v4034_v63 = vrot.slane %v4027_v53, 7  ;;  %v4017_v13 = vmax.f32 %v4013_v37, 0.0 }
 0xb85   : > { %v4021_v24 = vmin.f32 %v4017_v13, 6.0  ;;  %v4035_v10 = vsel %vm605_vm0, %v4034_v63, %v4026_v56 }
 0xb86   : > { %v4036_v0 = vsel %vm607_vm1, %v4034_v63, %v4035_v10  ;;  %v4047_v2 = vsel %vm610_vm2, %v4037_v14, %v4035_v10 }
 0xb87   : > { %v4025_v62 = vmul.f32 0.16666667, %v4021_v24  ;;  %v4038_v61 = vsel %vm610_vm2, %v4037_v14, %v4036_v0 }
 0xb88   : > { %v4039_v27 = vsel %vm612_vm3, %v4037_v14, %v4038_v61 }
 0xb89   : > { %v4029_v49 = vmul.f32 %v4025_v62, %v4009_v44 }
 0xb8b   : > { %v4040_v4 = vrot.slane %v4029_v49, 5 }
 0xb8d   : > { %v4048_v41 = vsel %vm615_vm4, %v4040_v4, %v4047_v2  ;;  %v4041_v29 = vsel %vm615_vm4, %v4040_v4, %v4039_v27 }
 0xb8e   : > { %v4050_v9 = vsel %vm620_vm5, %v4048_v41, 0.0  ;;  %v4042_v20 = vsel %vm617_vm6, %v4040_v4, %v4041_v29 }
 0xb8f   : > { %4051 = vadd.xlane.f32.xlu1 %v4050_v9  ;;  %4043 = vrot.lane.b32.xlu2 %v4042_v20, %s4327_s13 }
 0xbd9   : > { %v3816_v48 = vpop.permute.xlu2 %3815 }
 0xbda   : > { %3818 = vst.msk [vmem:[%s4887_s6 + $0x4] sm:$0xf] %vm1994_vm12, %v3816_v48 }
 0xbe9   : > { %v4044_v42 = vpop.permute.xlu2 %4043 }
 0xbea   : > { %4046 = vst.msk [vmem:[%s4887_s6 + $0x4] sm:$0xf] %vm2223_vm13, %v4044_v42 }
 0xbf2   : > { %v3824_v38 = vpop.xlane.xlu0 %3823 }
 0xbf3   : > { %v3825_v7 = vadd.f32 %v3824_v38, %v7608_v30 }
 0xc02   : > { %v4052_v26 = vpop.xlane.xlu1 %4051 }
 0xc03   : > { %v4053_v60 = vadd.f32 %v4052_v26, %v3825_v7 }
 0xc05   : > { %4055 = vst.msk [vmem:[%s291_s21] sm:$0xf] %vm4054_vm14, %v4053_v60 }
 0xc06 PF: > { %s15_s17 = sadd.s32 1, %s4308_s17   ;;  %s7609_s15 = smov %s4304_s16 }
 0xc07   : > { %p12_p5 = scmp.ge.s32.totalorder %s15_s17, 4   ;;  %s7610_s16 = smov %s7612_s18 }
 0xc09   :  { %14 = sbr.rel (!%p12_p5) target bundleno = 2 (0x2), region = 80 }

</bundles_post_ra>
